<compile_context>
chip_gen: v7x
topology: tpu7x:2x2x1
jax: 0.10.0
libtpu: 0.0.40
codegen_flags: <defaults>
</compile_context>

<pallas_src>
import functools
import math

import jax
import jax.numpy as jnp
from jax.experimental import pallas as pl
from jax.experimental.pallas import tpu as pltpu

LN_EPS = 1e-5
INV_SQRT2 = 1.0 / math.sqrt(2.0)


def _layernorm(x, gamma, beta):
    mu = jnp.mean(x, axis=-1, keepdims=True)
    var = jnp.mean((x - mu) ** 2, axis=-1, keepdims=True)
    return (x - mu) * jax.lax.rsqrt(var + LN_EPS) * gamma + beta


# ---------------------------------------------------------------------------
# Fused kernel: grid = (batch, depth).  One batch element's (N, D) activation
# slab stays resident in VMEM (inside the output block) across all layers.
# ---------------------------------------------------------------------------

def layer_kernel(x_ref,
                 ln1g_ref, ln1b_ref, wqkv_ref, bqkv_ref, wo_ref, bo_ref,
                 ln2g_ref, ln2b_ref, w1_ref, b1_ref, w2_ref, b2_ref,
                 o_ref, *, heads, dim_head, compute_dtype):
    layer = pl.program_id(1)
    _, N, D = x_ref.shape
    inner = heads * dim_head

    # Layer 0: seed the VMEM-resident activation carry from the HBM input.
    @pl.when(layer == 0)
    def _():
        o_ref[...] = x_ref[...]

    x = o_ref[0]                                               # (N, D) f32 carry

    # ---------------- attention sub-block (pre-norm) ----------------------
    ln1 = _layernorm(x, ln1g_ref[0], ln1b_ref[0])              # (N, D) f32
    # Fused, lane-dense q/k/v projection: one (N,D) x (D,3*inner) matmul.
    qkv = jnp.dot(ln1.astype(compute_dtype), wqkv_ref[0],
                  preferred_element_type=jnp.float32) + bqkv_ref[0]

    def split_heads(t):                                        # (N,inner)->(h,N,dh)
        t = t.astype(compute_dtype).reshape(N, heads, dim_head)
        return jnp.transpose(t, (1, 0, 2))

    q = split_heads(qkv[:, :inner])          # softmax scale folded into wq/bq
    k = split_heads(qkv[:, inner:2 * inner])
    v = split_heads(qkv[:, 2 * inner:])

    s = jnp.einsum("hnd,hmd->hnm", q, k,
                   preferred_element_type=jnp.float32)         # (h, N, N) f32
    s = s - jnp.max(s, axis=-1, keepdims=True)
    e = jnp.exp(s)
    denom = jnp.sum(e, axis=-1, keepdims=True)                 # (h, N, 1) f32
    ctx = jnp.einsum("hnm,hmd->hnd", e.astype(compute_dtype), v,
                     preferred_element_type=jnp.float32)       # (h, N, dh) f32
    # Late normalization: EUP reciprocal applied to the small context tensor.
    ctx = ctx * pl.reciprocal(denom, approx=True)

    # Merge heads; single (N, inner) x (inner, D) output projection.
    ctx = jnp.transpose(ctx.astype(compute_dtype), (1, 0, 2)).reshape(N, inner)
    attn = jnp.dot(ctx, wo_ref[0],
                   preferred_element_type=jnp.float32) + bo_ref[0]
    x1 = attn + x                                              # residual (f32)

    # ---------------- feed-forward sub-block (pre-norm) -------------------
    ln2 = _layernorm(x1, ln2g_ref[0], ln2b_ref[0])
    h = jnp.dot(ln2.astype(compute_dtype), w1_ref[0],
                preferred_element_type=jnp.float32) + b1_ref[0]
    # exact GELU (matches torch.nn.GELU default, approximate='none')
    h = 0.5 * h * (1.0 + jax.lax.erf(h * INV_SQRT2))
    y = jnp.dot(h.astype(compute_dtype), w2_ref[0],
                preferred_element_type=jnp.float32) + b2_ref[0]
    o_ref[0] = y + x1                                          # carry / output


# ---------------------------------------------------------------------------
# pallas_call wrapper (single fused call for the whole transformer)
# ---------------------------------------------------------------------------

PARAM_ORDER = ("ln1_g", "ln1_b", "wqkv", "bqkv", "wo", "bo",
               "ln2_g", "ln2_b", "w1", "b1", "w2", "b2")


def transformer_forward(x, packed, *, heads, dim_head,
                        compute_dtype=jnp.bfloat16):
    B, N, D = x.shape
    depth = packed["wqkv"].shape[0]
    params = [packed[k] for k in PARAM_ORDER]

    def wspec(a):                       # one layer's slab per depth-grid step
        nd = a.ndim
        return pl.BlockSpec((1,) + a.shape[1:],
                            lambda b, l, nd=nd: (l,) + (0,) * (nd - 1))

    kernel = functools.partial(layer_kernel, heads=heads, dim_head=dim_head,
                               compute_dtype=compute_dtype)

    return pl.pallas_call(
        kernel,
        out_shape=jax.ShapeDtypeStruct((B, N, D), x.dtype),
        grid=(B, depth),
        in_specs=[pl.BlockSpec((1, N, D), lambda b, l: (b, 0, 0))]
                 + [wspec(a) for a in params],
        out_specs=pl.BlockSpec((1, N, D), lambda b, l: (b, 0, 0)),
        compiler_params=pltpu.CompilerParams(
            dimension_semantics=("parallel", "arbitrary")),
    )(x, *params)


# ---------------------------------------------------------------------------
# Parameter construction (logical, module-shaped) + host-side packing
# ---------------------------------------------------------------------------

def init_params(key, depth, dim, heads, dim_head, scale):
    inner = heads * dim_head
    hidden = dim * scale

    def w(k, shp):
        return 0.02 * jax.random.normal(k, shp, jnp.float32)

    layers = []
    for _ in range(depth):
        key, *ks = jax.random.split(key, 13)
        layers.append({
            "ln1_g": jnp.ones((1, dim), jnp.float32),
            "ln1_b": jnp.zeros((1, dim), jnp.float32),
            "wq": w(ks[0], (dim, inner)), "bq": w(ks[1], (1, inner)),
            "wk": w(ks[2], (dim, inner)), "bk": w(ks[3], (1, inner)),
            "wv": w(ks[4], (dim, inner)), "bv": w(ks[5], (1, inner)),
            "wo": w(ks[6], (inner, dim)), "bo": w(ks[7], (1, dim)),
            "ln2_g": jnp.ones((1, dim), jnp.float32),
            "ln2_b": jnp.zeros((1, dim), jnp.float32),
            "w1": w(ks[8], (dim, hidden)), "b1": w(ks[9], (1, hidden)),
            "w2": w(ks[10], (hidden, dim)), "b2": w(ks[11], (1, dim)),
        })
    return layers


def pack_params(layers, heads, dim_head, compute_dtype=jnp.bfloat16):
    """Host-side repacking for the fused kernel: q/k/v weights fused into one
    lane-dense (D, 3*inner) operand with the softmax scale folded into the q
    block; per-layer weights stacked along a leading depth axis; matmul
    operands stored in bf16 (biases / LN params stay f32)."""
    sc = dim_head ** -0.5

    def stack(fn):
        return jnp.stack([fn(p) for p in layers])

    return {
        "ln1_g": stack(lambda p: p["ln1_g"]),
        "ln1_b": stack(lambda p: p["ln1_b"]),
        "wqkv": stack(lambda p: jnp.concatenate(
            [p["wq"] * sc, p["wk"], p["wv"]], axis=1).astype(compute_dtype)),
        "bqkv": stack(lambda p: jnp.concatenate(
            [p["bq"] * sc, p["bk"], p["bv"]], axis=1)),
        "wo": stack(lambda p: p["wo"].astype(compute_dtype)),
        "bo": stack(lambda p: p["bo"]),
        "ln2_g": stack(lambda p: p["ln2_g"]),
        "ln2_b": stack(lambda p: p["ln2_b"]),
        "w1": stack(lambda p: p["w1"].astype(compute_dtype)),
        "b1": stack(lambda p: p["b1"]),
        "w2": stack(lambda p: p["w2"].astype(compute_dtype)),
        "b2": stack(lambda p: p["b2"]),
    }


# ---------------------------------------------------------------------------
# Pure-JAX reference.  All matmuls run f32 x f32 (HIGHEST precision) so no
# BF16 dot is ever emitted outside the Pallas kernel.  With
# bf16_inputs=True the matmul *operands* are rounded through bf16 first,
# mirroring the kernel's MXU input precision (apples-to-apples check).
# ---------------------------------------------------------------------------

def ref_forward(x, layers, heads, dim_head, bf16_inputs=False):
    scale = dim_head ** -0.5
    hp = jax.lax.Precision.HIGHEST
    r = ((lambda a: a.astype(jnp.bfloat16).astype(jnp.float32))
         if bf16_inputs else (lambda a: a))
    B, N, _ = x.shape
    for p in layers:
        ln = _layernorm(x, p["ln1_g"], p["ln1_b"])
        q = jnp.einsum("bnd,de->bne", r(ln), r(p["wq"]), precision=hp) + p["bq"]
        k = jnp.einsum("bnd,de->bne", r(ln), r(p["wk"]), precision=hp) + p["bk"]
        v = jnp.einsum("bnd,de->bne", r(ln), r(p["wv"]), precision=hp) + p["bv"]
        qh = q.reshape(B, N, heads, dim_head)
        kh = k.reshape(B, N, heads, dim_head)
        vh = v.reshape(B, N, heads, dim_head)
        s = jnp.einsum("bnhd,bmhd->bhnm", r(qh), r(kh), precision=hp) * scale
        s = s - jnp.max(s, axis=-1, keepdims=True)
        e = jnp.exp(s)
        pr = e / jnp.sum(e, axis=-1, keepdims=True)
        ctx = jnp.einsum("bhnm,bmhd->bnhd", r(pr), r(vh), precision=hp)
        ctx = ctx.reshape(B, N, heads * dim_head)
        attn = jnp.einsum("bne,ed->bnd", r(ctx), r(p["wo"]), precision=hp) + p["bo"]
        x = attn + x
        ln2 = _layernorm(x, p["ln2_g"], p["ln2_b"])
        h = jnp.einsum("bnd,dk->bnk", r(ln2), r(p["w1"]), precision=hp) + p["b1"]
        h = 0.5 * h * (1.0 + jax.lax.erf(h * INV_SQRT2))
        y = jnp.einsum("bnk,kd->bnd", r(h), r(p["w2"]), precision=hp) + p["b2"]
        x = y + x
    return x


if __name__ == "__main__":
    # Small but lane-dense shapes: D = inner = N = 128, hidden = 256.
    depth, dim, heads, dim_head, ff_scale = 2, 128, 4, 32, 2
    B, N = 2, 128

    key = jax.random.PRNGKey(0)
    kx, kp = jax.random.split(key)
    x = jax.random.normal(kx, (B, N, dim), jnp.float32)        # (B, N, D)
    layers = init_params(kp, depth, dim, heads, dim_head, ff_scale)
    packed = pack_params(layers, heads, dim_head)

    fwd = jax.jit(functools.partial(transformer_forward,
                                    heads=heads, dim_head=dim_head))
    out = jax.block_until_ready(fwd(x, packed))
    assert out.shape == (B, N, dim)

    # Apples-to-apples: reference with bf16-rounded matmul operands.
    ref_matched = ref_forward(x, layers, heads, dim_head, bf16_inputs=True)
    err_matched = float(jnp.max(jnp.abs(out - ref_matched)))
    assert err_matched < 2.5e-2, f"mismatch vs bf16-matched reference: {err_matched}"

    # Module-semantics check: full-f32 reference (loose tol for bf16 matmuls).
    ref_f32 = ref_forward(x, layers, heads, dim_head, bf16_inputs=False)
    err_f32 = float(jnp.max(jnp.abs(out - ref_f32)))
    assert err_f32 < 7.5e-2, f"mismatch vs float32 reference: {err_f32}"

    print("KERNEL_OK")
</pallas_src>

<mosaic_0001>
module attributes {stable_mosaic.version = 11 : i64} {
  func.func @layer_kernel(%arg0: i32, %arg1: i32, %arg2: memref<1x128x128xf32, #tpu.memory_space<vmem>>, %arg3: memref<1x1x128xf32, #tpu.memory_space<vmem>>, %arg4: memref<1x1x128xf32, #tpu.memory_space<vmem>>, %arg5: memref<1x128x384xbf16, #tpu.memory_space<vmem>>, %arg6: memref<1x1x384xf32, #tpu.memory_space<vmem>>, %arg7: memref<1x128x128xbf16, #tpu.memory_space<vmem>>, %arg8: memref<1x1x128xf32, #tpu.memory_space<vmem>>, %arg9: memref<1x1x128xf32, #tpu.memory_space<vmem>>, %arg10: memref<1x1x128xf32, #tpu.memory_space<vmem>>, %arg11: memref<1x128x256xbf16, #tpu.memory_space<vmem>>, %arg12: memref<1x1x256xf32, #tpu.memory_space<vmem>>, %arg13: memref<1x256x128xbf16, #tpu.memory_space<vmem>>, %arg14: memref<1x1x128xf32, #tpu.memory_space<vmem>>, %arg15: memref<1x128x128xf32, #tpu.memory_space<vmem>>) attributes {dimension_semantics = [#tpu.dimension_semantics<parallel>, #tpu.dimension_semantics<arbitrary>], iteration_bounds = array<i64: 2, 2>, scalar_prefetch = 0 : i64, scratch_operands = 0 : i64, tpu.core_type = #tpu.core_type<tc>, window_params = [{transform_indices = @transform_0, window_bounds = array<i64: 1, 128, 128>}, {transform_indices = @transform_1, window_bounds = array<i64: 1, 1, 128>}, {transform_indices = @transform_2, window_bounds = array<i64: 1, 1, 128>}, {transform_indices = @transform_3, window_bounds = array<i64: 1, 128, 384>}, {transform_indices = @transform_4, window_bounds = array<i64: 1, 1, 384>}, {transform_indices = @transform_5, window_bounds = array<i64: 1, 128, 128>}, {transform_indices = @transform_6, window_bounds = array<i64: 1, 1, 128>}, {transform_indices = @transform_7, window_bounds = array<i64: 1, 1, 128>}, {transform_indices = @transform_8, window_bounds = array<i64: 1, 1, 128>}, {transform_indices = @transform_9, window_bounds = array<i64: 1, 128, 256>}, {transform_indices = @transform_10, window_bounds = array<i64: 1, 1, 256>}, {transform_indices = @transform_11, window_bounds = array<i64: 1, 256, 128>}, {transform_indices = @transform_12, window_bounds = array<i64: 1, 1, 128>}, {transform_indices = @transform_13, window_bounds = array<i64: 1, 128, 128>}]} {
    %c0_i32 = arith.constant 0 : i32
    %0 = arith.cmpi eq, %arg1, %c0_i32 : i32
    %1 = arith.extui %0 : i1 to i32
    %c0_i32_0 = arith.constant 0 : i32
    %2 = arith.cmpi ne, %1, %c0_i32_0 : i32
    scf.if %2 {
      %c0_62 = arith.constant 0 : index
      %c0_63 = arith.constant 0 : index
      %c0_64 = arith.constant 0 : index
      %129 = vector.load %arg2[%c0_62, %c0_63, %c0_64] : memref<1x128x128xf32, #tpu.memory_space<vmem>>, vector<1x128x128xf32>
      %c0_65 = arith.constant 0 : index
      %c0_66 = arith.constant 0 : index
      %c0_67 = arith.constant 0 : index
      %130 = vector.load %arg15[%c0_65, %c0_66, %c0_67] : memref<1x128x128xf32, #tpu.memory_space<vmem>>, vector<1x128x128xf32>
      tpu.vector_store %arg15[%c0_65, %c0_66, %c0_67], %129 {strides = array<i32>} : memref<1x128x128xf32, #tpu.memory_space<vmem>>, vector<1x128x128xf32>,
    } else {
    }
    %c0 = arith.constant 0 : index
    %c0_1 = arith.constant 0 : index
    %c0_2 = arith.constant 0 : index
    %3 = vector.load %arg15[%c0, %c0_1, %c0_2] : memref<1x128x128xf32, #tpu.memory_space<vmem>>, vector<1x128x128xf32>
    %4 = vector.shape_cast %3 : vector<1x128x128xf32> to vector<128x128xf32>
    %c0_3 = arith.constant 0 : index
    %c0_4 = arith.constant 0 : index
    %c0_5 = arith.constant 0 : index
    %5 = vector.load %arg3[%c0_3, %c0_4, %c0_5] : memref<1x1x128xf32, #tpu.memory_space<vmem>>, vector<1x1x128xf32>
    %6 = vector.shape_cast %5 : vector<1x1x128xf32> to vector<1x128xf32>
    %c0_6 = arith.constant 0 : index
    %c0_7 = arith.constant 0 : index
    %c0_8 = arith.constant 0 : index
    %7 = vector.load %arg4[%c0_6, %c0_7, %c0_8] : memref<1x1x128xf32, #tpu.memory_space<vmem>>, vector<1x1x128xf32>
    %8 = vector.shape_cast %7 : vector<1x1x128xf32> to vector<1x128xf32>
    %cst = arith.constant dense<0.000000e+00> : vector<128xf32>
    %9 = vector.multi_reduction <add>, %4, %cst [1] : vector<128x128xf32> to vector<128xf32>
    %10 = vector.shape_cast %9 : vector<128xf32> to vector<128x1xf32>
    %cst_9 = arith.constant 1.280000e+02 : f32
    %11 = vector.broadcast %cst_9 : f32 to vector<128x1xf32>
    %12 = arith.divf %10, %11 : vector<128x1xf32>
    %13 = vector.broadcast %12 : vector<128x1xf32> to vector<128x128xf32>
    %14 = arith.subf %4, %13 : vector<128x128xf32>
    %15 = arith.mulf %14, %14 : vector<128x128xf32>
    %cst_10 = arith.constant dense<0.000000e+00> : vector<128xf32>
    %16 = vector.multi_reduction <add>, %15, %cst_10 [1] : vector<128x128xf32> to vector<128xf32>
    %17 = vector.shape_cast %16 : vector<128xf32> to vector<128x1xf32>
    %cst_11 = arith.constant 1.280000e+02 : f32
    %18 = vector.broadcast %cst_11 : f32 to vector<128x1xf32>
    %19 = arith.divf %17, %18 : vector<128x1xf32>
    %20 = vector.broadcast %12 : vector<128x1xf32> to vector<128x128xf32>
    %21 = arith.subf %4, %20 : vector<128x128xf32>
    %cst_12 = arith.constant 9.99999974E-6 : f32
    %22 = vector.broadcast %cst_12 : f32 to vector<128x1xf32>
    %23 = arith.addf %19, %22 : vector<128x1xf32>
    %24 = math.rsqrt %23 : vector<128x1xf32>
    %25 = vector.broadcast %24 : vector<128x1xf32> to vector<128x128xf32>
    %26 = arith.mulf %21, %25 : vector<128x128xf32>
    %27 = vector.broadcast %6 : vector<1x128xf32> to vector<128x128xf32>
    %28 = arith.mulf %26, %27 : vector<128x128xf32>
    %29 = vector.broadcast %8 : vector<1x128xf32> to vector<128x128xf32>
    %30 = arith.addf %28, %29 : vector<128x128xf32>
    %31 = arith.truncf %30 : vector<128x128xf32> to vector<128x128xbf16>
    %c0_13 = arith.constant 0 : index
    %c0_14 = arith.constant 0 : index
    %c0_15 = arith.constant 0 : index
    %32 = vector.load %arg5[%c0_13, %c0_14, %c0_15] : memref<1x128x384xbf16, #tpu.memory_space<vmem>>, vector<1x128x384xbf16>
    %33 = vector.shape_cast %32 : vector<1x128x384xbf16> to vector<128x384xbf16>
    %cst_16 = arith.constant dense<0.000000e+00> : vector<128x384xf32>
    %34 = tpu.matmul %31, %33, %cst_16 {dimension_numbers = #tpu.dot_dimension_numbers<[1], [0], [0], [1], [0, 0, 1, 1], [], []>} : vector<128x128xbf16>, vector<128x384xbf16>, vector<128x384xf32> -> vector<128x384xf32>
    %c0_17 = arith.constant 0 : index
    %c0_18 = arith.constant 0 : index
    %c0_19 = arith.constant 0 : index
    %35 = vector.load %arg6[%c0_17, %c0_18, %c0_19] : memref<1x1x384xf32, #tpu.memory_space<vmem>>, vector<1x1x384xf32>
    %36 = vector.shape_cast %35 : vector<1x1x384xf32> to vector<1x384xf32>
    %37 = vector.broadcast %36 : vector<1x384xf32> to vector<128x384xf32>
    %38 = arith.addf %34, %37 : vector<128x384xf32>
    %39 = vector.extract_strided_slice %38 {offsets = [0, 0], sizes = [128, 128], strides = [1, 1]} : vector<128x384xf32> to vector<128x128xf32>
    %40 = arith.truncf %39 : vector<128x128xf32> to vector<128x128xbf16>
    %41 = vector.shape_cast %40 : vector<128x128xbf16> to vector<128x4x32xbf16>
    %42 = tpu.transpose %41, [1, 0, 2] : vector<128x4x32xbf16> -> vector<4x128x32xbf16>
    %43 = vector.extract_strided_slice %38 {offsets = [0, 128], sizes = [128, 128], strides = [1, 1]} : vector<128x384xf32> to vector<128x128xf32>
    %44 = arith.truncf %43 : vector<128x128xf32> to vector<128x128xbf16>
    %45 = vector.shape_cast %44 : vector<128x128xbf16> to vector<128x4x32xbf16>
    %46 = tpu.transpose %45, [1, 0, 2] : vector<128x4x32xbf16> -> vector<4x128x32xbf16>
    %47 = vector.extract_strided_slice %38 {offsets = [0, 256], sizes = [128, 128], strides = [1, 1]} : vector<128x384xf32> to vector<128x128xf32>
    %48 = arith.truncf %47 : vector<128x128xf32> to vector<128x128xbf16>
    %49 = vector.shape_cast %48 : vector<128x128xbf16> to vector<128x4x32xbf16>
    %50 = tpu.transpose %49, [1, 0, 2] : vector<128x4x32xbf16> -> vector<4x128x32xbf16>
    "tpu.trace_start"() <{level = 10 : i32, message = "hnd,hmd->hnm"}> : () -> ()
    %cst_20 = arith.constant dense<0.000000e+00> : vector<4x128x128xf32>
    %51 = tpu.matmul %42, %46, %cst_20 {dimension_numbers = #tpu.dot_dimension_numbers<[2], [2], [1], [1], [0, 0, 0, 1, 1, 1], [0], [0]>} : vector<4x128x32xbf16>, vector<4x128x32xbf16>, vector<4x128x128xf32> -> vector<4x128x128xf32>
    "tpu.trace_stop"() : () -> ()
    %cst_21 = arith.constant dense<0xFF800000> : vector<4x128xf32>
    %52 = vector.multi_reduction <maximumf>, %51, %cst_21 [2] : vector<4x128x128xf32> to vector<4x128xf32>
    %53 = vector.shape_cast %52 : vector<4x128xf32> to vector<4x128x1xf32>
    %54 = vector.broadcast %53 : vector<4x128x1xf32> to vector<4x128x128xf32>
    %55 = arith.subf %51, %54 : vector<4x128x128xf32>
    %56 = math.exp %55 : vector<4x128x128xf32>
    %cst_22 = arith.constant dense<0.000000e+00> : vector<4x128xf32>
    %57 = vector.multi_reduction <add>, %56, %cst_22 [2] : vector<4x128x128xf32> to vector<4x128xf32>
    %58 = vector.shape_cast %57 : vector<4x128xf32> to vector<4x128x1xf32>
    %59 = arith.truncf %56 : vector<4x128x128xf32> to vector<4x128x128xbf16>
    "tpu.trace_start"() <{level = 10 : i32, message = "hnm,hmd->hnd"}> : () -> ()
    %cst_23 = arith.constant dense<0.000000e+00> : vector<4x128x32xf32>
    %60 = tpu.matmul %59, %50, %cst_23 {dimension_numbers = #tpu.dot_dimension_numbers<[2], [1], [1], [2], [0, 0, 0, 1, 1, 2], [0], [0]>} : vector<4x128x128xbf16>, vector<4x128x32xbf16>, vector<4x128x32xf32> -> vector<4x128x32xf32>
    "tpu.trace_stop"() : () -> ()
    %61 = tpu.reciprocal %58 {approx = true} : vector<4x128x1xf32> -> vector<4x128x1xf32>
    %62 = vector.broadcast %61 : vector<4x128x1xf32> to vector<4x128x32xf32>
    %63 = arith.mulf %60, %62 : vector<4x128x32xf32>
    %64 = arith.truncf %63 : vector<4x128x32xf32> to vector<4x128x32xbf16>
    %65 = tpu.transpose %64, [1, 0, 2] : vector<4x128x32xbf16> -> vector<128x4x32xbf16>
    %66 = vector.shape_cast %65 : vector<128x4x32xbf16> to vector<128x128xbf16>
    %c0_24 = arith.constant 0 : index
    %c0_25 = arith.constant 0 : index
    %c0_26 = arith.constant 0 : index
    %67 = vector.load %arg7[%c0_24, %c0_25, %c0_26] : memref<1x128x128xbf16, #tpu.memory_space<vmem>>, vector<1x128x128xbf16>
    %68 = vector.shape_cast %67 : vector<1x128x128xbf16> to vector<128x128xbf16>
    %cst_27 = arith.constant dense<0.000000e+00> : vector<128x128xf32>
    %69 = tpu.matmul %66, %68, %cst_27 {dimension_numbers = #tpu.dot_dimension_numbers<[1], [0], [0], [1], [0, 0, 1, 1], [], []>} : vector<128x128xbf16>, vector<128x128xbf16>, vector<128x128xf32> -> vector<128x128xf32>
    %c0_28 = arith.constant 0 : index
    %c0_29 = arith.constant 0 : index
    %c0_30 = arith.constant 0 : index
    %70 = vector.load %arg8[%c0_28, %c0_29, %c0_30] : memref<1x1x128xf32, #tpu.memory_space<vmem>>, vector<1x1x128xf32>
    %71 = vector.shape_cast %70 : vector<1x1x128xf32> to vector<1x128xf32>
    %72 = vector.broadcast %71 : vector<1x128xf32> to vector<128x128xf32>
    %73 = arith.addf %69, %72 : vector<128x128xf32>
    %74 = arith.addf %73, %4 : vector<128x128xf32>
    %c0_31 = arith.constant 0 : index
    %c0_32 = arith.constant 0 : index
    %c0_33 = arith.constant 0 : index
    %75 = vector.load %arg9[%c0_31, %c0_32, %c0_33] : memref<1x1x128xf32, #tpu.memory_space<vmem>>, vector<1x1x128xf32>
    %76 = vector.shape_cast %75 : vector<1x1x128xf32> to vector<1x128xf32>
    %c0_34 = arith.constant 0 : index
    %c0_35 = arith.constant 0 : index
    %c0_36 = arith.constant 0 : index
    %77 = vector.load %arg10[%c0_34, %c0_35, %c0_36] : memref<1x1x128xf32, #tpu.memory_space<vmem>>, vector<1x1x128xf32>
    %78 = vector.shape_cast %77 : vector<1x1x128xf32> to vector<1x128xf32>
    %cst_37 = arith.constant dense<0.000000e+00> : vector<128xf32>
    %79 = vector.multi_reduction <add>, %74, %cst_37 [1] : vector<128x128xf32> to vector<128xf32>
    %80 = vector.shape_cast %79 : vector<128xf32> to vector<128x1xf32>
    %cst_38 = arith.constant 1.280000e+02 : f32
    %81 = vector.broadcast %cst_38 : f32 to vector<128x1xf32>
    %82 = arith.divf %80, %81 : vector<128x1xf32>
    %83 = vector.broadcast %82 : vector<128x1xf32> to vector<128x128xf32>
    %84 = arith.subf %74, %83 : vector<128x128xf32>
    %85 = arith.mulf %84, %84 : vector<128x128xf32>
    %cst_39 = arith.constant dense<0.000000e+00> : vector<128xf32>
    %86 = vector.multi_reduction <add>, %85, %cst_39 [1] : vector<128x128xf32> to vector<128xf32>
    %87 = vector.shape_cast %86 : vector<128xf32> to vector<128x1xf32>
    %cst_40 = arith.constant 1.280000e+02 : f32
    %88 = vector.broadcast %cst_40 : f32 to vector<128x1xf32>
    %89 = arith.divf %87, %88 : vector<128x1xf32>
    %90 = vector.broadcast %82 : vector<128x1xf32> to vector<128x128xf32>
    %91 = arith.subf %74, %90 : vector<128x128xf32>
    %cst_41 = arith.constant 9.99999974E-6 : f32
    %92 = vector.broadcast %cst_41 : f32 to vector<128x1xf32>
    %93 = arith.addf %89, %92 : vector<128x1xf32>
    %94 = math.rsqrt %93 : vector<128x1xf32>
    %95 = vector.broadcast %94 : vector<128x1xf32> to vector<128x128xf32>
    %96 = arith.mulf %91, %95 : vector<128x128xf32>
    %97 = vector.broadcast %76 : vector<1x128xf32> to vector<128x128xf32>
    %98 = arith.mulf %96, %97 : vector<128x128xf32>
    %99 = vector.broadcast %78 : vector<1x128xf32> to vector<128x128xf32>
    %100 = arith.addf %98, %99 : vector<128x128xf32>
    %101 = arith.truncf %100 : vector<128x128xf32> to vector<128x128xbf16>
    %c0_42 = arith.constant 0 : index
    %c0_43 = arith.constant 0 : index
    %c0_44 = arith.constant 0 : index
    %102 = vector.load %arg11[%c0_42, %c0_43, %c0_44] : memref<1x128x256xbf16, #tpu.memory_space<vmem>>, vector<1x128x256xbf16>
    %103 = vector.shape_cast %102 : vector<1x128x256xbf16> to vector<128x256xbf16>
    %cst_45 = arith.constant dense<0.000000e+00> : vector<128x256xf32>
    %104 = tpu.matmul %101, %103, %cst_45 {dimension_numbers = #tpu.dot_dimension_numbers<[1], [0], [0], [1], [0, 0, 1, 1], [], []>} : vector<128x128xbf16>, vector<128x256xbf16>, vector<128x256xf32> -> vector<128x256xf32>
    %c0_46 = arith.constant 0 : index
    %c0_47 = arith.constant 0 : index
    %c0_48 = arith.constant 0 : index
    %105 = vector.load %arg12[%c0_46, %c0_47, %c0_48] : memref<1x1x256xf32, #tpu.memory_space<vmem>>, vector<1x1x256xf32>
    %106 = vector.shape_cast %105 : vector<1x1x256xf32> to vector<1x256xf32>
    %107 = vector.broadcast %106 : vector<1x256xf32> to vector<128x256xf32>
    %108 = arith.addf %104, %107 : vector<128x256xf32>
    %cst_49 = arith.constant 5.000000e-01 : f32
    %109 = vector.broadcast %cst_49 : f32 to vector<128x256xf32>
    %110 = arith.mulf %109, %108 : vector<128x256xf32>
    %cst_50 = arith.constant 0.707106769 : f32
    %111 = vector.broadcast %cst_50 : f32 to vector<128x256xf32>
    %112 = arith.mulf %108, %111 : vector<128x256xf32>
    %113 = math.erf %112 : vector<128x256xf32>
    %cst_51 = arith.constant 1.000000e+00 : f32
    %114 = vector.broadcast %cst_51 : f32 to vector<128x256xf32>
    %115 = arith.addf %114, %113 : vector<128x256xf32>
    %116 = arith.mulf %110, %115 : vector<128x256xf32>
    %117 = arith.truncf %116 : vector<128x256xf32> to vector<128x256xbf16>
    %c0_52 = arith.constant 0 : index
    %c0_53 = arith.constant 0 : index
    %c0_54 = arith.constant 0 : index
    %118 = vector.load %arg13[%c0_52, %c0_53, %c0_54] : memref<1x256x128xbf16, #tpu.memory_space<vmem>>, vector<1x256x128xbf16>
    %119 = vector.shape_cast %118 : vector<1x256x128xbf16> to vector<256x128xbf16>
    %cst_55 = arith.constant dense<0.000000e+00> : vector<128x128xf32>
    %120 = tpu.matmul %117, %119, %cst_55 {dimension_numbers = #tpu.dot_dimension_numbers<[1], [0], [0], [1], [0, 0, 1, 1], [], []>} : vector<128x256xbf16>, vector<256x128xbf16>, vector<128x128xf32> -> vector<128x128xf32>
    %c0_56 = arith.constant 0 : index
    %c0_57 = arith.constant 0 : index
    %c0_58 = arith.constant 0 : index
    %121 = vector.load %arg14[%c0_56, %c0_57, %c0_58] : memref<1x1x128xf32, #tpu.memory_space<vmem>>, vector<1x1x128xf32>
    %122 = vector.shape_cast %121 : vector<1x1x128xf32> to vector<1x128xf32>
    %123 = vector.broadcast %122 : vector<1x128xf32> to vector<128x128xf32>
    %124 = arith.addf %120, %123 : vector<128x128xf32>
    %125 = arith.addf %124, %74 : vector<128x128xf32>
    %c0_59 = arith.constant 0 : index
    %c0_60 = arith.constant 0 : index
    %c0_61 = arith.constant 0 : index
    %126 = vector.load %arg15[%c0_59, %c0_60, %c0_61] : memref<1x128x128xf32, #tpu.memory_space<vmem>>, vector<1x128x128xf32>
    %127 = vector.shape_cast %126 : vector<1x128x128xf32> to vector<128x128xf32>
    %128 = vector.shape_cast %125 : vector<128x128xf32> to vector<1x128x128xf32>
    tpu.vector_store %arg15[%c0_59, %c0_60, %c0_61], %128 {strides = array<i32>} : memref<1x128x128xf32, #tpu.memory_space<vmem>>, vector<1x128x128xf32>,
    return
  }
  func.func @transform_0(%arg0: i32, %arg1: i32) -> (i32, i32, i32) {
    %c0_i32 = arith.constant 0 : i32
    %c0_i32_0 = arith.constant 0 : i32
    %c0_i32_1 = arith.constant 0 : i32
    return %arg0, %c0_i32, %c0_i32_0 : i32, i32, i32
  }
  func.func @transform_1(%arg0: i32, %arg1: i32) -> (i32, i32, i32) {
    %c0_i32 = arith.constant 0 : i32
    %c0_i32_0 = arith.constant 0 : i32
    %c0_i32_1 = arith.constant 0 : i32
    return %arg1, %c0_i32, %c0_i32_0 : i32, i32, i32
  }
  func.func @transform_2(%arg0: i32, %arg1: i32) -> (i32, i32, i32) {
    %c0_i32 = arith.constant 0 : i32
    %c0_i32_0 = arith.constant 0 : i32
    %c0_i32_1 = arith.constant 0 : i32
    return %arg1, %c0_i32, %c0_i32_0 : i32, i32, i32
  }
  func.func @transform_3(%arg0: i32, %arg1: i32) -> (i32, i32, i32) {
    %c0_i32 = arith.constant 0 : i32
    %c0_i32_0 = arith.constant 0 : i32
    %c0_i32_1 = arith.constant 0 : i32
    return %arg1, %c0_i32, %c0_i32_0 : i32, i32, i32
  }
  func.func @transform_4(%arg0: i32, %arg1: i32) -> (i32, i32, i32) {
    %c0_i32 = arith.constant 0 : i32
    %c0_i32_0 = arith.constant 0 : i32
    %c0_i32_1 = arith.constant 0 : i32
    return %arg1, %c0_i32, %c0_i32_0 : i32, i32, i32
  }
  func.func @transform_5(%arg0: i32, %arg1: i32) -> (i32, i32, i32) {
    %c0_i32 = arith.constant 0 : i32
    %c0_i32_0 = arith.constant 0 : i32
    %c0_i32_1 = arith.constant 0 : i32
    return %arg1, %c0_i32, %c0_i32_0 : i32, i32, i32
  }
  func.func @transform_6(%arg0: i32, %arg1: i32) -> (i32, i32, i32) {
    %c0_i32 = arith.constant 0 : i32
    %c0_i32_0 = arith.constant 0 : i32
    %c0_i32_1 = arith.constant 0 : i32
    return %arg1, %c0_i32, %c0_i32_0 : i32, i32, i32
  }
  func.func @transform_7(%arg0: i32, %arg1: i32) -> (i32, i32, i32) {
    %c0_i32 = arith.constant 0 : i32
    %c0_i32_0 = arith.constant 0 : i32
    %c0_i32_1 = arith.constant 0 : i32
    return %arg1, %c0_i32, %c0_i32_0 : i32, i32, i32
  }
  func.func @transform_8(%arg0: i32, %arg1: i32) -> (i32, i32, i32) {
    %c0_i32 = arith.constant 0 : i32
    %c0_i32_0 = arith.constant 0 : i32
    %c0_i32_1 = arith.constant 0 : i32
    return %arg1, %c0_i32, %c0_i32_0 : i32, i32, i32
  }
  func.func @transform_9(%arg0: i32, %arg1: i32) -> (i32, i32, i32) {
    %c0_i32 = arith.constant 0 : i32
    %c0_i32_0 = arith.constant 0 : i32
    %c0_i32_1 = arith.constant 0 : i32
    return %arg1, %c0_i32, %c0_i32_0 : i32, i32, i32
  }
  func.func @transform_10(%arg0: i32, %arg1: i32) -> (i32, i32, i32) {
    %c0_i32 = arith.constant 0 : i32
    %c0_i32_0 = arith.constant 0 : i32
    %c0_i32_1 = arith.constant 0 : i32
    return %arg1, %c0_i32, %c0_i32_0 : i32, i32, i32
  }
  func.func @transform_11(%arg0: i32, %arg1: i32) -> (i32, i32, i32) {
    %c0_i32 = arith.constant 0 : i32
    %c0_i32_0 = arith.constant 0 : i32
    %c0_i32_1 = arith.constant 0 : i32
    return %arg1, %c0_i32, %c0_i32_0 : i32, i32, i32
  }
  func.func @transform_12(%arg0: i32, %arg1: i32) -> (i32, i32, i32) {
    %c0_i32 = arith.constant 0 : i32
    %c0_i32_0 = arith.constant 0 : i32
    %c0_i32_1 = arith.constant 0 : i32
    return %arg1, %c0_i32, %c0_i32_0 : i32, i32, i32
  }
  func.func @transform_13(%arg0: i32, %arg1: i32) -> (i32, i32, i32) {
    %c0_i32 = arith.constant 0 : i32
    %c0_i32_0 = arith.constant 0 : i32
    %c0_i32_1 = arith.constant 0 : i32
    return %arg0, %c0_i32, %c0_i32_0 : i32, i32, i32
  }
}

</mosaic_0001>

<bundles_post_ra>
// kernel: transformer_forward.1
= control target key start
LH: loop header
LB: loop body
LE: loop exit
PB: predicated region body
PF: predicated region fallthrough
CT: control target
= control target key end

     0   :  { %s20773_s0 = inlined_call_operand.hbm [shape: f32[2,128,128], index: 0, kind: input, shape index: {}]   ;;  %s20774_s1 = inlined_call_operand.vmem [shape: f32[2,1,128], index: 1, kind: input, shape index: {}]   ;;  %s20775_s2 = inlined_call_operand.vmem [shape: f32[2,1,128], index: 2, kind: input, shape index: {}]   ;;  %s20776_s3 = inlined_call_operand.hbm [shape: bf16[2,128,384], index: 3, kind: input, shape index: {}]   ;;  %s20777_s4 = inlined_call_operand.vmem [shape: f32[2,1,384], index: 4, kind: input, shape index: {}]   ;;  %s20778_s5 = inlined_call_operand.hbm [shape: bf16[2,128,128], index: 5, kind: input, shape index: {}]   ;;  %s20779_s6 = inlined_call_operand.hbm [shape: f32[2,1,128], index: 6, kind: input, shape index: {}]   ;;  %s20780_s7 = inlined_call_operand.vmem [shape: f32[2,1,128], index: 7, kind: input, shape index: {}]   ;;  %s20781_s8 = inlined_call_operand.vmem [shape: f32[2,1,128], index: 8, kind: input, shape index: {}]   ;;  %s20782_s9 = inlined_call_operand.hbm [shape: bf16[2,128,256], index: 9, kind: input, shape index: {}]   ;;  %s20783_s10 = inlined_call_operand.hbm [shape: f32[2,1,256], index: 10, kind: input, shape index: {}]   ;;  %s20784_s11 = inlined_call_operand.hbm [shape: bf16[2,256,128], index: 11, kind: input, shape index: {}]   ;;  %s20785_s12 = inlined_call_operand.hbm [shape: f32[2,1,128], index: 12, kind: input, shape index: {}]   ;;  %s20786_s13 = inlined_call_operand.hbm [shape: f32[2,128,128], index: 13, kind: output, shape index: {}]  }
   0x1   :  { %20966 = sst [smem:[#allocation88_spill]] %s20773_s0 }
   0x2   :  { %20967 = sst [smem:[#allocation89_spill]] %s20774_s1 }
   0x3   :  { %20968 = sst [smem:[#allocation90_spill]] %s20775_s2 }
   0x4   :  { %20969 = sst [smem:[#allocation91_spill]] %s20776_s3 }
   0x5   :  { %20970 = sst [smem:[#allocation92_spill]] %s20777_s4 }
   0x6   :  { %20971 = sst [smem:[#allocation93_spill]] %s20778_s5 }
   0x7   :  { %20972 = sst [smem:[#allocation94_spill]] %s20779_s6 }
   0x8   :  { %20973 = sst [smem:[#allocation95_spill]] %s20780_s7 }
   0x9   :  { %20974 = sst [smem:[#allocation96_spill]] %s20781_s8 }
   0xa   :  { %20975 = sst [smem:[#allocation97_spill]] %s20782_s9 }
   0xb   :  { %20976 = sst [smem:[#allocation98_spill]] %s20783_s10 }
   0xc   :  { %20977 = sst [smem:[#allocation99_spill]] %s20784_s11 }
   0xd   :  { %20978 = sst [smem:[#allocation100_spill]] %s20785_s12 }
   0xe   :  { %20979 = sst [smem:[#allocation101_spill]] %s20786_s13 }
   0xf   :  { %18 = vsyncpa [#allocation3], 0 }
  0x10   :  { %20 = vsyncpa [#allocation3 + $0x1], 0 }
  0x11   :  { %21 = vsyncpa [#allocation6], 0 }
  0x12   :  { %23 = vsyncpa [#allocation6 + $0x1], 0 }
  0x13   :  { %24 = vsyncpa [#allocation9], 0 }
  0x14   :  { %26 = vsyncpa [#allocation9 + $0x1], 0 }
  0x15   :  { %27 = vsyncpa [#allocation12], 0 }
  0x16   :  { %29 = vsyncpa [#allocation12 + $0x1], 0 }
  0x17   :  { %30 = vsyncpa [#allocation15], 0 }
  0x18   :  { %32 = vsyncpa [#allocation15 + $0x1], 0 }
  0x19   :  { %33 = vsyncpa [#allocation4], 0 }
  0x1a   :  { %35 = vsyncpa [#allocation4 + $0x1], 0  ;;  %s15083_s25 = smov 0   ;;  %s15085_s26 = smov 0  }
  0x1b   :  { %s15087_s27 = smov 0   ;;  %s15089_s28 = smov 0  }
  0x1c   :  { %s15091_s29 = smov 0   ;;  %s15093_s30 = smov 0  }
  0x1d   :  { %s15095_s14 = smov 0   ;;  %s15097_s15 = smov 0  }
  0x1e   :  { %s15099_s16 = smov 0   ;;  %s15101_s17 = smov 0  }
  0x1f   :  { %s15103_s18 = smov 0  }
  0x20 LB: > { %20980 = sst [smem:[#allocation23_spill]] %s14952_s26  ;;  %p20789_p0 = scmp.eq.s32.totalorder %s14988_s18, 0  ;;  %s14988_s18 = sphi %s15103_s18, %s41_s18   ;;  %s14984_s17 = sphi %s15101_s17, %s21502_s17   ;;  %s14980_s16 = sphi %s15099_s16, %s21501_s16   ;;  %s14976_s15 = sphi %s15097_s15, %s21500_s15   ;;  %s14972_s14 = sphi %s15095_s14, %s21499_s14   ;;  %s14968_s30 = sphi %s15093_s30, %s21498_s30   ;;  %s14964_s29 = sphi %s15091_s29, %s21497_s29   ;;  %s14960_s28 = sphi %s15089_s28, %s21496_s28   ;;  %s14956_s27 = sphi %s15087_s27, %s21495_s27   ;;  %s14952_s26 = sphi %s15085_s26, %s21494_s26   ;;  %s14948_s25 = sphi %s15083_s25, %s21493_s25  }
  0x21   : > { %20981 = sst [smem:[#allocation24_spill]] %s14956_s27  ;;  %p145_p1 = scmp.ne.s32.totalorder %s14956_s27, %s14952_s26 }
  0x22   : > { %20982 = sst [smem:[#allocation25_spill]] %s14960_s28  ;;  %p20788_p2 = scmp.lt.s32.totalorder %s14988_s18, 4 }
  0x23   : > { %20983 = sst [smem:[#allocation26_spill]] %s14964_s29  ;;  %s15144_s20 = sand.u32 1, %s14988_s18  }
  0x24   : > { %20984 = sst [smem:[#allocation27_spill]] %s14968_s30  ;;  %p147_p3 = por %p145_p1, %p20789_p0 }
  0x25   : > { %20985 = sst [smem:[#allocation28_spill]] %s14972_s14  ;;  %s15149_s21 = sand.u32 1, %s14956_s27  }
  0x26   : > { %20986 = sst [smem:[#allocation29_spill]] %s14976_s15  ;;  %s13976_s22 = smul.u32 3072, %s14980_s16 }
  0x27   : > { %20987 = sst [smem:[#allocation30_spill]] %s14980_s16  ;;  %s13975_s23 = smul.u32 192, %s15149_s21 }
  0x28   : > { %20988 = sst [smem:[#allocation31_spill]] %s14984_s17  ;;  %p15155_p4 = pnand %p20788_p2, %p147_p3 }
  0x29   : > { %20989 = sst [smem:[#allocation32_spill]] %s14988_s18  ;;  %s472_s4 = scalar_lea.vmem [#allocation5], %s13975_s23 }
  0x2a   : > { %s20990_s24 = scalar_select %p15155_p4, 1, 0 }
  0x2b   : > { %s20991_s3 = sld [smem:[#allocation91_spill]]  ;;  %s479_s8 = sshll.u32 %s472_s4, 4  ;;  %s15164_s8 = int_to_ptr.vmem [resolvable:$true] %s479_s8 }
  0x2c   : > { %p15172_p7 = pneg %p15155_p4 }
  0x31   : > { %s15162_s19 = scalar_lea.hbm %s20991_s3, %s13976_s22  ;;  %s14615_s22 = scalar_lea.hbm %s20991_s3, 6144 }
  0x32   : > { %s14610_s2 = scalar_lea.hbm %s15162_s19, 3072  ;;  %p14616_p10 = scmp.lt.u32.totalorder %s15162_s19, %s20991_s3 }
  0x33   : > { %p14611_p6 = scmp.ne.s32.totalorder %s15162_s19, %s14610_s2  ;;  %p14617_p11 = scmp.lt.u32.totalorder %s14615_s22, %s14610_s2 }
  0x34   : > { %p14619_p13 = scmp.lt.u32.totalorder %s14610_s2, %s15162_s19 }
  0x35   : > { %p14613_p8 = pnand %p15172_p7, %p14611_p6  ;;  %p14618_p12 = por %p14617_p11, %p14616_p10 }
  0x37   : > { %p14614_p9 = pneg %p14613_p8  ;;  %p14620_p1 = por %p14619_p13, %p14618_p12 }
  0x39   : > { %p14621_p3 = pnand %p14620_p1, %p14614_p9 }
  0x3b   : > { %14624 = shalt.err (!%p14621_p3)
}
  0x3c   : > { %s14625_s7 = scalar_lea.vmem %s15164_s8, 3072  ;;  %s14990_s13 = smov [#allocation5]  }
  0x3d   : > { %p14626_p6 = scmp.ne.s32.totalorder %s15164_s8, %s14625_s7  ;;  %s14630_s15 = sshll.u32 %s14990_s13, 4  ;;  %s14631_s15 = int_to_ptr.vmem [resolvable:$false] %s14630_s15 }
  0x3e   : > { %s14632_s4 = scalar_lea.vmem %s14631_s15, 6144  ;;  %p14633_p0 = scmp.lt.s32.totalorder %s15164_s8, %s14631_s15 }
  0x3f   : > { %p14628_p8 = pnand %p14626_p6, %p15172_p7  ;;  %p14634_p5 = scmp.lt.s32.totalorder %s14632_s4, %s14625_s7 }
  0x41   : > { %p14629_p2 = pneg %p14628_p8  ;;  %p14635_p10 = por %p14634_p5, %p14633_p0 }
  0x43   : > { %p14636_p11 = pnand %p14635_p10, %p14629_p2 }
  0x45   : > { %14639 = shalt.err (!%p14636_p11)
}
  0x46   : > { %s14991_s2 = smov 192   ;;  %s14992_s22 = smov 12  }
  0x47   : > { %s20993_s23 = scalar_lea.sflag [#allocation6], %s15144_s20  ;;  %p622_p0 = scmp.lt.s32.totalorder %s14988_s18, 5 }
  0x48   : > { %14003 = dma.hbm_to_vmem [thread:$0]  (!%p15155_p4), %s15162_s19, 3072, %s15164_s8, %s20993_s23, %s14991_s2, %s14991_s2, %s14992_s22  }
  0x49   : > { %s20792_s7 = sshll.u32 %s14980_s16, 4  ;;  %p20994_p2 = scmp.ge.s32.totalorder %s14988_s18, 1 }
  0x4a   : > { %s20996_s6 = sld [smem:[#allocation94_spill]]  ;;  %s520_s14 = scalar_lea.vmem [#allocation8], %s15149_s21 }
  0x4b   : > { %p15201_p5 = pnand %p20994_p2, %p622_p0  ;;  %s527_s12 = sshll.u32 %s520_s14, 4  ;;  %s15213_s12 = int_to_ptr.vmem [resolvable:$true] %s527_s12 }
  0x4c   : > { %s13127_s8 = sshll.u32 %s15149_s21, 1  ;;  %s20793_s19 = scalar_lea.sflag [#allocation9], %s15144_s20 }
  0x4d   : > { %s20995_s13 = scalar_select %p15201_p5, 1, 0 }
  0x50   : > { %s15210_s3 = scalar_lea.hbm %s20996_s6, %s20792_s7  ;;  %s14645_s15 = scalar_lea.hbm %s20996_s6, 32 }
  0x51   : > { %s14640_s2 = scalar_lea.hbm %s15210_s3, 16  ;;  %p14646_p1 = scmp.lt.u32.totalorder %s15210_s3, %s20996_s6 }
  0x52   : > { %p14641_p9 = scmp.ne.s32.totalorder %s15210_s3, %s14640_s2  ;;  %p14647_p3 = scmp.lt.u32.totalorder %s14645_s15, %s14640_s2 }
  0x53   : > { %p14649_p8 = scmp.lt.u32.totalorder %s14640_s2, %s15210_s3 }
  0x54   : > { %p14643_p12 = pnand %p14641_p9, %p15172_p7  ;;  %p14648_p6 = por %p14647_p3, %p14646_p1 }
  0x56   : > { %p14644_p13 = pneg %p14643_p12  ;;  %p14650_p10 = por %p14649_p8, %p14648_p6 }
  0x58   : > { %p14651_p11 = pnand %p14650_p10, %p14644_p13 }
  0x5a   : > { %14654 = shalt.err (!%p14651_p11)
}
  0x5b   : > { %s14655_s14 = scalar_lea.vmem %s15213_s12, 16  ;;  %s14993_s22 = smov [#allocation8]  }
  0x5c   : > { %p14656_p0 = scmp.ne.s32.totalorder %s15213_s12, %s14655_s14  ;;  %s14660_s23 = sshll.u32 %s14993_s22, 4  ;;  %s14661_s23 = int_to_ptr.vmem [resolvable:$false] %s14660_s23 }
  0x5d   : > { %s14662_s7 = scalar_lea.vmem %s14661_s23, 32  ;;  %p14663_p12 = scmp.lt.s32.totalorder %s15213_s12, %s14661_s23 }
  0x5e   : > { %p14658_p2 = pnand %p14656_p0, %p15172_p7  ;;  %p14664_p5 = scmp.lt.s32.totalorder %s14662_s7, %s14655_s14 }
  0x60   : > { %p14659_p9 = pneg %p14658_p2  ;;  %p14665_p1 = por %p14664_p5, %p14663_p12 }
  0x62   : > { %p14666_p3 = pnand %p14665_p1, %p14659_p9 }
  0x64   : > { %14669 = shalt.err (!%p14666_p3)
}
  0x65   : > { %14009 = dma.hbm_to_vmem [thread:$0]  (!%p15155_p4), %s15210_s3, 16, %s15213_s12, %s20793_s19  }
  0x66   : > { %s13380_s2 = sshll.u32 %s14980_s16, 5  ;;  %s20997_s10 = sld [smem:[#allocation98_spill]] }
  0x67   : > { %s571_s14 = scalar_lea.vmem [#allocation11], %s13127_s8  ;;  %s20796_s7 = scalar_lea.sflag [#allocation12], %s15144_s20 }
  0x68   : > { %s579_s23 = sshll.u32 %s571_s14, 4  ;;  %s580_s23 = int_to_ptr.vmem [resolvable:$true] %s579_s23 }
  0x6c   : > { %s15244_s22 = scalar_lea.hbm %s20997_s10, %s13380_s2  ;;  %s14675_s15 = scalar_lea.hbm %s20997_s10, 64 }
  0x6d   : > { %s14670_s6 = scalar_lea.hbm %s15244_s22, 32  ;;  %p14676_p8 = scmp.lt.u32.totalorder %s15244_s22, %s20997_s10 }
  0x6e   : > { %p14671_p5 = scmp.ne.s32.totalorder %s15244_s22, %s14670_s6  ;;  %p14677_p10 = scmp.lt.u32.totalorder %s14675_s15, %s14670_s6 }
  0x6f   : > { %p14679_p0 = scmp.lt.u32.totalorder %s14670_s6, %s15244_s22 }
  0x70   : > { %p14673_p13 = pnand %p14671_p5, %p15172_p7  ;;  %p14678_p11 = por %p14677_p10, %p14676_p8 }
  0x72   : > { %p14674_p6 = pneg %p14673_p13  ;;  %p14680_p2 = por %p14679_p0, %p14678_p11 }
  0x74   : > { %p14681_p9 = pnand %p14680_p2, %p14674_p6 }
  0x76   : > { %14684 = shalt.err (!%p14681_p9)
}
  0x77   : > { %s14685_s8 = scalar_lea.vmem %s580_s23, 32  ;;  %s14994_s14 = smov [#allocation11]  }
  0x78   : > { %p14686_p12 = scmp.ne.s32.totalorder %s580_s23, %s14685_s8  ;;  %s14690_s19 = sshll.u32 %s14994_s14, 4  ;;  %s14691_s19 = int_to_ptr.vmem [resolvable:$false] %s14690_s19 }
  0x79   : > { %s14692_s3 = scalar_lea.vmem %s14691_s19, 64  ;;  %p14693_p5 = scmp.lt.s32.totalorder %s580_s23, %s14691_s19 }
  0x7a   : > { %p14688_p1 = pnand %p14686_p12, %p15172_p7  ;;  %p14694_p13 = scmp.lt.s32.totalorder %s14692_s3, %s14685_s8 }
  0x7c   : > { %p14689_p3 = pneg %p14688_p1  ;;  %p14695_p4 = por %p14694_p13, %p14693_p5 }
  0x7e   : > { %p14696_p8 = pnand %p14695_p4, %p14689_p3 }
  0x80   : > { %14699 = shalt.err (!%p14696_p8)
}
  0x81   : > { %p20998_p10 = scmp.ne.s32.totalorder %s20990_s24, 0  ;;  %s15269_s6 = sadd.s32 4294967295, %s14988_s18  }
  0x82   : > { %s13113_s19 = sadd.s32 4294967294, %s14988_s18   ;;  %s50_s12 = sadd.s32 1, %s14980_s16 }
  0x83   : > { %14015 = dma.hbm_to_vmem [thread:$0]  (!%p20998_p10), %s15244_s22, 32, %s580_s23, %s20796_s7  }
  0x84   : > { %p51_p4 = scmp.ge.s32.totalorder %s50_s12, 2  ;;  %s53_s15 = sadd.s32 1, %s14984_s17 }
  0x85   : > { %s60_s2 = sadd.s32 1, %s14968_s30  ;;  %p67_p6 = scmp.ne.s32.totalorder %s14968_s30, %s14964_s29 }
  0x86   : > { %s21504_s12 = smov (%p51_p4, %s50_s12), 0  ;;  %s21506_s15 = smov (!%p51_p4, %s53_s15), %s14984_s17 }
  0x87   : > { %20999 = sst [smem:[#allocation33_spill]] %s21504_s12  ;;  %p21000_p11 = scmp.eq.s32.totalorder %s14988_s18, 0 }
  0x88   : > { %p73_p2 = scmp.ne.s32.totalorder %s14964_s29, %s14960_s28  ;;  %p55_p9 = scmp.ge.s32.totalorder %s21506_s15, 2 }
  0x89   : > { %p15285_p0 = por %p21000_p11, %p67_p6  ;;  %p74_p12 = scmp.eq.s32.totalorder %s15269_s6, 0 }
  0x8a   : > { %s135_s23 = ssub.s32 %s14980_s16, %s21504_s12  ;;  %p151_p1 = scmp.ne.s32.totalorder %s14952_s26, %s14948_s25 }
  0x8b   : > { %s21508_s15 = smov (%p55_p9, %s21506_s15), 0  ;;  %p15301_p3 = por %p74_p12, %p73_p2 }
  0x8c   : > { %21002 = sst [smem:[#allocation34_spill]] %s21508_s15  ;;  %p136_p5 = scmp.eq.s32.totalorder %s135_s23, 0 }
  0x8d   : > { %s21003_s4 = scalar_select %p15301_p3, 1, 0 }
  0x8e   : > { %s57_s8 = ssub.s32 %s14984_s17, %s21508_s15  ;;  %p15307_p13 = por %p151_p1, %p74_p12 }
  0x8f   : > { %p58_p8 = scmp.eq.s32.totalorder %s57_s8, 0  ;;  %p409_p4 = scmp.eq.s32.totalorder %s15269_s6, 3 }
  0x90   : > { %s21004_s14 = scalar_select %p15307_p13, 1, 0 }
  0x91   : > { %s21006_s25 = sadd.s32 1, %s14956_s27  ;;  %p15323_p11 = por %p409_p4, %p67_p6 }
  0x92   : > { %21005 = sst [smem:[#allocation35_spill]] %s21004_s14  ;;  %p415_p9 = scmp.eq.s32.totalorder %s13113_s19, 3 }
  0x93   : > { %s15315_s3 = scalar_select %p136_p5, %s14956_s27, %s21006_s25  }
  0x94   : > { %s15318_s7 = scalar_select %p58_p8, %s14968_s30, %s60_s2  }
  0x95   : > { %21007 = sst [smem:[#allocation36_spill]] %s15315_s3  ;;  %s435_s23 = sand.u32 1, %s14968_s30  }
  0x96   : > { %21008 = sst [smem:[#allocation37_spill]] %s15318_s7  ;;  %s13377_s15 = sshll.u32 %s14984_s17, 11 }
  0x97   : > { %s21009_s10 = scalar_select %p15323_p11, 1, 0 }
  0x98   : > { %p15332_p12 = por %p415_p9, %p73_p2  ;;  %s13116_s8 = sshll.u32 %s435_s23, 7 }
  0x99   : > { %s21012_s0 = sld [smem:[#allocation88_spill]]  ;;  %p21013_p1 = scmp.lt.s32.totalorder %s14988_s18, 4 }
  0x9a   : > { %s21010_s12 = scalar_select %p15332_p12, 1, 0 }
  0x9b   : > { %p15345_p6 = pnand %p21013_p1, %p15285_p0  ;;  %s439_s2 = scalar_lea.vmem [#allocation2], %s13116_s8 }
  0x9c   : > { %21011 = sst [smem:[#allocation38_spill]] %s21010_s12  ;;  %s446_s17 = sshll.u32 %s439_s2, 4  ;;  %s15349_s17 = int_to_ptr.vmem [resolvable:$true] %s446_s17 }
  0x9d   : > { %s13120_s7 = sshll.u32 %s15149_s21, 6  ;;  %s15352_s26 = scalar_lea.sflag [#allocation3], %s435_s23 }
  0x9e   : > { %p14702_p5 = pneg %p15345_p6 }
  0x9f   : > { %s15339_s25 = scalar_lea.hbm %s21012_s0, %s13377_s15  ;;  %s14705_s30 = scalar_lea.hbm %s21012_s0, 4096 }
  0xa0   : > { %s14700_s15 = scalar_lea.hbm %s15339_s25, 2048  ;;  %p14706_p4 = scmp.lt.u32.totalorder %s15339_s25, %s21012_s0 }
  0xa1   : > { %p14701_p2 = scmp.ne.s32.totalorder %s15339_s25, %s14700_s15  ;;  %p14707_p9 = scmp.lt.u32.totalorder %s14705_s30, %s14700_s15 }
  0xa2   : > { %p14709_p12 = scmp.lt.u32.totalorder %s14700_s15, %s15339_s25 }
  0xa3   : > { %p14703_p8 = pnand %p14702_p5, %p14701_p2  ;;  %p14708_p1 = por %p14707_p9, %p14706_p4 }
  0xa5   : > { %p14704_p0 = pneg %p14703_p8  ;;  %p14710_p11 = por %p14709_p12, %p14708_p1 }
  0xa7   : > { %p14711_p13 = pnand %p14710_p11, %p14704_p0 }
  0xa9   : > { %14714 = shalt.err (!%p14711_p13)
}
  0xaa   : > { %s14715_s23 = scalar_lea.vmem %s15349_s17, 2048  ;;  %s14995_s2 = smov [#allocation2]  }
  0xab   : > { %p14716_p2 = scmp.ne.s32.totalorder %s15349_s17, %s14715_s23  ;;  %s14720_s22 = sshll.u32 %s14995_s2, 4  ;;  %s14721_s22 = int_to_ptr.vmem [resolvable:$false] %s14720_s22 }
  0xac   : > { %s14722_s3 = scalar_lea.vmem %s14721_s22, 4096  ;;  %p14723_p10 = scmp.lt.s32.totalorder %s15349_s17, %s14721_s22 }
  0xad   : > { %p14718_p8 = pnand %p14716_p2, %p14702_p5  ;;  %p14724_p4 = scmp.lt.s32.totalorder %s14722_s3, %s14715_s23 }
  0xaf   : > { %p14719_p3 = pneg %p14718_p8  ;;  %p14725_p9 = por %p14724_p4, %p14723_p10 }
  0xb1   : > { %p14726_p12 = pnand %p14725_p9, %p14719_p3 }
  0xb3   : > { %14729 = shalt.err (!%p14726_p12)
}
  0xb4   : > { %s20807_s30 = smov 128   ;;  %s14997_s15 = smov 8  }
  0xb5   : > { %14000 = dma.hbm_to_vmem [thread:$0]  (!%p15345_p6), %s15339_s25, 2048, %s15349_s17, %s15352_s26, %s20807_s30, %s20807_s30, %s14997_s15  }
  0xb6   : > { %s13378_s14 = sshll.u32 %s14980_s16, 10  ;;  %s21015_s5 = sld [smem:[#allocation93_spill]] }
  0xb7   : > { %s500_s22 = scalar_lea.vmem [#allocation7], %s13120_s7  ;;  %s13124_s19 = sshll.u32 %s15149_s21, 7 }
  0xb8   : > { %s507_s3 = sshll.u32 %s500_s22, 4  ;;  %s15391_s3 = int_to_ptr.vmem [resolvable:$true] %s507_s3 }
  0xbc   : > { %s15387_s2 = scalar_lea.hbm %s21015_s5, %s13378_s14  ;;  %s14735_s26 = scalar_lea.hbm %s21015_s5, 2048 }
  0xbd   : > { %s14730_s0 = scalar_lea.hbm %s15387_s2, 1024  ;;  %p14736_p11 = scmp.lt.u32.totalorder %s15387_s2, %s21015_s5 }
  0xbe   : > { %p14731_p10 = scmp.ne.s32.totalorder %s15387_s2, %s14730_s0  ;;  %p14737_p6 = scmp.lt.u32.totalorder %s14735_s26, %s14730_s0 }
  0xbf   : > { %p14739_p0 = scmp.lt.u32.totalorder %s14730_s0, %s15387_s2 }
  0xc0   : > { %p14733_p3 = pnand %p14731_p10, %p15172_p7  ;;  %p14738_p5 = por %p14737_p6, %p14736_p11 }
  0xc2   : > { %p14734_p13 = pneg %p14733_p3  ;;  %p14740_p1 = por %p14739_p0, %p14738_p5 }
  0xc4   : > { %p14741_p2 = pnand %p14740_p1, %p14734_p13 }
  0xc6   : > { %14744 = shalt.err (!%p14741_p2)
}
  0xc7   : > { %s14745_s7 = scalar_lea.vmem %s15391_s3, 1024  ;;  %s14998_s23 = smov [#allocation7]  }
  0xc8   : > { %p14746_p8 = scmp.ne.s32.totalorder %s15391_s3, %s14745_s7  ;;  %s14750_s22 = sshll.u32 %s14998_s23, 4  ;;  %s14751_s22 = int_to_ptr.vmem [resolvable:$false] %s14750_s22 }
  0xc9   : > { %s14752_s17 = scalar_lea.vmem %s14751_s22, 2048  ;;  %p14753_p12 = scmp.lt.s32.totalorder %s15391_s3, %s14751_s22 }
  0xca   : > { %p14748_p4 = pnand %p14746_p8, %p15172_p7  ;;  %p14754_p10 = scmp.lt.s32.totalorder %s14752_s17, %s14745_s7 }
  0xcc   : > { %p14749_p9 = pneg %p14748_p4  ;;  %p14755_p3 = por %p14754_p10, %p14753_p12 }
  0xce   : > { %p14756_p11 = pnand %p14755_p3, %p14749_p9 }
  0xd0   : > { %14759 = shalt.err (!%p14756_p11)
}
  0xd1   : > { %s20808_s0 = smov 64   ;;  %s15000_s25 = smov 4  }
  0xd2   : > { %p21016_p13 = scmp.ne.s32.totalorder %s20990_s24, 0  ;;  %s21017_s26 = scalar_lea.sflag [#allocation6], %s15144_s20 }
  0xd3   : > { %s13379_s14 = sshll.u32 %s14980_s16, 11  ;;  %s21018_s9 = sld [smem:[#allocation97_spill]] }
  0xd4   : > { %14006 = dma.hbm_to_vmem [thread:$0]  (!%p21016_p13), %s15387_s2, 1024, %s15391_s3, %s21017_s26, %s20808_s0, %s20808_s0, %s15000_s25  }
  0xd5   : > { %s550_s22 = scalar_lea.vmem [#allocation10], %s13124_s19 }
  0xd6   : > { %s557_s17 = sshll.u32 %s550_s22, 4  ;;  %s15430_s17 = int_to_ptr.vmem [resolvable:$true] %s557_s17 }
  0xd9   : > { %s15426_s23 = scalar_lea.hbm %s21018_s9, %s13379_s14  ;;  %s14765_s26 = scalar_lea.hbm %s21018_s9, 4096 }
  0xda   : > { %s14760_s30 = scalar_lea.hbm %s15426_s23, 2048  ;;  %p14766_p1 = scmp.lt.u32.totalorder %s15426_s23, %s21018_s9 }
  0xdb   : > { %p14761_p6 = scmp.ne.s32.totalorder %s15426_s23, %s14760_s30  ;;  %p14767_p2 = scmp.lt.u32.totalorder %s14765_s26, %s14760_s30 }
  0xdc   : > { %p14769_p4 = scmp.lt.u32.totalorder %s14760_s30, %s15426_s23 }
  0xdd   : > { %p14763_p5 = pnand %p14761_p6, %p15172_p7  ;;  %p14768_p8 = por %p14767_p2, %p14766_p1 }
  0xdf   : > { %p14764_p0 = pneg %p14763_p5  ;;  %p14770_p9 = por %p14769_p4, %p14768_p8 }
  0xe1   : > { %p14771_p12 = pnand %p14770_p9, %p14764_p0 }
  0xe3   : > { %14774 = shalt.err (!%p14771_p12)
}
  0xe4   : > { %s14775_s22 = scalar_lea.vmem %s15430_s17, 2048  ;;  %s15001_s2 = smov [#allocation10]  }
  0xe5   : > { %p14776_p10 = scmp.ne.s32.totalorder %s15430_s17, %s14775_s22  ;;  %s14780_s3 = sshll.u32 %s15001_s2, 4  ;;  %s14781_s3 = int_to_ptr.vmem [resolvable:$false] %s14780_s3 }
  0xe6   : > { %s14782_s8 = scalar_lea.vmem %s14781_s3, 4096  ;;  %p14783_p6 = scmp.lt.s32.totalorder %s15430_s17, %s14781_s3 }
  0xe7   : > { %p14778_p3 = pnand %p14776_p10, %p15172_p7  ;;  %p14784_p5 = scmp.lt.s32.totalorder %s14782_s8, %s14775_s22 }
  0xe9   : > { %p14779_p11 = pneg %p14778_p3  ;;  %p14785_p1 = por %p14784_p5, %p14783_p6 }
  0xeb   : > { %p14786_p2 = pnand %p14785_p1, %p14779_p11 }
  0xed   : > { %14789 = shalt.err (!%p14786_p2)
}
  0xee   : > { %s21019_s30 = smov 128   ;;  %s21020_s26 = scalar_lea.sflag [#allocation9], %s15144_s20 }
  0xef   : > { %14012 = dma.hbm_to_vmem [thread:$0]  (!%p21016_p13), %s15426_s23, 2048, %s15430_s17, %s21020_s26, %s21019_s30, %s21019_s30, %s14997_s15  }
  0xf0   : > { %s21021_s11 = sld [smem:[#allocation99_spill]]  ;;  %s590_s3 = scalar_lea.vmem [#allocation13], %s13124_s19 }
  0xf1   : > { %s597_s8 = sshll.u32 %s590_s3, 4  ;;  %s15467_s8 = int_to_ptr.vmem [resolvable:$true] %s597_s8 }
  0xf6   : > { %s15463_s22 = scalar_lea.hbm %s21021_s11, %s13379_s14  ;;  %s14795_s17 = scalar_lea.hbm %s21021_s11, 4096 }
  0xf7   : > { %s14790_s0 = scalar_lea.hbm %s15463_s22, 2048  ;;  %p14796_p9 = scmp.lt.u32.totalorder %s15463_s22, %s21021_s11 }
  0xf8   : > { %p14791_p0 = scmp.ne.s32.totalorder %s15463_s22, %s14790_s0  ;;  %p14797_p12 = scmp.lt.u32.totalorder %s14795_s17, %s14790_s0 }
  0xf9   : > { %p14799_p3 = scmp.lt.u32.totalorder %s14790_s0, %s15463_s22 }
  0xfa   : > { %p14793_p8 = pnand %p14791_p0, %p15172_p7  ;;  %p14798_p10 = por %p14797_p12, %p14796_p9 }
  0xfc   : > { %p14794_p4 = pneg %p14793_p8  ;;  %p14800_p11 = por %p14799_p3, %p14798_p10 }
  0xfe   : > { %p14801_p6 = pnand %p14800_p11, %p14794_p4 }
 0x100   : > { %14804 = shalt.err (!%p14801_p6)
}
 0x101   : > { %s14805_s19 = scalar_lea.vmem %s15467_s8, 2048  ;;  %s15002_s26 = smov [#allocation13]  }
 0x102   : > { %p14806_p5 = scmp.ne.s32.totalorder %s15467_s8, %s14805_s19  ;;  %s14810_s7 = sshll.u32 %s15002_s26, 4  ;;  %s14811_s7 = int_to_ptr.vmem [resolvable:$false] %s14810_s7 }
 0x103   : > { %s14812_s2 = scalar_lea.vmem %s14811_s7, 4096  ;;  %p14813_p0 = scmp.lt.s32.totalorder %s15467_s8, %s14811_s7 }
 0x104   : > { %p14808_p1 = pnand %p14806_p5, %p15172_p7  ;;  %p14814_p8 = scmp.lt.s32.totalorder %s14812_s2, %s14805_s19 }
 0x106   : > { %p14809_p2 = pneg %p14808_p1  ;;  %p14815_p9 = por %p14814_p8, %p14813_p0 }
 0x108   : > { %p14816_p12 = pnand %p14815_p9, %p14809_p2 }
 0x10a   : > { %14819 = shalt.err (!%p14816_p12)
}
 0x10b   : > { %s21022_s0 = smov 64   ;;  %s21023_s3 = scalar_lea.sflag [#allocation12], %s15144_s20 }
 0x10c   : > { %14018 = dma.hbm_to_vmem [thread:$0]  (!%p21016_p13), %s15463_s22, 2048, %s15467_s8, %s21023_s3, %s21022_s0, %s21022_s0, %s15000_s25  }
 0x10d   : > { %s21024_s15 = sshll.u32 %s14980_s16, 4  ;;  %s21025_s14 = sld [smem:[#allocation100_spill]] }
 0x10e   : > { %s610_s26 = scalar_lea.vmem [#allocation14], %s15149_s21  ;;  %s608_s20 = scalar_lea.sflag [#allocation15], %s15149_s21 }
 0x10f   : > { %s617_s7 = sshll.u32 %s610_s26, 4  ;;  %s618_s7 = int_to_ptr.vmem [resolvable:$true] %s617_s7 }
 0x113   : > { %s21026_s19 = smov %s21025_s14  ;;  %s15500_s30 = scalar_lea.hbm %s21025_s14, %s21024_s15 }
 0x114   : > { %s14820_s2 = scalar_lea.hbm %s15500_s30, 16  ;;  %s14825_s8 = scalar_lea.hbm %s21026_s19, 32 }
 0x115   : > { %p14821_p4 = scmp.ne.s32.totalorder %s15500_s30, %s14820_s2  ;;  %p14826_p11 = scmp.lt.u32.totalorder %s15500_s30, %s21026_s19 }
 0x116   : > { %p14827_p6 = scmp.lt.u32.totalorder %s14825_s8, %s14820_s2  ;;  %p14829_p1 = scmp.lt.u32.totalorder %s14820_s2, %s15500_s30 }
 0x117   : > { %p14823_p10 = pnand %p14821_p4, %p15172_p7 }
 0x118   : > { %p14828_p5 = por %p14827_p6, %p14826_p11 }
 0x119   : > { %p14824_p3 = pneg %p14823_p10 }
 0x11a   : > { %p14830_p2 = por %p14829_p1, %p14828_p5 }
 0x11c   : > { %p14831_p0 = pnand %p14830_p2, %p14824_p3 }
 0x11e   : > { %14834 = shalt.err (!%p14831_p0)
}
 0x11f   : > { %s14835_s21 = scalar_lea.vmem %s618_s7, 16  ;;  %s15003_s15 = smov [#allocation14]  }
 0x120   : > { %p14836_p8 = scmp.ne.s32.totalorder %s618_s7, %s14835_s21  ;;  %s14840_s23 = sshll.u32 %s15003_s15, 4  ;;  %s14841_s23 = int_to_ptr.vmem [resolvable:$false] %s14840_s23 }
 0x121   : > { %s14842_s17 = scalar_lea.vmem %s14841_s23, 32  ;;  %p14843_p4 = scmp.lt.s32.totalorder %s618_s7, %s14841_s23 }
 0x122   : > { %p14838_p9 = pnand %p14836_p8, %p15172_p7  ;;  %p14844_p10 = scmp.lt.s32.totalorder %s14842_s17, %s14835_s21 }
 0x124   : > { %p14839_p12 = pneg %p14838_p9  ;;  %p14845_p13 = por %p14844_p10, %p14843_p4 }
 0x126   : > { %p14846_p6 = pnand %p14845_p13, %p14839_p12 }
 0x128   : > { %14849 = shalt.err (!%p14846_p6)
}
 0x129   : > { %p21027_p11 = scmp.ne.s32.totalorder %s20990_s24, 0  ;;  %p21028_p3 = scmp.ne.s32.totalorder %s20995_s13, 0 }
 0x12b   : > { %14021 = dma.hbm_to_vmem [thread:$0]  (!%p21027_p11), %s15500_s30, 16, %s618_s7, %s608_s20  }
 0x12c   : > { %626 = sbr.rel (%p21028_p3) target bundleno = 3264 (0xcc0), region = 72 }
 0x133   : > { %s15524_s1 = sand.u32 1, %s14964_s29   ;;  %p21029_p7 = scmp.ne.s32.totalorder %s21003_s4, 0 }
 0x134   : > { %s20810_s14 = sshll.u32 %s15524_s1, 7  ;;  %s629_s26 = scalar_lea.sflag [#allocation3], %s15524_s1 }
 0x135   : > { %s15530_s2 = scalar_lea.vmem [#allocation2], %s20810_s14 }
 0x136   : > { %14923 = dma.done.wait (%p21029_p7), %s629_s26, 2048  }
 0x137   : > { %14925 = vsyncadd (%p21029_p7), %s629_s26, 4294965248  ;;  %s21030_s24 = sld [smem:[#allocation23_spill]]  ;;  %s21031_s13 = sld [smem:[#allocation35_spill]] }
 0x138   : > { %s637_s30 = sand.u32 1, %s15269_s6  }
 0x139   : > { %s638_s25 = scalar_lea.sflag [#allocation6], %s637_s30 }
 0x13d   : > { %s15538_s7 = sand.u32 1, %s21030_s24   ;;  %p21032_p13 = scmp.ne.s32.totalorder %s21031_s13, 0 }
 0x13e   : > { %s13977_s20 = smul.u32 192, %s15538_s7 }
 0x140   : > { %s15541_s22 = scalar_lea.vmem [#allocation5], %s13977_s20 }
 0x141   : > { %14927 = dma.done.wait (%p21032_p13), %s638_s25, 4096  }
 0x142   : > { %14929 = vsyncadd (%p21032_p13), %s638_s25, 4294963200  ;;  %s13136_s4 = sshll.u32 %s15538_s7, 6  ;;  %s656_s0 = scalar_lea.sflag [#allocation9], %s637_s30 }
 0x143   : > { %s15548_s8 = scalar_lea.vmem [#allocation7], %s13136_s4 }
 0x144   : > { %14931 = dma.done.wait (%p21032_p13), %s656_s0, 2064  }
 0x145   : > { %14933 = vsyncadd (%p21032_p13), %s656_s0, 4294965232  ;;  %s13137_s3 = sshll.u32 %s15538_s7, 7  ;;  %s13138_s21 = sshll.u32 %s15538_s7, 1 }
 0x146   : > { %s15557_s15 = scalar_lea.vmem [#allocation10], %s13137_s3  ;;  %s673_s23 = scalar_lea.sflag [#allocation12], %s637_s30 }
 0x147   : > { %s15559_s17 = scalar_lea.vmem [#allocation11], %s13138_s21 }
 0x148   : > { %14935 = dma.done.wait (%p21032_p13), %s673_s23, 2080  }
 0x149   : > { %14937 = vsyncadd (%p21032_p13), %s673_s23, 4294965216  ;;  %s15565_s26 = scalar_lea.vmem [#allocation13], %s13137_s3  ;;  %s691_s24 = scalar_lea.sflag [#allocation15], %s15538_s7 }
 0x14a   : > { %14939 = dma.done.wait (%p21032_p13), %s691_s24, 16  }
 0x14b   : > { %14941 = vsyncadd (%p21032_p13), %s691_s24, 4294967280  ;;  %s21033_s30 = sld [smem:[#allocation28_spill]]  ;;  %s21035_s6 = sld [smem:[#allocation90_spill]] }
 0x14c   : > { %s21034_s21 = sld [smem:[#allocation89_spill]]  ;;  %s21036_s9 = sld [smem:[#allocation95_spill]] }
 0x14d   : > { %s21037_s29 = sld [smem:[#allocation96_spill]]  ;;  %s21038_s0 = sld [smem:[#allocation92_spill]] }
 0x14e   : > { %s21039_s18 = sshll.u32 %s15524_s1, 7 }
 0x151   : > { %p785_p5 = scmp.lt.s32.totalorder %s21033_s30, 1  ;;  %p13141_p1 = scmp.ne.s32.totalorder %s21033_s30, 0 }
 0x152   : > { %v806_v0 = vld [vmem:[%s15530_s2] sm:$0xff] (!%p13141_p1)  ;;  %v807_v1 = vld [vmem:[%s15530_s2 + $0x8] sm:$0xff] (!%p13141_p1)  ;;  %v808_v2 = vld [vmem:[%s15530_s2 + $0x10] sm:$0xff] (!%p13141_p1) }
 0x153   : > { %s15575_s25 = scalar_select %p785_p5, %s21033_s30, 1 }
 0x154   : > { %805 = sbr.rel (%p13141_p1) target bundleno = 352 (0x160), region = 108  ;;  %v809_v3 = vld [vmem:[%s15530_s2 + $0x18] sm:$0xff] (!%p13141_p1)  ;;  %v810_v4 = vld [vmem:[%s15530_s2 + $0x20] sm:$0xff] (!%p13141_p1)  ;;  %v811_v5 = vld [vmem:[%s15530_s2 + $0x28] sm:$0xff] (!%p13141_p1) }
 0x155   : > { %s787_s3 = scalar_lea.vmem %s21034_s21, %s15575_s25  ;;  %s790_s13 = scalar_lea.vmem %s21035_s6, %s15575_s25  ;;  %v812_v6 = vld [vmem:[%s15530_s2 + $0x30] sm:$0xff] (!%p13141_p1)  ;;  %v813_v7 = vld [vmem:[%s15530_s2 + $0x38] sm:$0xff] (!%p13141_p1)  ;;  %v814_v8 = vld [vmem:[%s15530_s2 + $0x40] sm:$0xff] (!%p13141_p1) }
 0x156   : > { %s13978_s24 = smul.u32 3, %s15575_s25  ;;  %s797_s11 = scalar_lea.vmem %s21036_s9, %s15575_s25  ;;  %v815_v9 = vld [vmem:[%s15530_s2 + $0x48] sm:$0xff] (!%p13141_p1)  ;;  %v816_v10 = vld [vmem:[%s15530_s2 + $0x50] sm:$0xff] (!%p13141_p1)  ;;  %v817_v11 = vld [vmem:[%s15530_s2 + $0x58] sm:$0xff] (!%p13141_p1) }
 0x157   : > { %s800_s27 = scalar_lea.vmem %s21037_s29, %s15575_s25  ;;  %s15601_s21 = scalar_lea.vmem [#allocation16], %s21039_s18  ;;  %v818_v12 = vld [vmem:[%s15530_s2 + $0x60] sm:$0xff] (!%p13141_p1)  ;;  %v819_v13 = vld [vmem:[%s15530_s2 + $0x68] sm:$0xff] (!%p13141_p1)  ;;  %v820_v14 = vld [vmem:[%s15530_s2 + $0x70] sm:$0xff] (!%p13141_p1) }
 0x158   : > { %s15597_s28 = scalar_lea.vmem %s21038_s0, %s13978_s24  ;;  %822 = vst [vmem:[%s15601_s21] sm:$0xff] (!%p13141_p1), %v806_v0  ;;  %823 = vst [vmem:[%s15601_s21 + $0x8] sm:$0xff] (!%p13141_p1), %v807_v1  ;;  %v821_v15 = vld [vmem:[%s15530_s2 + $0x78] sm:$0xff] (!%p13141_p1) }
 0x159   : > { %824 = vst [vmem:[%s15601_s21 + $0x10] sm:$0xff] (!%p13141_p1), %v808_v2  ;;  %825 = vst [vmem:[%s15601_s21 + $0x18] sm:$0xff] (!%p13141_p1), %v809_v3 }
 0x15a   : > { %826 = vst [vmem:[%s15601_s21 + $0x20] sm:$0xff] (!%p13141_p1), %v810_v4  ;;  %827 = vst [vmem:[%s15601_s21 + $0x28] sm:$0xff] (!%p13141_p1), %v811_v5 }
 0x15b   : > { %828 = vst [vmem:[%s15601_s21 + $0x30] sm:$0xff] %v812_v6  ;;  %829 = vst [vmem:[%s15601_s21 + $0x38] sm:$0xff] %v813_v7 }
 0x15c   : > { %830 = vst [vmem:[%s15601_s21 + $0x40] sm:$0xff] %v814_v8  ;;  %831 = vst [vmem:[%s15601_s21 + $0x48] sm:$0xff] %v815_v9 }
 0x15d   : > { %832 = vst [vmem:[%s15601_s21 + $0x50] sm:$0xff] %v816_v10  ;;  %833 = vst [vmem:[%s15601_s21 + $0x58] sm:$0xff] %v817_v11 }
 0x15e   : > { %834 = vst [vmem:[%s15601_s21 + $0x60] sm:$0xff] %v818_v12  ;;  %835 = vst [vmem:[%s15601_s21 + $0x68] sm:$0xff] %v819_v13 }
 0x15f   : > { %836 = vst [vmem:[%s15601_s21 + $0x70] sm:$0xff] %v820_v14  ;;  %837 = vst [vmem:[%s15601_s21 + $0x78] sm:$0xff] %v821_v15 }
 0x160 PF: > { %v14130_v32 = vld [vmem:[%s15541_s22 + $0x4] ss:$12 sps:$4 sm:$0xff]   ;;  %v14132_v33 = vld [vmem:[%s15541_s22] ss:$12 sps:$4 sm:$0xff]   ;;  %v14133_v34 = vld [vmem:[%s15541_s22 + $0x1c] ss:$12 sps:$4 sm:$0xff]  }
 0x161   : > { %v14135_v35 = vld [vmem:[%s15541_s22 + $0x8] ss:$12 sps:$4 sm:$0xff]   ;;  %1262 = vmatprep.subr.bf16.mxu0 %v14130_v32  ;;  %v14136_v10 = vld [vmem:[%s15541_s22 + $0x18] ss:$12 sps:$4 sm:$0xff]   ;;  %s15006_s19 = smov 96   ;;  %s15007_s14 = smov 32  }
 0x162   : > { %1263 = vmatpush1.bf16.msra.mxu0 %v14132_v33  ;;  %13607 = vmatprep.subr.bf16.mxu1 %v14135_v35  ;;  %vm7942_vm0 = vcmask 261120   ;;  %vm11703_vm1 = vcmask 523264   ;;  %vm11720_vm2 = vcmask 785408   ;;  %s21478_s2 = scalar_lea.vmem [#allocation8], %s15538_s7  ;;  %p21488_p0 = scmp.ne.s32.totalorder %s21009_s10, 0 }
 0x163   : > { %v15649_v24 = vld [vmem:[%s15601_s21 + $0x40] sm:$0xff]  ;;  %v15652_v25 = vld [vmem:[%s15601_s21 + $0x48] sm:$0xff]  ;;  %1264 = vmatprep.subr.bf16.mxu0 %v14133_v34  ;;  %13608 = vmatpush3.bf16.msra.mxu1 %v14135_v35  ;;  %v14143_v35 = vld [vmem:[%s15541_s22 + $0x38] ss:$12 sps:$4 sm:$0xff]   ;;  %s15010_s4 = smov [#allocation16]  }
 0x164   : > { %v838_v16 = vld [vmem:[%s15601_s21] sm:$0xff]  ;;  %v839_v18 = vld [vmem:[%s15601_s21 + $0x8] sm:$0xff]  ;;  %v15657_v26 = vld [vmem:[%s15601_s21 + $0x50] sm:$0xff]  ;;  %s14854_s0 = sshll.u32 %s15010_s4, 4  ;;  %s14855_s0 = int_to_ptr.vmem [resolvable:$false] %s14854_s0 }
 0x165   : > { %v840_v17 = vld [vmem:[%s15601_s21 + $0x10] sm:$0xff]  ;;  %856 = vadd.xlane.f32.xlu0 %v838_v16  ;;  %v841_v19 = vld [vmem:[%s15601_s21 + $0x18] sm:$0xff]  ;;  %v15665_v28 = vld [vmem:[%s15601_s21 + $0x60] sm:$0xff]  ;;  %s14856_s5 = scalar_lea.vmem %s14855_s0, 4096 }
 0x166   : > { %860 = vadd.xlane.f32.xlu1 %v840_v17  ;;  %v842_v20 = vld [vmem:[%s15601_s21 + $0x20] sm:$0xff]  ;;  %v843_v21 = vld [vmem:[%s15601_s21 + $0x28] sm:$0xff]  ;;  %v15660_v27 = vld [vmem:[%s15601_s21 + $0x58] sm:$0xff]  ;;  %1265 = vmatpush1.bf16.msra.mxu0 %v14136_v10 }
 0x167   : > { %v15643_v22 = vld [vmem:[%s15601_s21 + $0x30] sm:$0xff]  ;;  %v15646_v23 = vld [vmem:[%s15601_s21 + $0x38] sm:$0xff]  ;;  %v15668_v29 = vld [vmem:[%s15601_s21 + $0x68] sm:$0xff] }
 0x168   : > { %v15673_v30 = vld [vmem:[%s15601_s21 + $0x70] sm:$0xff]  ;;  %v15676_v31 = vld [vmem:[%s15601_s21 + $0x78] sm:$0xff] }
 0x169   : > { %858 = vadd.xlane.f32.xlu0 %v839_v18  ;;  %v14141_v34 = vld [vmem:[%s15541_s22 + $0x4c] ss:$12 sps:$4 sm:$0xff]  }
 0x16a   : > { %862 = vadd.xlane.f32.xlu1 %v841_v19 }
 0x16d   : > { %864 = vadd.xlane.f32.xlu0 %v842_v20 }
 0x16e   : > { %866 = vadd.xlane.f32.xlu1 %v843_v21 }
 0x171   : > { %868 = vadd.xlane.f32.xlu0 %v15643_v22 }
 0x172   : > { %870 = vadd.xlane.f32.xlu1 %v15646_v23 }
 0x175   : > { %872 = vadd.xlane.f32.xlu0 %v15649_v24 }
 0x176   : > { %874 = vadd.xlane.f32.xlu1 %v15652_v25 }
 0x179   : > { %876 = vadd.xlane.f32.xlu0 %v15657_v26 }
 0x17a   : > { %878 = vadd.xlane.f32.xlu1 %v15660_v27 }
 0x17d   : > { %880 = vadd.xlane.f32.xlu0 %v15665_v28 }
 0x17e   : > { %882 = vadd.xlane.f32.xlu1 %v15668_v29 }
 0x181   : > { %884 = vadd.xlane.f32.xlu0 %v15673_v30 }
 0x182   : > { %886 = vadd.xlane.f32.xlu1 %v15676_v31 }
 0x1f2   : > { %v857_v36 = vpop.xlane.xlu0 %856 }
 0x1f3   : > { %v861_v37 = vpop.xlane.xlu1 %860  ;;  %v889_v38 = vmul.f32 0.0078125, %v857_v36 }
 0x1f4   : > { %v891_v39 = vmul.f32 0.0078125, %v861_v37 }
 0x1f5   : > { %v15686_v40 = vsub.f32 %v838_v16, %v889_v38  ;;  %v14137_v16 = vld [vmem:[%s15541_s22 + $0x34] ss:$12 sps:$4 sm:$0xff]  }
 0x1f6   : > { %v15688_v41 = vsub.f32 %v840_v17, %v891_v39  ;;  %v859_v42 = vpop.xlane.xlu0 %858  ;;  %v14139_v17 = vld [vmem:[%s15541_s22 + $0x20] ss:$12 sps:$4 sm:$0xff]   ;;  %1266 = vmatprep.subr.bf16.mxu0 %v14137_v16  ;;  %v14144_v38 = vld [vmem:[%s15541_s22 + $0x48] ss:$12 sps:$4 sm:$0xff]  }
 0x1f7   : > { %v863_v43 = vpop.xlane.xlu1 %862  ;;  %v890_v44 = vmul.f32 0.0078125, %v859_v42  ;;  %v921_v45 = vmul.f32 %v15686_v40, %v15686_v40  ;;  %13609 = vmatprep.subr.bf16.mxu1 %v14139_v17 }
 0x1f8   : > { %v892_v46 = vmul.f32 0.0078125, %v863_v43  ;;  %v923_v47 = vmul.f32 %v15688_v41, %v15688_v41  ;;  %13610 = vmatpush3.bf16.msra.mxu1 %v14139_v17 }
 0x1f9   : > { %937 = vadd.xlane.f32.xlu0 %v921_v45  ;;  %v15694_v48 = vsub.f32 %v839_v18, %v890_v44  ;;  %13611 = vmatprep.subr.bf16.mxu1 %v14143_v35  ;;  %v14145_v45 = vld [vmem:[%s15541_s22 + $0x64] ss:$12 sps:$4 sm:$0xff]  }
 0x1fa   : > { %v15696_v49 = vsub.f32 %v841_v19, %v892_v46  ;;  %v865_v50 = vpop.xlane.xlu0 %864  ;;  %v14147_v46 = vld [vmem:[%s15541_s22 + $0x50] ss:$12 sps:$4 sm:$0xff]  }
 0x1fb   : > { %v867_v51 = vpop.xlane.xlu1 %866  ;;  %v893_v52 = vmul.f32 0.0078125, %v865_v50  ;;  %v922_v53 = vmul.f32 %v15694_v48, %v15694_v48 }
 0x1fc   : > { %v894_v54 = vmul.f32 0.0078125, %v867_v51  ;;  %v924_v55 = vmul.f32 %v15696_v49, %v15696_v49  ;;  %13612 = vmatpush3.bf16.msra.mxu1 %v14143_v35  ;;  %v14151_v51 = vld [vmem:[%s15541_s22 + $0x68] ss:$12 sps:$4 sm:$0xff]  }
 0x1fd   : > { %941 = vadd.xlane.f32.xlu0 %v923_v47  ;;  %939 = vadd.xlane.f32.xlu1 %v922_v53  ;;  %v15702_v56 = vsub.f32 %v842_v20, %v893_v52  ;;  %v14148_v47 = vld [vmem:[%s15541_s22 + $0x60] ss:$12 sps:$4 sm:$0xff]   ;;  %v14152_v52 = vld [vmem:[%s15541_s22 + $0x78] ss:$12 sps:$4 sm:$0xff]  }
 0x1fe   : > { %v15704_v57 = vsub.f32 %v843_v21, %v894_v54  ;;  %v869_v58 = vpop.xlane.xlu0 %868  ;;  %13613 = vmatprep.subr.bf16.mxu1 %v14147_v46  ;;  %v14153_v53 = vld [vmem:[%s15541_s22 + $0x94] ss:$12 sps:$4 sm:$0xff]  }
 0x1ff   : > { %v871_v59 = vpop.xlane.xlu1 %870  ;;  %v895_v60 = vmul.f32 0.0078125, %v869_v58  ;;  %v925_v61 = vmul.f32 %v15702_v56, %v15702_v56  ;;  %v14155_v54 = vld [vmem:[%s15541_s22 + $0x80] ss:$12 sps:$4 sm:$0xff]  }
 0x200   : > { %v896_v62 = vmul.f32 0.0078125, %v871_v59  ;;  %v926_v63 = vmul.f32 %v15704_v57, %v15704_v57  ;;  %13614 = vmatpush3.bf16.msra.mxu1 %v14147_v46  ;;  %v14157_v58 = vld [vmem:[%s15541_s22 + $0xac] ss:$12 sps:$4 sm:$0xff]  }
 0x201   : > { %943 = vadd.xlane.f32.xlu1 %v924_v55  ;;  %945 = vadd.xlane.f32.xlu0 %v925_v61  ;;  %v15711_v0 = vsub.f32 %v15643_v22, %v895_v60  ;;  %v14156_v55 = vld [vmem:[%s15541_s22 + $0x90] ss:$12 sps:$4 sm:$0xff]   ;;  %v14159_v59 = vld [vmem:[%s15541_s22 + $0x98] ss:$12 sps:$4 sm:$0xff]   ;;  %v14160_v60 = vld [vmem:[%s15541_s22 + $0xa8] ss:$12 sps:$4 sm:$0xff]  }
 0x202   : > { %v15714_v1 = vsub.f32 %v15646_v23, %v896_v62  ;;  %v873_v2 = vpop.xlane.xlu0 %872  ;;  %v14140_v23 = vld [vmem:[%s15541_s22 + $0x30] ss:$12 sps:$4 sm:$0xff]   ;;  %13615 = vmatprep.subr.bf16.mxu1 %v14151_v51  ;;  %v20821_v62 = vmov 0  }
 0x203   : > { %v875_v3 = vpop.xlane.xlu1 %874  ;;  %v897_v4 = vmul.f32 0.0078125, %v873_v2  ;;  %v927_v5 = vmul.f32 %v15711_v0, %v15711_v0  ;;  %1267 = vmatpush1.bf16.msra.mxu0 %v14140_v23  ;;  %v14161_v61 = vld [vmem:[%s15541_s22 + $0xb0] ss:$12 sps:$4 sm:$0xff]   ;;  %1294 = vmatprep.mubr.bf16.mxu0 %v20821_v62 }
 0x204   : > { %v898_v6 = vmul.f32 0.0078125, %v875_v3  ;;  %v928_v7 = vmul.f32 %v15714_v1, %v15714_v1  ;;  %1268 = vmatprep.subr.bf16.mxu0 %v14141_v34  ;;  %13616 = vmatpush3.bf16.msra.mxu1 %v14151_v51 }
 0x205   : > { %947 = vadd.xlane.f32.xlu1 %v926_v63  ;;  %949 = vadd.xlane.f32.xlu0 %v927_v5  ;;  %v15721_v8 = vsub.f32 %v15649_v24, %v897_v4 }
 0x206   : > { %v15724_v9 = vsub.f32 %v15652_v25, %v898_v6  ;;  %v877_v11 = vpop.xlane.xlu0 %876  ;;  %13617 = vmatprep.subr.bf16.mxu1 %v14155_v54 }
 0x207   : > { %v879_v12 = vpop.xlane.xlu1 %878  ;;  %v899_v13 = vmul.f32 0.0078125, %v877_v11  ;;  %v929_v14 = vmul.f32 %v15721_v8, %v15721_v8  ;;  %1269 = vmatpush1.bf16.msra.mxu0 %v14144_v38  ;;  %v15787_v38 = vld [vmem:[%s787_s3] ss:$0 sm:$0xff]  ;;  %s21487_s3 = sld [smem:[#allocation101_spill]] }
 0x208   : > { %v900_v15 = vmul.f32 0.0078125, %v879_v12  ;;  %v930_v18 = vmul.f32 %v15724_v9, %v15724_v9  ;;  %1270 = vmatprep.subr.bf16.mxu0 %v14145_v45  ;;  %13618 = vmatpush3.bf16.msra.mxu1 %v14155_v54 }
 0x209   : > { %951 = vadd.xlane.f32.xlu1 %v928_v7  ;;  %953 = vadd.xlane.f32.xlu0 %v929_v14  ;;  %v15734_v19 = vsub.f32 %v15657_v26, %v899_v13 }
 0x20a   : > { %v15737_v20 = vsub.f32 %v15660_v27, %v900_v15  ;;  %v881_v21 = vpop.xlane.xlu0 %880  ;;  %13619 = vmatprep.subr.bf16.mxu1 %v14159_v59 }
 0x20b   : > { %v883_v22 = vpop.xlane.xlu1 %882  ;;  %v901_v24 = vmul.f32 0.0078125, %v881_v21  ;;  %v931_v25 = vmul.f32 %v15734_v19, %v15734_v19  ;;  %1271 = vmatpush1.bf16.msra.mxu0 %v14148_v47 }
 0x20c   : > { %v902_v32 = vmul.f32 0.0078125, %v883_v22  ;;  %v932_v26 = vmul.f32 %v15737_v20, %v15737_v20  ;;  %13620 = vmatpush3.bf16.msra.mxu1 %v14159_v59 }
 0x20d   : > { %955 = vadd.xlane.f32.xlu1 %v930_v18  ;;  %957 = vadd.xlane.f32.xlu0 %v931_v25  ;;  %v15745_v27 = vsub.f32 %v15665_v28, %v901_v24 }
 0x20e   : > { %v15748_v33 = vsub.f32 %v15668_v29, %v902_v32  ;;  %v885_v36 = vpop.xlane.xlu0 %884  ;;  %13621 = vmatprep.subr.bf16.mxu1 %v14161_v61 }
 0x20f   : > { %v887_v37 = vpop.xlane.xlu1 %886  ;;  %v903_v39 = vmul.f32 0.0078125, %v885_v36  ;;  %v933_v42 = vmul.f32 %v15745_v27, %v15745_v27 }
 0x210   : > { %v904_v43 = vmul.f32 0.0078125, %v887_v37  ;;  %v934_v28 = vmul.f32 %v15748_v33, %v15748_v33  ;;  %13622 = vmatpush3.bf16.msra.mxu1 %v14161_v61 }
 0x211   : > { %959 = vadd.xlane.f32.xlu1 %v932_v26  ;;  %961 = vadd.xlane.f32.xlu0 %v933_v42  ;;  %v15758_v29 = vsub.f32 %v15673_v30, %v903_v39 }
 0x212   : > { %v15761_v44 = vsub.f32 %v15676_v31, %v904_v43  ;;  %v14149_v31 = vld [vmem:[%s15541_s22 + $0x7c] ss:$12 sps:$4 sm:$0xff]  }
 0x213   : > { %v935_v50 = vmul.f32 %v15758_v29, %v15758_v29  ;;  %1272 = vmatprep.subr.bf16.mxu0 %v14149_v31  ;;  %v15796_v31 = vld [vmem:[%s790_s13] ss:$0 sm:$0xff]  ;;  %s12821_s13 = scalar_lea.sflag [#allocation4], %s15524_s1 }
 0x214   : > { %v936_v30 = vmul.f32 %v15761_v44, %v15761_v44  ;;  %1273 = vmatpush1.bf16.msra.mxu0 %v14152_v52 }
 0x215   : > { %963 = vadd.xlane.f32.xlu1 %v934_v28  ;;  %965 = vadd.xlane.f32.xlu0 %v935_v50 }
 0x216   : > { %1274 = vmatprep.subr.bf16.mxu0 %v14153_v53 }
 0x218   : > { %1275 = vmatpush1.bf16.msra.mxu0 %v14156_v55 }
 0x219   : > { %967 = vadd.xlane.f32.xlu1 %v936_v30  ;;  %1276 = vmatprep.subr.bf16.mxu0 %v14157_v58 }
 0x21c   : > { %1277 = vmatpush1.bf16.msra.mxu0 %v14160_v60 }
 0x286   : > { %v938_v63 = vpop.xlane.xlu0 %937 }
 0x287   : > { %v969_v2 = vmul.f32 0.0078125, %v938_v63 }
 0x289   : > { %v985_v3 = vadd.f32 1e-05, %v969_v2 }
 0x28a   : > { %v940_v4 = vpop.xlane.xlu1 %939  ;;  %v942_v5 = vpop.xlane.xlu0 %941 }
 0x28b   : > { %14210 = vrsqrt.f32 %v985_v3  ;;  %v970_v6 = vmul.f32 0.0078125, %v940_v4  ;;  %v971_v7 = vmul.f32 0.0078125, %v942_v5 }
 0x28d   : > { %v986_v10 = vadd.f32 1e-05, %v970_v6  ;;  %v987_v11 = vadd.f32 1e-05, %v971_v7 }
 0x28e   : > { %v944_v12 = vpop.xlane.xlu1 %943  ;;  %v946_v13 = vpop.xlane.xlu0 %945 }
 0x28f   : > { %14212 = vrsqrt.f32 %v986_v10  ;;  %v972_v14 = vmul.f32 0.0078125, %v944_v12  ;;  %v973_v15 = vmul.f32 0.0078125, %v946_v13 }
 0x290   : > { %14214 = vrsqrt.f32 %v987_v11 }
 0x291   : > { %v988_v16 = vadd.f32 1e-05, %v972_v14  ;;  %v989_v17 = vadd.f32 1e-05, %v973_v15 }
 0x292   : > { %v948_v18 = vpop.xlane.xlu1 %947  ;;  %v950_v21 = vpop.xlane.xlu0 %949 }
 0x293   : > { %14216 = vrsqrt.f32 %v988_v16  ;;  %v974_v22 = vmul.f32 0.0078125, %v948_v18  ;;  %v975_v23 = vmul.f32 0.0078125, %v950_v21 }
 0x294   : > { %14218 = vrsqrt.f32 %v989_v17 }
 0x295   : > { %v14211_v24 = vpop.eup %14210  ;;  %v990_v25 = vadd.f32 1e-05, %v974_v22  ;;  %v991_v32 = vadd.f32 1e-05, %v975_v23 }
 0x296   : > { %v952_v26 = vpop.xlane.xlu1 %951  ;;  %v954_v34 = vpop.xlane.xlu0 %953  ;;  %v1017_v35 = vmul.f32 %v14211_v24, %v15686_v40 }
 0x297   : > { %14220 = vrsqrt.f32 %v990_v25  ;;  %v976_v36 = vmul.f32 0.0078125, %v952_v26  ;;  %v977_v37 = vmul.f32 0.0078125, %v954_v34 }
 0x298   : > { %14222 = vrsqrt.f32 %v991_v32  ;;  %v1039_v40 = vmul.f32 %v15787_v38, %v1017_v35 }
 0x299   : > { %v14213_v39 = vpop.eup %14212  ;;  %v992_v42 = vadd.f32 1e-05, %v976_v36  ;;  %v993_v43 = vadd.f32 1e-05, %v977_v37 }
 0x29a   : > { %v14215_v28 = vpop.eup %14214  ;;  %v956_v45 = vpop.xlane.xlu1 %955  ;;  %v1018_v47 = vmul.f32 %v14213_v39, %v15694_v48  ;;  %v1061_v61 = vadd.f32 %v15796_v31, %v1039_v40 }
 0x29b   : > { %v958_v46 = vpop.xlane.xlu0 %957  ;;  %14224 = vrsqrt.f32 %v992_v42  ;;  %v978_v50 = vmul.f32 0.0078125, %v956_v45  ;;  %v1019_v51 = vmul.f32 %v14215_v28, %v15688_v41 }
 0x29c   : > { %v979_v30 = vmul.f32 0.0078125, %v958_v46  ;;  %14226 = vrsqrt.f32 %v993_v43  ;;  %v1040_v52 = vmul.f32 %v15787_v38, %v1018_v47 }
 0x29d   : > { %v14217_v53 = vpop.eup %14216  ;;  %v994_v54 = vadd.f32 1e-05, %v978_v50  ;;  %v1041_v48 = vmul.f32 %v15787_v38, %v1019_v51 }
 0x29e   : > { %v995_v55 = vadd.f32 1e-05, %v979_v30  ;;  %v14219_v58 = vpop.eup %14218  ;;  %v960_v59 = vpop.xlane.xlu1 %959  ;;  %v1062_v63 = vadd.f32 %v15796_v31, %v1040_v52  ;;  %v1020_v2 = vmul.f32 %v14217_v53, %v15696_v49 }
 0x29f   : > { %v962_v60 = vpop.xlane.xlu0 %961  ;;  %14228 = vrsqrt.f32 %v994_v54  ;;  %v980_v3 = vmul.f32 0.0078125, %v960_v59  ;;  %v1021_v6 = vmul.f32 %v14219_v58, %v15702_v56  ;;  %v1063_v12 = vadd.f32 %v15796_v31, %v1041_v48 }
 0x2a0   : > { %v981_v41 = vmul.f32 0.0078125, %v962_v60  ;;  %14230 = vrsqrt.f32 %v995_v55  ;;  %v1077_v4 = vpack.c.bf16 %v1062_v63, %v1061_v61  ;;  %v1042_v5 = vmul.f32 %v15787_v38, %v1020_v2 }
 0x2a1   : > { %v14221_v7 = vpop.eup %14220  ;;  %v996_v10 = vadd.f32 1e-05, %v980_v3  ;;  %v1043_v17 = vmul.f32 %v15787_v38, %v1021_v6 }
 0x2a2   : > { %v997_v11 = vadd.f32 1e-05, %v981_v41  ;;  %v14223_v13 = vpop.eup %14222  ;;  %v964_v14 = vpop.xlane.xlu1 %963  ;;  %1295 = vmatmul.mubr.bf16.vlgmr.msra.gmra.mrb[0].mxu0 %v1077_v4  ;;  %13623 = vmatprep.mubr.bf16.mxu1 %v1077_v4  ;;  %v1064_v49 = vadd.f32 %v15796_v31, %v1042_v5  ;;  %v1022_v16 = vmul.f32 %v14221_v7, %v15704_v57 }
 0x2a3   : > { %v966_v15 = vpop.xlane.xlu0 %965  ;;  %14232 = vrsqrt.f32 %v996_v10  ;;  %v982_v18 = vmul.f32 0.0078125, %v964_v14  ;;  %1304 = vmatprep.mubr.bf16.mxu0 %v20821_v62  ;;  %v1023_v56 = vmul.f32 %v14223_v13, %v15711_v0  ;;  %v1065_v35 = vadd.f32 %v15796_v31, %v1043_v17 }
 0x2a4   : > { %v983_v21 = vmul.f32 0.0078125, %v966_v15  ;;  %14234 = vrsqrt.f32 %v997_v11  ;;  %v1078_v22 = vpack.c.bf16 %v1064_v49, %v1063_v12  ;;  %v1044_v23 = vmul.f32 %v15787_v38, %v1022_v16 }
 0x2a5   : > { %v14225_v24 = vpop.eup %14224  ;;  %v998_v25 = vadd.f32 1e-05, %v982_v18  ;;  %v1045_v26 = vmul.f32 %v15787_v38, %v1023_v56 }
 0x2a6   : > { %v999_v32 = vadd.f32 1e-05, %v983_v21  ;;  %v14227_v34 = vpop.eup %14226  ;;  %v968_v57 = vpop.xlane.xlu1 %967  ;;  %13624 = vmatmul.mubr.bf16.vlgmr.msra.gmra.mrb[0].mxu1 %v1078_v22  ;;  %v1066_v36 = vadd.f32 %v15796_v31, %v1044_v23  ;;  %v1024_v37 = vmul.f32 %v14225_v24, %v15714_v1 }
 0x2a7   : > { %14236 = vrsqrt.f32 %v998_v25  ;;  %v984_v0 = vmul.f32 0.0078125, %v968_v57  ;;  %v1025_v39 = vmul.f32 %v14227_v34, %v15721_v8  ;;  %v1067_v46 = vadd.f32 %v15796_v31, %v1045_v26 }
 0x2a8   : > { %14238 = vrsqrt.f32 %v999_v32  ;;  %v1079_v42 = vpack.c.bf16 %v1066_v36, %v1065_v35  ;;  %v1046_v43 = vmul.f32 %v15787_v38, %v1024_v37 }
 0x2a9   : > { %v14229_v28 = vpop.eup %14228  ;;  %v1000_v45 = vadd.f32 1e-05, %v984_v0  ;;  %v1047_v1 = vmul.f32 %v15787_v38, %v1025_v39 }
 0x2aa   : > { %v14231_v47 = vpop.eup %14230  ;;  %1305 = vmatmul.mubr.bf16.gmra.mrb[4].mxu0 %v1078_v22  ;;  %13627 = vmatprep.mubr.bf16.mxu1 %v1079_v42  ;;  %v1068_v40 = vadd.f32 %v15796_v31, %v1046_v43  ;;  %v1026_v50 = vmul.f32 %v14229_v28, %v15724_v9 }
 0x2ab   : > { %14240 = vrsqrt.f32 %v1000_v45  ;;  %1314 = vmatprep.mubr.bf16.mxu0 %v20821_v62  ;;  %v1027_v8 = vmul.f32 %v14231_v47, %v15734_v19  ;;  %v1069_v55 = vadd.f32 %v15796_v31, %v1047_v1 }
 0x2ac   : > { %v1080_v30 = vpack.c.bf16 %v1068_v40, %v1067_v46  ;;  %v1048_v51 = vmul.f32 %v15787_v38, %v1026_v50 }
 0x2ad   : > { %v14233_v52 = vpop.eup %14232  ;;  %v1049_v53 = vmul.f32 %v15787_v38, %v1027_v8 }
 0x2ae   : > { %v14235_v54 = vpop.eup %14234  ;;  %13628 = vmatmul.mubr.bf16.gmra.mrb[4].mxu1 %v1080_v30  ;;  %v1070_v48 = vadd.f32 %v15796_v31, %v1048_v51  ;;  %v1028_v9 = vmul.f32 %v14233_v52, %v15737_v20 }
 0x2af   : > { %v1029_v58 = vmul.f32 %v14235_v54, %v15745_v27  ;;  %v1071_v61 = vadd.f32 %v15796_v31, %v1049_v53 }
 0x2b0   : > { %v1081_v59 = vpack.c.bf16 %v1070_v48, %v1069_v55  ;;  %v1050_v60 = vmul.f32 %v15787_v38, %v1028_v9 }
 0x2b1   : > { %v14237_v19 = vpop.eup %14236  ;;  %v1051_v41 = vmul.f32 %v15787_v38, %v1029_v58 }
 0x2b2   : > { %v14239_v63 = vpop.eup %14238  ;;  %1315 = vmatmul.mubr.bf16.gmra.mrb[8].mxu0 %v1079_v42  ;;  %13631 = vmatprep.mubr.bf16.mxu1 %v1081_v59  ;;  %v1072_v2 = vadd.f32 %v15796_v31, %v1050_v60  ;;  %v1030_v3 = vmul.f32 %v14237_v19, %v15748_v33 }
 0x2b3   : > { %1324 = vmatprep.mubr.bf16.mxu0 %v20821_v62  ;;  %v1031_v20 = vmul.f32 %v14239_v63, %v15758_v29  ;;  %v1073_v6 = vadd.f32 %v15796_v31, %v1051_v41 }
 0x2b4   : > { %v1082_v27 = vpack.c.bf16 %v1072_v2, %v1071_v61  ;;  %v1052_v4 = vmul.f32 %v15787_v38, %v1030_v3 }
 0x2b5   : > { %v14241_v5 = vpop.eup %14240  ;;  %v1053_v11 = vmul.f32 %v15787_v38, %v1031_v20 }
 0x2b6   : > { %13632 = vmatmul.mubr.bf16.gmra.mrb[8].mxu1 %v1082_v27  ;;  %v1074_v7 = vadd.f32 %v15796_v31, %v1052_v4  ;;  %v1032_v10 = vmul.f32 %v14241_v5, %v15761_v44  ;;  %v1119_v44 = vlaneseq }
 0x2b7   : > { %v1075_v29 = vadd.f32 %v15796_v31, %v1053_v11 }
 0x2b8   : > { %v1083_v33 = vpack.c.bf16 %v1074_v7, %v1073_v6  ;;  %v1054_v12 = vmul.f32 %v15787_v38, %v1032_v10  ;;  %v15850_v38 = vshrl.u32 %v1119_v44, 7 }
 0x2ba   : > { %1325 = vmatmul.mubr.bf16.gmra.mrb[12].mxu0 %v1080_v30  ;;  %13635 = vmatprep.mubr.bf16.mxu1 %v1083_v33  ;;  %v1076_v13 = vadd.f32 %v15796_v31, %v1054_v12  ;;  %21042 = vst [vmem:[#allocation39_spill] sm:$0xff] %v15850_v38  ;;  %v20820_v15 = vsub.s32 0, %v15850_v38  ;;  %v1117_v31 = vld [vmem:[%s15597_s28] sm:$0x7]  ;;  %v20819_v49 = vsub.s32 1, %v15850_v38  ;;  %v1129_v17 = vsub.s32 2, %v15850_v38 }
 0x2bb   : > { %1334 = vmatprep.mubr.bf16.mxu0 %v20821_v62  ;;  %s15005_s28 = smov 64  }
 0x2bc   : > { %v1084_v14 = vpack.c.bf16 %v1076_v13, %v1075_v29  ;;  %v15857_v16 = vrot.slane %v1117_v31, %v20820_v15  ;;  %v15862_v21 = vrot.slane %v1117_v31, %v20819_v49  ;;  %v15866_v32 = vrot.slane %v1117_v31, %v1129_v17 }
 0x2be   : > { %13636 = vmatmul.mubr.bf16.gmra.mrb[12].mxu1 %v1084_v14 }
 0x2c2   : > { %1335 = vmatmul.mubr.bf16.gmra.mrb[16].mxu0 %v1081_v59 }
 0x2c3   : > { %1344 = vmatprep.mubr.bf16.mxu0 %v20821_v62 }
 0x2ca   : > { %1345 = vmatmul.mubr.bf16.gmra.mrb[20].mxu0 %v1082_v27 }
 0x2cb   : > { %1354 = vmatprep.mubr.bf16.mxu0 %v20821_v62 }
 0x2d2   : > { %1355 = vmatmul.mubr.bf16.gmra.mrb[24].mxu0 %v1083_v33 }
 0x2d3   : > { %1364 = vmatprep.mubr.bf16.mxu0 %v20821_v62 }
 0x2da   : > { %1365 = vmatmul.mubr.bf16.gmra.mrb[28].mxu0 %v1084_v14 }
 0x375   : > { %v1296_v18 = vpop.f32.mrb[0].mxu0 }
 0x376   : > { %v1298_v56 = vpop.f32.mrb[1].mxu0  ;;  %v1297_v23 = vadd.f32 %v1296_v18, %v15857_v16 }
 0x377   : > { %v1300_v22 = vpop.f32.mrb[2].mxu0  ;;  %v1299_v26 = vadd.f32 %v1298_v56, %v15862_v21 }
 0x378   : > { %v1301_v24 = vadd.f32 %v1300_v22, %v15857_v16  ;;  %v1302_v25 = vpop.f32.mrb[3].mxu0 }
 0x379   : > { %v1303_v34 = vadd.f32 %v1302_v25, %v15862_v21  ;;  %v13625_v57 = vpop.f32.mrb[0].mxu1 }
 0x37a   : > { %v15870_v35 = vpack.c.bf16 %v1301_v24, %v1297_v23  ;;  %v1409_v36 = vpop.f32.mrb[1].mxu1  ;;  %v1418_v39 = vadd.f32 %v13625_v57, %v15866_v32 }
 0x37b   : > { %v15872_v37 = vpack.c.bf16 %v1303_v34, %v1299_v26  ;;  %v13626_v0 = vpop.f32.mrb[2].mxu1  ;;  %v1410_v28 = vadd.f32 %v1409_v36, %v15866_v32 }
 0x37c   : > { %v1421_v42 = vadd.f32 %v13626_v0, %v15866_v32  ;;  %v1412_v43 = vpop.f32.mrb[3].mxu1 }
 0x37d   : > { %v1413_v45 = vadd.f32 %v1412_v43, %v15866_v32  ;;  %3654 = vrot.lane.b32.xlu1 %v15872_v37, %s15005_s28  ;;  %3638 = vrot.lane.b32.xlu0 %v15872_v37, %s15006_s19  ;;  %v1306_v46 = vpop.f32.mrb[4].mxu0 }
 0x37e   : > { %v15882_v47 = vpack.c.bf16 %v1421_v42, %v1418_v39  ;;  %v1308_v40 = vpop.f32.mrb[5].mxu0  ;;  %v1307_v8 = vadd.f32 %v1306_v46, %v15857_v16 }
 0x37f   : > { %v15884_v50 = vpack.c.bf16 %v1413_v45, %v1410_v28  ;;  %v1310_v1 = vpop.f32.mrb[6].mxu0  ;;  %v1309_v52 = vadd.f32 %v1308_v40, %v15862_v21 }
 0x380   : > { %21043 = vst [vmem:[#allocation40_spill] sm:$0xff] %v15882_v47  ;;  %v1311_v30 = vadd.f32 %v1310_v1, %v15857_v16  ;;  %v1312_v51 = vpop.f32.mrb[7].mxu0 }
 0x381   : > { %21044 = vst [vmem:[#allocation41_spill] sm:$0xff] %v15884_v50  ;;  %v1313_v53 = vadd.f32 %v1312_v51, %v15862_v21  ;;  %3670 = vrot.lane.b32.xlu1 %v15872_v37, %s15007_s14  ;;  %v13629_v54 = vpop.f32.mrb[4].mxu1 }
 0x382   : > { %v15892_v55 = vpack.c.bf16 %v1311_v30, %v1307_v8  ;;  %v1425_v48 = vpop.f32.mrb[5].mxu1  ;;  %v1434_v59 = vadd.f32 %v13629_v54, %v15866_v32 }
 0x383   : > { %v15894_v9 = vpack.c.bf16 %v1313_v53, %v1309_v52  ;;  %v13630_v58 = vpop.f32.mrb[6].mxu1  ;;  %v1426_v61 = vadd.f32 %v1425_v48, %v15866_v32 }
 0x384   : > { %v1437_v60 = vadd.f32 %v13630_v58, %v15866_v32  ;;  %v1428_v19 = vpop.f32.mrb[7].mxu1 }
 0x385   : > { %v1429_v63 = vadd.f32 %v1428_v19, %v15866_v32  ;;  %3656 = vrot.lane.b32.xlu0 %v15894_v9, %s15005_s28  ;;  %3640 = vrot.lane.b32.xlu1 %v15894_v9, %s15006_s19  ;;  %v1316_v2 = vpop.f32.mrb[8].mxu0 }
 0x386   : > { %v15904_v3 = vpack.c.bf16 %v1437_v60, %v1434_v59  ;;  %v1318_v41 = vpop.f32.mrb[9].mxu0  ;;  %v1317_v4 = vadd.f32 %v1316_v2, %v15857_v16 }
 0x387   : > { %v15906_v20 = vpack.c.bf16 %v1429_v63, %v1426_v61  ;;  %v1320_v27 = vpop.f32.mrb[10].mxu0  ;;  %v1319_v7 = vadd.f32 %v1318_v41, %v15862_v21 }
 0x388   : > { %21045 = vst [vmem:[#allocation42_spill] sm:$0xff] %v15904_v3  ;;  %v1321_v5 = vadd.f32 %v1320_v27, %v15857_v16  ;;  %v1322_v6 = vpop.f32.mrb[11].mxu0 }
 0x389   : > { %21046 = vst [vmem:[#allocation43_spill] sm:$0xff] %v15906_v20  ;;  %v1323_v10 = vadd.f32 %v1322_v6, %v15862_v21  ;;  %3672 = vrot.lane.b32.xlu1 %v15894_v9, %s15007_s14  ;;  %v13633_v11 = vpop.f32.mrb[8].mxu1 }
 0x38a   : > { %v15914_v33 = vpack.c.bf16 %v1321_v5, %v1317_v4  ;;  %v1441_v12 = vpop.f32.mrb[9].mxu1  ;;  %v1450_v14 = vadd.f32 %v13633_v11, %v15866_v32 }
 0x38b   : > { %v15916_v29 = vpack.c.bf16 %v1323_v10, %v1319_v7  ;;  %v13634_v13 = vpop.f32.mrb[10].mxu1  ;;  %v1442_v17 = vadd.f32 %v1441_v12, %v15866_v32 }
 0x38c   : > { %v1453_v44 = vadd.f32 %v13634_v13, %v15866_v32  ;;  %v1444_v31 = vpop.f32.mrb[11].mxu1 }
 0x38d   : > { %v1445_v18 = vadd.f32 %v1444_v31, %v15866_v32  ;;  %3658 = vrot.lane.b32.xlu1 %v15916_v29, %s15005_s28  ;;  %3642 = vrot.lane.b32.xlu0 %v15916_v29, %s15006_s19  ;;  %v1326_v56 = vpop.f32.mrb[12].mxu0 }
 0x38e   : > { %v15926_v22 = vpack.c.bf16 %v1453_v44, %v1450_v14  ;;  %v1328_v23 = vpop.f32.mrb[13].mxu0  ;;  %v1327_v26 = vadd.f32 %v1326_v56, %v15857_v16 }
 0x38f   : > { %v15928_v24 = vpack.c.bf16 %v1445_v18, %v1442_v17  ;;  %v1330_v25 = vpop.f32.mrb[14].mxu0  ;;  %v1329_v36 = vadd.f32 %v1328_v23, %v15862_v21 }
 0x390   : > { %21047 = vst [vmem:[#allocation44_spill] sm:$0xff] %v15926_v22  ;;  %v1331_v34 = vadd.f32 %v1330_v25, %v15857_v16  ;;  %v1332_v57 = vpop.f32.mrb[15].mxu0 }
 0x391   : > { %21048 = vst [vmem:[#allocation45_spill] sm:$0xff] %v15928_v24  ;;  %v1333_v0 = vadd.f32 %v1332_v57, %v15862_v21  ;;  %3674 = vrot.lane.b32.xlu0 %v15916_v29, %s15007_s14  ;;  %v13637_v39 = vpop.f32.mrb[12].mxu1 }
 0x392   : > { %v15936_v42 = vpack.c.bf16 %v1331_v34, %v1327_v26  ;;  %v1457_v43 = vpop.f32.mrb[13].mxu1  ;;  %v1466_v46 = vadd.f32 %v13637_v39, %v15866_v32 }
 0x393   : > { %v15938_v28 = vpack.c.bf16 %v1333_v0, %v1329_v36  ;;  %v13638_v45 = vpop.f32.mrb[14].mxu1  ;;  %v1458_v8 = vadd.f32 %v1457_v43, %v15866_v32 }
 0x394   : > { %v1469_v40 = vadd.f32 %v13638_v45, %v15866_v32  ;;  %v1460_v1 = vpop.f32.mrb[15].mxu1 }
 0x395   : > { %v1461_v30 = vadd.f32 %v1460_v1, %v15866_v32  ;;  %3660 = vrot.lane.b32.xlu0 %v15938_v28, %s15005_s28  ;;  %3644 = vrot.lane.b32.xlu1 %v15938_v28, %s15006_s19  ;;  %v1336_v51 = vpop.f32.mrb[16].mxu0 }
 0x396   : > { %v15948_v52 = vpack.c.bf16 %v1469_v40, %v1466_v46  ;;  %v1338_v53 = vpop.f32.mrb[17].mxu0  ;;  %v1337_v58 = vadd.f32 %v1336_v51, %v15857_v16 }
 0x397   : > { %v15950_v54 = vpack.c.bf16 %v1461_v30, %v1458_v8  ;;  %v1340_v48 = vpop.f32.mrb[18].mxu0  ;;  %v1339_v32 = vadd.f32 %v1338_v53, %v15862_v21  ;;  %v15009_v8 = vmov 1934713408  }
 0x398   : > { %21049 = vst [vmem:[#allocation46_spill] sm:$0xff] %v15948_v52  ;;  %v1341_v59 = vadd.f32 %v1340_v48, %v15857_v16  ;;  %v1342_v60 = vpop.f32.mrb[19].mxu0  ;;  %v1703_v30 = vunpack.c.l.s4 %v15009_v8  ;;  %v16066_v48 = vpack.i.b16 %v20821_v62, %v20821_v62 }
 0x399   : > { %21050 = vst [vmem:[#allocation47_spill] sm:$0xff] %v15950_v54  ;;  %v1343_v19 = vadd.f32 %v1342_v60, %v15862_v21  ;;  %3676 = vrot.lane.b32.xlu1 %v15938_v28, %s15007_s14  ;;  %v3690_v60 = vshrl.u32 %v15872_v37, 16 }
 0x39a   : > { %v15958_v61 = vpack.c.bf16 %v1341_v59, %v1337_v58  ;;  %v1704_v53 = vunpack.c.0.s8 %v1703_v30  ;;  %21054 = vst [vmem:[#allocation51_spill] sm:$0xff] %v16066_v48 }
 0x39b   : > { %v15960_v63 = vpack.c.bf16 %v1343_v19, %v1339_v32 }
 0x39c   : > { %v16073_v19 = vsub.s32 %v1704_v53, %v15850_v38 }
 0x39d   : > { %3662 = vrot.lane.b32.xlu1 %v15960_v63, %s15005_s28  ;;  %3646 = vrot.lane.b32.xlu0 %v15960_v63, %s15006_s19  ;;  %v1346_v2 = vpop.f32.mrb[20].mxu0 }
 0x39e   : > { %v1348_v41 = vpop.f32.mrb[21].mxu0  ;;  %v1347_v4 = vadd.f32 %v1346_v2, %v15857_v16  ;;  %21056 = vst [vmem:[#allocation53_spill] sm:$0xff] %v16073_v19 }
 0x39f   : > { %v1350_v27 = vpop.f32.mrb[22].mxu0  ;;  %v1349_v7 = vadd.f32 %v1348_v41, %v15862_v21 }
 0x3a0   : > { %v1351_v5 = vadd.f32 %v1350_v27, %v15857_v16  ;;  %v1352_v6 = vpop.f32.mrb[23].mxu0 }
 0x3a1   : > { %v1353_v10 = vadd.f32 %v1352_v6, %v15862_v21  ;;  %3678 = vrot.lane.b32.xlu0 %v15960_v63, %s15007_s14  ;;  %v3722_v6 = vshrl.u32 %v15916_v29, 16 }
 0x3a2   : > { %v15972_v11 = vpack.c.bf16 %v1351_v5, %v1347_v4  ;;  %v3706_v4 = vshrl.u32 %v15894_v9, 16 }
 0x3a3   : > { %v15974_v12 = vpack.c.bf16 %v1353_v10, %v1349_v7  ;;  %v3738_v7 = vshrl.u32 %v15938_v28, 16 }
 0x3a4   : > { %21051 = vst [vmem:[#allocation48_spill] sm:$0xff] %v15972_v11 }
 0x3a5   : > { %3664 = vrot.lane.b32.xlu0 %v15974_v12, %s15005_s28  ;;  %3648 = vrot.lane.b32.xlu1 %v15974_v12, %s15006_s19  ;;  %v1356_v13 = vpop.f32.mrb[24].mxu0 }
 0x3a6   : > { %v1358_v14 = vpop.f32.mrb[25].mxu0  ;;  %v1357_v31 = vadd.f32 %v1356_v13, %v15857_v16 }
 0x3a7   : > { %v1360_v44 = vpop.f32.mrb[26].mxu0  ;;  %v1359_v56 = vadd.f32 %v1358_v14, %v15862_v21 }
 0x3a8   : > { %v1361_v17 = vadd.f32 %v1360_v44, %v15857_v16  ;;  %v1362_v18 = vpop.f32.mrb[27].mxu0 }
 0x3a9   : > { %v1363_v23 = vadd.f32 %v1362_v18, %v15862_v21  ;;  %3680 = vrot.lane.b32.xlu1 %v15974_v12, %s15007_s14 }
 0x3aa   : > { %v15986_v25 = vpack.c.bf16 %v1361_v17, %v1357_v31 }
 0x3ab   : > { %v15988_v26 = vpack.c.bf16 %v1363_v23, %v1359_v56 }
 0x3ac   : > { %21052 = vst [vmem:[#allocation49_spill] sm:$0xff] %v15986_v25 }
 0x3ad   : > { %3666 = vrot.lane.b32.xlu1 %v15988_v26, %s15005_s28  ;;  %3650 = vrot.lane.b32.xlu0 %v15988_v26, %s15006_s19  ;;  %v1366_v34 = vpop.f32.mrb[28].mxu0 }
 0x3ae   : > { %v1368_v57 = vpop.f32.mrb[29].mxu0  ;;  %v1367_v0 = vadd.f32 %v1366_v34, %v15857_v16 }
 0x3af   : > { %v1370_v36 = vpop.f32.mrb[30].mxu0  ;;  %v1369_v45 = vadd.f32 %v1368_v57, %v15862_v21 }
 0x3b0   : > { %v1371_v39 = vadd.f32 %v1370_v36, %v15857_v16  ;;  %v1372_v43 = vpop.f32.mrb[31].mxu0  ;;  %v15008_v16 = vmov 1983009808  }
 0x3b1   : > { %v1373_v46 = vadd.f32 %v1372_v43, %v15862_v21  ;;  %3682 = vrot.lane.b32.xlu0 %v15988_v26, %s15007_s14  ;;  %v1672_v21 = vunpack.c.l.s4 %v15008_v16 }
 0x3b2   : > { %v16000_v40 = vpack.c.bf16 %v1371_v39, %v1367_v0 }
 0x3b3   : > { %v16002_v1 = vpack.c.bf16 %v1373_v46, %v1369_v45  ;;  %v1673_v51 = vunpack.c.0.s8 %v1672_v21 }
 0x3b4   : > { %21053 = vst [vmem:[#allocation50_spill] sm:$0xff] %v16000_v40 }
 0x3b5   : > { %3668 = vrot.lane.b32.xlu0 %v16002_v1, %s15005_s28  ;;  %3652 = vrot.lane.b32.xlu1 %v16002_v1, %s15006_s19  ;;  %v16069_v59 = vsub.s32 %v1673_v51, %v15850_v38 }
 0x3b7   : > { %21055 = vst [vmem:[#allocation52_spill] sm:$0xff] %v16069_v59 }
 0x3b9   : > { %1488 = vrot.lane.b32.xlu0 %v15870_v35, %s15006_s19  ;;  %3684 = vrot.lane.b32.xlu1 %v16002_v1, %s15007_s14 }
 0x3bd   : > { %1520 = vrot.lane.b32.xlu0 %v15870_v35, %s15007_s14  ;;  %1504 = vrot.lane.b32.xlu1 %v15870_v35, %s15005_s28 }
 0x3c1   : > { %1506 = vrot.lane.b32.xlu0 %v15892_v55, %s15005_s28  ;;  %1490 = vrot.lane.b32.xlu1 %v15892_v55, %s15006_s19 }
 0x3c5   : > { %1492 = vrot.lane.b32.xlu0 %v15914_v33, %s15006_s19  ;;  %1522 = vrot.lane.b32.xlu1 %v15892_v55, %s15007_s14 }
 0x3c9   : > { %1524 = vrot.lane.b32.xlu0 %v15914_v33, %s15007_s14  ;;  %1508 = vrot.lane.b32.xlu1 %v15914_v33, %s15005_s28 }
 0x3cd   : > { %1510 = vrot.lane.b32.xlu0 %v15936_v42, %s15005_s28  ;;  %1494 = vrot.lane.b32.xlu1 %v15936_v42, %s15006_s19 }
 0x3d1   : > { %1496 = vrot.lane.b32.xlu0 %v15958_v61, %s15006_s19  ;;  %1526 = vrot.lane.b32.xlu1 %v15936_v42, %s15007_s14 }
 0x3d5   : > { %1528 = vrot.lane.b32.xlu0 %v15958_v61, %s15007_s14  ;;  %1512 = vrot.lane.b32.xlu1 %v15958_v61, %s15005_s28 }
 0x3d9   : > { %1514 = vrot.lane.b32.xlu0 %v15972_v11, %s15005_s28  ;;  %1498 = vrot.lane.b32.xlu1 %v15972_v11, %s15006_s19 }
 0x3dd   : > { %1500 = vrot.lane.b32.xlu0 %v15986_v25, %s15006_s19  ;;  %1530 = vrot.lane.b32.xlu1 %v15972_v11, %s15007_s14 }
 0x3e1   : > { %1532 = vrot.lane.b32.xlu0 %v15986_v25, %s15007_s14  ;;  %1516 = vrot.lane.b32.xlu1 %v15986_v25, %s15005_s28 }
 0x3e5   : > { %1518 = vrot.lane.b32.xlu0 %v16000_v40, %s15005_s28  ;;  %1502 = vrot.lane.b32.xlu1 %v16000_v40, %s15006_s19 }
 0x3e9   : > { %5782 = vrot.lane.b32.xlu0 %v15884_v50, %s15006_s19  ;;  %1534 = vrot.lane.b32.xlu1 %v16000_v40, %s15007_s14 }
 0x3ed   : > { %5814 = vrot.lane.b32.xlu0 %v15884_v50, %s15007_s14  ;;  %5798 = vrot.lane.b32.xlu1 %v15884_v50, %s15005_s28 }
 0x3ef   : > { %v3655_v58 = vpop.permute.xlu1 %3654  ;;  %v3639_v32 = vpop.permute.xlu0 %3638 }
 0x3f0   : > { %v3688_v41 = vpack.i.b16 %v3639_v32, %v15872_v37  ;;  %v3691_v27 = vshrl.u32 %v3639_v32, 16  ;;  %v3698_v43 = vshrl.u32 %v3655_v58, 16 }
 0x3f1   : > { %5800 = vrot.lane.b32.xlu0 %v15882_v47, %s15005_s28  ;;  %5784 = vrot.lane.b32.xlu1 %v15882_v47, %s15006_s19 }
 0x3f2   : > { %v3692_v37 = vpack.i.b16 %v3691_v27, %v3690_v60  ;;  %v3814_v17 = vcombine.high %v3688_v41, %v16066_v48  ;;  %v3821_v21 = vrot.slane %v3688_v41, %v16069_v59 }
 0x3f3   : > { %v3671_v18 = vpop.permute.xlu1 %3670 }
 0x3f4   : > { %v3880_v57 = vcombine.high %v3692_v37, %v16066_v48  ;;  %v3696_v36 = vpack.i.b16 %v3671_v18, %v3655_v58  ;;  %v3699_v45 = vshrl.u32 %v3671_v18, 16  ;;  %v3828_v53 = vrot.slane %v3814_v17, %v16069_v59 }
 0x3f5   : > { %5786 = vrot.lane.b32.xlu0 %v15906_v20, %s15006_s19  ;;  %5816 = vrot.lane.b32.xlu1 %v15882_v47, %s15007_s14  ;;  %v3887_v58 = vrot.slane %v3692_v37, %v16069_v59 }
 0x3f6   : > { %v3829_v8 = vcombine.high %v3696_v36, %v16066_v48  ;;  %v3836_v30 = vrot.slane %v3696_v36, %v16069_v59  ;;  %v3894_v60 = vrot.slane %v3880_v57, %v16069_v59  ;;  %v3700_v32 = vpack.i.b16 %v3699_v45, %v3698_v43 }
 0x3f7   : > { %v3641_v27 = vpop.permute.xlu1 %3640  ;;  %v3657_v18 = vpop.permute.xlu0 %3656 }
 0x3f8   : > { %v3843_v49 = vrot.slane %v3829_v8, %v16069_v59  ;;  %v3844_v15 = vcombine.low %v3821_v21, %v3836_v30  ;;  %v3845_v62 = vcombine.high %v3821_v21, %v3836_v30  ;;  %v3704_v41 = vpack.i.b16 %v3641_v27, %v15894_v9 }
 0x3f9   : > { %v3895_v16 = vcombine.high %v3700_v32, %v16066_v48  ;;  %v3902_v36 = vrot.slane %v3700_v32, %v16069_v59  ;;  %v3707_v46 = vshrl.u32 %v3641_v27, 16  ;;  %v3714_v34 = vshrl.u32 %v3657_v18, 16  ;;  %5818 = vrot.lane.b32.xlu0 %v15906_v20, %s15007_s14  ;;  %5802 = vrot.lane.b32.xlu1 %v15906_v20, %s15005_s28 }
 0x3fa   : > { %v3852_v37 = vrot.slane %v3844_v15, %v16073_v19  ;;  %v3859_v17 = vrot.slane %v3845_v62, %v16073_v19  ;;  %v3860_v57 = vcombine.low %v3828_v53, %v3843_v49  ;;  %v3861_v43 = vcombine.high %v3828_v53, %v3843_v49 }
 0x3fb   : > { %v3909_v9 = vrot.slane %v3895_v16, %v16069_v59  ;;  %v3910_v45 = vcombine.low %v3887_v58, %v3902_v36  ;;  %v3911_v21 = vcombine.high %v3887_v58, %v3902_v36  ;;  %v3708_v8 = vpack.i.b16 %v3707_v46, %v3706_v4  ;;  %v3673_v30 = vpop.permute.xlu1 %3672 }
 0x3fc   : > { %v16122_v32 = vrot.slane %v3860_v57, %v16073_v19  ;;  %v16125_v27 = vrot.slane %v3861_v43, %v16073_v19  ;;  %v4870_v51 = vcombine.low %v3852_v37, %v3859_v17  ;;  %v13200_v39 = vcombine.high %v3852_v37, %v3859_v17 }
 0x3fd   : > { %v16128_v15 = vrot.slane %v3910_v45, %v16073_v19  ;;  %v16131_v62 = vrot.slane %v3911_v21, %v16073_v19  ;;  %v3926_v49 = vcombine.low %v3894_v60, %v3909_v9  ;;  %v3927_v16 = vcombine.high %v3894_v60, %v3909_v9  ;;  %5804 = vrot.lane.b32.xlu0 %v15904_v3, %s15005_s28 }
 0x3fe   : > { %v16136_v4 = vrot.slane %v4870_v51, %v16069_v59  ;;  %v16139_v46 = vrot.slane %v13200_v39, %v16069_v59  ;;  %5788 = vrot.lane.b32.xlu1 %v15904_v3, %s15006_s19  ;;  %v3946_v57 = vcombine.high %v3704_v41, %v16066_v48  ;;  %v3953_v43 = vrot.slane %v3704_v41, %v16069_v59 }
 0x3ff   : > { %v16148_v60 = vrot.slane %v3926_v49, %v16073_v19  ;;  %v16151_v36 = vrot.slane %v3927_v16, %v16073_v19  ;;  %v3659_v37 = vpop.permute.xlu1 %3658  ;;  %v3643_v17 = vpop.permute.xlu0 %3642  ;;  %v4012_v9 = vcombine.high %v3708_v8, %v16066_v48  ;;  %v4019_v45 = vrot.slane %v3708_v8, %v16069_v59 }
 0x400   : > { %v3712_v16 = vpack.i.b16 %v3673_v30, %v3657_v18  ;;  %v3715_v0 = vshrl.u32 %v3673_v30, 16  ;;  %v3960_v31 = vrot.slane %v3946_v57, %v16069_v59  ;;  %v3730_v41 = vshrl.u32 %v3659_v37, 16 }
 0x401   : > { %5790 = vrot.lane.b32.xlu0 %v15928_v24, %s15006_s19  ;;  %v4026_v13 = vrot.slane %v4012_v9, %v16069_v59  ;;  %v3720_v10 = vpack.i.b16 %v3643_v17, %v15916_v29  ;;  %v3723_v18 = vshrl.u32 %v3643_v17, 16 }
 0x402   : > { %5820 = vrot.lane.b32.xlu1 %v15904_v3, %s15007_s14  ;;  %v3716_v8 = vpack.i.b16 %v3715_v0, %v3714_v34  ;;  %v3961_v5 = vcombine.high %v3712_v16, %v16066_v48  ;;  %v3968_v2 = vrot.slane %v3712_v16, %v16069_v59 }
 0x403   : > { %v3675_v30 = vpop.permute.xlu0 %3674  ;;  %v4078_v23 = vcombine.high %v3720_v10, %v16066_v48  ;;  %v4085_v56 = vrot.slane %v3720_v10, %v16069_v59  ;;  %v3724_v0 = vpack.i.b16 %v3723_v18, %v3722_v6 }
 0x404   : > { %v3728_v57 = vpack.i.b16 %v3675_v30, %v3659_v37  ;;  %v3731_v44 = vshrl.u32 %v3675_v30, 16  ;;  %v3975_v9 = vrot.slane %v3961_v5, %v16069_v59  ;;  %v3976_v14 = vcombine.low %v3953_v43, %v3968_v2 }
 0x405   : > { %v3977_v49 = vcombine.high %v3953_v43, %v3968_v2  ;;  %v4027_v21 = vcombine.high %v3716_v8, %v16066_v48  ;;  %5822 = vrot.lane.b32.xlu0 %v15928_v24, %s15007_s14  ;;  %v4034_v34 = vrot.slane %v3716_v8, %v16069_v59  ;;  %v4092_v17 = vrot.slane %v4078_v23, %v16069_v59 }
 0x406   : > { %v3732_v16 = vpack.i.b16 %v3731_v44, %v3730_v41  ;;  %5806 = vrot.lane.b32.xlu1 %v15928_v24, %s15005_s28  ;;  %v3984_v5 = vrot.slane %v3976_v14, %v16073_v19  ;;  %v3992_v10 = vcombine.low %v3960_v31, %v3975_v9  ;;  %v3993_v37 = vcombine.high %v3960_v31, %v3975_v9 }
 0x407   : > { %v3991_v2 = vrot.slane %v3977_v49, %v16073_v19  ;;  %v4041_v43 = vrot.slane %v4027_v21, %v16069_v59  ;;  %v4042_v30 = vcombine.low %v4019_v45, %v4034_v34  ;;  %v4043_v39 = vcombine.high %v4019_v45, %v4034_v34 }
 0x408   : > { %v4144_v8 = vcombine.high %v3724_v0, %v16066_v48  ;;  %v16191_v29 = vrot.slane %v3992_v10, %v16073_v19  ;;  %v16194_v6 = vrot.slane %v3993_v37, %v16073_v19  ;;  %v4151_v10 = vrot.slane %v3724_v0, %v16069_v59 }
 0x409   : > { %v4970_v44 = vcombine.low %v3984_v5, %v3991_v2  ;;  %v13204_v23 = vcombine.high %v3984_v5, %v3991_v2  ;;  %5808 = vrot.lane.b32.xlu0 %v15926_v22, %s15005_s28  ;;  %v16199_v14 = vrot.slane %v4042_v30, %v16073_v19  ;;  %v16202_v31 = vrot.slane %v4043_v39, %v16073_v19  ;;  %v3645_v2 = vpop.permute.xlu1 %3644 }
 0x40a   : > { %v4058_v45 = vcombine.low %v4026_v13, %v4041_v43  ;;  %v4059_v21 = vcombine.high %v4026_v13, %v4041_v43  ;;  %5792 = vrot.lane.b32.xlu1 %v15926_v22, %s15006_s19  ;;  %v4158_v37 = vrot.slane %v4144_v8, %v16069_v59  ;;  %v4093_v43 = vcombine.high %v3728_v57, %v16066_v48 }
 0x40b   : > { %v16207_v49 = vrot.slane %v4970_v44, %v16069_v59  ;;  %v16210_v41 = vrot.slane %v13204_v23, %v16069_v59  ;;  %v4100_v30 = vrot.slane %v3728_v57, %v16069_v59  ;;  %v3736_v5 = vpack.i.b16 %v3645_v2, %v15938_v28 }
 0x40c   : > { %v16217_v39 = vrot.slane %v4058_v45, %v16073_v19  ;;  %v16220_v13 = vrot.slane %v4059_v21, %v16073_v19  ;;  %v4159_v45 = vcombine.high %v3732_v16, %v16066_v48  ;;  %v4166_v21 = vrot.slane %v3732_v16, %v16069_v59 }
 0x40d   : > { %5794 = vrot.lane.b32.xlu0 %v15950_v54, %s15006_s19  ;;  %v4107_v0 = vrot.slane %v4093_v43, %v16069_v59  ;;  %v4108_v8 = vcombine.low %v4085_v56, %v4100_v30  ;;  %v4109_v57 = vcombine.high %v4085_v56, %v4100_v30  ;;  %v3739_v18 = vshrl.u32 %v3645_v2, 16 }
 0x40e   : > { %5824 = vrot.lane.b32.xlu1 %v15926_v22, %s15007_s14  ;;  %v4173_v34 = vrot.slane %v4159_v45, %v16069_v59  ;;  %v4174_v9 = vcombine.low %v4151_v10, %v4166_v21  ;;  %v4175_v44 = vcombine.high %v4151_v10, %v4166_v21  ;;  %v21057_v28 = vcombine.low %v16122_v32, %v16125_v27 }
 0x40f   : > { %v4116_v23 = vrot.slane %v4108_v8, %v16073_v19  ;;  %v4123_v51 = vrot.slane %v4109_v57, %v16073_v19  ;;  %v4124_v58 = vcombine.low %v4092_v17, %v4107_v0  ;;  %v4125_v16 = vcombine.high %v4092_v17, %v4107_v0 }
 0x410   : > { %v16248_v43 = vrot.slane %v4174_v9, %v16073_v19  ;;  %v16251_v56 = vrot.slane %v4175_v44, %v16073_v19  ;;  %v4190_v30 = vcombine.low %v4158_v37, %v4173_v34  ;;  %v4191_v45 = vcombine.high %v4158_v37, %v4173_v34  ;;  %v3661_v44 = vpop.permute.xlu0 %3660 }
 0x411   : > { %5826 = vrot.lane.b32.xlu0 %v15950_v54, %s15007_s14  ;;  %v16256_v2 = vrot.slane %v4124_v58, %v16073_v19  ;;  %v16259_v10 = vrot.slane %v4125_v16, %v16073_v19  ;;  %v5070_v17 = vcombine.low %v4116_v23, %v4123_v51  ;;  %v13208_v21 = vcombine.high %v4116_v23, %v4123_v51  ;;  %v3677_v58 = vpop.permute.xlu1 %3676 }
 0x412   : > { %5810 = vrot.lane.b32.xlu1 %v15950_v54, %s15005_s28  ;;  %v16262_v0 = vrot.slane %v4190_v30, %v16073_v19  ;;  %v16265_v9 = vrot.slane %v4191_v45, %v16073_v19  ;;  %v3740_v45 = vpack.i.b16 %v3739_v18, %v3738_v7  ;;  %v3746_v37 = vshrl.u32 %v3661_v44, 16 }
 0x413   : > { %v16272_v8 = vrot.slane %v5070_v17, %v16069_v59  ;;  %v16275_v57 = vrot.slane %v13208_v21, %v16069_v59  ;;  %v4210_v17 = vcombine.high %v3736_v5, %v16066_v48  ;;  %v4217_v21 = vrot.slane %v3736_v5, %v16069_v59 }
 0x414   : > { %v3744_v34 = vpack.i.b16 %v3677_v58, %v3661_v44  ;;  %v3747_v23 = vshrl.u32 %v3677_v58, 16  ;;  %v4276_v16 = vcombine.high %v3740_v45, %v16066_v48  ;;  %v4283_v53 = vrot.slane %v3740_v45, %v16069_v59 }
 0x415   : > { %5812 = vrot.lane.b32.xlu0 %v15948_v52, %s15005_s28  ;;  %v4224_v51 = vrot.slane %v4210_v17, %v16069_v59  ;;  %v4893_v7 = vrot.slane %v21057_v28, %v16069_v59  ;;  %v21058_v5 = vcombine.high %v16122_v32, %v16125_v27  ;;  %v4902_v45 = vcombine.low %v16136_v4, %v16139_v46 }
 0x416   : > { %5796 = vrot.lane.b32.xlu1 %v15948_v52, %s15006_s19  ;;  %v3748_v18 = vpack.i.b16 %v3747_v23, %v3746_v37  ;;  %v4225_v30 = vcombine.high %v3744_v34, %v16066_v48  ;;  %v4232_v38 = vrot.slane %v3744_v34, %v16069_v59  ;;  %v4290_v58 = vrot.slane %v4276_v16, %v16069_v59 }
 0x417   : > { %v4901_v44 = vrot.slane %v21058_v5, %v16069_v59  ;;  %v21059_v17 = vcombine.low %v16128_v15, %v16131_v62  ;;  %v21060_v37 = vcombine.high %v16128_v15, %v16131_v62  ;;  %v16323_v46 = vrot.slane %v4902_v45, %v16073_v19 }
 0x418   : > { %v4239_v32 = vrot.slane %v4225_v30, %v16069_v59  ;;  %v4240_v27 = vcombine.low %v4217_v21, %v4232_v38  ;;  %v4241_v23 = vcombine.high %v4217_v21, %v4232_v38  ;;  %v4291_v16 = vcombine.high %v3748_v18, %v16066_v48 }
 0x419   : > { %v4927_v28 = vrot.slane %v21059_v17, %v16069_v59  ;;  %v4935_v34 = vrot.slane %v21060_v37, %v16069_v59  ;;  %v4298_v4 = vrot.slane %v3748_v18, %v16069_v59  ;;  %v4910_v5 = vcombine.low %v4893_v7, %v4901_v44  ;;  %v3647_v17 = vpop.permute.xlu0 %3646 }
 0x41a   : > { %5828 = vrot.lane.b32.xlu1 %v15948_v52, %s15007_s14  ;;  %v21061_v15 = vcombine.low %v16148_v60, %v16151_v36  ;;  %v4248_v37 = vrot.slane %v4240_v27, %v16073_v19  ;;  %v4255_v30 = vrot.slane %v4241_v23, %v16073_v19  ;;  %v4256_v52 = vcombine.low %v4224_v51, %v4239_v32 }
 0x41b   : > { %v4257_v38 = vcombine.high %v4224_v51, %v4239_v32  ;;  %v4305_v21 = vrot.slane %v4291_v16, %v16069_v59  ;;  %v4306_v54 = vcombine.low %v4283_v53, %v4298_v4  ;;  %v4307_v18 = vcombine.high %v4283_v53, %v4298_v4  ;;  %v3663_v53 = vpop.permute.xlu1 %3662 }
 0x41c   : > { %v4943_v62 = vrot.slane %v21061_v15, %v16069_v59  ;;  %v16333_v45 = vrot.slane %v4910_v5, %v16073_v19  ;;  %v16336_v7 = vrot.slane %v4256_v52, %v16073_v19  ;;  %v5170_v15 = vcombine.low %v4248_v37, %v4255_v30 }
 0x41d   : > { %v16339_v44 = vrot.slane %v4257_v38, %v16073_v19  ;;  %v13212_v22 = vcombine.high %v4248_v37, %v4255_v30  ;;  %v16342_v27 = vrot.slane %v4306_v54, %v16073_v19  ;;  %v16345_v51 = vrot.slane %v4307_v18, %v16073_v19 }
 0x41e   : > { %v4322_v32 = vcombine.low %v4290_v58, %v4305_v21  ;;  %v4323_v23 = vcombine.high %v4290_v58, %v4305_v21  ;;  %v16348_v16 = vrot.slane %v5170_v15, %v16069_v59  ;;  %v4918_v38 = vcombine.low %v16323_v46, %v16333_v45 }
 0x41f   : > { %v16351_v52 = vrot.slane %v13212_v22, %v16069_v59  ;;  %v3679_v22 = vpop.permute.xlu0 %3678  ;;  %v21062_v21 = vcombine.high %v16148_v60, %v16151_v36  ;;  %v4952_v15 = vcombine.low %v4927_v28, %v4935_v34  ;;  %v3752_v30 = vpack.i.b16 %v3647_v17, %v15960_v63 }
 0x420   : > { %v16358_v54 = vrot.slane %v4322_v32, %v16073_v19  ;;  %v16361_v37 = vrot.slane %v4323_v23, %v16073_v19  ;;  %v3762_v32 = vshrl.u32 %v3663_v53, 16  ;;  %v3755_v5 = vshrl.u32 %v3647_v17, 16 }
 0x421   : > { %v4951_v18 = vrot.slane %v21062_v21, %v16069_v59  ;;  %v16379_v4 = vrot.slane %v4952_v15, %v16073_v19  ;;  %v5673_v20 = vshrl.u32 %v4918_v38, 16  ;;  %v3760_v47 = vpack.i.b16 %v3679_v22, %v3663_v53 }
 0x422   : > { %v21064_v60 = vshrl.u32 %v15960_v63, 16  ;;  %v4342_v28 = vcombine.high %v3752_v30, %v16066_v48  ;;  %v4349_v34 = vrot.slane %v3752_v30, %v16069_v59  ;;  %v3763_v21 = vshrl.u32 %v3679_v22, 16 }
 0x423   : > { %21063 = vst [vmem:[#allocation54_spill] sm:$0xff] %v16379_v4  ;;  %v4960_v24 = vcombine.low %v4943_v62, %v4951_v18  ;;  %v4357_v58 = vcombine.high %v3760_v47, %v16066_v48  ;;  %v4364_v17 = vrot.slane %v3760_v47, %v16069_v59  ;;  %v21065_v62 = vcombine.low %v16191_v29, %v16194_v6 }
 0x424   : > { %v3756_v36 = vpack.i.b16 %v3755_v5, %v21064_v60  ;;  %v4356_v63 = vrot.slane %v4342_v28, %v16069_v59  ;;  %v3764_v30 = vpack.i.b16 %v3763_v21, %v3762_v32  ;;  %v21066_v28 = vcombine.high %v16191_v29, %v16194_v6 }
 0x425   : > { %v16386_v23 = vrot.slane %v4960_v24, %v16073_v19  ;;  %v4993_v53 = vrot.slane %v21065_v62, %v16069_v59  ;;  %v4371_v22 = vrot.slane %v4357_v58, %v16069_v59  ;;  %v4372_v15 = vcombine.low %v4349_v34, %v4364_v17 }
 0x426   : > { %v4408_v5 = vcombine.high %v3756_v36, %v16066_v48  ;;  %v4415_v18 = vrot.slane %v3756_v36, %v16069_v59  ;;  %v4373_v60 = vcombine.high %v4349_v34, %v4364_v17  ;;  %v4423_v3 = vcombine.high %v3764_v30, %v16066_v48 }
 0x427   : > { %v4968_v24 = vcombine.low %v16379_v4, %v16386_v23  ;;  %v4430_v62 = vrot.slane %v3764_v30, %v16069_v59  ;;  %v5001_v50 = vrot.slane %v21066_v28, %v16069_v59  ;;  %v4380_v21 = vrot.slane %v4372_v15, %v16073_v19 }
 0x428   : > { %v4422_v47 = vrot.slane %v4408_v5, %v16069_v59  ;;  %v4387_v40 = vrot.slane %v4373_v60, %v16073_v19  ;;  %v4388_v58 = vcombine.low %v4356_v63, %v4371_v22  ;;  %v4389_v25 = vcombine.high %v4356_v63, %v4371_v22  ;;  %v3649_v5 = vpop.permute.xlu1 %3648 }
 0x429   : > { %v5672_v36 = vpack.i.b16 %v4968_v24, %v4918_v38  ;;  %v5674_v32 = vshrl.u32 %v4968_v24, 16  ;;  %v4437_v34 = vrot.slane %v4423_v3, %v16069_v59  ;;  %v4438_v17 = vcombine.low %v4415_v18, %v4430_v62 }
 0x42a   : > { %v4439_v4 = vcombine.high %v4415_v18, %v4430_v62  ;;  %v5270_v29 = vcombine.low %v4380_v21, %v4387_v40  ;;  %v16413_v6 = vrot.slane %v4388_v58, %v16073_v19  ;;  %v16416_v38 = vrot.slane %v4389_v25, %v16073_v19 }
 0x42b   : > { %13943 = vmatprep.subr.msk.bf16.mxu0 %vm7942_vm0, %v5672_v36  ;;  %v7968_v30 = vsel %vm7942_vm0, %v5672_v36, 0  ;;  %v5675_v11 = vpack.i.b16 %v5674_v32, %v5673_v20  ;;  %v16419_v63 = vrot.slane %v4438_v17, %v16073_v19  ;;  %v4454_v3 = vcombine.low %v4422_v47, %v4437_v34  ;;  %v3665_v17 = vpop.permute.xlu0 %3664 }
 0x42c   : > { %13640 = vmatpush3.bf16.xpose.msra.mxu0 %v7968_v30  ;;  %v16424_v22 = vrot.slane %v4439_v4, %v16073_v19  ;;  %v4455_v20 = vcombine.high %v4422_v47, %v4437_v34  ;;  %v16427_v18 = vrot.slane %v5270_v29, %v16069_v59  ;;  %v13216_v25 = vcombine.high %v4380_v21, %v4387_v40  ;;  %v3681_v30 = vpop.permute.xlu1 %3680 }
 0x42d   : > { %13951 = vmatprep.subr.msk.bf16.mxu1 %vm7942_vm0, %v5675_v11  ;;  %v8113_v24 = vsel %vm7942_vm0, %v5675_v11, 0  ;;  %v16430_v15 = vrot.slane %v4454_v3, %v16073_v19  ;;  %v5002_v28 = vcombine.low %v16207_v49, %v16210_v41  ;;  %v5010_v36 = vcombine.low %v4993_v53, %v5001_v50 }
 0x42e   : > { %13672 = vmatpush3.bf16.xpose.msra.mxu1 %v8113_v24  ;;  %v16437_v11 = vrot.slane %v4455_v20, %v16073_v19  ;;  %v16446_v40 = vrot.slane %v13216_v25, %v16069_v59  ;;  %v21067_v32 = vcombine.low %v16199_v14, %v16202_v31  ;;  %v21068_v58 = vcombine.high %v16199_v14, %v16202_v31 }
 0x42f   : > { %v16461_v50 = vrot.slane %v5002_v28, %v16073_v19  ;;  %v21069_v41 = vcombine.low %v16217_v39, %v16220_v13  ;;  %v16468_v3 = vrot.slane %v5010_v36, %v16073_v19  ;;  %v21070_v14 = vcombine.high %v16217_v39, %v16220_v13 }
 0x430   : > { %v5027_v21 = vrot.slane %v21067_v32, %v16069_v59  ;;  %v5035_v34 = vrot.slane %v21068_v58, %v16069_v59  ;;  %v3768_v20 = vpack.i.b16 %v3649_v5, %v15974_v12  ;;  %v3771_v25 = vshrl.u32 %v3649_v5, 16 }
 0x431   : > { %v5043_v53 = vrot.slane %v21069_v41, %v16069_v59  ;;  %v5051_v31 = vrot.slane %v21070_v14, %v16069_v59  ;;  %v3778_v32 = vshrl.u32 %v3665_v17, 16  ;;  %v3776_v28 = vpack.i.b16 %v3681_v30, %v3665_v17 }
 0x432   : > { %v5052_v24 = vcombine.low %v5027_v21, %v5035_v34  ;;  %v3779_v58 = vshrl.u32 %v3681_v30, 16  ;;  %v5018_v49 = vcombine.low %v16461_v50, %v16468_v3  ;;  %v4474_v29 = vcombine.high %v3768_v20, %v16066_v48 }
 0x433   : > { %v5060_v36 = vcombine.low %v5043_v53, %v5051_v31  ;;  %v21072_v47 = vshrl.u32 %v15974_v12, 16  ;;  %v4481_v13 = vrot.slane %v3768_v20, %v16069_v59  ;;  %v4489_v5 = vcombine.high %v3776_v28, %v16066_v48 }
 0x434   : > { %v16478_v41 = vrot.slane %v5052_v24, %v16073_v19  ;;  %v3780_v21 = vpack.i.b16 %v3779_v58, %v3778_v32  ;;  %v5685_v17 = vshrl.u32 %v5018_v49, 16  ;;  %v4488_v30 = vrot.slane %v4474_v29, %v16069_v59 }
 0x435   : > { %v3772_v39 = vpack.i.b16 %v3771_v25, %v21072_v47  ;;  %v16486_v34 = vrot.slane %v5060_v36, %v16073_v19  ;;  %v4496_v14 = vrot.slane %v3776_v28, %v16069_v59  ;;  %v4503_v12 = vrot.slane %v4489_v5, %v16069_v59 }
 0x436   : > { %21071 = vst [vmem:[#allocation55_spill] sm:$0xff] %v16478_v41  ;;  %v4555_v47 = vcombine.high %v3780_v21, %v16066_v48  ;;  %v4562_v32 = vrot.slane %v3780_v21, %v16069_v59 }
 0x437   : > { %v4540_v53 = vcombine.high %v3772_v39, %v16066_v48  ;;  %v4547_v31 = vrot.slane %v3772_v39, %v16069_v59  ;;  %v5068_v24 = vcombine.low %v16478_v41, %v16486_v34  ;;  %v4504_v20 = vcombine.low %v4481_v13, %v4496_v14 }
 0x438   : > { %v4505_v25 = vcombine.high %v4481_v13, %v4496_v14  ;;  %v4520_v29 = vcombine.low %v4488_v30, %v4503_v12  ;;  %v4521_v36 = vcombine.high %v4488_v30, %v4503_v12  ;;  %v4569_v28 = vrot.slane %v4555_v47, %v16069_v59  ;;  %v3651_v14 = vpop.permute.xlu0 %3650 }
 0x439   : > { %v4554_v58 = vrot.slane %v4540_v53, %v16069_v59  ;;  %v5684_v4 = vpack.i.b16 %v5068_v24, %v5018_v49  ;;  %v5686_v62 = vshrl.u32 %v5068_v24, 16  ;;  %v4512_v39 = vrot.slane %v4504_v20, %v16073_v19 }
 0x43a   : > { %v4519_v5 = vrot.slane %v4505_v25, %v16073_v19  ;;  %v16502_v60 = vrot.slane %v4520_v29, %v16073_v19  ;;  %v16505_v41 = vrot.slane %v4521_v36, %v16073_v19  ;;  %v4570_v13 = vcombine.low %v4547_v31, %v4562_v32 }
 0x43b   : > { %v4571_v21 = vcombine.high %v4547_v31, %v4562_v32  ;;  %13944 = vmatprep.subr.msk.bf16.mxu0 %vm7942_vm0, %v5684_v4  ;;  %v7971_v30 = vsel %vm7942_vm0, %v5684_v4, 0  ;;  %v5687_v53 = vpack.i.b16 %v5686_v62, %v5685_v17  ;;  %v4586_v49 = vcombine.low %v4554_v58, %v4569_v28 }
 0x43c   : > { %v4587_v12 = vcombine.high %v4554_v58, %v4569_v28  ;;  %13642 = vmatpush3.bf16.xpose.msra.mxu0 %v7971_v30  ;;  %v16510_v47 = vrot.slane %v4570_v13, %v16073_v19  ;;  %v5370_v20 = vcombine.low %v4512_v39, %v4519_v5  ;;  %v13220_v25 = vcombine.high %v4512_v39, %v4519_v5  ;;  %v3667_v28 = vpop.permute.xlu1 %3666  ;;  %v3683_v5 = vpop.permute.xlu0 %3682 }
 0x43d   : > { %v16513_v24 = vrot.slane %v4571_v21, %v16073_v19  ;;  %13952 = vmatprep.subr.msk.bf16.mxu1 %vm7942_vm0, %v5687_v53  ;;  %v8116_v31 = vsel %vm7942_vm0, %v5687_v53, 0  ;;  %v16518_v32 = vrot.slane %v4586_v49, %v16073_v19  ;;  %v21073_v21 = vcombine.low %v16256_v2, %v16259_v10 }
 0x43e   : > { %v16521_v62 = vrot.slane %v4587_v12, %v16073_v19  ;;  %13674 = vmatpush3.bf16.xpose.msra.mxu1 %v8116_v31  ;;  %v16526_v17 = vrot.slane %v5370_v20, %v16069_v59  ;;  %v16529_v58 = vrot.slane %v13220_v25, %v16069_v59  ;;  %v21074_v53 = vcombine.high %v16256_v2, %v16259_v10 }
 0x43f   : > { %v5093_v30 = vrot.slane %v21073_v21, %v16069_v59  ;;  %v5102_v12 = vcombine.low %v16272_v8, %v16275_v57  ;;  %v21075_v20 = vcombine.low %v16248_v43, %v16251_v56  ;;  %v21076_v31 = vcombine.high %v16248_v43, %v16251_v56 }
 0x440   : > { %v5101_v49 = vrot.slane %v21074_v53, %v16069_v59  ;;  %v21077_v21 = vcombine.low %v16262_v0, %v16265_v9  ;;  %v21078_v10 = vcombine.high %v16262_v0, %v16265_v9  ;;  %v3794_v57 = vshrl.u32 %v3667_v28, 16 }
 0x441   : > { %v5127_v25 = vrot.slane %v21075_v20, %v16069_v59  ;;  %v5135_v13 = vrot.slane %v21076_v31, %v16069_v59  ;;  %v3784_v53 = vpack.i.b16 %v3651_v14, %v15988_v26  ;;  %v16569_v20 = vrot.slane %v5102_v12, %v16073_v19 }
 0x442   : > { %v5143_v2 = vrot.slane %v21077_v21, %v16069_v59  ;;  %v5151_v8 = vrot.slane %v21078_v10, %v16069_v59  ;;  %v5110_v39 = vcombine.low %v5093_v30, %v5101_v49  ;;  %v3787_v56 = vshrl.u32 %v3651_v14, 16 }
 0x443   : > { %21079 = vst [vmem:[#allocation56_spill] sm:$0xff] %v16569_v20  ;;  %v5152_v43 = vcombine.low %v5127_v25, %v5135_v13  ;;  %v4606_v36 = vcombine.high %v3784_v53, %v16066_v48  ;;  %v4613_v29 = vrot.slane %v3784_v53, %v16069_v59  ;;  %v3792_v21 = vpack.i.b16 %v3683_v5, %v3667_v28 }
 0x444   : > { %v5160_v31 = vcombine.low %v5143_v2, %v5151_v8  ;;  %v16574_v4 = vrot.slane %v5110_v39, %v16073_v19  ;;  %v21082_v9 = vshrl.u32 %v15988_v26, 16  ;;  %v3795_v12 = vshrl.u32 %v3683_v5, 16 }
 0x445   : > { %v16577_v0 = vrot.slane %v5152_v43, %v16073_v19  ;;  %v4620_v14 = vrot.slane %v4606_v36, %v16069_v59  ;;  %v4621_v13 = vcombine.high %v3792_v21, %v16066_v48  ;;  %v4628_v49 = vrot.slane %v3792_v21, %v16069_v59 }
 0x446   : > { %21080 = vst [vmem:[#allocation57_spill] sm:$0xff] %v16574_v4  ;;  %v3788_v10 = vpack.i.b16 %v3787_v56, %v21082_v9  ;;  %v16582_v30 = vrot.slane %v5160_v31, %v16073_v19  ;;  %v5118_v28 = vcombine.low %v16569_v20, %v16574_v4  ;;  %v3796_v2 = vpack.i.b16 %v3795_v12, %v3794_v57 }
 0x447   : > { %21081 = vst [vmem:[#allocation58_spill] sm:$0xff] %v16577_v0  ;;  %v4635_v5 = vrot.slane %v4621_v13, %v16069_v59  ;;  %v4636_v8 = vcombine.low %v4613_v29, %v4628_v49  ;;  %v4637_v53 = vcombine.high %v4613_v29, %v4628_v49 }
 0x448   : > { %21083 = vst [vmem:[#allocation59_spill] sm:$0xff] %v16582_v30  ;;  %v4672_v39 = vcombine.high %v3788_v10, %v16066_v48  ;;  %v4679_v25 = vrot.slane %v3788_v10, %v16069_v59  ;;  %v5168_v26 = vcombine.low %v16577_v0, %v16582_v30  ;;  %v5697_v36 = vshrl.u32 %v5118_v28, 16  ;;  %v3653_v30 = vpop.permute.xlu1 %3652 }
 0x449   : > { %v4687_v56 = vcombine.high %v3796_v2, %v16066_v48  ;;  %v4694_v31 = vrot.slane %v3796_v2, %v16069_v59  ;;  %v4644_v20 = vrot.slane %v4636_v8, %v16073_v19  ;;  %v4651_v57 = vrot.slane %v4637_v53, %v16073_v19 }
 0x44a   : > { %v4686_v43 = vrot.slane %v4672_v39, %v16069_v59  ;;  %v5696_v21 = vpack.i.b16 %v5168_v26, %v5118_v28  ;;  %v5698_v9 = vshrl.u32 %v5168_v26, 16  ;;  %v4652_v10 = vcombine.low %v4620_v14, %v4635_v5 }
 0x44b   : > { %v4653_v12 = vcombine.high %v4620_v14, %v4635_v5  ;;  %v4701_v0 = vrot.slane %v4687_v56, %v16069_v59  ;;  %v4702_v13 = vcombine.low %v4679_v25, %v4694_v31  ;;  %v4703_v39 = vcombine.high %v4679_v25, %v4694_v31 }
 0x44c   : > { %13945 = vmatprep.subr.msk.bf16.mxu0 %vm7942_vm0, %v5696_v21  ;;  %v7974_v29 = vsel %vm7942_vm0, %v5696_v21, 0  ;;  %v5699_v49 = vpack.i.b16 %v5698_v9, %v5697_v36  ;;  %v5470_v4 = vcombine.low %v4644_v20, %v4651_v57  ;;  %v16603_v28 = vrot.slane %v4652_v10, %v16073_v19 }
 0x44d   : > { %13644 = vmatpush3.bf16.xpose.msra.mxu0 %v7974_v29  ;;  %v16606_v2 = vrot.slane %v4653_v12, %v16073_v19  ;;  %v16609_v14 = vrot.slane %v4702_v13, %v16073_v19  ;;  %v4718_v26 = vcombine.low %v4686_v43, %v4701_v0  ;;  %v16614_v8 = vrot.slane %v4703_v39, %v16073_v19  ;;  %v3669_v39 = vpop.permute.xlu0 %3668 }
 0x44e   : > { %13953 = vmatprep.subr.msk.bf16.mxu1 %vm7942_vm0, %v5699_v49  ;;  %v8119_v5 = vsel %vm7942_vm0, %v5699_v49, 0  ;;  %v4719_v25 = vcombine.high %v4686_v43, %v4701_v0  ;;  %v16617_v53 = vrot.slane %v5470_v4, %v16069_v59  ;;  %v13224_v56 = vcombine.high %v4644_v20, %v4651_v57 }
 0x44f   : > { %13676 = vmatpush3.bf16.xpose.msra.mxu1 %v8119_v5  ;;  %v16620_v36 = vrot.slane %v4718_v26, %v16073_v19  ;;  %v21084_v43 = vcombine.low %v16336_v7, %v16339_v44  ;;  %v21085_v10 = vcombine.high %v16336_v7, %v16339_v44  ;;  %v5202_v13 = vcombine.low %v16348_v16, %v16351_v52  ;;  %v3685_v26 = vpop.permute.xlu1 %3684 }
 0x450   : > { %v16627_v9 = vrot.slane %v4719_v25, %v16073_v19  ;;  %v16638_v57 = vrot.slane %v13224_v56, %v16069_v59  ;;  %v21086_v29 = vcombine.low %v16342_v27, %v16345_v51  ;;  %v21087_v7 = vcombine.high %v16342_v27, %v16345_v51 }
 0x451   : > { %v5193_v20 = vrot.slane %v21084_v43, %v16069_v59  ;;  %v5201_v12 = vrot.slane %v21085_v10, %v16069_v59  ;;  %v21088_v16 = vcombine.low %v16358_v54, %v16361_v37  ;;  %v16663_v56 = vrot.slane %v5202_v13, %v16073_v19 }
 0x452   : > { %v5227_v49 = vrot.slane %v21086_v29, %v16069_v59  ;;  %v5235_v44 = vrot.slane %v21087_v7, %v16069_v59  ;;  %v21090_v10 = vcombine.high %v16358_v54, %v16361_v37  ;;  %v3800_v25 = vpack.i.b16 %v3653_v30, %v16002_v1 }
 0x453   : > { %v5243_v52 = vrot.slane %v21088_v16, %v16069_v59  ;;  %21089 = vst [vmem:[#allocation60_spill] sm:$0xff] %v16663_v56  ;;  %v5210_v43 = vcombine.low %v5193_v20, %v5201_v12  ;;  %v3803_v4 = vshrl.u32 %v3653_v30, 16  ;;  %v3810_v27 = vshrl.u32 %v3669_v39, 16 }
 0x454   : > { %v5251_v29 = vrot.slane %v21090_v10, %v16069_v59  ;;  %v5252_v5 = vcombine.low %v5227_v49, %v5235_v44  ;;  %v3808_v51 = vpack.i.b16 %v3685_v26, %v3669_v39  ;;  %v4738_v16 = vcombine.high %v3800_v25, %v16066_v48 }
 0x455   : > { %v16671_v7 = vrot.slane %v5210_v43, %v16073_v19  ;;  %v4745_v13 = vrot.slane %v3800_v25, %v16069_v59  ;;  %v21093_v54 = vshrl.u32 %v16002_v1, 16  ;;  %v3811_v12 = vshrl.u32 %v3685_v26, 16 }
 0x456   : > { %v5260_v0 = vcombine.low %v5243_v52, %v5251_v29  ;;  %v16676_v20 = vrot.slane %v5252_v5, %v16073_v19  ;;  %v4753_v49 = vcombine.high %v3808_v51, %v16066_v48  ;;  %v4752_v44 = vrot.slane %v4738_v16, %v16069_v59 }
 0x457   : > { %21091 = vst [vmem:[#allocation61_spill] sm:$0xff] %v16671_v7  ;;  %v3804_v37 = vpack.i.b16 %v3803_v4, %v21093_v54  ;;  %v5218_v30 = vcombine.low %v16663_v56, %v16671_v7  ;;  %v4760_v52 = vrot.slane %v3808_v51, %v16069_v59  ;;  %v3812_v43 = vpack.i.b16 %v3811_v12, %v3810_v27 }
 0x458   : > { %21092 = vst [vmem:[#allocation62_spill] sm:$0xff] %v16676_v20  ;;  %v16684_v39 = vrot.slane %v5260_v0, %v16073_v19  ;;  %v4767_v1 = vrot.slane %v4753_v49, %v16069_v59 }
 0x459   : > { %v4804_v25 = vcombine.high %v3804_v37, %v16066_v48  ;;  %v4811_v5 = vrot.slane %v3804_v37, %v16069_v59  ;;  %v5709_v26 = vshrl.u32 %v5218_v30, 16  ;;  %v4768_v10 = vcombine.low %v4745_v13, %v4760_v52 }
 0x45a   : > { %21094 = vst [vmem:[#allocation63_spill] sm:$0xff] %v16684_v39  ;;  %v5268_v4 = vcombine.low %v16676_v20, %v16684_v39  ;;  %v4769_v29 = vcombine.high %v4745_v13, %v4760_v52  ;;  %v4784_v54 = vcombine.low %v4752_v44, %v4767_v1  ;;  %v4785_v21 = vcombine.high %v4752_v44, %v4767_v1 }
 0x45b   : > { %v4818_v0 = vrot.slane %v4804_v25, %v16069_v59  ;;  %v4819_v16 = vcombine.high %v3812_v43, %v16066_v48  ;;  %v4776_v56 = vrot.slane %v4768_v10, %v16073_v19  ;;  %v4826_v13 = vrot.slane %v3812_v43, %v16069_v59 }
 0x45c   : > { %v5708_v51 = vpack.i.b16 %v5268_v4, %v5218_v30  ;;  %v5710_v31 = vshrl.u32 %v5268_v4, 16  ;;  %v4783_v27 = vrot.slane %v4769_v29, %v16073_v19  ;;  %v16698_v37 = vrot.slane %v4784_v54, %v16073_v19  ;;  %v1489_v54 = vpop.permute.xlu0 %1488 }
 0x45d   : > { %v16701_v12 = vrot.slane %v4785_v21, %v16073_v19  ;;  %v4833_v49 = vrot.slane %v4819_v16, %v16069_v59  ;;  %v4834_v1 = vcombine.low %v4811_v5, %v4826_v13  ;;  %v4835_v4 = vcombine.high %v4811_v5, %v4826_v13 }
 0x45e   : > { %13946 = vmatprep.subr.msk.bf16.mxu0 %vm7942_vm0, %v5708_v51  ;;  %v7977_v44 = vsel %vm7942_vm0, %v5708_v51, 0  ;;  %v5711_v30 = vpack.i.b16 %v5710_v31, %v5709_v26  ;;  %v5570_v52 = vcombine.low %v4776_v56, %v4783_v27  ;;  %v13228_v25 = vcombine.high %v4776_v56, %v4783_v27  ;;  %v1505_v56 = vpop.permute.xlu1 %1504 }
 0x45f   : > { %13646 = vmatpush3.bf16.xpose.msra.mxu0 %v7977_v44  ;;  %v4850_v10 = vcombine.low %v4818_v0, %v4833_v49  ;;  %v4851_v29 = vcombine.high %v4818_v0, %v4833_v49  ;;  %v16718_v5 = vrot.slane %v4834_v1, %v16073_v19  ;;  %v16721_v26 = vrot.slane %v4835_v4, %v16073_v19 }
 0x460   : > { %13954 = vmatprep.subr.msk.bf16.mxu1 %vm7942_vm0, %v5711_v30  ;;  %v8122_v21 = vsel %vm7942_vm0, %v5711_v30, 0  ;;  %v16710_v43 = vrot.slane %v5570_v52, %v16069_v59  ;;  %v16713_v16 = vrot.slane %v13228_v25, %v16069_v59  ;;  %v1538_v13 = vpack.i.b16 %v1489_v54, %v15870_v35 }
 0x461   : > { %13678 = vmatpush3.bf16.xpose.msra.mxu1 %v8122_v21  ;;  %v16724_v0 = vrot.slane %v4850_v10, %v16073_v19  ;;  %v16727_v51 = vrot.slane %v4851_v29, %v16073_v19  ;;  %v1541_v49 = vshrl.u32 %v1489_v54, 16  ;;  %v21095_v44 = vcombine.low %v16413_v6, %v16416_v38 }
 0x462   : > { %v21096_v10 = vshrl.u32 %v15870_v35, 16  ;;  %v1670_v54 = vcombine.high %v1538_v13, %v16066_v48  ;;  %v1677_v21 = vrot.slane %v1538_v13, %v16069_v59  ;;  %v5302_v25 = vcombine.low %v16427_v18, %v16446_v40  ;;  %v1491_v27 = vpop.permute.xlu1 %1490 }
 0x463   : > { %v5293_v30 = vrot.slane %v21095_v44, %v16069_v59  ;;  %v21097_v44 = vcombine.high %v16413_v6, %v16416_v38  ;;  %v21098_v1 = vcombine.low %v16419_v63, %v16424_v22  ;;  %v21099_v35 = vcombine.high %v16419_v63, %v16424_v22  ;;  %v1521_v6 = vpop.permute.xlu0 %1520 }
 0x464   : > { %v1542_v29 = vpack.i.b16 %v1541_v49, %v21096_v10  ;;  %v21100_v13 = vcombine.low %v16430_v15, %v16437_v11  ;;  %v1684_v38 = vrot.slane %v1670_v54, %v16069_v59  ;;  %v21102_v63 = vcombine.high %v16430_v15, %v16437_v11 }
 0x465   : > { %v5301_v52 = vrot.slane %v21097_v44, %v16069_v59  ;;  %v5327_v4 = vrot.slane %v21098_v1, %v16069_v59  ;;  %v5335_v49 = vrot.slane %v21099_v35, %v16069_v59  ;;  %v16770_v1 = vrot.slane %v5302_v25, %v16073_v19 }
 0x466   : > { %v5343_v10 = vrot.slane %v21100_v13, %v16069_v59  ;;  %v1736_v18 = vcombine.high %v1542_v29, %v16066_v48  ;;  %v1743_v40 = vrot.slane %v1542_v29, %v16069_v59  ;;  %v5351_v22 = vrot.slane %v21102_v63, %v16069_v59 }
 0x467   : > { %v5310_v44 = vcombine.low %v5293_v30, %v5301_v52  ;;  %21101 = vst [vmem:[#allocation64_spill] sm:$0xff] %v16770_v1  ;;  %v5352_v35 = vcombine.low %v5327_v4, %v5335_v49  ;;  %v1548_v31 = vshrl.u32 %v1505_v56, 16  ;;  %v1546_v20 = vpack.i.b16 %v1521_v6, %v1505_v56 }
 0x468   : > { %v1750_v13 = vrot.slane %v1736_v18, %v16069_v59  ;;  %v1549_v39 = vshrl.u32 %v1521_v6, 16  ;;  %v5360_v52 = vcombine.low %v5343_v10, %v5351_v22  ;;  %v1560_v25 = vpack.i.b16 %v1491_v27, %v15892_v55 }
 0x469   : > { %v16778_v54 = vrot.slane %v5310_v44, %v16073_v19  ;;  %v16781_v30 = vrot.slane %v5352_v35, %v16073_v19  ;;  %v1563_v29 = vshrl.u32 %v1491_v27, 16  ;;  %v1685_v4 = vcombine.high %v1546_v20, %v16066_v48 }
 0x46a   : > { %v1550_v11 = vpack.i.b16 %v1549_v39, %v1548_v31  ;;  %v1692_v49 = vrot.slane %v1546_v20, %v16069_v59  ;;  %v16789_v18 = vrot.slane %v5360_v52, %v16073_v19  ;;  %v21106_v56 = vshrl.u32 %v15892_v55, 16 }
 0x46b   : > { %21103 = vst [vmem:[#allocation65_spill] sm:$0xff] %v16778_v54  ;;  %21104 = vst [vmem:[#allocation66_spill] sm:$0xff] %v16781_v30  ;;  %v5318_v15 = vcombine.low %v16770_v1, %v16778_v54  ;;  %v1802_v44 = vcombine.high %v1560_v25, %v16066_v48  ;;  %v16795_v10 = vrot.slane %v1560_v25, %v16069_v59  ;;  %v1507_v54 = vpop.permute.xlu0 %1506 }
 0x46c   : > { %21105 = vst [vmem:[#allocation67_spill] sm:$0xff] %v16789_v18  ;;  %v1564_v6 = vpack.i.b16 %v1563_v29, %v21106_v56  ;;  %v1699_v63 = vrot.slane %v1685_v4, %v16069_v59  ;;  %v1700_v22 = vcombine.low %v1677_v21, %v1692_v49  ;;  %v1701_v39 = vcombine.high %v1677_v21, %v1692_v49 }
 0x46d   : > { %v5721_v27 = vshrl.u32 %v5318_v15, 16  ;;  %v5368_v31 = vcombine.low %v16781_v30, %v16789_v18  ;;  %v1751_v20 = vcombine.high %v1550_v11, %v16066_v48  ;;  %v1758_v35 = vrot.slane %v1550_v11, %v16069_v59 }
 0x46e   : > { %v16803_v55 = vrot.slane %v1802_v44, %v16069_v59  ;;  %v1708_v52 = vrot.slane %v1700_v22, %v16073_v19  ;;  %v1715_v25 = vrot.slane %v1701_v39, %v16073_v19  ;;  %v1716_v29 = vcombine.low %v1684_v38, %v1699_v63 }
 0x46f   : > { %v1717_v56 = vcombine.high %v1684_v38, %v1699_v63  ;;  %v5720_v1 = vpack.i.b16 %v5368_v31, %v5318_v15  ;;  %v5722_v4 = vshrl.u32 %v5368_v31, 16  ;;  %v1765_v21 = vrot.slane %v1751_v20, %v16069_v59 }
 0x470   : > { %v1766_v49 = vcombine.low %v1743_v40, %v1758_v35  ;;  %v16809_v30 = vrot.slane %v1716_v29, %v16073_v19  ;;  %v1767_v11 = vcombine.high %v1743_v40, %v1758_v35  ;;  %v2726_v44 = vcombine.low %v1708_v52, %v1715_v25 }
 0x471   : > { %v16812_v18 = vrot.slane %v1717_v56, %v16073_v19  ;;  %13947 = vmatprep.subr.msk.bf16.mxu0 %vm7942_vm0, %v5720_v1  ;;  %v7980_v22 = vsel %vm7942_vm0, %v5720_v1, 0  ;;  %v5723_v39 = vpack.i.b16 %v5722_v4, %v5721_v27  ;;  %v1782_v15 = vcombine.low %v1750_v13, %v1765_v21 }
 0x472   : > { %v16817_v38 = vrot.slane %v1766_v49, %v16073_v19  ;;  %13648 = vmatpush3.bf16.xpose.msra.mxu0 %v7980_v22  ;;  %v16820_v63 = vrot.slane %v1767_v11, %v16073_v19  ;;  %v1783_v31 = vcombine.high %v1750_v13, %v1765_v21  ;;  %v16823_v20 = vrot.slane %v2726_v44, %v16069_v59  ;;  %v1523_v22 = vpop.permute.xlu1 %1522 }
 0x473   : > { %v13168_v40 = vcombine.high %v1708_v52, %v1715_v25  ;;  %13955 = vmatprep.subr.msk.bf16.mxu1 %vm7942_vm0, %v5723_v39  ;;  %v8125_v35 = vsel %vm7942_vm0, %v5723_v39, 0  ;;  %v16828_v1 = vrot.slane %v1782_v15, %v16073_v19  ;;  %v1868_v4 = vcombine.high %v1564_v6, %v16066_v48 }
 0x474   : > { %13680 = vmatpush3.bf16.xpose.msra.mxu1 %v8125_v35  ;;  %v16835_v13 = vrot.slane %v1783_v31, %v16073_v19  ;;  %v1875_v21 = vrot.slane %v1564_v6, %v16069_v59  ;;  %v1570_v49 = vshrl.u32 %v1507_v54, 16  ;;  %v21107_v11 = vcombine.low %v16502_v60, %v16505_v41  ;;  %v1493_v35 = vpop.permute.xlu0 %1492 }
 0x475   : > { %v16838_v56 = vrot.slane %v13168_v40, %v16069_v59  ;;  %v21108_v31 = vcombine.high %v16502_v60, %v16505_v41  ;;  %v5402_v6 = vcombine.low %v16526_v17, %v16529_v58  ;;  %v1882_v25 = vrot.slane %v1868_v4, %v16069_v59 }
 0x476   : > { %v5393_v44 = vrot.slane %v21107_v11, %v16069_v59  ;;  %v21109_v11 = vcombine.low %v16510_v47, %v16513_v24  ;;  %v21110_v15 = vcombine.high %v16510_v47, %v16513_v24  ;;  %v21111_v60 = vcombine.low %v16518_v32, %v16521_v62 }
 0x477   : > { %v5401_v40 = vrot.slane %v21108_v31, %v16069_v59  ;;  %v16874_v17 = vrot.slane %v5402_v6, %v16073_v19  ;;  %v21113_v4 = vcombine.high %v16518_v32, %v16521_v62  ;;  %v1571_v27 = vshrl.u32 %v1523_v22, 16 }
 0x478   : > { %v5427_v52 = vrot.slane %v21109_v11, %v16069_v59  ;;  %v5435_v39 = vrot.slane %v21110_v15, %v16069_v59  ;;  %v5443_v41 = vrot.slane %v21111_v60, %v16069_v59  ;;  %v1568_v11 = vpack.i.b16 %v1523_v22, %v1507_v54 }
 0x479   : > { %21112 = vst [vmem:[#allocation68_spill] sm:$0xff] %v16874_v17  ;;  %v5410_v58 = vcombine.low %v5393_v44, %v5401_v40  ;;  %v5451_v31 = vrot.slane %v21113_v4, %v16069_v59  ;;  %v16881_v47 = vpack.i.b16 %v1493_v35, %v15914_v33  ;;  %v1579_v24 = vshrl.u32 %v1493_v35, 16 }
 0x47a   : > { %v5452_v29 = vcombine.low %v5427_v52, %v5435_v39  ;;  %v1817_v6 = vcombine.high %v1568_v11, %v16066_v48  ;;  %v1824_v44 = vrot.slane %v1568_v11, %v16069_v59  ;;  %v1572_v32 = vpack.i.b16 %v1571_v27, %v1570_v49 }
 0x47b   : > { %v16884_v15 = vrot.slane %v5410_v58, %v16073_v19  ;;  %v5460_v60 = vcombine.low %v5443_v41, %v5451_v31  ;;  %v21116_v62 = vshrl.u32 %v15914_v33, 16  ;;  %v1934_v52 = vcombine.high %v16881_v47, %v16066_v48 }
 0x47c   : > { %v16889_v40 = vrot.slane %v5452_v29, %v16073_v19  ;;  %v1831_v35 = vrot.slane %v1817_v6, %v16069_v59  ;;  %v1832_v41 = vcombine.low %v16795_v10, %v1824_v44  ;;  %v1833_v29 = vcombine.high %v16795_v10, %v1824_v44 }
 0x47d   : > { %21114 = vst [vmem:[#allocation69_spill] sm:$0xff] %v16884_v15  ;;  %v16893_v54 = vpack.i.b16 %v1579_v24, %v21116_v62  ;;  %v5418_v22 = vcombine.low %v16874_v17, %v16884_v15  ;;  %v16900_v39 = vrot.slane %v5460_v60, %v16073_v19  ;;  %v1883_v27 = vcombine.high %v1572_v32, %v16066_v48 }
 0x47e   : > { %21115 = vst [vmem:[#allocation70_spill] sm:$0xff] %v16889_v40  ;;  %v1890_v33 = vrot.slane %v1572_v32, %v16069_v59  ;;  %v16909_v49 = vrot.slane %v16881_v47, %v16069_v59  ;;  %v1840_v31 = vrot.slane %v1832_v41, %v16073_v19  ;;  %v1848_v11 = vcombine.low %v16803_v55, %v1831_v35 }
 0x47f   : > { %21117 = vst [vmem:[#allocation71_spill] sm:$0xff] %v16900_v39  ;;  %v5468_v58 = vcombine.low %v16889_v40, %v16900_v39  ;;  %v5733_v4 = vshrl.u32 %v5418_v22, 16  ;;  %v1847_v24 = vrot.slane %v1833_v29, %v16073_v19  ;;  %v1849_v10 = vcombine.high %v16803_v55, %v1831_v35 }
 0x480   : > { %v1897_v60 = vrot.slane %v1883_v27, %v16069_v59  ;;  %v1898_v6 = vcombine.low %v1875_v21, %v1890_v33  ;;  %v1856_v47 = vrot.slane %v1848_v11, %v16073_v19  ;;  %v1899_v62 = vcombine.high %v1875_v21, %v1890_v33 }
 0x481   : > { %v5732_v44 = vpack.i.b16 %v5468_v58, %v5418_v22  ;;  %v5734_v32 = vshrl.u32 %v5468_v58, 16  ;;  %v1863_v17 = vrot.slane %v1849_v10, %v16073_v19  ;;  %v2826_v35 = vcombine.low %v1840_v31, %v1847_v24 }
 0x482   : > { %v1906_v40 = vrot.slane %v1898_v6, %v16073_v19  ;;  %v1914_v39 = vcombine.low %v1882_v25, %v1897_v60  ;;  %v1915_v41 = vcombine.high %v1882_v25, %v1897_v60  ;;  %v1913_v55 = vrot.slane %v1899_v62, %v16073_v19  ;;  %v1509_v62 = vpop.permute.xlu1 %1508 }
 0x483   : > { %13948 = vmatprep.subr.msk.bf16.mxu0 %vm7942_vm0, %v5732_v44  ;;  %v7983_v29 = vsel %vm7942_vm0, %v5732_v44, 0  ;;  %v5735_v15 = vpack.i.b16 %v5734_v32, %v5733_v4  ;;  %v13172_v21 = vcombine.high %v1840_v31, %v1847_v24  ;;  %v2842_v33 = vcombine.low %v1856_v47, %v1863_v17 }
 0x484   : > { %13650 = vmatpush3.bf16.xpose.msra.mxu0 %v7983_v29  ;;  %v1922_v22 = vrot.slane %v1914_v39, %v16073_v19  ;;  %v1929_v27 = vrot.slane %v1915_v41, %v16073_v19  ;;  %v2833_v58 = vrot.slane %v2826_v35, %v16069_v59  ;;  %v13173_v25 = vcombine.high %v1856_v47, %v1863_v17  ;;  %v1525_v41 = vpop.permute.xlu0 %1524 }
 0x485   : > { %13956 = vmatprep.subr.msk.bf16.mxu1 %vm7942_vm0, %v5735_v15  ;;  %v2876_v11 = vcombine.low %v1906_v40, %v1913_v55  ;;  %v13174_v10 = vcombine.high %v1906_v40, %v1913_v55  ;;  %v2841_v60 = vrot.slane %v13172_v21, %v16069_v59  ;;  %v2849_v4 = vrot.slane %v2842_v33, %v16069_v59 }
 0x486   : > { %v2892_v6 = vcombine.low %v1922_v22, %v1929_v27  ;;  %v13175_v44 = vcombine.high %v1922_v22, %v1929_v27  ;;  %v2857_v32 = vrot.slane %v13173_v25, %v16069_v59  ;;  %v8128_v24 = vsel %vm7942_vm0, %v5735_v15, 0 }
 0x487   : > { %v2883_v39 = vrot.slane %v2876_v11, %v16069_v59  ;;  %v2891_v31 = vrot.slane %v13174_v10, %v16069_v59  ;;  %v2858_v29 = vcombine.low %v2833_v58, %v2841_v60  ;;  %13682 = vmatpush3.bf16.xpose.msra.mxu1 %v8128_v24  ;;  %v1948_v47 = vrot.slane %v1934_v52, %v16069_v59 }
 0x488   : > { %v16935_v17 = vrot.slane %v2892_v6, %v16069_v59  ;;  %v16938_v40 = vrot.slane %v13175_v44, %v16069_v59  ;;  %v2866_v55 = vcombine.low %v2849_v4, %v2857_v32  ;;  %v2000_v22 = vcombine.high %v16893_v54, %v16066_v48 }
 0x489   : > { %v2908_v35 = vcombine.low %v2883_v39, %v2891_v31  ;;  %v2007_v15 = vrot.slane %v16893_v54, %v16069_v59  ;;  %v16946_v27 = vrot.slane %v2858_v29, %v16073_v19  ;;  %v1586_v33 = vshrl.u32 %v1509_v62, 16 }
 0x48a   : > { %v1584_v58 = vpack.i.b16 %v1525_v41, %v1509_v62  ;;  %v16951_v25 = vrot.slane %v2866_v55, %v16073_v19  ;;  %v2014_v11 = vrot.slane %v2000_v22, %v16069_v59  ;;  %v1587_v10 = vshrl.u32 %v1525_v41, 16 }
 0x48b   : > { %21118 = vst [vmem:[#allocation72_spill] sm:$0xff] %v16946_v27  ;;  %v16954_v52 = vrot.slane %v2908_v35, %v16073_v19  ;;  %v21121_v4 = vcombine.low %v16603_v28, %v16606_v2  ;;  %v21122_v44 = vcombine.high %v16603_v28, %v16606_v2  ;;  %v5502_v31 = vcombine.low %v16617_v53, %v16638_v57 }
 0x48c   : > { %21119 = vst [vmem:[#allocation73_spill] sm:$0xff] %v16951_v25  ;;  %v1949_v60 = vcombine.high %v1584_v58, %v16066_v48  ;;  %v1956_v54 = vrot.slane %v1584_v58, %v16069_v59  ;;  %v1588_v39 = vpack.i.b16 %v1587_v10, %v1586_v33  ;;  %v21123_v24 = vcombine.low %v16609_v14, %v16614_v8 }
 0x48d   : > { %21120 = vst [vmem:[#allocation74_spill] sm:$0xff] %v16954_v52  ;;  %v5493_v6 = vrot.slane %v21121_v4, %v16069_v59  ;;  %v5501_v32 = vrot.slane %v21122_v44, %v16069_v59  ;;  %v21124_v41 = vcombine.high %v16609_v14, %v16614_v8  ;;  %v16983_v57 = vrot.slane %v5502_v31, %v16073_v19 }
 0x48e   : > { %v5527_v62 = vrot.slane %v21123_v24, %v16069_v59  ;;  %v1963_v55 = vrot.slane %v1949_v60, %v16069_v59  ;;  %v1964_v35 = vcombine.low %v16909_v49, %v1956_v54  ;;  %v1965_v28 = vcombine.high %v16909_v49, %v1956_v54  ;;  %v1495_v49 = vpop.permute.xlu1 %1494 }
 0x48f   : > { %v5535_v29 = vrot.slane %v21124_v41, %v16069_v59  ;;  %v5510_v2 = vcombine.low %v5493_v6, %v5501_v32  ;;  %v2015_v22 = vcombine.high %v1588_v39, %v16066_v48  ;;  %v2022_v53 = vrot.slane %v1588_v39, %v16069_v59  ;;  %21125 = vst [vmem:[#allocation75_spill] sm:$0xff] %v16983_v57  ;;  %v1511_v32 = vpop.permute.xlu0 %1510 }
 0x490   : > { %v21126_v33 = vcombine.low %v16620_v36, %v16627_v9  ;;  %v1972_v8 = vrot.slane %v1964_v35, %v16073_v19  ;;  %v1979_v58 = vrot.slane %v1965_v28, %v16073_v19  ;;  %v1980_v10 = vcombine.low %v1948_v47, %v1963_v55 }
 0x491   : > { %v1981_v60 = vcombine.high %v1948_v47, %v1963_v55  ;;  %v2029_v54 = vrot.slane %v2015_v22, %v16069_v59  ;;  %v2030_v4 = vcombine.low %v2007_v15, %v2022_v53  ;;  %v2031_v6 = vcombine.high %v2007_v15, %v2022_v53 }
 0x492   : > { %v5543_v14 = vrot.slane %v21126_v33, %v16069_v59  ;;  %v16993_v44 = vrot.slane %v5510_v2, %v16073_v19  ;;  %v16996_v39 = vrot.slane %v1980_v10, %v16073_v19  ;;  %v2926_v24 = vcombine.low %v1972_v8, %v1979_v58 }
 0x493   : > { %v16999_v31 = vrot.slane %v1981_v60, %v16073_v19  ;;  %v13176_v41 = vcombine.high %v1972_v8, %v1979_v58  ;;  %v17002_v35 = vrot.slane %v2030_v4, %v16073_v19  ;;  %v17005_v47 = vrot.slane %v2031_v6, %v16073_v19 }
 0x494   : > { %21127 = vst [vmem:[#allocation76_spill] sm:$0xff] %v16993_v44  ;;  %v2046_v55 = vcombine.low %v2014_v11, %v2029_v54  ;;  %v2047_v15 = vcombine.high %v2014_v11, %v2029_v54  ;;  %v17008_v28 = vrot.slane %v2926_v24, %v16069_v59  ;;  %v5518_v10 = vcombine.low %v16983_v57, %v16993_v44  ;;  %v1527_v24 = vpop.permute.xlu1 %1526  ;;  %v1497_v11 = vpop.permute.xlu0 %1496 }
 0x495   : > { %v17011_v2 = vrot.slane %v13176_v41, %v16069_v59  ;;  %v21129_v60 = vcombine.high %v16620_v36, %v16627_v9  ;;  %v5552_v4 = vcombine.low %v5527_v62, %v5535_v29  ;;  %v1592_v6 = vpack.i.b16 %v1495_v49, %v15936_v42 }
 0x496   : > { %v17018_v33 = vrot.slane %v2046_v55, %v16073_v19  ;;  %v17021_v8 = vrot.slane %v2047_v15, %v16073_v19  ;;  %v1595_v15 = vshrl.u32 %v1495_v49, 16  ;;  %v1602_v58 = vshrl.u32 %v1511_v32, 16 }
 0x497   : > { %v5551_v54 = vrot.slane %v21129_v60, %v16069_v59  ;;  %v17039_v53 = vrot.slane %v5552_v4, %v16073_v19  ;;  %v5745_v21 = vshrl.u32 %v5518_v10, 16  ;;  %v2066_v36 = vcombine.high %v1592_v6, %v16066_v48 }
 0x498   : > { %21128 = vst [vmem:[#allocation77_spill] sm:$0xff] %v17021_v8  ;;  %v21131_v9 = vshrl.u32 %v15936_v42, 16  ;;  %v2073_v29 = vrot.slane %v1592_v6, %v16069_v59  ;;  %v1600_v60 = vpack.i.b16 %v1527_v24, %v1511_v32  ;;  %v1603_v41 = vshrl.u32 %v1527_v24, 16 }
 0x499   : > { %21130 = vst [vmem:[#allocation78_spill] sm:$0xff] %v17039_v53  ;;  %v5560_v22 = vcombine.low %v5543_v14, %v5551_v54  ;;  %v2080_v49 = vrot.slane %v2066_v36, %v16069_v59  ;;  %v1608_v55 = vpack.i.b16 %v1497_v11, %v15958_v61  ;;  %v1611_v4 = vshrl.u32 %v1497_v11, 16 }
 0x49a   : > { %v1596_v62 = vpack.i.b16 %v1595_v15, %v21131_v9  ;;  %v1604_v44 = vpack.i.b16 %v1603_v41, %v1602_v58  ;;  %v2081_v42 = vcombine.high %v1600_v60, %v16066_v48  ;;  %v2088_v32 = vrot.slane %v1600_v60, %v16069_v59 }
 0x49b   : > { %v17046_v57 = vrot.slane %v5560_v22, %v16073_v19  ;;  %v21133_v22 = vshrl.u32 %v15958_v61, 16  ;;  %v2198_v15 = vcombine.high %v1608_v55, %v16066_v48 }
 0x49c   : > { %v2132_v14 = vcombine.high %v1596_v62, %v16066_v48  ;;  %v2139_v54 = vrot.slane %v1596_v62, %v16069_v59  ;;  %v2095_v11 = vrot.slane %v2081_v42, %v16069_v59  ;;  %v2147_v9 = vcombine.high %v1604_v44, %v16066_v48 }
 0x49d   : > { %21132 = vst [vmem:[#allocation79_spill] sm:$0xff] %v17046_v57  ;;  %v5568_v6 = vcombine.low %v17039_v53, %v17046_v57  ;;  %v1612_v24 = vpack.i.b16 %v1611_v4, %v21133_v22  ;;  %v2154_v58 = vrot.slane %v1604_v44, %v16069_v59  ;;  %v2096_v7 = vcombine.low %v2073_v29, %v2088_v32 }
 0x49e   : > { %v2146_v36 = vrot.slane %v2132_v14, %v16069_v59  ;;  %v2097_v8 = vcombine.high %v2073_v29, %v2088_v32  ;;  %v2112_v53 = vcombine.low %v2080_v49, %v2095_v11  ;;  %v2113_v57 = vcombine.high %v2080_v49, %v2095_v11 }
 0x49f   : > { %v5744_v41 = vpack.i.b16 %v5568_v6, %v5518_v10  ;;  %v5746_v62 = vshrl.u32 %v5568_v6, 16  ;;  %v2161_v60 = vrot.slane %v2147_v9, %v16069_v59  ;;  %v2162_v61 = vcombine.low %v2139_v54, %v2154_v58 }
 0x4a0   : > { %v2104_v42 = vrot.slane %v2096_v7, %v16073_v19  ;;  %v2111_v22 = vrot.slane %v2097_v8, %v16073_v19  ;;  %v17069_v44 = vrot.slane %v2112_v53, %v16073_v19  ;;  %v17072_v10 = vrot.slane %v2113_v57, %v16073_v19 }
 0x4a1   : > { %13949 = vmatprep.subr.msk.bf16.mxu0 %vm7942_vm0, %v5744_v41  ;;  %v7986_v4 = vsel %vm7942_vm0, %v5744_v41, 0  ;;  %v5747_v14 = vpack.i.b16 %v5746_v62, %v5745_v21  ;;  %v2163_v29 = vcombine.high %v2139_v54, %v2154_v58  ;;  %v17075_v49 = vrot.slane %v2162_v61, %v16073_v19 }
 0x4a2   : > { %13652 = vmatpush3.bf16.xpose.msra.mxu0 %v7986_v4  ;;  %v2178_v21 = vcombine.low %v2146_v36, %v2161_v60  ;;  %v2179_v32 = vcombine.high %v2146_v36, %v2161_v60  ;;  %v3026_v7 = vcombine.low %v2104_v42, %v2111_v22  ;;  %v13180_v53 = vcombine.high %v2104_v42, %v2111_v22 }
 0x4a3   : > { %13957 = vmatprep.subr.msk.bf16.mxu1 %vm7942_vm0, %v5747_v14  ;;  %v8131_v6 = vsel %vm7942_vm0, %v5747_v14, 0  ;;  %v17080_v8 = vrot.slane %v2163_v29, %v16073_v19  ;;  %v2205_v58 = vrot.slane %v1608_v55, %v16069_v59  ;;  %v2212_v61 = vrot.slane %v2198_v15, %v16069_v59 }
 0x4a4   : > { %13684 = vmatpush3.bf16.xpose.msra.mxu1 %v8131_v6  ;;  %v17087_v11 = vrot.slane %v2178_v21, %v16073_v19  ;;  %v17090_v9 = vrot.slane %v2179_v32, %v16073_v19  ;;  %v17093_v36 = vrot.slane %v3026_v7, %v16069_v59  ;;  %v17097_v41 = vrot.slane %v13180_v53, %v16069_v59  ;;  %v1513_v53 = vpop.permute.xlu1 %1512 }
 0x4a5   : > { %v2264_v42 = vcombine.high %v1612_v24, %v16066_v48  ;;  %v2271_v55 = vrot.slane %v1612_v24, %v16069_v59  ;;  %v21134_v22 = vcombine.low %v16698_v37, %v16701_v12  ;;  %v21135_v6 = vcombine.high %v16698_v37, %v16701_v12  ;;  %v1529_v24 = vpop.permute.xlu0 %1528 }
 0x4a6   : > { %v5602_v21 = vcombine.low %v16710_v43, %v16713_v16  ;;  %v21136_v32 = vcombine.low %v16718_v5, %v16721_v26  ;;  %v21138_v37 = vcombine.low %v16724_v0, %v16727_v51  ;;  %v21139_v43 = vcombine.high %v16724_v0, %v16727_v51 }
 0x4a7   : > { %v5593_v29 = vrot.slane %v21134_v22, %v16069_v59  ;;  %v5601_v15 = vrot.slane %v21135_v6, %v16069_v59  ;;  %v17125_v14 = vrot.slane %v2264_v42, %v16069_v59  ;;  %v21137_v22 = vcombine.high %v16718_v5, %v16721_v26  ;;  %v21141_v5 = vld [vmem:[#allocation54_spill] sm:$0xff] }
 0x4a8   : > { %v5627_v7 = vrot.slane %v21136_v32, %v16069_v59  ;;  %v5643_v12 = vrot.slane %v21138_v37, %v16069_v59  ;;  %v5651_v16 = vrot.slane %v21139_v43, %v16069_v59  ;;  %v17140_v6 = vrot.slane %v5602_v21, %v16073_v19 }
 0x4a9   : > { %v5635_v4 = vrot.slane %v21137_v22, %v16069_v59  ;;  %v5610_v42 = vcombine.low %v5593_v29, %v5601_v15  ;;  %v17144_v32 = vcombine.high %v16323_v46, %v16333_v45  ;;  %v17148_v26 = vcombine.high %v21141_v5, %v16386_v23 }
 0x4aa   : > { %21140 = vst [vmem:[#allocation80_spill] sm:$0xff] %v17140_v6  ;;  %v5660_v60 = vcombine.low %v5643_v12, %v5651_v16  ;;  %v1618_v37 = vshrl.u32 %v1513_v53, 16  ;;  %v1616_v62 = vpack.i.b16 %v1529_v24, %v1513_v53  ;;  %v1619_v51 = vshrl.u32 %v1529_v24, 16 }
 0x4ab   : > { %v5652_v22 = vcombine.low %v5627_v7, %v5635_v4  ;;  %v17151_v54 = vrot.slane %v5610_v42, %v16073_v19  ;;  %v17155_v0 = vpack.i.b16 %v17148_v26, %v17144_v32  ;;  %v21143_v46 = vcombine.low %v16809_v30, %v16812_v18 }
 0x4ac   : > { %v17165_v4 = vrot.slane %v5660_v60, %v16073_v19  ;;  %v2213_v29 = vcombine.high %v1616_v62, %v16066_v48  ;;  %v2220_v15 = vrot.slane %v1616_v62, %v16069_v59  ;;  %v1620_v7 = vpack.i.b16 %v1619_v51, %v1618_v37 }
 0x4ad   : > { %21142 = vst [vmem:[#allocation54_spill] sm:$0xff] %v17151_v54  ;;  %v2749_v45 = vrot.slane %v21143_v46, %v16069_v59  ;;  %v17162_v23 = vrot.slane %v5652_v22, %v16073_v19  ;;  %v5618_v21 = vcombine.low %v17140_v6, %v17151_v54  ;;  %v21146_v53 = vcombine.high %v16809_v30, %v16812_v18 }
 0x4ae   : > { %21145 = vst [vmem:[#allocation82_spill] sm:$0xff] %v17165_v4  ;;  %v2758_v12 = vcombine.low %v16823_v20, %v16838_v56  ;;  %v2227_v43 = vrot.slane %v2213_v29, %v16069_v59  ;;  %v2228_v16 = vcombine.low %v2205_v58, %v2220_v15  ;;  %v2229_v42 = vcombine.high %v2205_v58, %v2220_v15 }
 0x4af   : > { %21144 = vst [vmem:[#allocation81_spill] sm:$0xff] %v17162_v23  ;;  %v2757_v24 = vrot.slane %v21146_v53, %v16069_v59  ;;  %v5668_v60 = vcombine.low %v17162_v23, %v17165_v4  ;;  %v5757_v62 = vshrl.u32 %v5618_v21, 16  ;;  %v2279_v5 = vcombine.high %v1620_v7, %v16066_v48 }
 0x4b0   : > { %v2286_v22 = vrot.slane %v1620_v7, %v16069_v59  ;;  %v17183_v37 = vrot.slane %v2758_v12, %v16073_v19  ;;  %v2236_v51 = vrot.slane %v2228_v16, %v16073_v19  ;;  %v2243_v20 = vrot.slane %v2229_v42, %v16073_v19 }
 0x4b1   : > { %v5756_v30 = vpack.i.b16 %v5668_v60, %v5618_v21  ;;  %v5758_v18 = vshrl.u32 %v5668_v60, 16  ;;  %v2244_v56 = vcombine.low %v2212_v61, %v2227_v43  ;;  %v2245_v46 = vcombine.high %v2212_v61, %v2227_v43  ;;  %v1499_v43 = vpop.permute.xlu1 %1498 }
 0x4b2   : > { %21147 = vst [vmem:[#allocation83_spill] sm:$0xff] %v17183_v37  ;;  %v2293_v29 = vrot.slane %v2279_v5, %v16069_v59  ;;  %v2294_v53 = vcombine.low %v2271_v55, %v2286_v22  ;;  %v2295_v7 = vcombine.high %v2271_v55, %v2286_v22  ;;  %v3126_v57 = vcombine.low %v2236_v51, %v2243_v20  ;;  %v1515_v5 = vpop.permute.xlu0 %1514 }
 0x4b3   : > { %13950 = vmatprep.subr.msk.bf16.mxu0 %vm7942_vm0, %v5756_v30  ;;  %v7989_v58 = vsel %vm7942_vm0, %v5756_v30, 0  ;;  %v5759_v15 = vpack.i.b16 %v5758_v18, %v5757_v62  ;;  %v17191_v21 = vrot.slane %v2244_v56, %v16073_v19  ;;  %v17194_v12 = vrot.slane %v2245_v46, %v16073_v19 }
 0x4b4   : > { %13654 = vmatpush3.bf16.xpose.msra.mxu0 %v7989_v58  ;;  %v17197_v60 = vrot.slane %v2294_v53, %v16073_v19  ;;  %v2310_v61 = vcombine.low %v17125_v14, %v2293_v29  ;;  %v17205_v16 = vrot.slane %v2295_v7, %v16073_v19  ;;  %v2311_v42 = vcombine.high %v17125_v14, %v2293_v29 }
 0x4b5   : > { %13958 = vmatprep.subr.msk.bf16.mxu1 %vm7942_vm0, %v5759_v15  ;;  %13959 = vmatprep.subr.msk.bf16.mxu0 %vm7942_vm0, %v17155_v0  ;;  %v8134_v55 = vsel %vm7942_vm0, %v5759_v15, 0  ;;  %v17209_v62 = vrot.slane %v3126_v57, %v16069_v59  ;;  %v13184_v30 = vcombine.high %v2236_v51, %v2243_v20  ;;  %v2766_v29 = vcombine.low %v2749_v45, %v2757_v24  ;;  %v1531_v57 = vpop.permute.xlu1 %1530 }
 0x4b6   : > { %13686 = vmatpush3.bf16.xpose.msra.mxu1 %v8134_v55  ;;  %v17212_v22 = vrot.slane %v2310_v61, %v16073_v19  ;;  %v17219_v46 = vrot.slane %v2311_v42, %v16073_v19  ;;  %v21148_v51 = vcombine.low %v16817_v38, %v16820_v63  ;;  %v21149_v58 = vcombine.high %v16817_v38, %v16820_v63  ;;  %v1501_v56 = vpop.permute.xlu0 %1500 }
 0x4b7   : > { %v17226_v53 = vrot.slane %v13184_v30, %v16069_v59  ;;  %v21150_v7 = vcombine.low %v16828_v1, %v16835_v13  ;;  %v17245_v55 = vrot.slane %v2766_v29, %v16073_v19  ;;  %v21152_v42 = vcombine.high %v16828_v1, %v16835_v13 }
 0x4b8   : > { %v2783_v20 = vrot.slane %v21148_v51, %v16069_v59  ;;  %v2791_v15 = vrot.slane %v21149_v58, %v16069_v59  ;;  %v5679_v30 = vshrl.u32 %v17144_v32, 16  ;;  %v5680_v51 = vshrl.u32 %v17148_v26, 16  ;;  %v21153_v58 = vld [vmem:[#allocation48_spill] sm:$0xff] }
 0x4b9   : > { %v2799_v61 = vrot.slane %v21150_v7, %v16069_v59  ;;  %21151 = vst [vmem:[#allocation84_spill] sm:$0xff] %v17245_v55  ;;  %v2807_v38 = vrot.slane %v21152_v42, %v16069_v59  ;;  %v1624_v7 = vpack.i.b16 %v1499_v43, %v21153_v58  ;;  %v2774_v45 = vcombine.low %v17183_v37, %v17245_v55 }
 0x4ba   : > { %v2808_v63 = vcombine.low %v2783_v20, %v2791_v15  ;;  %v1627_v14 = vshrl.u32 %v1499_v43, 16  ;;  %v1634_v29 = vshrl.u32 %v1515_v5, 16  ;;  %v17259_v1 = vpack.i.b16 %v5680_v51, %v5679_v30 }
 0x4bb   : > { %v2816_v24 = vcombine.low %v2799_v61, %v2807_v38  ;;  %v2330_v13 = vcombine.high %v1624_v7, %v16066_v48  ;;  %v2337_v32 = vrot.slane %v1624_v7, %v16069_v59  ;;  %v3529_v20 = vshrl.u32 %v2774_v45, 16 }
 0x4bc   : > { %v17257_v18 = vrot.slane %v2808_v63, %v16073_v19  ;;  %v21156_v15 = vshrl.u32 %v21153_v58, 16  ;;  %v1632_v61 = vpack.i.b16 %v1531_v57, %v1515_v5  ;;  %13967 = vmatprep.subr.msk.bf16.mxu1 %vm7942_vm0, %v17259_v1  ;;  %v1635_v38 = vshrl.u32 %v1531_v57, 16  ;;  %v21157_v63 = vld [vmem:[#allocation49_spill] sm:$0xff] }
 0x4bd   : > { %v17264_v26 = vrot.slane %v2816_v24, %v16073_v19  ;;  %v2344_v43 = vrot.slane %v2330_v13, %v16069_v59  ;;  %v1640_v30 = vpack.i.b16 %v1501_v56, %v21157_v63  ;;  %v1643_v51 = vshrl.u32 %v1501_v56, 16 }
 0x4be   : > { %21154 = vst [vmem:[#allocation48_spill] sm:$0xff] %v17257_v18  ;;  %v1628_v42 = vpack.i.b16 %v1627_v14, %v21156_v15  ;;  %v2345_v58 = vcombine.high %v1632_v61, %v16066_v48  ;;  %v1636_v14 = vpack.i.b16 %v1635_v38, %v1634_v29  ;;  %v2352_v5 = vrot.slane %v1632_v61, %v16069_v59 }
 0x4bf   : > { %21155 = vst [vmem:[#allocation85_spill] sm:$0xff] %v17264_v26  ;;  %v2824_v7 = vcombine.low %v17257_v18, %v17264_v26  ;;  %v21158_v15 = vshrl.u32 %v21157_v63, 16  ;;  %v2462_v57 = vcombine.high %v1640_v30, %v16066_v48  ;;  %v17287_v63 = vrot.slane %v1640_v30, %v16069_v59 }
 0x4c0   : > { %v2396_v24 = vcombine.high %v1628_v42, %v16066_v48  ;;  %v2403_v23 = vrot.slane %v1628_v42, %v16069_v59  ;;  %v2359_v54 = vrot.slane %v2345_v58, %v16069_v59  ;;  %v2360_v18 = vcombine.low %v2337_v32, %v2352_v5 }
 0x4c1   : > { %v1644_v4 = vpack.i.b16 %v1643_v51, %v21158_v15  ;;  %v3528_v13 = vpack.i.b16 %v2824_v7, %v2774_v45  ;;  %v3530_v6 = vshrl.u32 %v2824_v7, 16  ;;  %v2361_v26 = vcombine.high %v2337_v32, %v2352_v5 }
 0x4c2   : > { %v2410_v56 = vrot.slane %v2396_v24, %v16069_v59  ;;  %v2411_v42 = vcombine.high %v1636_v14, %v16066_v48  ;;  %v2418_v37 = vrot.slane %v1636_v14, %v16069_v59  ;;  %v2376_v61 = vcombine.low %v2344_v43, %v2359_v54 }
 0x4c3   : > { %13655 = vmatprep.mubr.msk.bf16.mxu0 %vm7942_vm0, %v3528_v13  ;;  %v3531_v29 = vpack.i.b16 %v3530_v6, %v3529_v20  ;;  %v2377_v38 = vcombine.high %v2344_v43, %v2359_v54  ;;  %v2368_v45 = vrot.slane %v2360_v18, %v16073_v19  ;;  %v2375_v51 = vrot.slane %v2361_v26, %v16073_v19 }
 0x4c4   : > { %v2425_v7 = vrot.slane %v2411_v42, %v16069_v59  ;;  %v2426_v24 = vcombine.low %v2403_v23, %v2418_v37  ;;  %v17294_v32 = vrot.slane %v2376_v61, %v16073_v19  ;;  %v2427_v6 = vcombine.high %v2403_v23, %v2418_v37 }
 0x4c5   : > { %13687 = vmatprep.mubr.msk.bf16.mxu1 %vm7942_vm0, %v3531_v29  ;;  %v17297_v58 = vrot.slane %v2377_v38, %v16073_v19  ;;  %v17300_v54 = vrot.slane %v2462_v57, %v16069_v59  ;;  %v3226_v43 = vcombine.low %v2368_v45, %v2375_v51  ;;  %v13188_v14 = vcombine.high %v2368_v45, %v2375_v51  ;;  %v1517_v38 = vpop.permute.xlu1 %1516  ;;  %v1533_v45 = vpop.permute.xlu0 %1532 }
 0x4c6   : > { %v17303_v20 = vrot.slane %v2426_v24, %v16073_v19  ;;  %v2442_v18 = vcombine.low %v2410_v56, %v2425_v7  ;;  %v2443_v26 = vcombine.high %v2410_v56, %v2425_v7  ;;  %v17306_v30 = vrot.slane %v2427_v6, %v16073_v19 }
 0x4c7   : > { %v17319_v57 = vrot.slane %v3226_v43, %v16069_v59  ;;  %v2528_v13 = vcombine.high %v1644_v4, %v16066_v48  ;;  %v17323_v56 = vrot.slane %v13188_v14, %v16069_v59  ;;  %v17330_v61 = vrot.slane %v1644_v4, %v16069_v59  ;;  %v21161_v14 = vld [vmem:[#allocation55_spill] sm:$0xff] }
 0x4c8   : > { %v17313_v23 = vrot.slane %v2442_v18, %v16073_v19  ;;  %v17316_v37 = vrot.slane %v2443_v26, %v16073_v19  ;;  %v2874_v6 = vcombine.low %v16946_v27, %v16951_v25  ;;  %v21159_v18 = vcombine.low %v16935_v17, %v16938_v40 }
 0x4c9   : > { %v17337_v24 = vrot.slane %v2528_v13, %v16069_v59  ;;  %v8258_v26 = vsel %vm7942_vm0, %v17155_v0, 0  ;;  %v5019_v43 = vcombine.high %v16461_v50, %v16468_v3  ;;  %v5069_v7 = vcombine.high %v21161_v14, %v16486_v34  ;;  %v1503_v27 = vpop.permute.xlu1 %1502 }
 0x4ca   : > { %v17345_v4 = vrot.slane %v21159_v18, %v16073_v19  ;;  %v3541_v13 = vshrl.u32 %v2874_v6, 16  ;;  %v8403_v51 = vsel %vm7942_vm0, %v17259_v1, 0  ;;  %v1650_v29 = vshrl.u32 %v1517_v38, 16 }
 0x4cb   : > { %v1648_v42 = vpack.i.b16 %v1533_v45, %v1517_v38  ;;  %v17357_v40 = vpack.i.b16 %v5069_v7, %v5019_v43  ;;  %v5691_v18 = vshrl.u32 %v5019_v43, 16  ;;  %v5692_v15 = vshrl.u32 %v5069_v7, 16 }
 0x4cc   : > { %21160 = vst [vmem:[#allocation49_spill] sm:$0xff] %v17345_v4  ;;  %v2924_v17 = vcombine.low %v16954_v52, %v17345_v4  ;;  %v1651_v0 = vshrl.u32 %v1533_v45, 16  ;;  %v21162_v3 = vcombine.low %v16996_v39, %v16999_v31  ;;  %v21163_v52 = vcombine.high %v16996_v39, %v16999_v31 }
 0x4cd   : > { %v2477_v5 = vcombine.high %v1648_v42, %v16066_v48  ;;  %v2484_v50 = vrot.slane %v1648_v42, %v16069_v59  ;;  %v17365_v38 = vpack.i.b16 %v5692_v15, %v5691_v18  ;;  %v2958_v15 = vcombine.low %v17008_v28, %v17011_v2 }
 0x4ce   : > { %v2949_v34 = vrot.slane %v21162_v3, %v16069_v59  ;;  %v3540_v1 = vpack.i.b16 %v2924_v17, %v2874_v6  ;;  %v3542_v14 = vshrl.u32 %v2924_v17, 16  ;;  %v2957_v43 = vrot.slane %v21163_v52, %v16069_v59 }
 0x4cf   : > { %v1652_v7 = vpack.i.b16 %v1651_v0, %v1650_v29  ;;  %v2491_v45 = vrot.slane %v2477_v5, %v16069_v59  ;;  %v2492_v4 = vcombine.low %v17287_v63, %v2484_v50  ;;  %v2493_v42 = vcombine.high %v17287_v63, %v2484_v50 }
 0x4d0   : > { %13656 = vmatmul.mubr.msk.bf16.vlgmr.msra.gmra.mrb[32].mxu0 %vm7942_vm0, %v3540_v1  ;;  %v3543_v3 = vpack.i.b16 %v3542_v14, %v3541_v13  ;;  %v2966_v6 = vcombine.low %v2949_v34, %v2957_v43  ;;  %v21164_v39 = vcombine.low %v17002_v35, %v17005_v47  ;;  %v17391_v13 = vrot.slane %v2958_v15, %v16073_v19 }
 0x4d1   : > { %13704 = vmatpush3.bf16.xpose.msra.mxu0 %v8258_v26  ;;  %v2500_v31 = vrot.slane %v2492_v4, %v16073_v19  ;;  %v2507_v5 = vrot.slane %v2493_v42, %v16073_v19  ;;  %v2508_v63 = vcombine.low %v17300_v54, %v2491_v45  ;;  %v2509_v29 = vcombine.high %v17300_v54, %v2491_v45 }
 0x4d2   : > { %v2983_v52 = vrot.slane %v21164_v39, %v16069_v59  ;;  %13960 = vmatprep.subr.msk.bf16.mxu0 %vm7942_vm0, %v17357_v40  ;;  %13688 = vmatmul.mubr.msk.bf16.vlgmr.msra.gmra.mrb[16].mxu1 %vm7942_vm0, %v3543_v3  ;;  %v2543_v28 = vcombine.high %v1652_v7, %v16066_v48  ;;  %v2550_v2 = vrot.slane %v1652_v7, %v16069_v59  ;;  %v1659_v26 = vshrl.u32 %v1503_v27, 16 }
 0x4d3   : > { %21165 = vst [vmem:[#allocation55_spill] sm:$0xff] %v17391_v13  ;;  %13736 = vmatpush3.bf16.xpose.msra.mxu1 %v8403_v51  ;;  %v17394_v4 = vrot.slane %v2508_v63, %v16073_v19  ;;  %v17397_v17 = vrot.slane %v2509_v29, %v16073_v19  ;;  %v3326_v54 = vcombine.low %v2500_v31, %v2507_v5  ;;  %v8406_v7 = vsel %vm7942_vm0, %v17365_v38, 0 }
 0x4d4   : > { %v13192_v18 = vcombine.high %v2500_v31, %v2507_v5  ;;  %13968 = vmatprep.subr.msk.bf16.mxu1 %vm7942_vm0, %v17365_v38  ;;  %v2557_v0 = vrot.slane %v2543_v28, %v16069_v59  ;;  %v2558_v50 = vcombine.low %v17330_v61, %v2550_v2  ;;  %v2559_v34 = vcombine.high %v17330_v61, %v2550_v2  ;;  %v21168_v31 = vld [vmem:[#allocation77_spill] sm:$0xff]  ;;  %v1519_v2 = vpop.permute.xlu0 %1518 }
 0x4d5   : > { %v17405_v1 = vrot.slane %v2966_v6, %v16073_v19  ;;  %v17408_v51 = vrot.slane %v3326_v54, %v16069_v59  ;;  %v21167_v6 = vcombine.high %v17002_v35, %v17005_v47  ;;  %v21169_v5 = vcombine.low %v17018_v33, %v21168_v31  ;;  %v21178_v35 = vld [vmem:[#allocation58_spill] sm:$0xff] }
 0x4d6   : > { %v17411_v14 = vrot.slane %v13192_v18, %v16069_v59  ;;  %v17418_v45 = vrot.slane %v2558_v50, %v16073_v19  ;;  %v17421_v61 = vrot.slane %v2559_v34, %v16073_v19  ;;  %v2574_v42 = vcombine.low %v17337_v24, %v2557_v0  ;;  %v21171_v34 = vld [vmem:[#allocation50_spill] sm:$0xff] }
 0x4d7   : > { %21166 = vst [vmem:[#allocation86_spill] sm:$0xff] %v17405_v1  ;;  %v2575_v3 = vcombine.high %v17337_v24, %v2557_v0  ;;  %v2974_v15 = vcombine.low %v17391_v13, %v17405_v1  ;;  %v2991_v39 = vrot.slane %v21167_v6, %v16069_v59  ;;  %v2999_v63 = vrot.slane %v21169_v5, %v16069_v59 }
 0x4d8   : > { %v21170_v29 = vcombine.high %v17018_v33, %v21168_v31  ;;  %v17440_v24 = vrot.slane %v2574_v42, %v16073_v19  ;;  %v1656_v6 = vpack.i.b16 %v1503_v27, %v21171_v34  ;;  %v1666_v5 = vshrl.u32 %v1519_v2, 16  ;;  %v21177_v33 = vld [vmem:[#allocation59_spill] sm:$0xff]  ;;  %v5783_v43 = vpop.permute.xlu0 %5782 }
 0x4d9   : > { %v17443_v54 = vrot.slane %v2575_v3, %v16073_v19  ;;  %v3008_v18 = vcombine.low %v2983_v52, %v2991_v39  ;;  %v3553_v50 = vshrl.u32 %v2974_v15, 16  ;;  %v21172_v3 = vshrl.u32 %v21171_v34, 16  ;;  %v1535_v39 = vpop.permute.xlu1 %1534 }
 0x4da   : > { %v3007_v28 = vrot.slane %v21170_v29, %v16069_v59  ;;  %v2594_v52 = vcombine.high %v1656_v6, %v16066_v48  ;;  %v2601_v27 = vrot.slane %v1656_v6, %v16069_v59  ;;  %v8261_v34 = vsel %vm7942_vm0, %v17357_v40, 0 }
 0x4db   : > { %v1660_v31 = vpack.i.b16 %v1659_v26, %v21172_v3  ;;  %v17457_v29 = vrot.slane %v3008_v18, %v16073_v19  ;;  %v21175_v26 = vld [vmem:[#allocation57_spill] sm:$0xff]  ;;  %v21176_v3 = vld [vmem:[#allocation56_spill] sm:$0xff]  ;;  %13706 = vmatpush3.bf16.xpose.msra.mxu0 %v8261_v34  ;;  %v5169_v6 = vcombine.high %v21178_v35, %v21177_v33  ;;  %13738 = vmatpush3.bf16.xpose.msra.mxu1 %v8406_v7  ;;  %v1667_v13 = vshrl.u32 %v1535_v39, 16 }
 0x4dc   : > { %v3016_v0 = vcombine.low %v2999_v63, %v3007_v28  ;;  %v5119_v42 = vcombine.high %v21176_v3, %v21175_v26  ;;  %v1664_v40 = vpack.i.b16 %v1535_v39, %v1519_v2  ;;  %v21179_v33 = vld [vmem:[#allocation41_spill] sm:$0xff]  ;;  %v21180_v2 = vcombine.low %v17069_v44, %v17072_v10 }
 0x4dd   : > { %21173 = vst [vmem:[#allocation77_spill] sm:$0xff] %v17457_v29  ;;  %v2660_v63 = vcombine.high %v1660_v31, %v16066_v48  ;;  %v2667_v28 = vrot.slane %v1660_v31, %v16069_v59 }
 0x4de   : > { %v17460_v47 = vrot.slane %v3016_v0, %v16073_v19  ;;  %v2608_v0 = vrot.slane %v2594_v52, %v16069_v59  ;;  %v5703_v1 = vshrl.u32 %v5119_v42, 16  ;;  %v17478_v25 = vpack.i.b16 %v5169_v6, %v5119_v42 }
 0x4df   : > { %v2674_v31 = vrot.slane %v2660_v63, %v16069_v59  ;;  %v1668_v52 = vpack.i.b16 %v1667_v13, %v1666_v5  ;;  %v2609_v34 = vcombine.high %v1664_v40, %v16066_v48  ;;  %v2616_v35 = vrot.slane %v1664_v40, %v16069_v59 }
 0x4e0   : > { %21174 = vst [vmem:[#allocation50_spill] sm:$0xff] %v17460_v47  ;;  %v3024_v18 = vcombine.low %v17457_v29, %v17460_v47  ;;  %v5704_v29 = vshrl.u32 %v5169_v6, 16  ;;  %v5832_v47 = vpack.i.b16 %v5783_v43, %v21179_v33  ;;  %13961 = vmatprep.subr.msk.bf16.mxu0 %vm7942_vm0, %v17478_v25  ;;  %v3049_v13 = vrot.slane %v21180_v2, %v16069_v59  ;;  %v21182_v6 = vld [vmem:[#allocation42_spill] sm:$0xff] }
 0x4e1   : > { %v2623_v42 = vrot.slane %v2609_v34, %v16069_v59  ;;  %v2624_v5 = vcombine.low %v2601_v27, %v2616_v35  ;;  %v2625_v39 = vcombine.high %v2601_v27, %v2616_v35  ;;  %v2675_v63 = vcombine.high %v1668_v52, %v16066_v48 }
 0x4e2   : > { %v3552_v26 = vpack.i.b16 %v3024_v18, %v2974_v15  ;;  %v3554_v3 = vshrl.u32 %v3024_v18, 16  ;;  %v17486_v7 = vpack.i.b16 %v5704_v29, %v5703_v1  ;;  %v5835_v15 = vshrl.u32 %v5783_v43, 16  ;;  %v5799_v18 = vpop.permute.xlu1 %5798 }
 0x4e3   : > { %v21181_v1 = vshrl.u32 %v21179_v33, 16  ;;  %v5958_v29 = vcombine.high %v5832_v47, %v16066_v48  ;;  %v2639_v27 = vrot.slane %v2625_v39, %v16073_v19  ;;  %v2641_v34 = vcombine.high %v2608_v0, %v2623_v42 }
 0x4e4   : > { %13659 = vmatprep.mubr.msk.bf16.mxu0 %vm7942_vm0, %v3552_v26  ;;  %v3555_v38 = vpack.i.b16 %v3554_v3, %v3553_v50  ;;  %v2682_v50 = vrot.slane %v1668_v52, %v16069_v59  ;;  %13969 = vmatprep.subr.msk.bf16.mxu1 %vm7942_vm0, %v17486_v7  ;;  %v2632_v26 = vrot.slane %v2624_v5, %v16073_v19  ;;  %v5842_v2 = vshrl.u32 %v5799_v18, 16 }
 0x4e5   : > { %v5836_v43 = vpack.i.b16 %v5835_v15, %v21181_v1  ;;  %v2640_v3 = vcombine.low %v2608_v0, %v2623_v42  ;;  %v2689_v35 = vrot.slane %v2675_v63, %v16069_v59  ;;  %v17509_v33 = vrot.slane %v2641_v34, %v16073_v19 }
 0x4e6   : > { %13691 = vmatprep.mubr.msk.bf16.mxu1 %vm7942_vm0, %v3555_v38  ;;  %v2690_v38 = vcombine.low %v2667_v28, %v2682_v50  ;;  %v2691_v52 = vcombine.high %v2667_v28, %v2682_v50  ;;  %v3426_v15 = vcombine.low %v2632_v26, %v2639_v27  ;;  %v13196_v1 = vcombine.high %v2632_v26, %v2639_v27 }
 0x4e7   : > { %v17506_v55 = vrot.slane %v2640_v3, %v16073_v19  ;;  %v2706_v0 = vcombine.low %v2674_v31, %v2689_v35  ;;  %v2707_v42 = vcombine.high %v2674_v31, %v2689_v35  ;;  %v5965_v50 = vrot.slane %v5832_v47, %v16069_v59 }
 0x4e8   : > { %v17512_v40 = vrot.slane %v2690_v38, %v16073_v19  ;;  %v17515_v5 = vrot.slane %v2691_v52, %v16073_v19  ;;  %v17518_v39 = vrot.slane %v3426_v15, %v16069_v59  ;;  %v17521_v28 = vrot.slane %v13196_v1, %v16069_v59  ;;  %v5815_v15 = vpop.permute.xlu0 %5814 }
 0x4e9   : > { %v17527_v26 = vrot.slane %v2706_v0, %v16073_v19  ;;  %v17530_v27 = vrot.slane %v2707_v42, %v16073_v19  ;;  %v5972_v35 = vrot.slane %v5958_v29, %v16069_v59  ;;  %v6024_v38 = vcombine.high %v5836_v43, %v16066_v48 }
 0x4ea   : > { %v21183_v47 = vcombine.high %v17069_v44, %v17072_v10  ;;  %v6031_v0 = vrot.slane %v5836_v43, %v16069_v59  ;;  %v3058_v42 = vcombine.low %v17093_v36, %v17097_v41  ;;  %v21184_v29 = vcombine.low %v17075_v49, %v17080_v8 }
 0x4eb   : > { %v21185_v44 = vcombine.high %v17075_v49, %v17080_v8  ;;  %v21186_v43 = vcombine.low %v17087_v11, %v17090_v9  ;;  %v21188_v41 = vcombine.high %v17087_v11, %v17090_v9  ;;  %v5840_v3 = vpack.i.b16 %v5815_v15, %v5799_v18 }
 0x4ec   : > { %v3057_v52 = vrot.slane %v21183_v47, %v16069_v59  ;;  %v3083_v34 = vrot.slane %v21184_v29, %v16069_v59  ;;  %v17564_v36 = vrot.slane %v3058_v42, %v16073_v19  ;;  %v21189_v8 = vcombine.low %v17191_v21, %v17194_v12 }
 0x4ed   : > { %v3091_v10 = vrot.slane %v21185_v44, %v16069_v59  ;;  %v3099_v47 = vrot.slane %v21186_v43, %v16069_v59  ;;  %v3107_v29 = vrot.slane %v21188_v41, %v16069_v59  ;;  %v21190_v42 = vcombine.high %v17191_v21, %v17194_v12 }
 0x4ee   : > { %v3066_v31 = vcombine.low %v3049_v13, %v3057_v52  ;;  %21187 = vst [vmem:[#allocation57_spill] sm:$0xff] %v17564_v36  ;;  %v5843_v13 = vshrl.u32 %v5815_v15, 16  ;;  %v3149_v44 = vrot.slane %v21189_v8, %v16069_v59  ;;  %v5973_v11 = vcombine.high %v5840_v3, %v16066_v48 }
 0x4ef   : > { %v3108_v49 = vcombine.low %v3083_v34, %v3091_v10  ;;  %v3157_v43 = vrot.slane %v21190_v42, %v16069_v59  ;;  %v3116_v1 = vcombine.low %v3099_v47, %v3107_v29  ;;  %v5980_v9 = vrot.slane %v5840_v3, %v16069_v59 }
 0x4f0   : > { %v17571_v52 = vrot.slane %v3066_v31, %v16073_v19  ;;  %v5844_v63 = vpack.i.b16 %v5843_v13, %v5842_v2  ;;  %v6038_v18 = vrot.slane %v6024_v38, %v16069_v59  ;;  %v3158_v15 = vcombine.low %v17209_v62, %v17226_v53 }
 0x4f1   : > { %v17587_v34 = vrot.slane %v3108_v49, %v16073_v19  ;;  %v17592_v21 = vrot.slane %v3116_v1, %v16073_v19  ;;  %v5987_v12 = vrot.slane %v5973_v11, %v16069_v59  ;;  %v5988_v2 = vcombine.low %v5965_v50, %v5980_v9 }
 0x4f2   : > { %v3074_v31 = vcombine.low %v17564_v36, %v17571_v52  ;;  %v5989_v10 = vcombine.high %v5965_v50, %v5980_v9  ;;  %v6039_v3 = vcombine.high %v5844_v63, %v16066_v48  ;;  %v6046_v38 = vrot.slane %v5844_v63, %v16069_v59  ;;  %v21219_v36 = vld [vmem:[#allocation66_spill] sm:$0xff] }
 0x4f3   : > { %21191 = vst [vmem:[#allocation56_spill] sm:$0xff] %v17587_v34  ;;  %21192 = vst [vmem:[#allocation59_spill] sm:$0xff] %v17592_v21  ;;  %v3166_v41 = vcombine.low %v3149_v44, %v3157_v43  ;;  %v3124_v29 = vcombine.low %v17587_v34, %v17592_v21  ;;  %v17600_v13 = vrot.slane %v5988_v2, %v16073_v19  ;;  %v5785_v2 = vpop.permute.xlu1 %5784 }
 0x4f4   : > { %v3565_v47 = vshrl.u32 %v3074_v31, 16  ;;  %v17603_v62 = vrot.slane %v5989_v10, %v16073_v19  ;;  %v6004_v53 = vcombine.low %v5972_v35, %v5987_v12  ;;  %v6005_v1 = vcombine.high %v5972_v35, %v5987_v12 }
 0x4f5   : > { %v6053_v49 = vrot.slane %v6039_v3, %v16069_v59  ;;  %v6054_v50 = vcombine.low %v6031_v0, %v6046_v38  ;;  %v6055_v8 = vcombine.high %v6031_v0, %v6046_v38  ;;  %v3564_v42 = vpack.i.b16 %v3124_v29, %v3074_v31 }
 0x4f6   : > { %v3566_v11 = vshrl.u32 %v3124_v29, 16  ;;  %v17607_v63 = vrot.slane %v6004_v53, %v16073_v19  ;;  %v17610_v44 = vrot.slane %v3158_v15, %v16073_v19  ;;  %v17613_v43 = vrot.slane %v6005_v1, %v16073_v19  ;;  %v21199_v53 = vld [vmem:[#allocation61_spill] sm:$0xff]  ;;  %v21202_v29 = vld [vmem:[#allocation62_spill] sm:$0xff] }
 0x4f7   : > { %v17616_v9 = vrot.slane %v6054_v50, %v16073_v19  ;;  %v17619_v35 = vrot.slane %v6055_v8, %v16073_v19  ;;  %v6070_v12 = vcombine.low %v6038_v18, %v6053_v49  ;;  %13660 = vmatmul.mubr.msk.bf16.gmra.mrb[36].mxu0 %vm7942_vm0, %v3564_v42  ;;  %v6071_v31 = vcombine.high %v6038_v18, %v6053_v49  ;;  %v5801_v50 = vpop.permute.xlu0 %5800 }
 0x4f8   : > { %21193 = vst [vmem:[#allocation58_spill] sm:$0xff] %v17610_v44  ;;  %v3567_v0 = vpack.i.b16 %v3566_v11, %v3565_v47  ;;  %v17625_v15 = vrot.slane %v3166_v41, %v16073_v19  ;;  %v21195_v1 = vcombine.low %v17197_v60, %v17205_v16  ;;  %v21196_v8 = vcombine.high %v17197_v60, %v17205_v16  ;;  %v21200_v60 = vld [vmem:[#allocation60_spill] sm:$0xff] }
 0x4f9   : > { %v17628_v3 = vrot.slane %v6070_v12, %v16073_v19  ;;  %v17638_v18 = vrot.slane %v6071_v31, %v16073_v19  ;;  %v21197_v11 = vcombine.low %v17212_v22, %v17219_v46  ;;  %v8264_v47 = vsel %vm7942_vm0, %v17478_v25, 0  ;;  %v5817_v25 = vpop.permute.xlu1 %5816 }
 0x4fa   : > { %21194 = vst [vmem:[#allocation41_spill] sm:$0xff] %v17625_v15  ;;  %13692 = vmatmul.mubr.msk.bf16.gmra.mrb[20].mxu1 %vm7942_vm0, %v3567_v0  ;;  %v3174_v41 = vcombine.low %v17610_v44, %v17625_v15  ;;  %v3183_v49 = vrot.slane %v21195_v1, %v16069_v59  ;;  %v3191_v42 = vrot.slane %v21196_v8, %v16069_v59  ;;  %v21201_v8 = vld [vmem:[#allocation63_spill] sm:$0xff] }
 0x4fb   : > { %v3199_v12 = vrot.slane %v21197_v11, %v16069_v59  ;;  %v21198_v0 = vcombine.high %v17212_v22, %v17219_v46  ;;  %13708 = vmatpush3.bf16.xpose.msra.mxu0 %v8264_v47  ;;  %v5219_v16 = vcombine.high %v21200_v60, %v21199_v53  ;;  %v5269_v38 = vcombine.high %v21202_v29, %v21201_v8  ;;  %v21203_v22 = vld [vmem:[#allocation40_spill] sm:$0xff] }
 0x4fc   : > { %v8409_v11 = vsel %vm7942_vm0, %v17486_v7, 0  ;;  %v3208_v10 = vcombine.low %v3183_v49, %v3191_v42  ;;  %v5848_v46 = vpack.i.b16 %v5785_v2, %v21203_v22  ;;  %v3577_v1 = vshrl.u32 %v3174_v41, 16 }
 0x4fd   : > { %v3207_v31 = vrot.slane %v21198_v0, %v16069_v59  ;;  %13740 = vmatpush3.bf16.xpose.msra.mxu1 %v8409_v11  ;;  %v5851_v0 = vshrl.u32 %v5785_v2, 16  ;;  %v17671_v15 = vpack.i.b16 %v5269_v38, %v5219_v16  ;;  %v5715_v47 = vshrl.u32 %v5219_v16, 16 }
 0x4fe   : > { %v5716_v34 = vshrl.u32 %v5269_v38, 16  ;;  %v17674_v53 = vrot.slane %v3208_v10, %v16073_v19  ;;  %v21206_v7 = vshrl.u32 %v21203_v22, 16  ;;  %v6090_v42 = vcombine.high %v5848_v46, %v16066_v48  ;;  %v5787_v38 = vpop.permute.xlu0 %5786 }
 0x4ff   : > { %v3216_v44 = vcombine.low %v3199_v12, %v3207_v31  ;;  %13962 = vmatprep.subr.msk.bf16.mxu0 %vm7942_vm0, %v17671_v15  ;;  %v5858_v12 = vshrl.u32 %v5801_v50, 16  ;;  %v5856_v31 = vpack.i.b16 %v5817_v25, %v5801_v50  ;;  %v5859_v60 = vshrl.u32 %v5817_v25, 16 }
 0x500   : > { %21204 = vst [vmem:[#allocation42_spill] sm:$0xff] %v17674_v53  ;;  %v5852_v49 = vpack.i.b16 %v5851_v0, %v21206_v7  ;;  %v17684_v2 = vpack.i.b16 %v5716_v34, %v5715_v47  ;;  %v6104_v16 = vrot.slane %v6090_v42, %v16069_v59  ;;  %v21207_v47 = vld [vmem:[#allocation43_spill] sm:$0xff] }
 0x501   : > { %v17677_v29 = vrot.slane %v3216_v44, %v16073_v19  ;;  %v6097_v44 = vrot.slane %v5848_v46, %v16069_v59  ;;  %v5860_v34 = vpack.i.b16 %v5859_v60, %v5858_v12  ;;  %v6105_v22 = vcombine.high %v5856_v31, %v16066_v48 }
 0x502   : > { %v6156_v8 = vcombine.high %v5852_v49, %v16066_v48  ;;  %v6163_v11 = vrot.slane %v5852_v49, %v16069_v59  ;;  %13970 = vmatprep.subr.msk.bf16.mxu1 %vm7942_vm0, %v17684_v2  ;;  %v6112_v50 = vrot.slane %v5856_v31, %v16069_v59  ;;  %v5864_v7 = vpack.i.b16 %v5787_v38, %v21207_v47 }
 0x503   : > { %21205 = vst [vmem:[#allocation61_spill] sm:$0xff] %v17677_v29  ;;  %v3224_v10 = vcombine.low %v17674_v53, %v17677_v29  ;;  %v5867_v53 = vshrl.u32 %v5787_v38, 16  ;;  %v6119_v46 = vrot.slane %v6105_v22, %v16069_v59  ;;  %v6171_v21 = vcombine.high %v5860_v34, %v16066_v48 }
 0x504   : > { %v6120_v42 = vcombine.low %v6097_v44, %v6112_v50  ;;  %v6121_v29 = vcombine.high %v6097_v44, %v6112_v50  ;;  %v6170_v12 = vrot.slane %v6156_v8, %v16069_v59  ;;  %v6178_v60 = vrot.slane %v5860_v34, %v16069_v59 }
 0x505   : > { %v3576_v0 = vpack.i.b16 %v3224_v10, %v3174_v41  ;;  %v3578_v25 = vshrl.u32 %v3224_v10, 16  ;;  %v21208_v31 = vshrl.u32 %v21207_v47, 16  ;;  %v6136_v22 = vcombine.low %v6104_v16, %v6119_v46 }
 0x506   : > { %v17705_v10 = vrot.slane %v6120_v42, %v16073_v19  ;;  %v17708_v38 = vrot.slane %v6121_v29, %v16073_v19  ;;  %v6137_v44 = vcombine.high %v6104_v16, %v6119_v46  ;;  %v6185_v50 = vrot.slane %v6171_v21, %v16069_v59  ;;  %v21216_v46 = vld [vmem:[#allocation64_spill] sm:$0xff] }
 0x507   : > { %13663 = vmatprep.mubr.msk.bf16.mxu0 %vm7942_vm0, %v3576_v0  ;;  %v3579_v49 = vpack.i.b16 %v3578_v25, %v3577_v1  ;;  %v5868_v41 = vpack.i.b16 %v5867_v53, %v21208_v31  ;;  %v6186_v1 = vcombine.low %v6163_v11, %v6178_v60  ;;  %v6187_v0 = vcombine.high %v6163_v11, %v6178_v60 }
 0x508   : > { %v6222_v8 = vcombine.high %v5864_v7, %v16066_v48  ;;  %v17714_v34 = vrot.slane %v6136_v22, %v16073_v19  ;;  %v17717_v53 = vrot.slane %v6137_v44, %v16073_v19  ;;  %v17722_v25 = vrot.slane %v5864_v7, %v16069_v59 }
 0x509   : > { %13695 = vmatprep.mubr.msk.bf16.mxu1 %vm7942_vm0, %v3579_v49  ;;  %v17725_v16 = vrot.slane %v6186_v1, %v16073_v19  ;;  %v17728_v21 = vrot.slane %v6187_v0, %v16073_v19  ;;  %v6202_v11 = vcombine.low %v6170_v12, %v6185_v50  ;;  %v6203_v47 = vcombine.high %v6170_v12, %v6185_v50 }
 0x50a   : > { %v6288_v7 = vcombine.high %v5868_v41, %v16066_v48  ;;  %v17746_v22 = vrot.slane %v6222_v8, %v16069_v59  ;;  %v17749_v44 = vrot.slane %v5868_v41, %v16069_v59  ;;  %v21209_v1 = vcombine.low %v17294_v32, %v17297_v58 }
 0x50b   : > { %v17738_v60 = vrot.slane %v6202_v11, %v16073_v19  ;;  %v17741_v31 = vrot.slane %v6203_v47, %v16073_v19  ;;  %v21210_v11 = vcombine.high %v17294_v32, %v17297_v58  ;;  %v3258_v8 = vcombine.low %v17319_v57, %v17323_v56  ;;  %v5803_v32 = vpop.permute.xlu1 %5802 }
 0x50c   : > { %v17752_v50 = vrot.slane %v6288_v7, %v16069_v59  ;;  %v3249_v0 = vrot.slane %v21209_v1, %v16069_v59  ;;  %v21211_v41 = vcombine.low %v17303_v20, %v17306_v30  ;;  %v21212_v7 = vcombine.high %v17303_v20, %v17306_v30  ;;  %v5819_v20 = vpop.permute.xlu0 %5818 }
 0x50d   : > { %v3257_v47 = vrot.slane %v21210_v11, %v16069_v59  ;;  %v21213_v1 = vcombine.low %v17313_v23, %v17316_v37  ;;  %v21214_v57 = vcombine.high %v17313_v23, %v17316_v37  ;;  %v8267_v11 = vsel %vm7942_vm0, %v17671_v15, 0 }
 0x50e   : > { %v3283_v12 = vrot.slane %v21211_v41, %v16069_v59  ;;  %v3291_v49 = vrot.slane %v21212_v7, %v16069_v59  ;;  %v21215_v41 = vld [vmem:[#allocation65_spill] sm:$0xff]  ;;  %v17785_v30 = vrot.slane %v3258_v8, %v16073_v19  ;;  %13710 = vmatpush3.bf16.xpose.msra.mxu0 %v8267_v11  ;;  %v5874_v15 = vshrl.u32 %v5803_v32, 16 }
 0x50f   : > { %v3299_v42 = vrot.slane %v21213_v1, %v16069_v59  ;;  %v3266_v58 = vcombine.low %v3249_v0, %v3257_v47  ;;  %v3307_v56 = vrot.slane %v21214_v57, %v16069_v59  ;;  %v5319_v29 = vcombine.high %v21216_v46, %v21215_v41  ;;  %v21218_v1 = vld [vmem:[#allocation67_spill] sm:$0xff] }
 0x510   : > { %21217 = vst [vmem:[#allocation60_spill] sm:$0xff] %v17785_v30  ;;  %v3308_v7 = vcombine.low %v3283_v12, %v3291_v49  ;;  %v5369_v0 = vcombine.high %v21219_v36, %v21218_v1  ;;  %v8412_v47 = vsel %vm7942_vm0, %v17684_v2, 0  ;;  %v5872_v12 = vpack.i.b16 %v5819_v20, %v5803_v32 }
 0x511   : > { %v17792_v23 = vrot.slane %v3266_v58, %v16073_v19  ;;  %v3316_v37 = vcombine.low %v3299_v42, %v3307_v56  ;;  %13742 = vmatpush3.bf16.xpose.msra.mxu1 %v8412_v47  ;;  %v5727_v57 = vshrl.u32 %v5319_v29, 16  ;;  %v5875_v2 = vshrl.u32 %v5819_v20, 16 }
 0x512   : > { %v17795_v46 = vrot.slane %v3308_v7, %v16073_v19  ;;  %v17797_v8 = vpack.i.b16 %v5369_v0, %v5319_v29  ;;  %v5728_v49 = vshrl.u32 %v5369_v0, 16  ;;  %v21223_v42 = vcombine.low %v17394_v4, %v17397_v17 }
 0x513   : > { %21220 = vst [vmem:[#allocation63_spill] sm:$0xff] %v17792_v23  ;;  %v3274_v36 = vcombine.low %v17785_v30, %v17792_v23  ;;  %v17802_v11 = vrot.slane %v3316_v37, %v16073_v19  ;;  %v6237_v29 = vcombine.high %v5872_v12, %v16066_v48  ;;  %v6244_v32 = vrot.slane %v5872_v12, %v16069_v59 }
 0x514   : > { %21221 = vst [vmem:[#allocation62_spill] sm:$0xff] %v17795_v46  ;;  %v3349_v58 = vrot.slane %v21223_v42, %v16069_v59  ;;  %13963 = vmatprep.subr.msk.bf16.mxu0 %vm7942_vm0, %v17797_v8  ;;  %v17810_v56 = vpack.i.b16 %v5728_v49, %v5727_v57  ;;  %v21224_v41 = vcombine.high %v17394_v4, %v17397_v17 }
 0x515   : > { %21222 = vst [vmem:[#allocation40_spill] sm:$0xff] %v17802_v11  ;;  %v3324_v20 = vcombine.low %v17795_v46, %v17802_v11  ;;  %v3589_v1 = vshrl.u32 %v3274_v36, 16  ;;  %v5876_v0 = vpack.i.b16 %v5875_v2, %v5874_v15  ;;  %v3358_v47 = vcombine.low %v17408_v51, %v17411_v14  ;;  %v21232_v46 = vld [vmem:[#allocation69_spill] sm:$0xff]  ;;  %v21235_v11 = vld [vmem:[#allocation70_spill] sm:$0xff] }
 0x516   : > { %v3357_v7 = vrot.slane %v21224_v41, %v16069_v59  ;;  %13971 = vmatprep.subr.msk.bf16.mxu1 %vm7942_vm0, %v17810_v56  ;;  %v6251_v37 = vrot.slane %v6237_v29, %v16069_v59  ;;  %v6252_v57 = vcombine.low %v17722_v25, %v6244_v32  ;;  %v6253_v49 = vcombine.high %v17722_v25, %v6244_v32  ;;  %v5789_v32 = vpop.permute.xlu1 %5788 }
 0x517   : > { %v3588_v4 = vpack.i.b16 %v3324_v20, %v3274_v36  ;;  %v3590_v17 = vshrl.u32 %v3324_v20, 16  ;;  %v6303_v42 = vcombine.high %v5876_v0, %v16066_v48  ;;  %v6310_v41 = vrot.slane %v5876_v0, %v16069_v59 }
 0x518   : > { %v3366_v12 = vcombine.low %v3349_v58, %v3357_v7  ;;  %v17830_v15 = vrot.slane %v6252_v57, %v16073_v19  ;;  %v17833_v51 = vrot.slane %v6253_v49, %v16073_v19  ;;  %v6268_v14 = vcombine.low %v17746_v22, %v6251_v37 }
 0x519   : > { %v6269_v2 = vcombine.high %v17746_v22, %v6251_v37  ;;  %13664 = vmatmul.mubr.msk.bf16.gmra.mrb[40].mxu0 %vm7942_vm0, %v3588_v4  ;;  %v3591_v25 = vpack.i.b16 %v3590_v17, %v3589_v1  ;;  %v6317_v36 = vrot.slane %v6303_v42, %v16069_v59  ;;  %v6318_v58 = vcombine.low %v17749_v44, %v6310_v41 }
 0x51a   : > { %v6319_v29 = vcombine.high %v17749_v44, %v6310_v41  ;;  %v17844_v20 = vrot.slane %v6268_v14, %v16073_v19  ;;  %v17865_v17 = vrot.slane %v3358_v47, %v16073_v19  ;;  %v17868_v42 = vrot.slane %v3366_v12, %v16073_v19  ;;  %v5821_v22 = vpop.permute.xlu1 %5820 }
 0x51b   : > { %v17847_v0 = vrot.slane %v6269_v2, %v16073_v19  ;;  %13696 = vmatmul.mubr.msk.bf16.gmra.mrb[24].mxu1 %vm7942_vm0, %v3591_v25  ;;  %v17853_v1 = vrot.slane %v6318_v58, %v16073_v19  ;;  %v6334_v37 = vcombine.low %v17752_v50, %v6317_v36  ;;  %v6335_v57 = vcombine.high %v17752_v50, %v6317_v36  ;;  %v5805_v25 = vpop.permute.xlu0 %5804 }
 0x51c   : > { %v17856_v44 = vrot.slane %v6319_v29, %v16073_v19  ;;  %21225 = vst [vmem:[#allocation43_spill] sm:$0xff] %v17865_v17  ;;  %21226 = vst [vmem:[#allocation65_spill] sm:$0xff] %v17868_v42  ;;  %v3374_v47 = vcombine.low %v17865_v17, %v17868_v42  ;;  %v21227_v12 = vcombine.low %v17418_v45, %v17421_v61  ;;  %v5883_v49 = vshrl.u32 %v5789_v32, 16 }
 0x51d   : > { %v17871_v41 = vrot.slane %v6334_v37, %v16073_v19  ;;  %v17874_v14 = vrot.slane %v6335_v57, %v16073_v19  ;;  %v21228_v58 = vcombine.high %v17418_v45, %v17421_v61  ;;  %v21229_v37 = vcombine.low %v17440_v24, %v17443_v54 }
 0x51e   : > { %v3383_v36 = vrot.slane %v21227_v12, %v16069_v59  ;;  %v21230_v50 = vcombine.high %v17440_v24, %v17443_v54  ;;  %v5880_v12 = vpack.i.b16 %v5789_v32, %v21182_v6  ;;  %v3601_v45 = vshrl.u32 %v3374_v47, 16  ;;  %v21233_v24 = vld [vmem:[#allocation68_spill] sm:$0xff]  ;;  %v21234_v32 = vld [vmem:[#allocation71_spill] sm:$0xff] }
 0x51f   : > { %v3391_v29 = vrot.slane %v21228_v58, %v16069_v59  ;;  %v3399_v57 = vrot.slane %v21229_v37, %v16069_v59  ;;  %v5890_v61 = vshrl.u32 %v5805_v25, 16  ;;  %v8270_v58 = vsel %vm7942_vm0, %v17797_v8, 0 }
 0x520   : > { %v3407_v4 = vrot.slane %v21230_v50, %v16069_v59  ;;  %v21231_v37 = vshrl.u32 %v21182_v6, 16  ;;  %v6354_v2 = vcombine.high %v5880_v12, %v16066_v48  ;;  %13712 = vmatpush3.bf16.xpose.msra.mxu0 %v8270_v58  ;;  %v5419_v54 = vcombine.high %v21233_v24, %v21232_v46 }
 0x521   : > { %v3408_v7 = vcombine.low %v3383_v36, %v3391_v29  ;;  %v6361_v50 = vrot.slane %v5880_v12, %v16069_v59  ;;  %v5469_v36 = vcombine.high %v21235_v11, %v21234_v32  ;;  %v8415_v29 = vsel %vm7942_vm0, %v17810_v56, 0 }
 0x522   : > { %v3416_v17 = vcombine.low %v3399_v57, %v3407_v4  ;;  %v5884_v42 = vpack.i.b16 %v5883_v49, %v21231_v37  ;;  %v5888_v30 = vpack.i.b16 %v5821_v22, %v5805_v25  ;;  %v6368_v49 = vrot.slane %v6354_v2, %v16069_v59  ;;  %13744 = vmatpush3.bf16.xpose.msra.mxu1 %v8415_v29 }
 0x523   : > { %v17914_v8 = vrot.slane %v3408_v7, %v16073_v19  ;;  %v17921_v46 = vpack.i.b16 %v5469_v36, %v5419_v54  ;;  %v5891_v57 = vshrl.u32 %v5821_v22, 16  ;;  %v5739_v25 = vshrl.u32 %v5419_v54, 16  ;;  %v5791_v22 = vpop.permute.xlu0 %5790 }
 0x524   : > { %v17917_v6 = vrot.slane %v3416_v17, %v16073_v19  ;;  %v6420_v4 = vcombine.high %v5884_v42, %v16066_v48  ;;  %v6369_v11 = vcombine.high %v5888_v30, %v16066_v48  ;;  %v6376_v12 = vrot.slane %v5888_v30, %v16069_v59 }
 0x525   : > { %21236 = vst [vmem:[#allocation64_spill] sm:$0xff] %v17914_v8  ;;  %v6427_v7 = vrot.slane %v5884_v42, %v16069_v59  ;;  %v5740_v17 = vshrl.u32 %v5469_v36, 16  ;;  %13964 = vmatprep.subr.msk.bf16.mxu0 %vm7942_vm0, %v17921_v46  ;;  %v5892_v2 = vpack.i.b16 %v5891_v57, %v5890_v61 }
 0x526   : > { %21237 = vst [vmem:[#allocation67_spill] sm:$0xff] %v17917_v6  ;;  %v3424_v56 = vcombine.low %v17914_v8, %v17917_v6  ;;  %v6383_v58 = vrot.slane %v6369_v11, %v16069_v59  ;;  %v6384_v37 = vcombine.low %v6361_v50, %v6376_v12  ;;  %v6385_v24 = vcombine.high %v6361_v50, %v6376_v12  ;;  %v21239_v12 = vld [vmem:[#allocation45_spill] sm:$0xff] }
 0x527   : > { %v6434_v30 = vrot.slane %v6420_v4, %v16069_v59  ;;  %v17932_v23 = vpack.i.b16 %v5740_v17, %v5739_v25  ;;  %v6435_v50 = vcombine.high %v5892_v2, %v16066_v48  ;;  %v5899_v4 = vshrl.u32 %v5791_v22, 16  ;;  %v21252_v6 = vld [vmem:[#allocation85_spill] sm:$0xff] }
 0x528   : > { %v3600_v32 = vpack.i.b16 %v3424_v56, %v3374_v47  ;;  %v3602_v29 = vshrl.u32 %v3424_v56, 16  ;;  %v17935_v8 = vrot.slane %v6384_v37, %v16073_v19  ;;  %v17938_v42 = vrot.slane %v6385_v24, %v16073_v19  ;;  %v5823_v24 = vpop.permute.xlu0 %5822 }
 0x529   : > { %v6400_v54 = vcombine.low %v6368_v49, %v6383_v58  ;;  %v6401_v36 = vcombine.high %v6368_v49, %v6383_v58  ;;  %v6442_v47 = vrot.slane %v5892_v2, %v16069_v59  ;;  %13972 = vmatprep.subr.msk.bf16.mxu1 %vm7942_vm0, %v17932_v23  ;;  %v5898_v56 = vshrl.u32 %v21239_v12, 16  ;;  %v21251_v58 = vld [vmem:[#allocation83_spill] sm:$0xff] }
 0x52a   : > { %13667 = vmatprep.mubr.msk.bf16.mxu0 %vm7942_vm0, %v3600_v32  ;;  %v3603_v61 = vpack.i.b16 %v3602_v29, %v3601_v45  ;;  %v6449_v45 = vrot.slane %v6435_v50, %v16069_v59  ;;  %v5896_v2 = vpack.i.b16 %v5791_v22, %v21239_v12 }
 0x52b   : > { %v17946_v57 = vrot.slane %v6400_v54, %v16073_v19  ;;  %v17949_v11 = vrot.slane %v6401_v36, %v16073_v19  ;;  %v6450_v25 = vcombine.low %v6427_v7, %v6442_v47  ;;  %v6451_v17 = vcombine.high %v6427_v7, %v6442_v47 }
 0x52c   : > { %13699 = vmatprep.mubr.msk.bf16.mxu1 %vm7942_vm0, %v3603_v61  ;;  %v5900_v32 = vpack.i.b16 %v5899_v4, %v5898_v56  ;;  %v6466_v36 = vcombine.low %v6434_v30, %v6449_v45  ;;  %v6467_v7 = vcombine.high %v6434_v30, %v6449_v45  ;;  %v6486_v22 = vcombine.high %v5896_v2, %v16066_v48 }
 0x52d   : > { %21238 = vst [vmem:[#allocation66_spill] sm:$0xff] %v17949_v11  ;;  %v17964_v29 = vrot.slane %v6450_v25, %v16073_v19  ;;  %v17967_v54 = vrot.slane %v6451_v17, %v16073_v19  ;;  %v6493_v61 = vrot.slane %v5896_v2, %v16069_v59  ;;  %v21242_v47 = vcombine.low %v17506_v55, %v17509_v33 }
 0x52e   : > { %v6552_v50 = vcombine.high %v5900_v32, %v16066_v48  ;;  %v17977_v4 = vrot.slane %v6466_v36, %v16073_v19  ;;  %v17980_v56 = vrot.slane %v6467_v7, %v16073_v19  ;;  %v17985_v45 = vrot.slane %v5900_v32, %v16069_v59 }
 0x52f   : > { %21240 = vst [vmem:[#allocation69_spill] sm:$0xff] %v17964_v29  ;;  %21241 = vst [vmem:[#allocation68_spill] sm:$0xff] %v17967_v54  ;;  %v3449_v12 = vrot.slane %v21242_v47, %v16069_v59  ;;  %v6500_v17 = vrot.slane %v6486_v22, %v16069_v59  ;;  %v21245_v2 = vcombine.high %v17506_v55, %v17509_v33  ;;  %v5807_v47 = vpop.permute.xlu1 %5806 }
 0x530   : > { %21243 = vst [vmem:[#allocation71_spill] sm:$0xff] %v17977_v4  ;;  %21244 = vst [vmem:[#allocation70_spill] sm:$0xff] %v17980_v56  ;;  %v3458_v7 = vcombine.low %v17518_v39, %v17521_v28  ;;  %v21246_v32 = vcombine.low %v17512_v40, %v17515_v5  ;;  %v21247_v25 = vcombine.high %v17512_v40, %v17515_v5  ;;  %v21253_v40 = vld [vmem:[#allocation48_spill] sm:$0xff]  ;;  %v5906_v56 = vshrl.u32 %v5807_v47, 16 }
 0x531   : > { %v3457_v36 = vrot.slane %v21245_v2, %v16069_v59  ;;  %v21248_v55 = vcombine.low %v17527_v26, %v17530_v27  ;;  %v21249_v39 = vcombine.high %v17527_v26, %v17530_v27  ;;  %v18013_v2 = vrot.slane %v6552_v50, %v16069_v59 }
 0x532   : > { %v3483_v30 = vrot.slane %v21246_v32, %v16069_v59  ;;  %v3491_v22 = vrot.slane %v21247_v25, %v16069_v59  ;;  %v21250_v32 = vld [vmem:[#allocation84_spill] sm:$0xff]  ;;  %v2825_v5 = vcombine.high %v21253_v40, %v21252_v6  ;;  %v5904_v54 = vpack.i.b16 %v5823_v24, %v5807_v47 }
 0x533   : > { %v3499_v33 = vrot.slane %v21248_v55, %v16069_v59  ;;  %v3507_v28 = vrot.slane %v21249_v39, %v16069_v59  ;;  %v3466_v37 = vcombine.low %v3449_v12, %v3457_v36  ;;  %v2775_v49 = vcombine.high %v21251_v58, %v21250_v32  ;;  %v5793_v11 = vpop.permute.xlu1 %5792 }
 0x534   : > { %v3508_v25 = vcombine.low %v3483_v30, %v3491_v22  ;;  %v18020_v55 = vrot.slane %v3458_v7, %v16073_v19  ;;  %v5907_v36 = vshrl.u32 %v5823_v24, 16  ;;  %v6501_v6 = vcombine.high %v5904_v54, %v16066_v48  ;;  %v21259_v24 = vld [vmem:[#allocation75_spill] sm:$0xff] }
 0x535   : > { %v3516_v4 = vcombine.low %v3499_v33, %v3507_v28  ;;  %v18023_v26 = vrot.slane %v3466_v37, %v16073_v19  ;;  %v3534_v27 = vpack.i.b16 %v2825_v5, %v2775_v49  ;;  %v3535_v50 = vshrl.u32 %v2775_v49, 16 }
 0x536   : > { %21254 = vst [vmem:[#allocation45_spill] sm:$0xff] %v18020_v55  ;;  %v18026_v12 = vrot.slane %v3508_v25, %v16073_v19  ;;  %v3536_v47 = vshrl.u32 %v2825_v5, 16  ;;  %v6508_v7 = vrot.slane %v5904_v54, %v16069_v59  ;;  %v8273_v37 = vsel %vm7942_vm0, %v17921_v46, 0  ;;  %v21260_v25 = vld [vmem:[#allocation79_spill] sm:$0xff]  ;;  %v21261_v5 = vld [vmem:[#allocation78_spill] sm:$0xff] }
 0x537   : > { %21255 = vst [vmem:[#allocation84_spill] sm:$0xff] %v18023_v26  ;;  %v18029_v58 = vrot.slane %v3516_v4, %v16073_v19  ;;  %v3474_v30 = vcombine.low %v18020_v55, %v18023_v26  ;;  %v5908_v22 = vpack.i.b16 %v5907_v36, %v5906_v56  ;;  %v6515_v33 = vrot.slane %v6501_v6, %v16069_v59  ;;  %v21258_v4 = vld [vmem:[#allocation76_spill] sm:$0xff] }
 0x538   : > { %21256 = vst [vmem:[#allocation83_spill] sm:$0xff] %v18026_v12  ;;  %13714 = vmatpush3.bf16.xpose.msra.mxu0 %v8273_v37  ;;  %v5519_v39 = vcombine.high %v21259_v24, %v21258_v4  ;;  %v6516_v32 = vcombine.low %v6493_v61, %v6508_v7  ;;  %v6517_v40 = vcombine.high %v6493_v61, %v6508_v7  ;;  %v5809_v37 = vpop.permute.xlu0 %5808 }
 0x539   : > { %21257 = vst [vmem:[#allocation85_spill] sm:$0xff] %v18029_v58  ;;  %v3524_v49 = vcombine.low %v18026_v12, %v18029_v58  ;;  %v3613_v28 = vshrl.u32 %v3474_v30, 16  ;;  %v5569_v55 = vcombine.high %v21261_v5, %v21260_v25  ;;  %v6532_v29 = vcombine.low %v6500_v17, %v6515_v33 }
 0x53a   : > { %v6533_v46 = vcombine.high %v6500_v17, %v6515_v33  ;;  %v18045_v12 = vrot.slane %v6516_v32, %v16073_v19  ;;  %v18048_v56 = vrot.slane %v6517_v40, %v16073_v19  ;;  %v6567_v36 = vcombine.high %v5908_v22, %v16066_v48  ;;  %v21262_v40 = vld [vmem:[#allocation44_spill] sm:$0xff] }
 0x53b   : > { %v3612_v54 = vpack.i.b16 %v3524_v49, %v3474_v30  ;;  %v3614_v26 = vshrl.u32 %v3524_v49, 16  ;;  %v6574_v6 = vrot.slane %v5908_v22, %v16069_v59  ;;  %v18054_v7 = vrot.slane %v6532_v29, %v16073_v19  ;;  %v21267_v29 = vld [vmem:[#allocation80_spill] sm:$0xff] }
 0x53c   : > { %v18057_v30 = vrot.slane %v6533_v46, %v16073_v19  ;;  %v5750_v17 = vpack.i.b16 %v5569_v55, %v5519_v39  ;;  %v3537_v49 = vpack.i.b16 %v3536_v47, %v3535_v50  ;;  %v6581_v33 = vrot.slane %v6567_v36, %v16069_v59 }
 0x53d   : > { %13668 = vmatmul.mubr.msk.bf16.gmra.mrb[44].mxu0 %vm7942_vm0, %v3612_v54  ;;  %v3615_v61 = vpack.i.b16 %v3614_v26, %v3613_v28  ;;  %v6582_v4 = vcombine.low %v17985_v45, %v6574_v6  ;;  %v6583_v22 = vcombine.high %v17985_v45, %v6574_v6  ;;  %v5914_v25 = vshrl.u32 %v21262_v40, 16  ;;  %v5825_v54 = vpop.permute.xlu1 %5824  ;;  %v21265_v6 = vld [vmem:[#allocation47_spill] sm:$0xff] }
 0x53e   : > { %13719 = vmatprep.mubr.msk.bf16.mxu0 %vm7942_vm0, %v3534_v27  ;;  %13965 = vmatprep.subr.msk.bf16.mxu0 %vm7942_vm0, %v5750_v17  ;;  %v8418_v27 = vsel %vm7942_vm0, %v17932_v23, 0  ;;  %v6598_v47 = vcombine.low %v18013_v2, %v6581_v33  ;;  %v6599_v28 = vcombine.high %v18013_v2, %v6581_v33  ;;  %v5912_v23 = vpack.i.b16 %v5793_v11, %v21262_v40 }
 0x53f   : > { %13700 = vmatmul.mubr.msk.bf16.gmra.mrb[28].mxu1 %vm7942_vm0, %v3615_v61  ;;  %v18075_v45 = vrot.slane %v6582_v4, %v16073_v19  ;;  %v18078_v50 = vrot.slane %v6583_v22, %v16073_v19  ;;  %v5915_v5 = vshrl.u32 %v5793_v11, 16  ;;  %v5751_v2 = vshrl.u32 %v5519_v39, 16  ;;  %v5795_v22 = vpop.permute.xlu0 %5794 }
 0x540   : > { %13751 = vmatprep.mubr.msk.bf16.mxu1 %vm7942_vm0, %v3537_v49  ;;  %13746 = vmatpush3.bf16.xpose.msra.mxu1 %v8418_v27  ;;  %v18087_v46 = vrot.slane %v6598_v47, %v16073_v19  ;;  %v18090_v36 = vrot.slane %v6599_v28, %v16073_v19  ;;  %v6618_v33 = vcombine.high %v5912_v23, %v16066_v48  ;;  %v5752_v4 = vshrl.u32 %v5569_v55, 16 }
 0x541   : > { %v5916_v49 = vpack.i.b16 %v5915_v5, %v5914_v25  ;;  %v6625_v11 = vrot.slane %v5912_v23, %v16069_v59  ;;  %v5922_v27 = vshrl.u32 %v5809_v37, 16  ;;  %v5920_v47 = vpack.i.b16 %v5825_v54, %v5809_v37  ;;  %v5811_v58 = vpop.permute.xlu1 %5810 }
 0x542   : > { %21263 = vst [vmem:[#allocation48_spill] sm:$0xff] %v18087_v46  ;;  %21264 = vst [vmem:[#allocation76_spill] sm:$0xff] %v18090_v36  ;;  %v5923_v40 = vshrl.u32 %v5825_v54, 16  ;;  %v6632_v28 = vrot.slane %v6618_v33, %v16069_v59  ;;  %v5753_v24 = vpack.i.b16 %v5752_v4, %v5751_v2  ;;  %v5930_v39 = vshrl.u32 %v21265_v6, 16 }
 0x543   : > { %v6684_v32 = vcombine.high %v5916_v49, %v16066_v48  ;;  %v6633_v61 = vcombine.high %v5920_v47, %v16066_v48  ;;  %v6640_v25 = vrot.slane %v5920_v47, %v16069_v59  ;;  %v5928_v55 = vpack.i.b16 %v5795_v22, %v21265_v6 }
 0x544   : > { %v5924_v26 = vpack.i.b16 %v5923_v40, %v5922_v27  ;;  %v6691_v5 = vrot.slane %v5916_v49, %v16069_v59  ;;  %13973 = vmatprep.subr.msk.bf16.mxu1 %vm7942_vm0, %v5753_v24  ;;  %v5931_v37 = vshrl.u32 %v5795_v22, 16  ;;  %v8276_v54 = vsel %vm7942_vm0, %v5750_v17, 0  ;;  %v21266_v49 = vld [vmem:[#allocation54_spill] sm:$0xff] }
 0x545   : > { %v6698_v23 = vrot.slane %v6684_v32, %v16069_v59  ;;  %v6647_v2 = vrot.slane %v6633_v61, %v16069_v59  ;;  %v6648_v33 = vcombine.low %v6625_v11, %v6640_v25  ;;  %v6649_v4 = vcombine.high %v6625_v11, %v6640_v25  ;;  %13716 = vmatpush3.bf16.xpose.msra.mxu0 %v8276_v54 }
 0x546   : > { %v6699_v27 = vcombine.high %v5924_v26, %v16066_v48  ;;  %v6706_v47 = vrot.slane %v5924_v26, %v16069_v59  ;;  %v5932_v40 = vpack.i.b16 %v5931_v37, %v5930_v39  ;;  %v6750_v6 = vcombine.high %v5928_v55, %v16066_v48  ;;  %v5827_v39 = vpop.permute.xlu0 %5826 }
 0x547   : > { %v5619_v32 = vcombine.high %v21267_v29, %v21266_v49  ;;  %v18115_v22 = vrot.slane %v6648_v33, %v16073_v19  ;;  %v18118_v17 = vrot.slane %v6649_v4, %v16073_v19  ;;  %v6664_v61 = vcombine.low %v6632_v28, %v6647_v2 }
 0x548   : > { %v6665_v11 = vcombine.high %v6632_v28, %v6647_v2  ;;  %v6713_v25 = vrot.slane %v6699_v27, %v16069_v59  ;;  %v6714_v54 = vcombine.low %v6691_v5, %v6706_v47  ;;  %v6715_v46 = vcombine.high %v6691_v5, %v6706_v47  ;;  %v21275_v47 = vld [vmem:[#allocation82_spill] sm:$0xff]  ;;  %v21276_v27 = vld [vmem:[#allocation81_spill] sm:$0xff] }
 0x549   : > { %21268 = vst [vmem:[#allocation75_spill] sm:$0xff] %v18115_v22  ;;  %21269 = vst [vmem:[#allocation79_spill] sm:$0xff] %v18118_v17  ;;  %v6757_v26 = vrot.slane %v5928_v55, %v16069_v59  ;;  %v18123_v37 = vrot.slane %v6664_v61, %v16073_v19  ;;  %v6764_v4 = vrot.slane %v6750_v6, %v16069_v59  ;;  %v8421_v33 = vsel %vm7942_vm0, %v5753_v24, 0 }
 0x54a   : > { %v18126_v29 = vrot.slane %v6665_v11, %v16073_v19  ;;  %v18132_v28 = vrot.slane %v6714_v54, %v16073_v19  ;;  %v18135_v2 = vrot.slane %v6715_v46, %v16073_v19  ;;  %v6730_v5 = vcombine.low %v6698_v23, %v6713_v25  ;;  %13748 = vmatpush3.bf16.xpose.msra.mxu1 %v8421_v33  ;;  %v18159_v17 = vpop.permute.xlu0 %5812 }
 0x54b   : > { %21270 = vst [vmem:[#allocation78_spill] sm:$0xff] %v18123_v37  ;;  %v6731_v55 = vcombine.high %v6698_v23, %v6713_v25  ;;  %v6816_v61 = vcombine.high %v5932_v40, %v16066_v48  ;;  %v6823_v23 = vrot.slane %v5932_v40, %v16069_v59  ;;  %v5797_v25 = vpop.permute.xlu1 %5796  ;;  %v5669_v49 = vcombine.high %v21276_v27, %v21275_v47 }
 0x54c   : > { %21271 = vst [vmem:[#allocation44_spill] sm:$0xff] %v18126_v29  ;;  %21272 = vst [vmem:[#allocation47_spill] sm:$0xff] %v18135_v2  ;;  %v18145_v6 = vrot.slane %v6730_v5, %v16073_v19  ;;  %v5938_v29 = vshrl.u32 %v5811_v58, 16  ;;  %v5763_v5 = vshrl.u32 %v5619_v32, 16  ;;  %v5947_v36 = vshrl.u32 %v5797_v25, 16 }
 0x54d   : > { %v18148_v11 = vrot.slane %v6731_v55, %v16073_v19  ;;  %v5939_v55 = vshrl.u32 %v5827_v39, 16  ;;  %v5762_v46 = vpack.i.b16 %v5669_v49, %v5619_v32  ;;  %v5764_v40 = vshrl.u32 %v5669_v49, 16 }
 0x54e   : > { %21273 = vst [vmem:[#allocation54_spill] sm:$0xff] %v18145_v6  ;;  %v5936_v6 = vpack.i.b16 %v5827_v39, %v5811_v58  ;;  %v6830_v54 = vrot.slane %v6816_v61, %v16069_v59  ;;  %v5954_v47 = vshrl.u32 %v18159_v17, 16 }
 0x54f   : > { %21274 = vst [vmem:[#allocation80_spill] sm:$0xff] %v18148_v11  ;;  %v21277_v11 = vld [vmem:[#allocation46_spill] sm:$0xff]  ;;  %v5940_v2 = vpack.i.b16 %v5939_v55, %v5938_v29  ;;  %13966 = vmatprep.subr.msk.bf16.mxu0 %vm7942_vm0, %v5762_v46  ;;  %v5765_v58 = vpack.i.b16 %v5764_v40, %v5763_v5 }
 0x550   : > { %v5946_v37 = vshrl.u32 %v21277_v11, 16  ;;  %v5944_v22 = vpack.i.b16 %v5797_v25, %v21277_v11  ;;  %v6765_v27 = vcombine.high %v5936_v6, %v16066_v48  ;;  %v6772_v24 = vrot.slane %v5936_v6, %v16069_v59 }
 0x551   : > { %v6831_v25 = vcombine.high %v5940_v2, %v16066_v48  ;;  %13974 = vmatprep.subr.msk.bf16.mxu1 %vm7942_vm0, %v5765_v58  ;;  %v6838_v29 = vrot.slane %v5940_v2, %v16069_v59 }
 0x552   : > { %v5948_v39 = vpack.i.b16 %v5947_v36, %v5946_v37  ;;  %v6882_v33 = vcombine.high %v5944_v22, %v16066_v48  ;;  %v6779_v32 = vrot.slane %v6765_v27, %v16069_v59  ;;  %v6780_v49 = vcombine.low %v6757_v26, %v6772_v24 }
 0x553   : > { %v6781_v11 = vcombine.high %v6757_v26, %v6772_v24  ;;  %v18173_v61 = vrot.slane %v5944_v22, %v16069_v59  ;;  %v6845_v40 = vrot.slane %v6831_v25, %v16069_v59  ;;  %v6846_v27 = vcombine.low %v6823_v23, %v6838_v29 }
 0x554   : > { %v18176_v6 = vrot.slane %v6882_v33, %v16069_v59  ;;  %v6948_v36 = vcombine.high %v5948_v39, %v16066_v48  ;;  %v18180_v37 = vrot.slane %v6780_v49, %v16073_v19  ;;  %v6796_v26 = vcombine.low %v6764_v4, %v6779_v32 }
 0x555   : > { %v18183_v5 = vrot.slane %v6781_v11, %v16073_v19  ;;  %v6797_v55 = vcombine.high %v6764_v4, %v6779_v32  ;;  %v6847_v2 = vcombine.high %v6823_v23, %v6838_v29  ;;  %v18187_v22 = vrot.slane %v5948_v39, %v16069_v59  ;;  %v5829_v29 = vpop.permute.xlu1 %5828 }
 0x556   : > { %v18190_v24 = vrot.slane %v6796_v26, %v16073_v19  ;;  %v18198_v11 = vrot.slane %v6948_v36, %v16069_v59  ;;  %v18201_v4 = vrot.slane %v6846_v27, %v16073_v19  ;;  %v6862_v39 = vcombine.low %v6830_v54, %v6845_v40 }
 0x557   : > { %v18193_v33 = vrot.slane %v6797_v55, %v16073_v19  ;;  %v18204_v23 = vrot.slane %v6847_v2, %v16073_v19  ;;  %v6863_v32 = vcombine.high %v6830_v54, %v6845_v40  ;;  %v8279_v26 = vsel %vm7942_vm0, %v5762_v46, 0 }
 0x558   : > { %21278 = vst [vmem:[#allocation82_spill] sm:$0xff] %v18190_v24  ;;  %v21280_v36 = vcombine.low %v17600_v13, %v17603_v62  ;;  %v18216_v27 = vrot.slane %v6862_v39, %v16073_v19  ;;  %13718 = vmatpush3.bf16.xpose.msra.mxu0 %v8279_v26  ;;  %v21283_v46 = vcombine.high %v17600_v13, %v17603_v62  ;;  %v8424_v49 = vsel %vm7942_vm0, %v5765_v58, 0 }
 0x559   : > { %21279 = vst [vmem:[#allocation81_spill] sm:$0xff] %v18193_v33  ;;  %v18219_v2 = vrot.slane %v6863_v32, %v16073_v19  ;;  %v21284_v39 = vcombine.low %v17607_v63, %v17613_v43  ;;  %v21285_v32 = vcombine.high %v17607_v63, %v17613_v43  ;;  %v21286_v26 = vcombine.low %v17616_v9, %v17619_v35 }
 0x55a   : > { %v7021_v55 = vrot.slane %v21280_v36, %v16069_v59  ;;  %21281 = vst [vmem:[#allocation46_spill] sm:$0xff] %v18216_v27  ;;  %v7029_v25 = vrot.slane %v21283_v46, %v16069_v59  ;;  %v21287_v13 = vcombine.high %v17616_v9, %v17619_v35  ;;  %v7080_v46 = vcombine.low %v17628_v3, %v17638_v18  ;;  %v21288_v35 = vld [vmem:[#allocation73_spill] sm:$0xff] }
 0x55b   : > { %21282 = vst [vmem:[#allocation87_spill] sm:$0xff] %v18219_v2  ;;  %v7037_v36 = vrot.slane %v21284_v39, %v16069_v59  ;;  %v7045_v54 = vrot.slane %v21285_v32, %v16069_v59  ;;  %v7071_v40 = vrot.slane %v21286_v26, %v16069_v59  ;;  %v13235_v39 = vcombine.high %v17628_v3, %v17638_v18 }
 0x55c   : > { %v7079_v62 = vrot.slane %v21287_v13, %v16069_v59  ;;  %v7046_v63 = vcombine.low %v7021_v55, %v7029_v25  ;;  %13750 = vmatpush3.bf16.xpose.msra.mxu1 %v8424_v49  ;;  %v5952_v32 = vpack.i.b16 %v5829_v29, %v18159_v17  ;;  %v5955_v27 = vshrl.u32 %v5829_v29, 16  ;;  %v21289_v13 = vld [vmem:[#allocation72_spill] sm:$0xff]  ;;  %v21290_v29 = vld [vmem:[#allocation49_spill] sm:$0xff]  ;;  %v21291_v55 = vld [vmem:[#allocation74_spill] sm:$0xff] }
 0x55d   : > { %v7054_v43 = vcombine.low %v7037_v36, %v7045_v54  ;;  %v7087_v26 = vrot.slane %v7080_v46, %v16069_v59  ;;  %v7095_v2 = vrot.slane %v13235_v39, %v16069_v59  ;;  %v2875_v33 = vcombine.high %v21289_v13, %v21288_v35 }
 0x55e   : > { %v7096_v9 = vcombine.low %v7071_v40, %v7079_v62  ;;  %v18256_v24 = vrot.slane %v7046_v63, %v16073_v19  ;;  %v5956_v18 = vpack.i.b16 %v5955_v27, %v5954_v47  ;;  %v6897_v58 = vcombine.high %v5952_v32, %v16066_v48 }
 0x55f   : > { %v18259_v3 = vrot.slane %v7054_v43, %v16073_v19  ;;  %v7104_v49 = vcombine.low %v7087_v26, %v7095_v2  ;;  %v6904_v25 = vrot.slane %v5952_v32, %v16069_v59  ;;  %v2925_v54 = vcombine.high %v21291_v55, %v21290_v29 }
 0x560   : > { %v18263_v17 = vrot.slane %v7096_v9, %v16073_v19  ;;  %v6911_v36 = vrot.slane %v6897_v58, %v16069_v59  ;;  %v6963_v62 = vcombine.high %v5956_v18, %v16066_v48  ;;  %v6970_v47 = vrot.slane %v5956_v18, %v16069_v59 }
 0x561   : > { %v7062_v40 = vcombine.low %v18256_v24, %v18259_v3  ;;  %v18274_v27 = vrot.slane %v7104_v49, %v16073_v19  ;;  %v6912_v46 = vcombine.low %v18173_v61, %v6904_v25  ;;  %v6913_v2 = vcombine.high %v18173_v61, %v6904_v25 }
 0x562   : > { %v3546_v39 = vpack.i.b16 %v2925_v54, %v2875_v33  ;;  %v6928_v63 = vcombine.low %v18176_v6, %v6911_v36  ;;  %v6929_v43 = vcombine.high %v18176_v6, %v6911_v36  ;;  %v6977_v32 = vrot.slane %v6963_v62, %v16069_v59 }
 0x563   : > { %v6978_v26 = vcombine.low %v18187_v22, %v6970_v47  ;;  %v7112_v9 = vcombine.low %v18263_v17, %v18274_v27  ;;  %v18285_v35 = vrot.slane %v6912_v46, %v16073_v19  ;;  %v18288_v13 = vrot.slane %v6913_v2, %v16073_v19 }
 0x564   : > { %v6979_v61 = vcombine.high %v18187_v22, %v6970_v47  ;;  %13720 = vmatmul.mubr.msk.bf16.vlgmr.msra.gmra.mrb[48].mxu0 %vm7942_vm0, %v3546_v39  ;;  %v18293_v18 = vrot.slane %v6928_v63, %v16073_v19  ;;  %v18296_v6 = vrot.slane %v6929_v43, %v16073_v19  ;;  %v6994_v49 = vcombine.low %v18198_v11, %v6977_v32  ;;  %v21295_v47 = vld [vmem:[#allocation77_spill] sm:$0xff] }
 0x565   : > { %v18299_v58 = vrot.slane %v6978_v26, %v16073_v19  ;;  %v7816_v29 = vpack.i.b16 %v7112_v9, %v7062_v40  ;;  %v6995_v22 = vcombine.high %v18198_v11, %v6977_v32  ;;  %v7818_v63 = vshrl.u32 %v7062_v40, 16  ;;  %v21292_v32 = vld [vmem:[#allocation86_spill] sm:$0xff]  ;;  %v21293_v26 = vld [vmem:[#allocation55_spill] sm:$0xff] }
 0x566   : > { %v18305_v55 = vrot.slane %v6979_v61, %v16073_v19  ;;  %v18309_v36 = vrot.slane %v6994_v49, %v16073_v19  ;;  %v13261_v39 = vcombine.high %v18293_v18, %v18296_v6  ;;  %v7819_v43 = vshrl.u32 %v7112_v9, 16  ;;  %v21294_v49 = vld [vmem:[#allocation50_spill] sm:$0xff] }
 0x567   : > { %13767 = vmatprep.subr.bf16.mxu0 %v7816_v29  ;;  %v18318_v2 = vrot.slane %v6995_v22, %v16073_v19  ;;  %v2975_v61 = vcombine.high %v21293_v26, %v21292_v32  ;;  %v3025_v62 = vcombine.high %v21295_v47, %v21294_v49  ;;  %v3547_v46 = vshrl.u32 %v2875_v33, 16 }
 0x568   : > { %13768 = vmatpush3.bf16.msra.mxu0 %v7816_v29  ;;  %v3548_v25 = vshrl.u32 %v2925_v54, 16  ;;  %v21296_v22 = vcombine.low %v17705_v10, %v17708_v38  ;;  %v21297_v11 = vcombine.high %v17705_v10, %v17708_v38  ;;  %v21298_v9 = vcombine.low %v17714_v34, %v17717_v53 }
 0x569   : > { %v7820_v26 = vpack.i.b16 %v7819_v43, %v7818_v63  ;;  %v3558_v47 = vpack.i.b16 %v3025_v62, %v2975_v61  ;;  %v21299_v33 = vcombine.high %v17714_v34, %v17717_v53  ;;  %v21300_v29 = vcombine.low %v17725_v16, %v17728_v21 }
 0x56a   : > { %v7121_v48 = vrot.slane %v21296_v22, %v16069_v59  ;;  %v7129_v40 = vrot.slane %v21297_v11, %v16069_v59  ;;  %v7137_v32 = vrot.slane %v21298_v9, %v16069_v59  ;;  %v3549_v22 = vpack.i.b16 %v3548_v25, %v3547_v46 }
 0x56b   : > { %v7145_v54 = vrot.slane %v21299_v33, %v16069_v59  ;;  %v7171_v49 = vrot.slane %v21300_v29, %v16069_v59  ;;  %v21301_v38 = vcombine.high %v17725_v16, %v17728_v21  ;;  %v7180_v63 = vcombine.low %v17738_v60, %v17741_v31  ;;  %13799 = vmatprep.subr.bf16.mxu1 %v7820_v26 }
 0x56c   : > { %v7146_v10 = vcombine.low %v7121_v48, %v7129_v40  ;;  %13723 = vmatprep.mubr.msk.bf16.mxu0 %vm7942_vm0, %v3558_v47  ;;  %v13239_v53 = vcombine.high %v17738_v60, %v17741_v31  ;;  %v3559_v43 = vshrl.u32 %v2975_v61, 16  ;;  %v3560_v9 = vshrl.u32 %v3025_v62, 16  ;;  %13752 = vmatmul.mubr.msk.bf16.vlgmr.msra.gmra.mrb[32].mxu1 %vm7942_vm0, %v3549_v22 }
 0x56d   : > { %v7179_v11 = vrot.slane %v21301_v38, %v16069_v59  ;;  %v7154_v34 = vcombine.low %v7137_v32, %v7145_v54  ;;  %v7187_v16 = vrot.slane %v7180_v63, %v16069_v59  ;;  %v21302_v25 = vcombine.low %v17830_v15, %v17833_v51  ;;  %13800 = vmatpush3.bf16.msra.mxu1 %v7820_v26  ;;  %v21308_v63 = vld [vmem:[#allocation57_spill] sm:$0xff] }
 0x56e   : > { %v18359_v48 = vrot.slane %v7146_v10, %v16073_v19  ;;  %v7195_v60 = vrot.slane %v13239_v53, %v16069_v59  ;;  %v3561_v31 = vpack.i.b16 %v3560_v9, %v3559_v43  ;;  %v21303_v62 = vcombine.high %v17830_v15, %v17833_v51 }
 0x56f   : > { %v7196_v21 = vcombine.low %v7171_v49, %v7179_v11  ;;  %v7221_v46 = vrot.slane %v21302_v25, %v16069_v59  ;;  %v18367_v40 = vrot.slane %v7154_v34, %v16073_v19  ;;  %v21304_v47 = vcombine.low %v17844_v20, %v17847_v0  ;;  %v21309_v25 = vld [vmem:[#allocation59_spill] sm:$0xff] }
 0x570   : > { %v7229_v61 = vrot.slane %v21303_v62, %v16069_v59  ;;  %v21305_v54 = vcombine.high %v17844_v20, %v17847_v0  ;;  %v21306_v26 = vcombine.low %v17853_v1, %v17856_v44  ;;  %v7204_v51 = vcombine.low %v7187_v16, %v7195_v60  ;;  %13755 = vmatprep.mubr.msk.bf16.mxu1 %vm7942_vm0, %v3561_v31  ;;  %v21311_v60 = vld [vmem:[#allocation41_spill] sm:$0xff]  ;;  %v21312_v31 = vld [vmem:[#allocation58_spill] sm:$0xff] }
 0x571   : > { %v18375_v32 = vrot.slane %v7196_v21, %v16073_v19  ;;  %v7237_v33 = vrot.slane %v21304_v47, %v16069_v59  ;;  %v7162_v15 = vcombine.low %v18359_v48, %v18367_v40  ;;  %v21307_v10 = vcombine.high %v17853_v1, %v17856_v44  ;;  %v21314_v47 = vld [vmem:[#allocation42_spill] sm:$0xff] }
 0x572   : > { %v7245_v29 = vrot.slane %v21305_v54, %v16069_v59  ;;  %v7271_v49 = vrot.slane %v21306_v26, %v16069_v59  ;;  %v7246_v22 = vcombine.low %v7221_v46, %v7229_v61  ;;  %v7280_v20 = vcombine.low %v17871_v41, %v17874_v14  ;;  %v21313_v61 = vld [vmem:[#allocation61_spill] sm:$0xff] }
 0x573   : > { %v7279_v38 = vrot.slane %v21307_v10, %v16069_v59  ;;  %v13243_v0 = vcombine.high %v17871_v41, %v17874_v14  ;;  %v3075_v34 = vcombine.high %v21308_v63, %v17571_v52  ;;  %v18403_v53 = vrot.slane %v7204_v51, %v16073_v19  ;;  %v21310_v41 = vld [vmem:[#allocation56_spill] sm:$0xff] }
 0x574   : > { %v7254_v11 = vcombine.low %v7237_v33, %v7245_v29  ;;  %v7834_v43 = vshrl.u32 %v7162_v15, 16  ;;  %v18406_v9 = vrot.slane %v7246_v22, %v16073_v19  ;;  %v7287_v44 = vrot.slane %v7280_v20, %v16069_v59 }
 0x575   : > { %v7296_v16 = vcombine.low %v7271_v49, %v7279_v38  ;;  %v7295_v21 = vrot.slane %v13243_v0, %v16069_v59  ;;  %v3125_v14 = vcombine.high %v21310_v41, %v21309_v25  ;;  %v7212_v52 = vcombine.low %v18375_v32, %v18403_v53 }
 0x576   : > { %v18409_v1 = vrot.slane %v7254_v11, %v16073_v19  ;;  %v3175_v62 = vcombine.high %v21312_v31, %v21311_v60  ;;  %v3225_v33 = vcombine.high %v21314_v47, %v21313_v61  ;;  %v3571_v49 = vshrl.u32 %v3075_v34, 16  ;;  %v21321_v31 = vld [vmem:[#allocation68_spill] sm:$0xff] }
 0x577   : > { %v18418_v46 = vrot.slane %v7296_v16, %v16073_v19  ;;  %v7304_v29 = vcombine.low %v7287_v44, %v7295_v21  ;;  %v3570_v26 = vpack.i.b16 %v3125_v14, %v3075_v34  ;;  %v7832_v51 = vpack.i.b16 %v7212_v52, %v7162_v15  ;;  %v21317_v21 = vld [vmem:[#allocation66_spill] sm:$0xff] }
 0x578   : > { %v7262_v54 = vcombine.low %v18406_v9, %v18409_v1  ;;  %v7835_v22 = vshrl.u32 %v7212_v52, 16  ;;  %v3582_v10 = vpack.i.b16 %v3225_v33, %v3175_v62  ;;  %v3572_v38 = vshrl.u32 %v3125_v14, 16 }
 0x579   : > { %v18427_v11 = vrot.slane %v7304_v29, %v16073_v19  ;;  %13724 = vmatmul.mubr.msk.bf16.gmra.mrb[52].mxu0 %vm7942_vm0, %v3570_v26  ;;  %v21315_v0 = vcombine.low %v17935_v8, %v17938_v42  ;;  %v21316_v16 = vcombine.high %v17935_v8, %v17938_v42  ;;  %13769 = vmatprep.subr.bf16.mxu0 %v7832_v51  ;;  %v3583_v14 = vshrl.u32 %v3175_v62, 16  ;;  %v21324_v26 = vld [vmem:[#allocation70_spill] sm:$0xff] }
 0x57a   : > { %v7850_v20 = vshrl.u32 %v7262_v54, 16  ;;  %v7836_v15 = vpack.i.b16 %v7835_v22, %v7834_v43  ;;  %13727 = vmatprep.mubr.msk.bf16.mxu0 %vm7942_vm0, %v3582_v10  ;;  %v3573_v44 = vpack.i.b16 %v3572_v38, %v3571_v49  ;;  %v21318_v25 = vcombine.low %v17946_v57, %v21317_v21  ;;  %13770 = vmatpush3.bf16.msra.mxu0 %v7832_v51  ;;  %v21320_v43 = vld [vmem:[#allocation69_spill] sm:$0xff]  ;;  %v21325_v49 = vld [vmem:[#allocation71_spill] sm:$0xff] }
 0x57b   : > { %v7321_v63 = vrot.slane %v21315_v0, %v16069_v59  ;;  %v7329_v34 = vrot.slane %v21316_v16, %v16069_v59  ;;  %v7312_v52 = vcombine.low %v18418_v46, %v18427_v11  ;;  %v21319_v8 = vcombine.high %v17946_v57, %v21317_v21 }
 0x57c   : > { %v7337_v41 = vrot.slane %v21318_v25, %v16069_v59  ;;  %v21322_v61 = vcombine.low %v21320_v43, %v21321_v31  ;;  %13801 = vmatprep.subr.bf16.mxu1 %v7836_v15  ;;  %13756 = vmatmul.mubr.msk.bf16.gmra.mrb[36].mxu1 %vm7942_vm0, %v3573_v44  ;;  %v21323_v62 = vcombine.high %v21320_v43, %v21321_v31  ;;  %v3584_v22 = vshrl.u32 %v3225_v33, 16 }
 0x57d   : > { %v7345_v42 = vrot.slane %v21319_v8, %v16069_v59  ;;  %v7346_v60 = vcombine.low %v7321_v63, %v7329_v34  ;;  %v7380_v51 = vcombine.low %v21325_v49, %v21324_v26  ;;  %v13247_v57 = vcombine.high %v21325_v49, %v21324_v26  ;;  %13802 = vmatpush3.bf16.msra.mxu1 %v7836_v15  ;;  %v21332_v26 = vld [vmem:[#allocation76_spill] sm:$0xff] }
 0x57e   : > { %v7371_v47 = vrot.slane %v21322_v61, %v16069_v59  ;;  %v7379_v29 = vrot.slane %v21323_v62, %v16069_v59  ;;  %v7848_v10 = vpack.i.b16 %v7312_v52, %v7262_v54  ;;  %v7851_v38 = vshrl.u32 %v7312_v52, 16  ;;  %v21333_v49 = vld [vmem:[#allocation48_spill] sm:$0xff] }
 0x57f   : > { %v18463_v0 = vrot.slane %v7346_v60, %v16073_v19  ;;  %v7354_v63 = vcombine.low %v7337_v41, %v7345_v42  ;;  %v7387_v16 = vrot.slane %v7380_v51, %v16069_v59  ;;  %v7395_v34 = vrot.slane %v13247_v57, %v16069_v59 }
 0x580   : > { %v7396_v44 = vcombine.low %v7371_v47, %v7379_v29  ;;  %v3585_v21 = vpack.i.b16 %v3584_v22, %v3583_v14  ;;  %13771 = vmatprep.subr.bf16.mxu0 %v7848_v10  ;;  %v7852_v25 = vpack.i.b16 %v7851_v38, %v7850_v20  ;;  %v21326_v33 = vcombine.low %v18045_v12, %v18048_v56  ;;  %v21335_v38 = vld [vmem:[#allocation60_spill] sm:$0xff] }
 0x581   : > { %v18468_v8 = vrot.slane %v7354_v63, %v16073_v19  ;;  %v21327_v15 = vcombine.high %v18045_v12, %v18048_v56  ;;  %13772 = vmatpush3.bf16.msra.mxu0 %v7848_v10  ;;  %v7404_v14 = vcombine.low %v7387_v16, %v7395_v34  ;;  %v21328_v20 = vcombine.low %v18054_v7, %v18057_v30  ;;  %v21334_v10 = vld [vmem:[#allocation63_spill] sm:$0xff] }
 0x582   : > { %v7421_v54 = vrot.slane %v21326_v33, %v16069_v59  ;;  %v18479_v52 = vrot.slane %v7396_v44, %v16073_v19  ;;  %13759 = vmatprep.mubr.msk.bf16.mxu1 %vm7942_vm0, %v3585_v21  ;;  %13803 = vmatprep.subr.bf16.mxu1 %v7852_v25  ;;  %v21329_v12 = vcombine.high %v18054_v7, %v18057_v30  ;;  %v21336_v21 = vld [vmem:[#allocation40_spill] sm:$0xff] }
 0x583   : > { %v7429_v41 = vrot.slane %v21327_v15, %v16069_v59  ;;  %v7437_v42 = vrot.slane %v21328_v20, %v16069_v59  ;;  %v7362_v60 = vcombine.low %v18463_v0, %v18468_v8  ;;  %v21330_v31 = vcombine.low %v18075_v45, %v18078_v50  ;;  %13804 = vmatpush3.bf16.msra.mxu1 %v7852_v25  ;;  %v21337_v25 = vld [vmem:[#allocation62_spill] sm:$0xff]  ;;  %v21339_v15 = vld [vmem:[#allocation43_spill] sm:$0xff]  ;;  %v21341_v20 = vld [vmem:[#allocation64_spill] sm:$0xff] }
 0x584   : > { %v7445_v56 = vrot.slane %v21329_v12, %v16069_v59  ;;  %v18497_v47 = vrot.slane %v7404_v14, %v16073_v19  ;;  %v21331_v62 = vcombine.high %v18075_v45, %v18078_v50  ;;  %v7480_v51 = vcombine.low %v21333_v49, %v21332_v26  ;;  %v21340_v14 = vld [vmem:[#allocation67_spill] sm:$0xff] }
 0x585   : > { %v7446_v43 = vcombine.low %v7421_v54, %v7429_v41  ;;  %v7471_v61 = vrot.slane %v21330_v31, %v16069_v59  ;;  %v13251_v7 = vcombine.high %v21333_v49, %v21332_v26  ;;  %v7866_v30 = vshrl.u32 %v7362_v60, 16  ;;  %v21338_v54 = vld [vmem:[#allocation65_spill] sm:$0xff] }
 0x586   : > { %v7479_v29 = vrot.slane %v21331_v62, %v16069_v59  ;;  %v7454_v22 = vcombine.low %v7437_v42, %v7445_v56  ;;  %v3275_v63 = vcombine.high %v21335_v38, %v21334_v10  ;;  %v7412_v16 = vcombine.low %v18479_v52, %v18497_v47 }
 0x587   : > { %v18508_v57 = vrot.slane %v7446_v43, %v16073_v19  ;;  %v7487_v45 = vrot.slane %v7480_v51, %v16069_v59  ;;  %v7495_v50 = vrot.slane %v13251_v7, %v16069_v59  ;;  %v3325_v33 = vcombine.high %v21337_v25, %v21336_v21 }
 0x588   : > { %v7496_v34 = vcombine.low %v7471_v61, %v7479_v29  ;;  %v18517_v44 = vrot.slane %v7454_v22, %v16073_v19  ;;  %v3375_v41 = vcombine.high %v21339_v15, %v21338_v54  ;;  %v3425_v42 = vcombine.high %v21341_v20, %v21340_v14  ;;  %v21342_v22 = vld [vmem:[#allocation75_spill] sm:$0xff] }
 0x589   : > { %v7864_v12 = vpack.i.b16 %v7412_v16, %v7362_v60  ;;  %v7867_v56 = vshrl.u32 %v7412_v16, 16  ;;  %v7504_v31 = vcombine.low %v7487_v45, %v7495_v50  ;;  %v3594_v62 = vpack.i.b16 %v3325_v33, %v3275_v63  ;;  %v21343_v60 = vld [vmem:[#allocation79_spill] sm:$0xff] }
 0x58a   : > { %v18526_v43 = vrot.slane %v7496_v34, %v16073_v19  ;;  %v7462_v61 = vcombine.low %v18508_v57, %v18517_v44  ;;  %v3606_v29 = vpack.i.b16 %v3425_v42, %v3375_v41  ;;  %v3595_v26 = vshrl.u32 %v3275_v63, 16  ;;  %v21346_v63 = vld [vmem:[#allocation78_spill] sm:$0xff]  ;;  %v21347_v34 = vld [vmem:[#allocation44_spill] sm:$0xff]  ;;  %v21350_v14 = vld [vmem:[#allocation47_spill] sm:$0xff] }
 0x58b   : > { %13773 = vmatprep.subr.bf16.mxu0 %v7864_v12  ;;  %v7868_v49 = vpack.i.b16 %v7867_v56, %v7866_v30  ;;  %v18531_v51 = vrot.slane %v7504_v31, %v16073_v19  ;;  %v3596_v7 = vshrl.u32 %v3325_v33, 16  ;;  %v21344_v10 = vcombine.low %v21342_v22, %v21343_v60  ;;  %13728 = vmatmul.mubr.msk.bf16.gmra.mrb[56].mxu0 %vm7942_vm0, %v3594_v62 }
 0x58c   : > { %13774 = vmatpush3.bf16.msra.mxu0 %v7864_v12  ;;  %v7882_v16 = vshrl.u32 %v7462_v61, 16  ;;  %v21345_v45 = vcombine.high %v21342_v22, %v21343_v60  ;;  %v21348_v30 = vcombine.low %v21346_v63, %v21347_v34  ;;  %v21349_v25 = vcombine.high %v21346_v63, %v21347_v34  ;;  %13731 = vmatprep.mubr.msk.bf16.mxu0 %vm7942_vm0, %v3606_v29 }
 0x58d   : > { %v7521_v38 = vrot.slane %v21344_v10, %v16069_v59  ;;  %13805 = vmatprep.subr.bf16.mxu1 %v7868_v49  ;;  %v7512_v54 = vcombine.low %v18526_v43, %v18531_v51  ;;  %v3597_v15 = vpack.i.b16 %v3596_v7, %v3595_v26  ;;  %v21351_v20 = vcombine.low %v18132_v28, %v21350_v14  ;;  %v21353_v26 = vld [vmem:[#allocation80_spill] sm:$0xff]  ;;  %v21354_v7 = vld [vmem:[#allocation54_spill] sm:$0xff] }
 0x58e   : > { %v7529_v50 = vrot.slane %v21345_v45, %v16069_v59  ;;  %v7537_v21 = vrot.slane %v21348_v30, %v16069_v59  ;;  %v7545_v33 = vrot.slane %v21349_v25, %v16069_v59  ;;  %v3607_v56 = vshrl.u32 %v3375_v41, 16  ;;  %13806 = vmatpush3.bf16.msra.mxu1 %v7868_v49 }
 0x58f   : > { %v7571_v12 = vrot.slane %v21351_v20, %v16069_v59  ;;  %v21352_v60 = vcombine.high %v18132_v28, %v21350_v14  ;;  %v3608_v45 = vshrl.u32 %v3425_v42, 16  ;;  %v7880_v63 = vpack.i.b16 %v7512_v54, %v7462_v61  ;;  %13760 = vmatmul.mubr.msk.bf16.gmra.mrb[40].mxu1 %vm7942_vm0, %v3597_v15  ;;  %v21357_v14 = vld [vmem:[#allocation82_spill] sm:$0xff]  ;;  %v21358_v20 = vld [vmem:[#allocation81_spill] sm:$0xff] }
 0x590   : > { %v7546_v31 = vcombine.low %v7521_v38, %v7529_v50  ;;  %v7554_v22 = vcombine.low %v7537_v21, %v7545_v33  ;;  %v7883_v62 = vshrl.u32 %v7512_v54, 16  ;;  %v7580_v34 = vcombine.low %v21354_v7, %v21353_v26 }
 0x591   : > { %v7579_v10 = vrot.slane %v21352_v60, %v16069_v59  ;;  %v13255_v41 = vcombine.high %v21354_v7, %v21353_v26  ;;  %v3609_v28 = vpack.i.b16 %v3608_v45, %v3607_v56  ;;  %13775 = vmatprep.subr.bf16.mxu0 %v7880_v63  ;;  %v21355_v30 = vcombine.low %v18180_v37, %v18183_v5  ;;  %v21364_v26 = vld [vmem:[#allocation46_spill] sm:$0xff] }
 0x592   : > { %v18567_v29 = vrot.slane %v7546_v31, %v16073_v19  ;;  %v18570_v49 = vrot.slane %v7554_v22, %v16073_v19  ;;  %v7884_v42 = vpack.i.b16 %v7883_v62, %v7882_v16  ;;  %v7587_v61 = vrot.slane %v7580_v34, %v16069_v59  ;;  %13776 = vmatpush3.bf16.msra.mxu0 %v7880_v63  ;;  %v21363_v62 = vld [vmem:[#allocation87_spill] sm:$0xff] }
 0x593   : > { %v7596_v38 = vcombine.low %v7571_v12, %v7579_v10  ;;  %v7595_v50 = vrot.slane %v13255_v41, %v16069_v59  ;;  %v7621_v21 = vrot.slane %v21355_v30, %v16069_v59  ;;  %v13262_v25 = vcombine.high %v18299_v58, %v18305_v55  ;;  %13763 = vmatprep.mubr.msk.bf16.mxu1 %vm7942_vm0, %v3609_v28 }
 0x594   : > { %v7562_v33 = vcombine.low %v18567_v29, %v18570_v49  ;;  %v21356_v16 = vcombine.high %v18180_v37, %v18183_v5  ;;  %13807 = vmatprep.subr.bf16.mxu1 %v7884_v42  ;;  %v21359_v12 = vcombine.low %v21357_v14, %v21358_v20  ;;  %v21360_v31 = vcombine.high %v21357_v14, %v21358_v20 }
 0x595   : > { %v7604_v15 = vcombine.low %v7587_v61, %v7595_v50  ;;  %v21361_v60 = vcombine.low %v18201_v4, %v18204_v23  ;;  %v18600_v37 = vrot.slane %v7596_v38, %v16073_v19  ;;  %13808 = vmatpush3.bf16.msra.mxu1 %v7884_v42  ;;  %v21362_v45 = vcombine.high %v18201_v4, %v18204_v23  ;;  %v21365_v61 = vld [vmem:[#allocation84_spill] sm:$0xff]  ;;  %v21366_v38 = vld [vmem:[#allocation45_spill] sm:$0xff] }
 0x596   : > { %v7629_v54 = vrot.slane %v21356_v16, %v16069_v59  ;;  %v7637_v56 = vrot.slane %v21359_v12, %v16069_v59  ;;  %v7645_v22 = vrot.slane %v21360_v31, %v16069_v59  ;;  %v7680_v7 = vcombine.low %v21364_v26, %v21363_v62  ;;  %v21367_v23 = vld [vmem:[#allocation85_spill] sm:$0xff] }
 0x597   : > { %v7671_v10 = vrot.slane %v21361_v60, %v16069_v59  ;;  %v7679_v63 = vrot.slane %v21362_v45, %v16069_v59  ;;  %v18609_v34 = vrot.slane %v7604_v15, %v16073_v19  ;;  %v13259_v28 = vcombine.high %v21364_v26, %v21363_v62 }
 0x598   : > { %v7646_v5 = vcombine.low %v7621_v21, %v7629_v54  ;;  %v7654_v41 = vcombine.low %v7637_v56, %v7645_v22  ;;  %v3475_v50 = vcombine.high %v21366_v38, %v21365_v61  ;;  %v7898_v42 = vshrl.u32 %v7562_v33, 16  ;;  %v21368_v21 = vld [vmem:[#allocation83_spill] sm:$0xff] }
 0x599   : > { %v7687_v4 = vrot.slane %v7680_v7, %v16069_v59  ;;  %v3525_v16 = vcombine.high %v21368_v21, %v21367_v23  ;;  %v7612_v54 = vcombine.low %v18600_v37, %v18609_v34  ;;  %v7695_v14 = vrot.slane %v13259_v28, %v16069_v59 }
 0x59a   : > { %v18616_v30 = vrot.slane %v7646_v5, %v16073_v19  ;;  %v18624_v15 = vrot.slane %v7654_v41, %v16073_v19  ;;  %v7696_v20 = vcombine.low %v7671_v10, %v7679_v63  ;;  %v3619_v56 = vshrl.u32 %v3475_v50, 16 }
 0x59b   : > { %v3618_v12 = vpack.i.b16 %v3525_v16, %v3475_v50  ;;  %v3620_v31 = vshrl.u32 %v3525_v16, 16  ;;  %v21369_v22 = vcombine.low %v18285_v35, %v18288_v13  ;;  %v7896_v5 = vpack.i.b16 %v7612_v54, %v7562_v33 }
 0x59c   : > { %v7899_v45 = vshrl.u32 %v7612_v54, 16  ;;  %v7662_v62 = vcombine.low %v18616_v30, %v18624_v15  ;;  %v7704_v26 = vcombine.low %v7687_v4, %v7695_v14  ;;  %v21370_v10 = vcombine.high %v18285_v35, %v18288_v13 }
 0x59d   : > { %v7721_v60 = vrot.slane %v21369_v22, %v16069_v59  ;;  %13732 = vmatmul.mubr.msk.bf16.gmra.mrb[60].mxu0 %vm7942_vm0, %v3618_v12  ;;  %v3621_v7 = vpack.i.b16 %v3620_v31, %v3619_v56  ;;  %v21371_v41 = vcombine.low %v18293_v18, %v18296_v6  ;;  %v7745_v33 = vrot.slane %v13261_v39, %v16069_v59 }
 0x59e   : > { %v7729_v63 = vrot.slane %v21370_v10, %v16069_v59  ;;  %13777 = vmatprep.subr.bf16.mxu0 %v7896_v5  ;;  %v7900_v61 = vpack.i.b16 %v7899_v45, %v7898_v42  ;;  %v18647_v38 = vrot.slane %v7696_v20, %v16073_v19  ;;  %v18650_v50 = vrot.slane %v7704_v26, %v16073_v19 }
 0x59f   : > { %v7737_v28 = vrot.slane %v21371_v41, %v16069_v59  ;;  %v21372_v35 = vcombine.low %v18299_v58, %v18305_v55  ;;  %13778 = vmatpush3.bf16.msra.mxu0 %v7896_v5  ;;  %13764 = vmatmul.mubr.msk.bf16.gmra.mrb[44].mxu1 %vm7942_vm0, %v3621_v7  ;;  %v7779_v18 = vrot.slane %v13262_v25, %v16069_v59  ;;  %v7914_v55 = vshrl.u32 %v7662_v62, 16 }
 0x5a0   : > { %v7746_v4 = vcombine.low %v7721_v60, %v7729_v63  ;;  %13809 = vmatprep.subr.bf16.mxu1 %v7900_v61  ;;  %v7712_v6 = vcombine.low %v18647_v38, %v18650_v50  ;;  %v7780_v39 = vcombine.low %v18309_v36, %v18318_v2  ;;  %v13263_v42 = vcombine.high %v18309_v36, %v18318_v2 }
 0x5a1   : > { %v7771_v13 = vrot.slane %v21372_v35, %v16069_v59  ;;  %v7754_v23 = vcombine.low %v7737_v28, %v7745_v33  ;;  %v7063_v58 = vcombine.high %v18256_v24, %v18259_v3  ;;  %13810 = vmatpush3.bf16.msra.mxu1 %v7900_v61  ;;  %v7113_v25 = vcombine.high %v18263_v17, %v18274_v27 }
 0x5a2   : > { %v7912_v54 = vpack.i.b16 %v7712_v6, %v7662_v62  ;;  %v7915_v14 = vshrl.u32 %v7712_v6, 16  ;;  %v7787_v20 = vrot.slane %v7780_v39, %v16069_v59  ;;  %v7795_v12 = vrot.slane %v13263_v42, %v16069_v59 }
 0x5a3   : > { %v18667_v21 = vrot.slane %v7754_v23, %v16073_v19  ;;  %v7796_v16 = vcombine.low %v7771_v13, %v7779_v18  ;;  %v18674_v36 = vrot.slane %v7746_v4, %v16073_v19  ;;  %v18676_v2 = vpack.i.b16 %v7113_v25, %v7063_v58  ;;  %v18690_v10 = vpop.f32.mrb[32].mxu0 }
 0x5a4   : > { %13779 = vmatprep.subr.bf16.mxu0 %v7912_v54  ;;  %v7916_v24 = vpack.i.b16 %v7915_v14, %v7914_v55  ;;  %v7804_v3 = vcombine.low %v7787_v20, %v7795_v12  ;;  %v7826_v56 = vshrl.u32 %v7063_v58, 16  ;;  %v7827_v31 = vshrl.u32 %v7113_v25, 16  ;;  %8527 = vmax.xlane.f32.xlu1 %v18690_v10  ;;  %v18693_v63 = vpop.f32.mrb[33].mxu0 }
 0x5a5   : > { %13780 = vmatpush3.bf16.msra.mxu0 %v7912_v54  ;;  %v7762_v17 = vcombine.low %v18674_v36, %v18667_v21  ;;  %v18681_v27 = vrot.slane %v7796_v16, %v16073_v19  ;;  %v18696_v41 = vpop.f32.mrb[34].mxu0  ;;  %v18698_v28 = vpop.f32.mrb[16].mxu1  ;;  %v7163_v4 = vcombine.high %v18359_v48, %v18367_v40  ;;  %v7213_v23 = vcombine.high %v18375_v32, %v18403_v53 }
 0x5a6   : > { %13811 = vmatprep.subr.bf16.mxu1 %v7916_v24  ;;  %v18684_v22 = vrot.slane %v7804_v3, %v16073_v19  ;;  %v18686_v60 = vpack.i.b16 %v7827_v31, %v7826_v56  ;;  %v18700_v33 = vpop.f32.mrb[17].mxu1  ;;  %8529 = vmax.xlane.f32.xlu0 %v18696_v41  ;;  %v18703_v61 = vpop.f32.mrb[35].mxu0  ;;  %v7263_v6 = vcombine.high %v18406_v9, %v18409_v1 }
 0x5a7   : > { %13812 = vmatpush3.bf16.msra.mxu1 %v7916_v24  ;;  %v7930_v62 = vshrl.u32 %v7762_v17, 16  ;;  %v18706_v35 = vpop.f32.mrb[18].mxu1  ;;  %v18719_v18 = vpack.i.b16 %v7213_v23, %v7163_v4  ;;  %v7842_v39 = vshrl.u32 %v7163_v4, 16  ;;  %v7843_v42 = vshrl.u32 %v7213_v23, 16 }
 0x5a8   : > { %v7812_v5 = vcombine.low %v18681_v27, %v18684_v22  ;;  %v18708_v13 = vpop.f32.mrb[19].mxu1  ;;  %8523 = vmax.xlane.f32.xlu1 %v18693_v63  ;;  %v7313_v58 = vcombine.high %v18418_v46, %v18427_v11  ;;  %v7858_v40 = vshrl.u32 %v7263_v6, 16  ;;  %v7363_v16 = vcombine.high %v18463_v0, %v18468_v8 }
 0x5a9   : > { %v18725_v55 = vpack.i.b16 %v7843_v42, %v7842_v39  ;;  %v7413_v9 = vcombine.high %v18479_v52, %v18497_v47  ;;  %v7463_v46 = vcombine.high %v18508_v57, %v18517_v44  ;;  %v7513_v54 = vcombine.high %v18526_v43, %v18531_v51 }
 0x5aa   : > { %v7928_v45 = vpack.i.b16 %v7812_v5, %v7762_v17  ;;  %v7931_v26 = vshrl.u32 %v7812_v5, 16  ;;  %8525 = vmax.xlane.f32.xlu0 %v18703_v61  ;;  %v18728_v48 = vpack.i.b16 %v7313_v58, %v7263_v6  ;;  %v7859_v32 = vshrl.u32 %v7313_v58, 16 }
 0x5ab   : > { %v18736_v1 = vpack.i.b16 %v7413_v9, %v7363_v16  ;;  %v7874_v11 = vshrl.u32 %v7363_v16, 16  ;;  %v7875_v25 = vshrl.u32 %v7413_v9, 16  ;;  %v18744_v20 = vpack.i.b16 %v7513_v54, %v7463_v46 }
 0x5ac   : > { %13781 = vmatprep.subr.bf16.mxu0 %v7928_v45  ;;  %v7932_v7 = vpack.i.b16 %v7931_v26, %v7930_v62  ;;  %8559 = vmax.xlane.f32.xlu1 %v18698_v28  ;;  %v18730_v53 = vpack.i.b16 %v7859_v32, %v7858_v40  ;;  %v7890_v12 = vshrl.u32 %v7463_v46, 16  ;;  %v7891_v24 = vshrl.u32 %v7513_v54, 16 }
 0x5ad   : > { %13782 = vmatpush3.bf16.msra.mxu0 %v7928_v45  ;;  %v18742_v14 = vpack.i.b16 %v7875_v25, %v7874_v11  ;;  %v7563_v8 = vcombine.high %v18567_v29, %v18570_v49  ;;  %v7613_v52 = vcombine.high %v18600_v37, %v18609_v34  ;;  %v7663_v43 = vcombine.high %v18616_v30, %v18624_v15 }
 0x5ae   : > { %13813 = vmatprep.subr.bf16.mxu1 %v7932_v7  ;;  %13831 = vmatprep.subr.bf16.mxu0 %v18676_v2  ;;  %v18746_v0 = vpack.i.b16 %v7891_v24, %v7890_v12  ;;  %v7713_v34 = vcombine.high %v18647_v38, %v18650_v50  ;;  %v7763_v38 = vcombine.high %v18674_v36, %v18667_v21 }
 0x5af   : > { %13814 = vmatpush3.bf16.msra.mxu1 %v7932_v7  ;;  %8555 = vmax.xlane.f32.xlu0 %v18700_v33  ;;  %v18757_v44 = vpack.i.b16 %v7613_v52, %v7563_v8  ;;  %v7906_v51 = vshrl.u32 %v7563_v8, 16  ;;  %v7907_v3 = vshrl.u32 %v7613_v52, 16  ;;  %v7922_v5 = vshrl.u32 %v7663_v43, 16 }
 0x5b0   : > { %13863 = vmatprep.subr.bf16.mxu1 %v18686_v60  ;;  %v18779_v15 = vpack.i.b16 %v7713_v34, %v7663_v43  ;;  %v7923_v45 = vshrl.u32 %v7713_v34, 16  ;;  %v7813_v50 = vcombine.high %v18681_v27, %v18684_v22  ;;  %v7938_v7 = vshrl.u32 %v7763_v38, 16 }
 0x5b1   : > { %v18772_v31 = vpack.i.b16 %v7907_v3, %v7906_v51 }
 0x5b2   : > { %v18782_v62 = vpack.i.b16 %v7923_v45, %v7922_v5  ;;  %v18791_v26 = vpack.i.b16 %v7813_v50, %v7763_v38  ;;  %v7939_v4 = vshrl.u32 %v7813_v50, 16 }
 0x5b3   : > { %8561 = vmax.xlane.f32.xlu0 %v18706_v35 }
 0x5b4   : > { %v18794_v23 = vpack.i.b16 %v7939_v4, %v7938_v7 }
 0x5b7   : > { %8557 = vmax.xlane.f32.xlu0 %v18708_v13 }
 0x5ca   : > { %v18752_v47 = vpop.f32.mrb[36].mxu0 }
 0x5cb   : > { %v18754_v57 = vpop.f32.mrb[37].mxu0  ;;  %8535 = vmax.xlane.f32.xlu0 %v18752_v47 }
 0x5cc   : > { %8531 = vmax.xlane.f32.xlu1 %v18754_v57  ;;  %v18764_v29 = vpop.f32.mrb[38].mxu0 }
 0x5cd   : > { %v18761_v56 = vpop.f32.mrb[20].mxu1  ;;  %v18766_v49 = vpop.f32.mrb[39].mxu0 }
 0x5ce   : > { %v18768_v37 = vpop.f32.mrb[21].mxu1 }
 0x5cf   : > { %v18774_v17 = vpop.f32.mrb[22].mxu1  ;;  %8567 = vmax.xlane.f32.xlu0 %v18761_v56 }
 0x5d0   : > { %v18776_v30 = vpop.f32.mrb[23].mxu1  ;;  %8537 = vmax.xlane.f32.xlu1 %v18764_v29 }
 0x5d3   : > { %8533 = vmax.xlane.f32.xlu0 %v18766_v49 }
 0x5d4   : > { %8569 = vmax.xlane.f32.xlu1 %v18774_v17 }
 0x5d7   : > { %8563 = vmax.xlane.f32.xlu0 %v18768_v37 }
 0x5d8   : > { %8565 = vmax.xlane.f32.xlu1 %v18776_v30 }
 0x5ec   : > { %v18796_v6 = vpop.f32.mrb[40].mxu0 }
 0x5ed   : > { %v18798_v39 = vpop.f32.mrb[41].mxu0  ;;  %8543 = vmax.xlane.f32.xlu0 %v18796_v6 }
 0x5ee   : > { %v18801_v21 = vpop.f32.mrb[42].mxu0  ;;  %v18803_v36 = vpop.f32.mrb[24].mxu1 }
 0x5ef   : > { %v18805_v27 = vpop.f32.mrb[43].mxu0  ;;  %v18807_v22 = vpop.f32.mrb[25].mxu1  ;;  %8545 = vmax.xlane.f32.xlu1 %v18801_v21 }
 0x5f0   : > { %v18810_v42 = vpop.f32.mrb[26].mxu1 }
 0x5f1   : > { %v18812_v58 = vpop.f32.mrb[27].mxu1  ;;  %8539 = vmax.xlane.f32.xlu0 %v18798_v39 }
 0x5f3   : > { %8541 = vmax.xlane.f32.xlu1 %v18805_v27 }
 0x5f5   : > { %8575 = vmax.xlane.f32.xlu0 %v18803_v36 }
 0x5f7   : > { %8577 = vmax.xlane.f32.xlu1 %v18810_v42 }
 0x5f9   : > { %8571 = vmax.xlane.f32.xlu0 %v18807_v22 }
 0x5fb   : > { %8573 = vmax.xlane.f32.xlu1 %v18812_v58 }
 0x610   : > { %v18820_v40 = vpop.f32.mrb[44].mxu0 }
 0x611   : > { %v18822_v32 = vpop.f32.mrb[45].mxu0  ;;  %8551 = vmax.xlane.f32.xlu0 %v18820_v40 }
 0x612   : > { %v18825_v16 = vpop.f32.mrb[46].mxu0  ;;  %v18827_v9 = vpop.f32.mrb[28].mxu1 }
 0x613   : > { %v18829_v46 = vpop.f32.mrb[47].mxu0  ;;  %v18831_v11 = vpop.f32.mrb[29].mxu1  ;;  %8553 = vmax.xlane.f32.xlu1 %v18825_v16 }
 0x614   : > { %v18834_v25 = vpop.f32.mrb[30].mxu1 }
 0x615   : > { %v18836_v54 = vpop.f32.mrb[31].mxu1  ;;  %8547 = vmax.xlane.f32.xlu0 %v18822_v32 }
 0x617   : > { %8549 = vmax.xlane.f32.xlu1 %v18829_v46 }
 0x619   : > { %8583 = vmax.xlane.f32.xlu0 %v18827_v9 }
 0x61b   : > { %8585 = vmax.xlane.f32.xlu1 %v18834_v25 }
 0x61d   : > { %8579 = vmax.xlane.f32.xlu0 %v18831_v11 }
 0x61f   : > { %8581 = vmax.xlane.f32.xlu1 %v18836_v54 }
 0x631   : > { %v8528_v12 = vpop.xlane.xlu1 %8527 }
 0x632   : > { %v8653_v24 = vsub.f32 %v18690_v10, %v8528_v12 }
 0x633   : > { %v8530_v8 = vpop.xlane.xlu0 %8529 }
 0x634   : > { %v8719_v52 = vmul.f32 1.442695, %v8653_v24  ;;  %v8654_v43 = vsub.f32 %v18696_v41, %v8530_v8 }
 0x635   : > { %v8524_v3 = vpop.xlane.xlu1 %8523 }
 0x636   : > { %v8721_v5 = vmul.f32 1.442695, %v8654_v43  ;;  %v8651_v45 = vsub.f32 %v18693_v63, %v8524_v3  ;;  %14242 = vpow2.f32 %v8719_v52 }
 0x637   : > { %v18846_v51 = vpop.f32.mrb[48].mxu0  ;;  %v8526_v50 = vpop.xlane.xlu0 %8525 }
 0x638   : > { %v18848_v34 = vpop.f32.mrb[49].mxu0  ;;  %8591 = vmax.xlane.f32.xlu0 %v18846_v51  ;;  %14244 = vpow2.f32 %v8721_v5  ;;  %v8715_v41 = vmul.f32 1.442695, %v8651_v45  ;;  %v8652_v7 = vsub.f32 %v18703_v61, %v8526_v50 }
 0x639   : > { %v18852_v38 = vpop.f32.mrb[50].mxu0  ;;  %v8560_v4 = vpop.xlane.xlu1 %8559 }
 0x63a   : > { %8593 = vmax.xlane.f32.xlu1 %v18852_v38  ;;  %v18855_v10 = vpop.f32.mrb[51].mxu0  ;;  %v8717_v12 = vmul.f32 1.442695, %v8652_v7  ;;  %14246 = vpow2.f32 %v8715_v41  ;;  %v8669_v24 = vsub.f32 %v18698_v28, %v8560_v4 }
 0x63c   : > { %8587 = vmax.xlane.f32.xlu0 %v18848_v34  ;;  %v8556_v63 = vpop.xlane.xlu0 %8555  ;;  %14248 = vpow2.f32 %v8717_v12  ;;  %v8751_v52 = vmul.f32 1.442695, %v8669_v24 }
 0x63d   : > { %v8667_v43 = vsub.f32 %v18700_v33, %v8556_v63 }
 0x63e   : > { %8589 = vmax.xlane.f32.xlu1 %v18855_v10  ;;  %14250 = vpow2.f32 %v8751_v52 }
 0x63f   : > { %v18861_v8 = vpop.f32.mrb[32].mxu1  ;;  %v8747_v33 = vmul.f32 1.442695, %v8667_v43 }
 0x640   : > { %v8562_v3 = vpop.xlane.xlu0 %8561  ;;  %v18864_v5 = vpop.f32.mrb[33].mxu1 }
 0x641   : > { %v8670_v61 = vsub.f32 %v18706_v35, %v8562_v3  ;;  %v18867_v45 = vpop.eup %14242  ;;  %v18869_v50 = vpop.f32.mrb[34].mxu1  ;;  %8619 = vmax.xlane.f32.xlu0 %v18864_v5 }
 0x642   : > { %v18872_v28 = vpop.eup %14244  ;;  %v18874_v41 = vpop.f32.mrb[35].mxu1 }
 0x643   : > { %v8753_v7 = vmul.f32 1.442695, %v8670_v61  ;;  %8621 = vmax.xlane.f32.xlu1 %v18874_v41  ;;  %v8972_v12 = vpack.c.bf16 %v18872_v28, %v18867_v45 }
 0x644   : > { %v8558_v4 = vpop.xlane.xlu0 %8557  ;;  %v18880_v24 = vpop.eup %14246 }
 0x645   : > { %14252 = vpow2.f32 %v8753_v7  ;;  %v8668_v35 = vsub.f32 %v18708_v13, %v8558_v4  ;;  %8623 = vmax.xlane.f32.xlu0 %v18861_v8 }
 0x646   : > { %v18883_v63 = vpop.eup %14248  ;;  %14254 = vpow2.f32 %v8747_v33 }
 0x647   : > { %v8749_v3 = vmul.f32 1.442695, %v8668_v35  ;;  %8625 = vmax.xlane.f32.xlu1 %v18869_v50  ;;  %v8971_v52 = vpack.c.bf16 %v18883_v63, %v18880_v24 }
 0x648   : > { %v18902_v33 = vpop.eup %14250 }
 0x649   : > { %14256 = vpow2.f32 %v8749_v3  ;;  %13783 = vmatprep.mubr.bf16.mxu0 %v8971_v52 }
 0x64a   : > { %13784 = vmatmul.mubr.bf16.vlgmr.msra.gmra.mrb[64].mxu0 %v8972_v12 }
 0x64b   : > { %13832 = vmatpush3.bf16.msra.mxu0 %v18676_v2 }
 0x64c   : > { %v18888_v43 = vpop.f32.mrb[52].mxu0  ;;  %13833 = vmatprep.subr.bf16.mxu0 %v18719_v18 }
 0x64d   : > { %v18890_v61 = vpop.f32.mrb[53].mxu0  ;;  %8599 = vmax.xlane.f32.xlu0 %v18888_v43 }
 0x64e   : > { %21373 = vst [vmem:[#allocation73_spill] sm:$0xff] %v18890_v61  ;;  %v18893_v13 = vpop.f32.mrb[54].mxu0 }
 0x64f   : > { %21374 = vst [vmem:[#allocation72_spill] sm:$0xff] %v18893_v13  ;;  %v18896_v7 = vpop.f32.mrb[36].mxu1  ;;  %v18898_v4 = vpop.f32.mrb[55].mxu0  ;;  %8601 = vmax.xlane.f32.xlu1 %v18893_v13  ;;  %13834 = vmatpush3.bf16.msra.mxu0 %v18719_v18 }
 0x650   : > { %21375 = vst [vmem:[#allocation49_spill] sm:$0xff] %v18896_v7  ;;  %21376 = vst [vmem:[#allocation74_spill] sm:$0xff] %v18898_v4  ;;  %v18904_v35 = vpop.f32.mrb[37].mxu1  ;;  %v18906_v3 = vpop.eup %14252  ;;  %13835 = vmatprep.subr.bf16.mxu0 %v18728_v48 }
 0x651   : > { %21377 = vst [vmem:[#allocation86_spill] sm:$0xff] %v18904_v35  ;;  %v18908_v52 = vpop.f32.mrb[38].mxu1  ;;  %8595 = vmax.xlane.f32.xlu0 %v18890_v61  ;;  %v8980_v2 = vpack.c.bf16 %v18906_v3, %v18902_v33  ;;  %v18918_v19 = vpop.eup %14254 }
 0x652   : > { %21378 = vst [vmem:[#allocation55_spill] sm:$0xff] %v18908_v52  ;;  %v18911_v12 = vpop.f32.mrb[39].mxu1 }
 0x653   : > { %21379 = vst [vmem:[#allocation50_spill] sm:$0xff] %v18911_v12  ;;  %8597 = vmax.xlane.f32.xlu1 %v18898_v4  ;;  %v18920_v59 = vpop.eup %14256  ;;  %13836 = vmatpush3.bf16.msra.mxu0 %v18728_v48 }
 0x654   : > { %v8979_v61 = vpack.c.bf16 %v18920_v59, %v18918_v19  ;;  %13837 = vmatprep.subr.bf16.mxu0 %v18736_v1 }
 0x655   : > { %8627 = vmax.xlane.f32.xlu0 %v18904_v35 }
 0x656   : > { %13815 = vmatprep.mubr.bf16.mxu1 %v8979_v61 }
 0x657   : > { %8629 = vmax.xlane.f32.xlu1 %v18911_v12  ;;  %13816 = vmatmul.mubr.bf16.vlgmr.msra.gmra.mrb[48].mxu1 %v8980_v2 }
 0x658   : > { %13838 = vmatpush3.bf16.msra.mxu0 %v18736_v1  ;;  %13864 = vmatpush3.bf16.msra.mxu1 %v18686_v60  ;;  %v8536_v18 = vpop.xlane.xlu0 %8535 }
 0x659   : > { %8631 = vmax.xlane.f32.xlu0 %v18896_v7  ;;  %13839 = vmatprep.subr.bf16.mxu0 %v18744_v20  ;;  %v8532_v48 = vpop.xlane.xlu1 %8531  ;;  %v8657_v35 = vsub.f32 %v18752_v47, %v8536_v18 }
 0x65a   : > { %13865 = vmatprep.subr.bf16.mxu1 %v18725_v55 }
 0x65b   : > { %8633 = vmax.xlane.f32.xlu1 %v18908_v52  ;;  %v8727_v18 = vmul.f32 1.442695, %v8657_v35 }
 0x65c   : > { %13840 = vmatpush3.bf16.msra.mxu0 %v18744_v20  ;;  %13866 = vmatpush3.bf16.msra.mxu1 %v18725_v55  ;;  %v8655_v20 = vsub.f32 %v18754_v57, %v8532_v48  ;;  %v8568_v4 = vpop.xlane.xlu0 %8567 }
 0x65d   : > { %13841 = vmatprep.subr.bf16.mxu0 %v18757_v44  ;;  %13867 = vmatprep.subr.bf16.mxu1 %v18730_v53  ;;  %v8538_v52 = vpop.xlane.xlu1 %8537  ;;  %v8673_v13 = vsub.f32 %v18761_v56, %v8568_v4  ;;  %14258 = vpow2.f32 %v8727_v18 }
 0x65e   : > { %v18935_v12 = vpop.f32.mrb[56].mxu0  ;;  %v8658_v55 = vsub.f32 %v18764_v29, %v8538_v52  ;;  %v8723_v57 = vmul.f32 1.442695, %v8655_v20 }
 0x65f   : > { %21380 = vst [vmem:[#allocation77_spill] sm:$0xff] %v18935_v12  ;;  %v18937_v61 = vpop.f32.mrb[57].mxu0  ;;  %8607 = vmax.xlane.f32.xlu0 %v18935_v12 }
 0x660   : > { %21381 = vst [vmem:[#allocation57_spill] sm:$0xff] %v18937_v61  ;;  %v18941_v1 = vpop.f32.mrb[58].mxu0  ;;  %13842 = vmatpush3.bf16.msra.mxu0 %v18757_v44  ;;  %13868 = vmatpush3.bf16.msra.mxu1 %v18730_v53  ;;  %v8729_v35 = vmul.f32 1.442695, %v8658_v55  ;;  %v8534_v29 = vpop.xlane.xlu0 %8533 }
 0x661   : > { %v18949_v47 = vpop.f32.mrb[59].mxu0  ;;  %8609 = vmax.xlane.f32.xlu1 %v18941_v1  ;;  %13843 = vmatprep.subr.bf16.mxu0 %v18779_v15  ;;  %v8570_v48 = vpop.xlane.xlu1 %8569  ;;  %v8656_v53 = vsub.f32 %v18766_v49, %v8534_v29 }
 0x662   : > { %v18943_v60 = vpop.f32.mrb[40].mxu1  ;;  %13869 = vmatprep.subr.bf16.mxu1 %v18742_v14  ;;  %14260 = vpow2.f32 %v8729_v35  ;;  %v8674_v44 = vsub.f32 %v18774_v17, %v8570_v48 }
 0x663   : > { %v18947_v2 = vpop.f32.mrb[41].mxu1  ;;  %8603 = vmax.xlane.f32.xlu0 %v18937_v61  ;;  %v8759_v61 = vmul.f32 1.442695, %v8673_v13  ;;  %v8725_v4 = vmul.f32 1.442695, %v8656_v53 }
 0x664   : > { %v18953_v12 = vpop.f32.mrb[42].mxu1  ;;  %13844 = vmatpush3.bf16.msra.mxu0 %v18779_v15  ;;  %13870 = vmatpush3.bf16.msra.mxu1 %v18742_v14  ;;  %v8761_v56 = vmul.f32 1.442695, %v8674_v44  ;;  %v8564_v17 = vpop.xlane.xlu0 %8563 }
 0x665   : > { %v18956_v7 = vpop.f32.mrb[43].mxu1  ;;  %8605 = vmax.xlane.f32.xlu1 %v18949_v47  ;;  %13845 = vmatprep.subr.bf16.mxu0 %v18791_v26  ;;  %14262 = vpow2.f32 %v8759_v61  ;;  %v8566_v13 = vpop.xlane.xlu1 %8565  ;;  %v8671_v15 = vsub.f32 %v18768_v37, %v8564_v17 }
 0x666   : > { %13871 = vmatprep.subr.bf16.mxu1 %v18746_v0  ;;  %14264 = vpow2.f32 %v8723_v57  ;;  %v8672_v49 = vsub.f32 %v18776_v30, %v8566_v13 }
 0x667   : > { %8635 = vmax.xlane.f32.xlu0 %v18947_v2  ;;  %14266 = vpow2.f32 %v8761_v56  ;;  %v18993_v35 = vpop.eup %14258 }
 0x668   : > { %13846 = vmatpush3.bf16.msra.mxu0 %v18791_v26  ;;  %14268 = vpow2.f32 %v8725_v4  ;;  %13872 = vmatpush3.bf16.msra.mxu1 %v18746_v0  ;;  %v8757_v20 = vmul.f32 1.442695, %v8672_v49  ;;  %v8755_v26 = vmul.f32 1.442695, %v8671_v15 }
 0x669   : > { %8637 = vmax.xlane.f32.xlu1 %v18956_v7  ;;  %13873 = vmatprep.subr.bf16.mxu1 %v18772_v31 }
 0x66a   : > { %14270 = vpow2.f32 %v8757_v20 }
 0x66b   : > { %8639 = vmax.xlane.f32.xlu0 %v18943_v60  ;;  %14272 = vpow2.f32 %v8755_v26 }
 0x66c   : > { %13874 = vmatpush3.bf16.msra.mxu1 %v18772_v31  ;;  %v19001_v37 = vpop.eup %14260 }
 0x66d   : > { %8641 = vmax.xlane.f32.xlu1 %v18953_v12  ;;  %13875 = vmatprep.subr.bf16.mxu1 %v18782_v62  ;;  %v8974_v48 = vpack.c.bf16 %v19001_v37, %v18993_v35 }
 0x66f   : > { %v19007_v44 = vpop.eup %14262 }
 0x670   : > { %v18974_v52 = vpop.f32.mrb[60].mxu0  ;;  %v19010_v29 = vpop.eup %14264  ;;  %13876 = vmatpush3.bf16.msra.mxu1 %v18782_v62 }
 0x671   : > { %v18979_v14 = vpop.f32.mrb[61].mxu0  ;;  %8615 = vmax.xlane.f32.xlu0 %v18974_v52  ;;  %v19013_v53 = vpop.eup %14266  ;;  %13877 = vmatprep.subr.bf16.mxu1 %v18794_v23 }
 0x672   : > { %v18983_v61 = vpop.f32.mrb[62].mxu0  ;;  %v18985_v18 = vpop.f32.mrb[44].mxu1  ;;  %v8982_v56 = vpack.c.bf16 %v19013_v53, %v19007_v44 }
 0x673   : > { %21382 = vst [vmem:[#allocation59_spill] sm:$0xff] %v18985_v18  ;;  %v18989_v30 = vpop.f32.mrb[45].mxu1  ;;  %v18991_v55 = vpop.f32.mrb[63].mxu0  ;;  %8617 = vmax.xlane.f32.xlu1 %v18983_v61 }
 0x674   : > { %v18995_v57 = vpop.f32.mrb[46].mxu1  ;;  %v19017_v31 = vpop.eup %14268  ;;  %13878 = vmatpush3.bf16.msra.mxu1 %v18794_v23 }
 0x675   : > { %v18998_v0 = vpop.f32.mrb[47].mxu1  ;;  %8611 = vmax.xlane.f32.xlu0 %v18979_v14  ;;  %v8973_v13 = vpack.c.bf16 %v19017_v31, %v19010_v29  ;;  %v19025_v4 = vpop.eup %14270 }
 0x676   : > { %21383 = vst [vmem:[#allocation56_spill] sm:$0xff] %v18998_v0  ;;  %v19028_v62 = vpop.eup %14272 }
 0x677   : > { %8613 = vmax.xlane.f32.xlu1 %v18991_v55  ;;  %13787 = vmatprep.mubr.bf16.mxu0 %v8973_v13  ;;  %v8981_v49 = vpack.c.bf16 %v19025_v4, %v19028_v62 }
 0x678   : > { %13788 = vmatmul.mubr.bf16.gmra.mrb[68].mxu0 %v8974_v48 }
 0x679   : > { %8643 = vmax.xlane.f32.xlu0 %v18989_v30  ;;  %13819 = vmatprep.mubr.bf16.mxu1 %v8981_v49 }
 0x67a   : > { %v8544_v17 = vpop.xlane.xlu0 %8543  ;;  %13820 = vmatmul.mubr.bf16.gmra.mrb[52].mxu1 %v8982_v56 }
 0x67b   : > { %8645 = vmax.xlane.f32.xlu1 %v18998_v0  ;;  %v8661_v15 = vsub.f32 %v18796_v6, %v8544_v17 }
 0x67c   : > { %v8546_v23 = vpop.xlane.xlu1 %8545 }
 0x67d   : > { %8647 = vmax.xlane.f32.xlu0 %v18985_v18  ;;  %v8662_v20 = vsub.f32 %v18801_v21, %v8546_v23  ;;  %v8735_v26 = vmul.f32 1.442695, %v8661_v15 }
 0x67e   : > { %v8540_v13 = vpop.xlane.xlu0 %8539 }
 0x67f   : > { %8649 = vmax.xlane.f32.xlu1 %v18995_v57  ;;  %v8737_v48 = vmul.f32 1.442695, %v8662_v20  ;;  %14274 = vpow2.f32 %v8735_v26  ;;  %v8659_v18 = vsub.f32 %v18798_v39, %v8540_v13 }
 0x680   : > { %v8542_v0 = vpop.xlane.xlu1 %8541 }
 0x681   : > { %8847 = vadd.xlane.f32.xlu0 %v18867_v45  ;;  %14276 = vpow2.f32 %v8737_v48  ;;  %v8660_v6 = vsub.f32 %v18805_v27, %v8542_v0  ;;  %v8731_v49 = vmul.f32 1.442695, %v8659_v18 }
 0x682   : > { %v8576_v56 = vpop.xlane.xlu0 %8575 }
 0x683   : > { %8849 = vadd.xlane.f32.xlu1 %v18872_v28  ;;  %v8733_v45 = vmul.f32 1.442695, %v8660_v6  ;;  %14278 = vpow2.f32 %v8731_v49  ;;  %v8677_v21 = vsub.f32 %v18803_v36, %v8576_v56 }
 0x684   : > { %v8578_v17 = vpop.xlane.xlu1 %8577 }
 0x685   : > { %8843 = vadd.xlane.f32.xlu0 %v18880_v24  ;;  %14280 = vpow2.f32 %v8733_v45  ;;  %v8678_v39 = vsub.f32 %v18810_v42, %v8578_v17  ;;  %v8767_v28 = vmul.f32 1.442695, %v8677_v21 }
 0x686   : > { %v8572_v15 = vpop.xlane.xlu0 %8571 }
 0x687   : > { %8845 = vadd.xlane.f32.xlu1 %v18883_v63  ;;  %v8769_v24 = vmul.f32 1.442695, %v8678_v39  ;;  %14282 = vpow2.f32 %v8767_v28  ;;  %v8675_v27 = vsub.f32 %v18807_v22, %v8572_v15 }
 0x688   : > { %v8574_v18 = vpop.xlane.xlu1 %8573 }
 0x689   : > { %8879 = vadd.xlane.f32.xlu0 %v18902_v33  ;;  %v14275_v63 = vpop.eup %14274  ;;  %14284 = vpow2.f32 %v8769_v24  ;;  %v8676_v36 = vsub.f32 %v18812_v58, %v8574_v18  ;;  %v8763_v0 = vmul.f32 1.442695, %v8675_v27 }
 0x68b   : > { %8881 = vadd.xlane.f32.xlu1 %v18906_v3  ;;  %v14277_v33 = vpop.eup %14276  ;;  %v8765_v42 = vmul.f32 1.442695, %v8676_v36  ;;  %14286 = vpow2.f32 %v8763_v0 }
 0x68c   : > { %v8976_v23 = vpack.c.bf16 %v14277_v33, %v14275_v63 }
 0x68d   : > { %8875 = vadd.xlane.f32.xlu0 %v18918_v19  ;;  %v14279_v20 = vpop.eup %14278  ;;  %14288 = vpow2.f32 %v8765_v42 }
 0x68f   : > { %8877 = vadd.xlane.f32.xlu1 %v18920_v59  ;;  %v14281_v3 = vpop.eup %14280 }
 0x690   : > { %v8975_v22 = vpack.c.bf16 %v14281_v3, %v14279_v20 }
 0x691   : > { %8855 = vadd.xlane.f32.xlu0 %v18993_v35  ;;  %v14283_v26 = vpop.eup %14282 }
 0x692   : > { %13791 = vmatprep.mubr.bf16.mxu0 %v8975_v22 }
 0x693   : > { %8857 = vadd.xlane.f32.xlu1 %v19001_v37  ;;  %v14285_v19 = vpop.eup %14284  ;;  %13792 = vmatmul.mubr.bf16.gmra.mrb[72].mxu0 %v8976_v23 }
 0x694   : > { %v8984_v59 = vpack.c.bf16 %v14285_v19, %v14283_v26 }
 0x695   : > { %8851 = vadd.xlane.f32.xlu0 %v19010_v29  ;;  %v14287_v58 = vpop.eup %14286 }
 0x697   : > { %8853 = vadd.xlane.f32.xlu1 %v19017_v31  ;;  %v14289_v13 = vpop.eup %14288 }
 0x698   : > { %v8983_v35 = vpack.c.bf16 %v14289_v13, %v14287_v58 }
 0x699   : > { %8887 = vadd.xlane.f32.xlu0 %v19007_v44 }
 0x69a   : > { %13823 = vmatprep.mubr.bf16.mxu1 %v8983_v35 }
 0x69b   : > { %8889 = vadd.xlane.f32.xlu1 %v19013_v53  ;;  %13824 = vmatmul.mubr.bf16.gmra.mrb[56].mxu1 %v8984_v59 }
 0x69d   : > { %8883 = vadd.xlane.f32.xlu0 %v19028_v62 }
 0x69e   : > { %v8552_v37 = vpop.xlane.xlu0 %8551 }
 0x69f   : > { %8885 = vadd.xlane.f32.xlu1 %v19025_v4  ;;  %v8665_v29 = vsub.f32 %v18820_v40, %v8552_v37 }
 0x6a0   : > { %v8554_v31 = vpop.xlane.xlu1 %8553 }
 0x6a1   : > { %8863 = vadd.xlane.f32.xlu0 %v14275_v63  ;;  %v8666_v48 = vsub.f32 %v18825_v16, %v8554_v31  ;;  %v8743_v6 = vmul.f32 1.442695, %v8665_v29 }
 0x6a2   : > { %v8548_v44 = vpop.xlane.xlu0 %8547 }
 0x6a3   : > { %8865 = vadd.xlane.f32.xlu1 %v14277_v33  ;;  %v8745_v49 = vmul.f32 1.442695, %v8666_v48  ;;  %14290 = vpow2.f32 %v8743_v6  ;;  %v8663_v53 = vsub.f32 %v18822_v32, %v8548_v44 }
 0x6a4   : > { %v8550_v62 = vpop.xlane.xlu1 %8549 }
 0x6a5   : > { %8859 = vadd.xlane.f32.xlu0 %v14279_v20  ;;  %14292 = vpow2.f32 %v8745_v49  ;;  %v8664_v4 = vsub.f32 %v18829_v46, %v8550_v62  ;;  %v8739_v56 = vmul.f32 1.442695, %v8663_v53 }
 0x6a6   : > { %v8584_v45 = vpop.xlane.xlu0 %8583 }
 0x6a7   : > { %8861 = vadd.xlane.f32.xlu1 %v14281_v3  ;;  %v8741_v21 = vmul.f32 1.442695, %v8664_v4  ;;  %14294 = vpow2.f32 %v8739_v56  ;;  %v8681_v16 = vsub.f32 %v18827_v9, %v8584_v45 }
 0x6a8   : > { %v8586_v40 = vpop.xlane.xlu1 %8585 }
 0x6a9   : > { %8895 = vadd.xlane.f32.xlu0 %v14283_v26  ;;  %14296 = vpow2.f32 %v8741_v21  ;;  %v8682_v17 = vsub.f32 %v18834_v25, %v8586_v40  ;;  %v8775_v15 = vmul.f32 1.442695, %v8681_v16 }
 0x6aa   : > { %v8580_v39 = vpop.xlane.xlu0 %8579 }
 0x6ab   : > { %8897 = vadd.xlane.f32.xlu1 %v14285_v19  ;;  %v8679_v32 = vsub.f32 %v18831_v11, %v8580_v39  ;;  %v8777_v18 = vmul.f32 1.442695, %v8682_v17 }
 0x6ac   : > { %v8582_v28 = vpop.xlane.xlu1 %8581 }
 0x6ad   : > { %8891 = vadd.xlane.f32.xlu0 %v14287_v58  ;;  %v14291_v46 = vpop.eup %14290  ;;  %v8680_v24 = vsub.f32 %v18836_v54, %v8582_v28  ;;  %v8771_v27 = vmul.f32 1.442695, %v8679_v32 }
 0x6af   : > { %8893 = vadd.xlane.f32.xlu1 %v14289_v13  ;;  %v14293_v63 = vpop.eup %14292  ;;  %v8773_v36 = vmul.f32 1.442695, %v8680_v24  ;;  %14298 = vpow2.f32 %v8771_v27 }
 0x6b0   : > { %14300 = vpow2.f32 %v8775_v15  ;;  %v8978_v9 = vpack.c.bf16 %v14293_v63, %v14291_v46  ;;  %v21384_v15 = vld [vmem:[#allocation72_spill] sm:$0xff] }
 0x6b1   : > { %8871 = vadd.xlane.f32.xlu0 %v14291_v46  ;;  %v14295_v0 = vpop.eup %14294  ;;  %14302 = vpow2.f32 %v8773_v36 }
 0x6b2   : > { %14304 = vpow2.f32 %v8777_v18  ;;  %v21385_v18 = vld [vmem:[#allocation73_spill] sm:$0xff] }
 0x6b3   : > { %8873 = vadd.xlane.f32.xlu1 %v14293_v63  ;;  %v14297_v25 = vpop.eup %14296 }
 0x6b4   : > { %v8977_v11 = vpack.c.bf16 %v14297_v25, %v14295_v0 }
 0x6b5   : > { %8867 = vadd.xlane.f32.xlu0 %v14295_v0  ;;  %v21386_v0 = vld [vmem:[#allocation74_spill] sm:$0xff] }
 0x6b6   : > { %13795 = vmatprep.mubr.bf16.mxu0 %v8977_v11 }
 0x6b7   : > { %8869 = vadd.xlane.f32.xlu1 %v14297_v25  ;;  %13796 = vmatmul.mubr.bf16.gmra.mrb[76].mxu0 %v8978_v9 }
 0x6b9   : > { %v14299_v54 = vpop.eup %14298 }
 0x6ba   : > { %v19066_v33 = vpop.eup %14300  ;;  %8899 = vadd.xlane.f32.xlu0 %v14299_v54 }
 0x6bb   : > { %v14303_v42 = vpop.eup %14302 }
 0x6bc   : > { %v19068_v23 = vpop.eup %14304  ;;  %8901 = vadd.xlane.f32.xlu1 %v14303_v42  ;;  %v8985_v20 = vpack.c.bf16 %v14303_v42, %v14299_v54 }
 0x6bd   : > { %v8986_v3 = vpack.c.bf16 %v19068_v23, %v19066_v33 }
 0x6be   : > { %13827 = vmatprep.mubr.bf16.mxu1 %v8985_v20  ;;  %v21387_v20 = vld [vmem:[#allocation86_spill] sm:$0xff] }
 0x6bf   : > { %13828 = vmatmul.mubr.bf16.gmra.mrb[60].mxu1 %v8986_v3 }
 0x6c5   : > { %v8592_v22 = vpop.xlane.xlu0 %8591 }
 0x6c6   : > { %v8685_v26 = vsub.f32 %v18846_v51, %v8592_v22 }
 0x6c7   : > { %v8594_v19 = vpop.xlane.xlu1 %8593 }
 0x6c8   : > { %v8686_v59 = vsub.f32 %v18852_v38, %v8594_v19  ;;  %v8783_v58 = vmul.f32 1.442695, %v8685_v26 }
 0x6c9   : > { %v8588_v13 = vpop.xlane.xlu0 %8587 }
 0x6ca   : > { %v8785_v35 = vmul.f32 1.442695, %v8686_v59  ;;  %14306 = vpow2.f32 %v8783_v58  ;;  %v8683_v37 = vsub.f32 %v18848_v34, %v8588_v13  ;;  %v21388_v59 = vld [vmem:[#allocation50_spill] sm:$0xff] }
 0x6cb   : > { %v8590_v29 = vpop.xlane.xlu1 %8589 }
 0x6cc   : > { %14308 = vpow2.f32 %v8785_v35  ;;  %v8684_v31 = vsub.f32 %v18855_v10, %v8590_v29  ;;  %v8779_v48 = vmul.f32 1.442695, %v8683_v37 }
 0x6ce   : > { %v8781_v6 = vmul.f32 1.442695, %v8684_v31  ;;  %14310 = vpow2.f32 %v8779_v48  ;;  %v8620_v44 = vpop.xlane.xlu0 %8619  ;;  %v21389_v31 = vld [vmem:[#allocation49_spill] sm:$0xff] }
 0x6cf   : > { %v8699_v51 = vsub.f32 %v18864_v5, %v8620_v44 }
 0x6d0   : > { %14312 = vpow2.f32 %v8781_v6  ;;  %v8622_v49 = vpop.xlane.xlu1 %8621 }
 0x6d1   : > { %v8700_v38 = vsub.f32 %v18874_v41, %v8622_v49  ;;  %v8811_v53 = vmul.f32 1.442695, %v8699_v51  ;;  %v21390_v49 = vld [vmem:[#allocation55_spill] sm:$0xff] }
 0x6d2   : > { %v8624_v4 = vpop.xlane.xlu0 %8623 }
 0x6d3   : > { %v8813_v56 = vmul.f32 1.442695, %v8700_v38  ;;  %14314 = vpow2.f32 %v8811_v53  ;;  %v8701_v34 = vsub.f32 %v18861_v8, %v8624_v4 }
 0x6d4   : > { %v14307_v62 = vpop.eup %14306  ;;  %v8626_v10 = vpop.xlane.xlu1 %8625 }
 0x6d5   : > { %8911 = vadd.xlane.f32.xlu0 %v14307_v62  ;;  %14316 = vpow2.f32 %v8813_v56  ;;  %v8702_v21 = vsub.f32 %v18869_v50, %v8626_v10  ;;  %v8815_v40 = vmul.f32 1.442695, %v8701_v34  ;;  %v21391_v34 = vld [vmem:[#allocation77_spill] sm:$0xff] }
 0x6d6   : > { %v14309_v45 = vpop.eup %14308 }
 0x6d7   : > { %8913 = vadd.xlane.f32.xlu1 %v14309_v45  ;;  %v8988_v16 = vpack.c.bf16 %v14309_v45, %v14307_v62  ;;  %v8817_v17 = vmul.f32 1.442695, %v8702_v21  ;;  %14318 = vpow2.f32 %v8815_v40 }
 0x6d8   : > { %v14311_v5 = vpop.eup %14310 }
 0x6d9   : > { %8907 = vadd.xlane.f32.xlu0 %v14311_v5  ;;  %14320 = vpow2.f32 %v8817_v17 }
 0x6da   : > { %v8600_v41 = vpop.xlane.xlu0 %8599  ;;  %v14313_v39 = vpop.eup %14312 }
 0x6db   : > { %v8689_v32 = vsub.f32 %v18888_v43, %v8600_v41  ;;  %8909 = vadd.xlane.f32.xlu1 %v14313_v39  ;;  %v8987_v8 = vpack.c.bf16 %v14313_v39, %v14311_v5 }
 0x6dc   : > { %v8602_v28 = vpop.xlane.xlu1 %8601 }
 0x6dd   : > { %v8690_v46 = vsub.f32 %v21384_v15, %v8602_v28  ;;  %v8791_v24 = vmul.f32 1.442695, %v8689_v32  ;;  %13847 = vmatprep.mubr.bf16.mxu0 %v8987_v8  ;;  %v14315_v36 = vpop.eup %14314  ;;  %v21392_v32 = vld [vmem:[#allocation57_spill] sm:$0xff] }
 0x6de   : > { %v8596_v27 = vpop.xlane.xlu0 %8595  ;;  %13848 = vmatmul.mubr.bf16.vlgmr.msra.gmra.mrb[80].mxu0 %v8988_v16 }
 0x6df   : > { %v8793_v50 = vmul.f32 1.442695, %v8690_v46  ;;  %14322 = vpow2.f32 %v8791_v24  ;;  %v8687_v63 = vsub.f32 %v21385_v18, %v8596_v27  ;;  %v14317_v11 = vpop.eup %14316 }
 0x6e0   : > { %v8598_v9 = vpop.xlane.xlu1 %8597  ;;  %v8995_v22 = vpack.c.bf16 %v14317_v11, %v14315_v36 }
 0x6e1   : > { %14324 = vpow2.f32 %v8793_v50  ;;  %v8688_v25 = vsub.f32 %v21386_v0, %v8598_v9  ;;  %v8787_v43 = vmul.f32 1.442695, %v8687_v63  ;;  %v14319_v26 = vpop.eup %14318 }
 0x6e2   : > { %v8628_v54 = vpop.xlane.xlu0 %8627  ;;  %13879 = vmatprep.mubr.bf16.mxu1 %v8995_v22  ;;  %8943 = vadd.xlane.f32.xlu0 %v14319_v26 }
 0x6e3   : > { %v8789_v42 = vmul.f32 1.442695, %v8688_v25  ;;  %14326 = vpow2.f32 %v8787_v43  ;;  %v8703_v3 = vsub.f32 %v21387_v20, %v8628_v54  ;;  %v14321_v35 = vpop.eup %14320 }
 0x6e4   : > { %v8630_v19 = vpop.xlane.xlu1 %8629  ;;  %8945 = vadd.xlane.f32.xlu1 %v14321_v35  ;;  %v8996_v6 = vpack.c.bf16 %v14321_v35, %v14319_v26 }
 0x6e5   : > { %14328 = vpow2.f32 %v8789_v42  ;;  %v8704_v58 = vsub.f32 %v21388_v59, %v8630_v19  ;;  %v8819_v13 = vmul.f32 1.442695, %v8703_v3 }
 0x6e6   : > { %v8632_v37 = vpop.xlane.xlu0 %8631  ;;  %13880 = vmatmul.mubr.bf16.vlgmr.msra.gmra.mrb[64].mxu1 %v8996_v6  ;;  %8939 = vadd.xlane.f32.xlu0 %v14315_v36 }
 0x6e7   : > { %v8821_v29 = vmul.f32 1.442695, %v8704_v58  ;;  %14330 = vpow2.f32 %v8819_v13  ;;  %v8705_v48 = vsub.f32 %v21389_v31, %v8632_v37 }
 0x6e8   : > { %v8634_v44 = vpop.xlane.xlu1 %8633  ;;  %8941 = vadd.xlane.f32.xlu1 %v14317_v11 }
 0x6e9   : > { %v14323_v51 = vpop.eup %14322  ;;  %14332 = vpow2.f32 %v8821_v29  ;;  %v8706_v38 = vsub.f32 %v21390_v49, %v8634_v44  ;;  %v8823_v53 = vmul.f32 1.442695, %v8705_v48 }
 0x6ea   : > { %8919 = vadd.xlane.f32.xlu0 %v14323_v51 }
 0x6eb   : > { %v14325_v62 = vpop.eup %14324  ;;  %v8825_v4 = vmul.f32 1.442695, %v8706_v38  ;;  %14334 = vpow2.f32 %v8823_v53 }
 0x6ec   : > { %v8608_v56 = vpop.xlane.xlu0 %8607  ;;  %v8990_v10 = vpack.c.bf16 %v14325_v62, %v14323_v51  ;;  %8921 = vadd.xlane.f32.xlu1 %v14325_v62 }
 0x6ed   : > { %v8693_v45 = vsub.f32 %v21391_v34, %v8608_v56  ;;  %v14327_v21 = vpop.eup %14326  ;;  %14336 = vpow2.f32 %v8825_v4 }
 0x6ee   : > { %v8610_v40 = vpop.xlane.xlu1 %8609  ;;  %8915 = vadd.xlane.f32.xlu0 %v14327_v21 }
 0x6ef   : > { %v8694_v16 = vsub.f32 %v18941_v1, %v8610_v40  ;;  %v8799_v5 = vmul.f32 1.442695, %v8693_v45  ;;  %v14329_v17 = vpop.eup %14328  ;;  %v21393_v45 = vld [vmem:[#allocation56_spill] sm:$0xff] }
 0x6f0   : > { %v8604_v41 = vpop.xlane.xlu0 %8603  ;;  %v8989_v8 = vpack.c.bf16 %v14329_v17, %v14327_v21  ;;  %8917 = vadd.xlane.f32.xlu1 %v14329_v17 }
 0x6f1   : > { %v8801_v39 = vmul.f32 1.442695, %v8694_v16  ;;  %14338 = vpow2.f32 %v8799_v5  ;;  %v8691_v28 = vsub.f32 %v21392_v32, %v8604_v41  ;;  %v14331_v15 = vpop.eup %14330  ;;  %v21394_v5 = vld [vmem:[#allocation59_spill] sm:$0xff] }
 0x6f2   : > { %v8606_v46 = vpop.xlane.xlu1 %8605  ;;  %13851 = vmatprep.mubr.bf16.mxu0 %v8989_v8 }
 0x6f3   : > { %14340 = vpow2.f32 %v8801_v39  ;;  %v8692_v24 = vsub.f32 %v18949_v47, %v8606_v46  ;;  %v8795_v27 = vmul.f32 1.442695, %v8691_v28  ;;  %v14333_v50 = vpop.eup %14332  ;;  %13852 = vmatmul.mubr.bf16.gmra.mrb[84].mxu0 %v8990_v10 }
 0x6f4   : > { %v8636_v1 = vpop.xlane.xlu0 %8635  ;;  %v8997_v36 = vpack.c.bf16 %v14333_v50, %v14331_v15 }
 0x6f5   : > { %v8797_v18 = vmul.f32 1.442695, %v8692_v24  ;;  %14342 = vpow2.f32 %v8795_v27  ;;  %v8707_v63 = vsub.f32 %v18947_v2, %v8636_v1  ;;  %v14335_v9 = vpop.eup %14334 }
 0x6f6   : > { %v8638_v0 = vpop.xlane.xlu1 %8637  ;;  %13883 = vmatprep.mubr.bf16.mxu1 %v8997_v36  ;;  %8951 = vadd.xlane.f32.xlu0 %v14335_v9 }
 0x6f7   : > { %14344 = vpow2.f32 %v8797_v18  ;;  %v8708_v25 = vsub.f32 %v18956_v7, %v8638_v0  ;;  %v8827_v43 = vmul.f32 1.442695, %v8707_v63  ;;  %v14337_v47 = vpop.eup %14336 }
 0x6f8   : > { %v8640_v11 = vpop.xlane.xlu0 %8639  ;;  %8953 = vadd.xlane.f32.xlu1 %v14337_v47  ;;  %v8998_v20 = vpack.c.bf16 %v14337_v47, %v14335_v9 }
 0x6f9   : > { %v8829_v54 = vmul.f32 1.442695, %v8708_v25  ;;  %14346 = vpow2.f32 %v8827_v43  ;;  %v8709_v42 = vsub.f32 %v18943_v60, %v8640_v11  ;;  %v21395_v11 = vmov 0  }
 0x6fa   : > { %v8642_v3 = vpop.xlane.xlu1 %8641  ;;  %13884 = vmatmul.mubr.bf16.gmra.mrb[68].mxu1 %v8998_v20  ;;  %8947 = vadd.xlane.f32.xlu0 %v14331_v15 }
 0x6fb   : > { %v14339_v22 = vpop.eup %14338  ;;  %14348 = vpow2.f32 %v8829_v54  ;;  %v8710_v2 = vsub.f32 %v18953_v12, %v8642_v3  ;;  %v8831_v26 = vmul.f32 1.442695, %v8709_v42 }
 0x6fc   : > { %8949 = vadd.xlane.f32.xlu1 %v14333_v50 }
 0x6fd   : > { %v14341_v19 = vpop.eup %14340  ;;  %v8833_v59 = vmul.f32 1.442695, %v8710_v2  ;;  %14350 = vpow2.f32 %v8831_v26 }
 0x6fe   : > { %v8616_v7 = vpop.xlane.xlu0 %8615  ;;  %v8992_v35 = vpack.c.bf16 %v14341_v19, %v14339_v22  ;;  %8927 = vadd.xlane.f32.xlu0 %v14339_v22 }
 0x6ff   : > { %v8697_v58 = vsub.f32 %v18974_v52, %v8616_v7  ;;  %v14343_v37 = vpop.eup %14342  ;;  %14352 = vpow2.f32 %v8833_v59 }
 0x700   : > { %v8618_v13 = vpop.xlane.xlu1 %8617  ;;  %8929 = vadd.xlane.f32.xlu1 %v14341_v19 }
 0x701   : > { %v8698_v60 = vsub.f32 %v18983_v61, %v8618_v13  ;;  %v8807_v29 = vmul.f32 1.442695, %v8697_v58  ;;  %v14345_v12 = vpop.eup %14344 }
 0x702   : > { %v8612_v31 = vpop.xlane.xlu0 %8611  ;;  %v8991_v51 = vpack.c.bf16 %v14345_v12, %v14343_v37  ;;  %8923 = vadd.xlane.f32.xlu0 %v14343_v37 }
 0x703   : > { %v8809_v48 = vmul.f32 1.442695, %v8698_v60  ;;  %14354 = vpow2.f32 %v8807_v29  ;;  %v8695_v6 = vsub.f32 %v18979_v14, %v8612_v31  ;;  %v14347_v49 = vpop.eup %14346 }
 0x704   : > { %v8614_v44 = vpop.xlane.xlu1 %8613  ;;  %13855 = vmatprep.mubr.bf16.mxu0 %v8991_v51  ;;  %8925 = vadd.xlane.f32.xlu1 %v14345_v12 }
 0x705   : > { %14356 = vpow2.f32 %v8809_v48  ;;  %v8696_v52 = vsub.f32 %v18991_v55, %v8614_v44  ;;  %v8803_v38 = vmul.f32 1.442695, %v8695_v6  ;;  %v14349_v61 = vpop.eup %14348  ;;  %13856 = vmatmul.mubr.bf16.gmra.mrb[88].mxu0 %v8992_v35 }
 0x706   : > { %v8644_v53 = vpop.xlane.xlu0 %8643  ;;  %v8999_v34 = vpack.c.bf16 %v14349_v61, %v14347_v49 }
 0x707   : > { %v8805_v62 = vmul.f32 1.442695, %v8696_v52  ;;  %14358 = vpow2.f32 %v8803_v38  ;;  %v8711_v4 = vsub.f32 %v18989_v30, %v8644_v53  ;;  %v14351_v14 = vpop.eup %14350 }
 0x708   : > { %v8646_v56 = vpop.xlane.xlu1 %8645  ;;  %13887 = vmatprep.mubr.bf16.mxu1 %v8999_v34  ;;  %8959 = vadd.xlane.f32.xlu0 %v14351_v14 }
 0x709   : > { %14360 = vpow2.f32 %v8805_v62  ;;  %v8712_v10 = vsub.f32 %v21393_v45, %v8646_v56  ;;  %v8835_v21 = vmul.f32 1.442695, %v8711_v4  ;;  %v14353_v40 = vpop.eup %14352 }
 0x70a   : > { %v8648_v55 = vpop.xlane.xlu0 %8647  ;;  %8961 = vadd.xlane.f32.xlu1 %v14353_v40  ;;  %v9000_v39 = vpack.c.bf16 %v14353_v40, %v14351_v14 }
 0x70b   : > { %v8837_v16 = vmul.f32 1.442695, %v8712_v10  ;;  %14362 = vpow2.f32 %v8835_v21  ;;  %v8713_v17 = vsub.f32 %v21394_v5, %v8648_v55 }
 0x70c   : > { %v8650_v41 = vpop.xlane.xlu1 %8649  ;;  %13888 = vmatmul.mubr.bf16.gmra.mrb[72].mxu1 %v9000_v39  ;;  %8955 = vadd.xlane.f32.xlu0 %v14347_v49 }
 0x70d   : > { %v14355_v32 = vpop.eup %14354  ;;  %14364 = vpow2.f32 %v8837_v16  ;;  %v8714_v30 = vsub.f32 %v18995_v57, %v8650_v41  ;;  %v8839_v28 = vmul.f32 1.442695, %v8713_v17 }
 0x70e   : > { %8957 = vadd.xlane.f32.xlu1 %v14349_v61  ;;  %v8848_v27 = vpop.xlane.xlu0 %8847 }
 0x70f   : > { %v14357_v8 = vpop.eup %14356  ;;  %v8841_v15 = vmul.f32 1.442695, %v8714_v30  ;;  %14366 = vpow2.f32 %v8839_v28 }
 0x710   : > { %v8994_v46 = vpack.c.bf16 %v14357_v8, %v14355_v32  ;;  %8903 = vadd.xlane.f32.xlu0 %v19066_v33  ;;  %v8850_v1 = vpop.xlane.xlu1 %8849 }
 0x711   : > { %v14359_v24 = vpop.eup %14358  ;;  %14368 = vpow2.f32 %v8841_v15 }
 0x712   : > { %8905 = vadd.xlane.f32.xlu1 %v19068_v23  ;;  %v8844_v9 = vpop.xlane.xlu0 %8843  ;;  %14370 = vrcp.f32 %v8848_v27 }
 0x713   : > { %v14361_v50 = vpop.eup %14360  ;;  %14372 = vrcp.f32 %v8850_v1 }
 0x714   : > { %v8993_v18 = vpack.c.bf16 %v14361_v50, %v14359_v24  ;;  %8935 = vadd.xlane.f32.xlu0 %v14355_v32  ;;  %v8846_v25 = vpop.xlane.xlu1 %8845  ;;  %14374 = vrcp.f32 %v8844_v9 }
 0x715   : > { %v14363_v63 = vpop.eup %14362  ;;  %14376 = vrcp.f32 %v8846_v25 }
 0x716   : > { %13859 = vmatprep.mubr.bf16.mxu0 %v8993_v18  ;;  %8937 = vadd.xlane.f32.xlu1 %v14357_v8  ;;  %v8880_v23 = vpop.xlane.xlu0 %8879 }
 0x717   : > { %v14365_v57 = vpop.eup %14364  ;;  %13860 = vmatmul.mubr.bf16.gmra.mrb[92].mxu0 %v8994_v46  ;;  %14378 = vrcp.f32 %v8880_v23 }
 0x718   : > { %v9001_v36 = vpack.c.bf16 %v14365_v57, %v14363_v63  ;;  %8931 = vadd.xlane.f32.xlu0 %v14359_v24  ;;  %v8882_v47 = vpop.xlane.xlu1 %8881 }
 0x719   : > { %v14367_v0 = vpop.eup %14366  ;;  %14380 = vrcp.f32 %v8882_v47 }
 0x71a   : > { %13891 = vmatprep.mubr.bf16.mxu1 %v9001_v36  ;;  %8933 = vadd.xlane.f32.xlu1 %v14361_v50  ;;  %v8876_v3 = vpop.xlane.xlu0 %8875 }
 0x71b   : > { %v14369_v33 = vpop.eup %14368  ;;  %14382 = vrcp.f32 %v8876_v3 }
 0x71c   : > { %v9002_v43 = vpack.c.bf16 %v14369_v33, %v14367_v0  ;;  %8963 = vadd.xlane.f32.xlu0 %v14363_v63  ;;  %v14371_v54 = vpop.eup %14370  ;;  %v8878_v26 = vpop.xlane.xlu1 %8877 }
 0x71d   : > { %v13785_v42 = vpop.f32.mrb[64].mxu0  ;;  %v14373_v20 = vpop.eup %14372  ;;  %14384 = vrcp.f32 %v8878_v26 }
 0x71e   : > { %13892 = vmatmul.mubr.bf16.gmra.mrb[76].mxu1 %v9002_v43  ;;  %8965 = vadd.xlane.f32.xlu1 %v14365_v57  ;;  %v9037_v22 = vpop.f32.mrb[65].mxu0  ;;  %v14375_v2 = vpop.eup %14374  ;;  %v9457_v59 = vmul.f32 %v14371_v54, %v13785_v42 }
 0x71f   : > { %12299 = vmatprep.mubr.bf16.mxu1 %v21395_v11  ;;  %v13786_v7 = vpop.f32.mrb[66].mxu0  ;;  %v14377_v19 = vpop.eup %14376  ;;  %v9455_v35 = vmul.f32 %v14375_v2, %v9037_v22 }
 0x720   : > { %8967 = vadd.xlane.f32.xlu0 %v14367_v0  ;;  %v9458_v58 = vmul.f32 %v14373_v20, %v13786_v7  ;;  %v9040_v13 = vpop.f32.mrb[67].mxu0  ;;  %v8856_v31 = vpop.xlane.xlu0 %8855 }
 0x721   : > { %v9456_v37 = vmul.f32 %v14377_v19, %v9040_v13  ;;  %v8858_v12 = vpop.xlane.xlu1 %8857  ;;  %v14379_v48 = vpop.eup %14378  ;;  %14386 = vrcp.f32 %v8856_v31 }
 0x722   : > { %8969 = vadd.xlane.f32.xlu1 %v14369_v33  ;;  %v9520_v60 = vpack.c.bf16 %v9458_v58, %v9457_v59  ;;  %14388 = vrcp.f32 %v8858_v12 }
 0x723   : > { %v9519_v29 = vpack.c.bf16 %v9456_v37, %v9455_v35  ;;  %v14381_v51 = vpop.eup %14380 }
 0x724   : > { %v8852_v49 = vpop.xlane.xlu0 %8851  ;;  %v9571_v40 = vshrl.u32 %v9520_v60, 16 }
 0x725   : > { %v8854_v6 = vpop.xlane.xlu1 %8853  ;;  %v14383_v38 = vpop.eup %14382  ;;  %v9555_v17 = vshrl.u32 %v9519_v29, 16  ;;  %14390 = vrcp.f32 %v8852_v49 }
 0x726   : > { %14392 = vrcp.f32 %v8854_v6 }
 0x727   : > { %v14385_v61 = vpop.eup %14384 }
 0x728   : > { %v8888_v55 = vpop.xlane.xlu0 %8887 }
 0x729   : > { %v8890_v10 = vpop.xlane.xlu1 %8889  ;;  %14394 = vrcp.f32 %v8888_v55 }
 0x72a   : > { %v13817_v44 = vpop.f32.mrb[48].mxu1  ;;  %14396 = vrcp.f32 %v8890_v10 }
 0x72b   : > { %v9134_v52 = vpop.f32.mrb[49].mxu1  ;;  %v9473_v62 = vmul.f32 %v14379_v48, %v13817_v44  ;;  %v14387_v18 = vpop.eup %14386 }
 0x72c   : > { %v13818_v53 = vpop.f32.mrb[50].mxu1  ;;  %v9471_v34 = vmul.f32 %v14383_v38, %v9134_v52  ;;  %v8884_v8 = vpop.xlane.xlu0 %8883 }
 0x72d   : > { %v9474_v4 = vmul.f32 %v14381_v51, %v13818_v53  ;;  %v9137_v56 = vpop.f32.mrb[51].mxu1  ;;  %v8886_v28 = vpop.xlane.xlu1 %8885  ;;  %14398 = vrcp.f32 %v8884_v8 }
 0x72e   : > { %v9472_v14 = vmul.f32 %v14385_v61, %v9137_v56  ;;  %14400 = vrcp.f32 %v8886_v28  ;;  %v14389_v57 = vpop.eup %14388 }
 0x72f   : > { %v9528_v45 = vpack.c.bf16 %v9474_v4, %v9473_v62  ;;  %v14391_v9 = vpop.eup %14390 }
 0x730   : > { %v9527_v21 = vpack.c.bf16 %v9472_v14, %v9471_v34  ;;  %v8864_v46 = vpop.xlane.xlu0 %8863  ;;  %v14393_v25 = vpop.eup %14392 }
 0x731   : > { %v19107_v16 = vpack.i.b16 %v9528_v45, %v9520_v60  ;;  %v9572_v5 = vshrl.u32 %v9528_v45, 16  ;;  %v8866_v15 = vpop.xlane.xlu1 %8865  ;;  %14402 = vrcp.f32 %v8864_v46 }
 0x732   : > { %v19109_v41 = vpack.i.b16 %v9527_v21, %v9519_v29  ;;  %v9556_v39 = vshrl.u32 %v9527_v21, 16  ;;  %14404 = vrcp.f32 %v8866_v15 }
 0x733   : > { %v19111_v32 = vpack.i.b16 %v9572_v5, %v9571_v40  ;;  %v14395_v47 = vpop.eup %14394 }
 0x734   : > { %v19113_v30 = vpack.i.b16 %v9556_v39, %v9555_v17  ;;  %v8860_v27 = vpop.xlane.xlu0 %8859  ;;  %v14397_v22 = vpop.eup %14396 }
 0x735   : > { %v8862_v24 = vpop.xlane.xlu1 %8861  ;;  %14406 = vrcp.f32 %v8860_v27 }
 0x736   : > { %14408 = vrcp.f32 %v8862_v24 }
 0x737   : > { %v14399_v19 = vpop.eup %14398 }
 0x738   : > { %v8896_v1 = vpop.xlane.xlu0 %8895  ;;  %v14401_v13 = vpop.eup %14400 }
 0x739   : > { %v8898_v50 = vpop.xlane.xlu1 %8897  ;;  %14410 = vrcp.f32 %v8896_v1 }
 0x73b   : > { %v14403_v10 = vpop.eup %14402 }
 0x73c   : > { %v8892_v2 = vpop.xlane.xlu0 %8891  ;;  %v14405_v40 = vpop.eup %14404 }
 0x73d   : > { %v8894_v54 = vpop.xlane.xlu1 %8893  ;;  %14412 = vrcp.f32 %v8892_v2 }
 0x73e   : > { %14414 = vrcp.f32 %v8898_v50 }
 0x73f   : > { %14416 = vrcp.f32 %v8894_v54  ;;  %v14407_v39 = vpop.eup %14406 }
 0x740   : > { %v19117_v44 = vpop.xlane.xlu0 %8871  ;;  %v14409_v8 = vpop.eup %14408 }
 0x741   : > { %v19115_v48 = vpop.xlane.xlu1 %8873  ;;  %14418 = vrcp.f32 %v19117_v44 }
 0x744   : > { %v8868_v34 = vpop.xlane.xlu0 %8867 }
 0x745   : > { %v8870_v56 = vpop.xlane.xlu1 %8869  ;;  %14420 = vrcp.f32 %v8868_v34 }
 0x746   : > { %14422 = vrcp.f32 %v19115_v48 }
 0x747   : > { %14424 = vrcp.f32 %v8870_v56 }
 0x748   : > { %v8900_v14 = vpop.xlane.xlu0 %8899 }
 0x749   : > { %v19127_v45 = vpop.xlane.xlu1 %8901  ;;  %14426 = vrcp.f32 %v8900_v14 }
 0x74a   : > { %14428 = vrcp.f32 %v19127_v45 }
 0x74b   : > { %v13789_v63 = vpop.f32.mrb[68].mxu0 }
 0x74c   : > { %v9053_v36 = vpop.f32.mrb[69].mxu0  ;;  %v9461_v33 = vmul.f32 %v14387_v18, %v13789_v63 }
 0x74d   : > { %v13790_v0 = vpop.f32.mrb[70].mxu0  ;;  %v9459_v42 = vmul.f32 %v14391_v9, %v9053_v36  ;;  %v13821_v3 = vpop.f32.mrb[52].mxu1 }
 0x74e   : > { %v9462_v43 = vmul.f32 %v14389_v57, %v13790_v0  ;;  %v9056_v23 = vpop.f32.mrb[71].mxu0  ;;  %v9150_v7 = vpop.f32.mrb[53].mxu1  ;;  %v9477_v35 = vmul.f32 %v14395_v47, %v13821_v3 }
 0x74f   : > { %v9460_v20 = vmul.f32 %v14393_v25, %v9056_v23  ;;  %v13822_v58 = vpop.f32.mrb[54].mxu1  ;;  %v9475_v29 = vmul.f32 %v14399_v19, %v9150_v7  ;;  %v14411_v36 = vpop.eup %14410 }
 0x750   : > { %v9522_v26 = vpack.c.bf16 %v9462_v43, %v9461_v33  ;;  %v9478_v37 = vmul.f32 %v14397_v22, %v13822_v58  ;;  %v9153_v60 = vpop.f32.mrb[55].mxu1  ;;  %v14413_v0 = vpop.eup %14412 }
 0x751   : > { %v9521_v59 = vpack.c.bf16 %v9460_v20, %v9459_v42  ;;  %v9476_v31 = vmul.f32 %v14401_v13, %v9153_v60  ;;  %v14415_v33 = vpop.eup %14414 }
 0x752   : > { %v9530_v12 = vpack.c.bf16 %v9478_v37, %v9477_v35  ;;  %v9603_v51 = vshrl.u32 %v9522_v26, 16  ;;  %v14417_v47 = vpop.eup %14416 }
 0x753   : > { %v9529_v6 = vpack.c.bf16 %v9476_v31, %v9475_v29  ;;  %v9587_v38 = vshrl.u32 %v9521_v59, 16 }
 0x754   : > { %v19119_v49 = vpack.i.b16 %v9530_v12, %v9522_v26  ;;  %v9604_v52 = vshrl.u32 %v9530_v12, 16 }
 0x755   : > { %v19121_v53 = vpack.i.b16 %v9529_v6, %v9521_v59  ;;  %v9588_v61 = vshrl.u32 %v9529_v6, 16 }
 0x756   : > { %v19123_v62 = vpack.i.b16 %v9604_v52, %v9603_v51 }
 0x757   : > { %v19125_v4 = vpack.i.b16 %v9588_v61, %v9587_v38 }
 0x762   : > { %v19129_v21 = vpop.xlane.xlu0 %8911 }
 0x764   : > { %v19131_v5 = vpop.xlane.xlu1 %8913 }
 0x766   : > { %v13793_v55 = vpop.f32.mrb[72].mxu0  ;;  %v19135_v50 = vpop.xlane.xlu0 %8907 }
 0x767   : > { %v9069_v17 = vpop.f32.mrb[73].mxu0  ;;  %v9465_v15 = vmul.f32 %v14403_v10, %v13793_v55 }
 0x768   : > { %v13794_v28 = vpop.f32.mrb[74].mxu0  ;;  %v9463_v27 = vmul.f32 %v14407_v39, %v9069_v17  ;;  %v19133_v57 = vpop.xlane.xlu1 %8909 }
 0x769   : > { %v9466_v46 = vmul.f32 %v14405_v40, %v13794_v28  ;;  %v9072_v24 = vpop.f32.mrb[75].mxu0  ;;  %v14419_v40 = vpop.eup %14418 }
 0x76a   : > { %v9464_v18 = vmul.f32 %v14409_v8, %v9072_v24  ;;  %v14421_v28 = vpop.eup %14420 }
 0x76b   : > { %v9524_v1 = vpack.c.bf16 %v9466_v46, %v9465_v15  ;;  %v14423_v8 = vpop.eup %14422 }
 0x76c   : > { %v9523_v63 = vpack.c.bf16 %v9464_v18, %v9463_v27  ;;  %v14425_v46 = vpop.eup %14424 }
 0x76d   : > { %v9635_v59 = vshrl.u32 %v9524_v1, 16 }
 0x76e   : > { %v13825_v9 = vpop.f32.mrb[56].mxu1  ;;  %v9619_v35 = vshrl.u32 %v9523_v63, 16 }
 0x76f   : > { %v9166_v25 = vpop.f32.mrb[57].mxu1  ;;  %v19137_v54 = vpop.xlane.xlu0 %8943  ;;  %v9481_v42 = vmul.f32 %v14411_v36, %v13825_v9 }
 0x770   : > { %v9479_v43 = vmul.f32 %v14413_v0, %v9166_v25  ;;  %v13826_v23 = vpop.f32.mrb[58].mxu1  ;;  %v14427_v0 = vpop.eup %14426 }
 0x771   : > { %v9482_v20 = vmul.f32 %v14415_v33, %v13826_v23  ;;  %v9169_v3 = vpop.f32.mrb[59].mxu1  ;;  %v19139_v2 = vpop.xlane.xlu1 %8945 }
 0x772   : > { %v9480_v22 = vmul.f32 %v14417_v47, %v9169_v3  ;;  %v14429_v23 = vpop.eup %14428 }
 0x773   : > { %v9532_v26 = vpack.c.bf16 %v9482_v20, %v9481_v42  ;;  %v19141_v19 = vpop.xlane.xlu0 %8939 }
 0x774   : > { %v9531_v7 = vpack.c.bf16 %v9480_v22, %v9479_v43 }
 0x775   : > { %v19143_v58 = vpack.i.b16 %v9532_v26, %v9524_v1  ;;  %v9636_v13 = vshrl.u32 %v9532_v26, 16  ;;  %v19147_v29 = vpop.xlane.xlu1 %8941 }
 0x776   : > { %v19145_v37 = vpack.i.b16 %v9531_v7, %v9523_v63  ;;  %v9620_v60 = vshrl.u32 %v9531_v7, 16 }
 0x777   : > { %v19149_v31 = vpack.i.b16 %v9636_v13, %v9635_v59  ;;  %v19153_v6 = vpop.xlane.xlu0 %8919 }
 0x778   : > { %v19151_v12 = vpack.i.b16 %v9620_v60, %v9619_v35 }
 0x779   : > { %v19155_v51 = vpop.xlane.xlu1 %8921 }
 0x77b   : > { %v19157_v52 = vpop.xlane.xlu0 %8915 }
 0x77d   : > { %v19160_v38 = vpop.xlane.xlu1 %8917 }
 0x783   : > { %v19163_v61 = vpop.xlane.xlu0 %8951 }
 0x785   : > { %v19165_v10 = vpop.xlane.xlu1 %8953 }
 0x787   : > { %v19167_v55 = vpop.xlane.xlu0 %8947 }
 0x789   : > { %v19169_v17 = vpop.xlane.xlu1 %8949 }
 0x78a   : > { %v13797_v39 = vpop.f32.mrb[76].mxu0 }
 0x78b   : > { %v9469_v44 = vmul.f32 %v14419_v40, %v13797_v39  ;;  %v9085_v34 = vpop.f32.mrb[77].mxu0  ;;  %v19172_v15 = vpop.xlane.xlu0 %8927 }
 0x78c   : > { %v9467_v48 = vmul.f32 %v14421_v28, %v9085_v34  ;;  %v13798_v56 = vpop.f32.mrb[78].mxu0 }
 0x78d   : > { %v9470_v24 = vmul.f32 %v14423_v8, %v13798_v56  ;;  %v9088_v27 = vpop.f32.mrb[79].mxu0  ;;  %v19174_v18 = vpop.xlane.xlu1 %8929 }
 0x78e   : > { %v9468_v14 = vmul.f32 %v14425_v46, %v9088_v27 }
 0x78f   : > { %v9526_v1 = vpack.c.bf16 %v9470_v24, %v9469_v44  ;;  %v19176_v63 = vpop.xlane.xlu0 %8923 }
 0x790   : > { %v9525_v36 = vpack.c.bf16 %v9468_v14, %v9467_v48  ;;  %v21397_v14 = vld [vmem:[#allocation52_spill] sm:$0xff] }
 0x791   : > { %v19178_v9 = vpop.xlane.xlu1 %8925 }
 0x792   : > { %v13829_v45 = vpop.f32.mrb[60].mxu1  ;;  %v9651_v7 = vshrl.u32 %v9525_v36, 16 }
 0x793   : > { %v9182_v25 = vpop.f32.mrb[61].mxu1 }
 0x794   : > { %v9483_v33 = vmul.f32 %v14427_v0, %v9182_v25  ;;  %v13830_v43 = vpop.f32.mrb[62].mxu1 }
 0x795   : > { %v19180_v47 = vpop.xlane.xlu0 %8959  ;;  %v9185_v42 = vpop.f32.mrb[63].mxu1 }
 0x796   : > { %v9484_v20 = vmul.f32 %v14429_v23, %v9185_v42 }
 0x797   : > { %v19182_v3 = vpop.xlane.xlu1 %8961 }
 0x798   : > { %v9533_v22 = vpack.c.bf16 %v9484_v20, %v9483_v33  ;;  %v19266_v20 = vrot.slane %v19119_v49, %v21397_v14 }
 0x799   : > { %v19184_v26 = vpop.xlane.xlu0 %8955 }
 0x79a   : > { %v19186_v59 = vpack.i.b16 %v9533_v22, %v9525_v36  ;;  %v9652_v13 = vshrl.u32 %v9533_v22, 16 }
 0x79b   : > { %v19188_v35 = vpop.xlane.xlu1 %8957 }
 0x79c   : > { %v19190_v60 = vpack.i.b16 %v9652_v13, %v9651_v7 }
 0x79d   : > { %v8904_v40 = vpop.xlane.xlu0 %8903 }
 0x79e   : > { %14430 = vrcp.f32 %v8904_v40 }
 0x79f   : > { %v8906_v39 = vpop.xlane.xlu1 %8905 }
 0x7a0   : > { %14432 = vrcp.f32 %v8906_v39 }
 0x7a1   : > { %14434 = vrcp.f32 %v19129_v21  ;;  %v19202_v21 = vpop.xlane.xlu0 %8935 }
 0x7a2   : > { %14436 = vrcp.f32 %v19131_v5 }
 0x7a3   : > { %14438 = vrcp.f32 %v19135_v50  ;;  %v21396_v50 = vld [vmem:[#allocation51_spill] sm:$0xff] }
 0x7a4   : > { %14440 = vrcp.f32 %v19133_v57  ;;  %v9679_v46 = vcombine.high %v19109_v41, %v21396_v50  ;;  %v10075_v42 = vcombine.high %v19119_v49, %v21396_v50 }
 0x7a5   : > { %14442 = vrcp.f32 %v19137_v54  ;;  %v9811_v54 = vcombine.high %v19107_v16, %v21396_v50  ;;  %v8932_v0 = vpop.xlane.xlu0 %8931 }
 0x7a6   : > { %14444 = vrcp.f32 %v19139_v2  ;;  %v19207_v2 = vpop.xlane.xlu1 %8937  ;;  %v19249_v33 = vrot.slane %v9679_v46, %v21397_v14  ;;  %v10273_v46 = vcombine.high %v19151_v12, %v21396_v50 }
 0x7a7   : > { %14446 = vrcp.f32 %v19141_v19 }
 0x7a8   : > { %v14431_v28 = vpop.eup %14430  ;;  %14448 = vrcp.f32 %v19147_v29  ;;  %v9667_v29 = vshrl.u32 %v9526_v1, 16 }
 0x7a9   : > { %v9485_v34 = vmul.f32 %v14431_v28, %v13829_v45  ;;  %14450 = vrcp.f32 %v19153_v6  ;;  %v19236_v45 = vrot.slane %v19111_v32, %v21397_v14 }
 0x7aa   : > { %v14433_v44 = vpop.eup %14432  ;;  %14452 = vrcp.f32 %v19155_v51  ;;  %v9877_v51 = vcombine.high %v19111_v32, %v21396_v50  ;;  %v19253_v32 = vrot.slane %v19113_v30, %v21397_v14 }
 0x7ab   : > { %v9486_v8 = vmul.f32 %v14433_v44, %v13830_v43  ;;  %v14435_v57 = vpop.eup %14434  ;;  %14454 = vrcp.f32 %v19157_v52  ;;  %v9745_v52 = vcombine.high %v19113_v30, %v21396_v50 }
 0x7ac   : > { %v14437_v19 = vpop.eup %14436  ;;  %14456 = vrcp.f32 %v19160_v38 }
 0x7ad   : > { %v9534_v5 = vpack.c.bf16 %v9486_v8, %v9485_v34  ;;  %v14439_v56 = vpop.eup %14438  ;;  %14458 = vrcp.f32 %v19163_v61  ;;  %v19232_v61 = vrot.slane %v9811_v54, %v21397_v14  ;;  %v10141_v34 = vcombine.high %v19123_v62, %v21396_v50 }
 0x7ae   : > { %v14441_v24 = vpop.eup %14440  ;;  %14460 = vrcp.f32 %v19165_v10  ;;  %v19240_v10 = vrot.slane %v19109_v41, %v21397_v14  ;;  %v8934_v41 = vpop.xlane.xlu1 %8933 }
 0x7af   : > { %v19210_v48 = vpack.i.b16 %v9534_v5, %v9526_v1  ;;  %v9668_v6 = vshrl.u32 %v9534_v5, 16  ;;  %v19222_v27 = vpop.eup %14442  ;;  %v19226_v1 = vrot.slane %v19107_v16, %v21397_v14  ;;  %14462 = vrcp.f32 %v19167_v55 }
 0x7b0   : > { %v19229_v36 = vpop.eup %14444  ;;  %14464 = vrcp.f32 %v19169_v17  ;;  %v19246_v55 = vrot.slane %v9877_v51, %v21397_v14  ;;  %v19259_v17 = vrot.slane %v9745_v52, %v21397_v14  ;;  %v19315_v51 = vrot.slane %v19125_v4, %v21397_v14 }
 0x7b1   : > { %v19220_v38 = vpack.i.b16 %v9668_v6, %v9667_v29  ;;  %v13849_v16 = vpop.f32.mrb[80].mxu0  ;;  %v19243_v25 = vpop.eup %14446  ;;  %14466 = vrcp.f32 %v19172_v15  ;;  %v9943_v15 = vcombine.high %v19121_v53, %v21396_v50 }
 0x7b2   : > { %v9231_v43 = vpop.f32.mrb[81].mxu0  ;;  %v19256_v23 = vpop.eup %14448  ;;  %14468 = vrcp.f32 %v19174_v18  ;;  %v9489_v7 = vmul.f32 %v14435_v57, %v13849_v16  ;;  %v19278_v18 = vrot.slane %v19121_v53, %v21397_v14  ;;  %v10339_v53 = vcombine.high %v19143_v58, %v21396_v50 }
 0x7b3   : > { %v13850_v30 = vpop.f32.mrb[82].mxu0  ;;  %v19268_v22 = vpop.eup %14450  ;;  %14470 = vrcp.f32 %v19176_v63  ;;  %v9487_v49 = vmul.f32 %v14439_v56, %v9231_v43  ;;  %v10009_v63 = vcombine.high %v19125_v4, %v21396_v50  ;;  %v19306_v29 = vrot.slane %v9943_v15, %v21397_v14 }
 0x7b4   : > { %v9490_v13 = vmul.f32 %v14437_v19, %v13850_v30  ;;  %v9234_v40 = vpop.f32.mrb[83].mxu0  ;;  %v19273_v39 = vpop.eup %14452  ;;  %14472 = vrcp.f32 %v19178_v9  ;;  %v19292_v9 = vrot.slane %v10075_v42, %v21397_v14  ;;  %v19332_v4 = vrot.slane %v19143_v58, %v21397_v14 }
 0x7b5   : > { %v9488_v28 = vmul.f32 %v14441_v24, %v9234_v40  ;;  %v19280_v44 = vpop.eup %14454  ;;  %14474 = vrcp.f32 %v19180_v47  ;;  %v8964_v57 = vpop.xlane.xlu0 %8963  ;;  %v19303_v47 = vrot.slane %v19123_v62, %v21397_v14  ;;  %v10405_v62 = vcombine.high %v19149_v31, %v21396_v50 }
 0x7b6   : > { %v19287_v8 = vpack.c.bf16 %v9490_v13, %v9489_v7  ;;  %v19289_v5 = vpop.eup %14456  ;;  %14476 = vrcp.f32 %v19182_v3  ;;  %v10207_v3 = vcombine.high %v19145_v37, %v21396_v50  ;;  %v8966_v6 = vpop.xlane.xlu1 %8965  ;;  %v19328_v52 = vrot.slane %v10009_v63, %v21397_v14 }
 0x7b7   : > { %v19297_v54 = vpack.c.bf16 %v9488_v28, %v9487_v49  ;;  %v19299_v19 = vpop.eup %14458  ;;  %14478 = vrcp.f32 %v19184_v26  ;;  %v19325_v26 = vrot.slane %v10141_v34, %v21397_v14  ;;  %v19339_v16 = vrot.slane %v10339_v53, %v21397_v14 }
 0x7b8   : > { %v19311_v56 = vpop.eup %14460  ;;  %14480 = vrcp.f32 %v19188_v35  ;;  %v19343_v43 = vrot.slane %v19149_v31, %v21397_v14  ;;  %v19347_v42 = vrot.slane %v19145_v37, %v21397_v14  ;;  %v10471_v15 = vcombine.high %v19186_v59, %v21396_v50 }
 0x7b9   : > { %v19322_v24 = vpop.eup %14462  ;;  %14482 = vrcp.f32 %v19202_v21  ;;  %21398 = vst [vmem:[#allocation41_spill] sm:$0xff] %v19339_v16  ;;  %v13881_v30 = vpop.f32.mrb[64].mxu1  ;;  %v19352_v21 = vrot.slane %v10207_v3, %v21397_v14  ;;  %v19363_v37 = vrot.slane %v10405_v62, %v21397_v14  ;;  %v19366_v13 = vrot.slane %v10273_v46, %v21397_v14 }
 0x7ba   : > { %v19335_v35 = vpop.eup %14464  ;;  %14484 = vrcp.f32 %v19207_v2  ;;  %21399 = vst [vmem:[#allocation58_spill] sm:$0xff] %v19343_v43  ;;  %21400 = vst [vmem:[#allocation61_spill] sm:$0xff] %v19347_v42  ;;  %v19356_v2 = vrot.slane %v19151_v12, %v21397_v14  ;;  %v9328_v31 = vpop.f32.mrb[65].mxu1  ;;  %v10537_v49 = vcombine.high %v19190_v60, %v21396_v50  ;;  %v19374_v34 = vrot.slane %v19186_v59, %v21397_v14  ;;  %v14163_v42 = vld [vmem:[%s15548_s8 + $0x8] sm:$0xff]  }
 0x7bb   : > { %v19349_v58 = vpop.eup %14466  ;;  %21401 = vst [vmem:[#allocation42_spill] sm:$0xff] %v19352_v21  ;;  %14486 = vrcp.f32 %v8932_v0  ;;  %21403 = vst [vmem:[#allocation69_spill] sm:$0xff] %v19363_v37  ;;  %v8968_v40 = vpop.xlane.xlu0 %8967  ;;  %v9505_v63 = vmul.f32 %v19222_v27, %v13881_v30  ;;  %v10603_v62 = vcombine.high %v19210_v48, %v21396_v50  ;;  %v9503_v46 = vmul.f32 %v19243_v25, %v9328_v31 }
 0x7bc   : > { %21402 = vst [vmem:[#allocation66_spill] sm:$0xff] %v19356_v2  ;;  %v19360_v7 = vpop.eup %14468  ;;  %14488 = vrcp.f32 %v8934_v41  ;;  %21404 = vst [vmem:[#allocation68_spill] sm:$0xff] %v19366_v13  ;;  %v13882_v12 = vpop.f32.mrb[66].mxu1  ;;  %v19387_v59 = vrot.slane %v10471_v15, %v21397_v14  ;;  %v19391_v27 = vrot.slane %v19190_v60, %v21397_v14  ;;  %v19398_v25 = vrot.slane %v10537_v49, %v21397_v14 }
 0x7bd   : > { %v19370_v28 = vpop.eup %14470  ;;  %v8970_v0 = vpop.xlane.xlu1 %8969  ;;  %14490 = vrcp.f32 %v8964_v57  ;;  %21405 = vst [vmem:[#allocation70_spill] sm:$0xff] %v19374_v34  ;;  %v9506_v41 = vmul.f32 %v19229_v36, %v13882_v12  ;;  %v19404_v15 = vrot.slane %v19210_v48, %v21397_v14  ;;  %v9579_v60 = vshrl.u32 %v19287_v8, 16 }
 0x7be   : > { %v9331_v53 = vpop.f32.mrb[67].mxu1  ;;  %v19378_v3 = vpop.eup %14472  ;;  %14492 = vrcp.f32 %v8966_v6  ;;  %21406 = vst [vmem:[#allocation71_spill] sm:$0xff] %v19387_v59  ;;  %21407 = vst [vmem:[#allocation76_spill] sm:$0xff] %v19391_v27  ;;  %v10669_v6 = vcombine.high %v19220_v38, %v21396_v50  ;;  %v9563_v49 = vshrl.u32 %v19297_v54, 16  ;;  %v19419_v48 = vrot.slane %v19220_v38, %v21397_v14 }
 0x7bf   : > { %v9504_v11 = vmul.f32 %v19256_v23, %v9331_v53  ;;  %v19384_v57 = vpop.eup %14474  ;;  %14494 = vrcp.f32 %v8968_v40  ;;  %v9544_v36 = vpack.c.bf16 %v9506_v41, %v9505_v63  ;;  %21408 = vst [vmem:[#allocation48_spill] sm:$0xff] %v19398_v25  ;;  %21409 = vst [vmem:[#allocation63_spill] sm:$0xff] %v19404_v15  ;;  %v21418_v15 = vld [vmem:[#allocation53_spill] sm:$0xff] }
 0x7c0   : > { %v19393_v30 = vpop.eup %14476  ;;  %14496 = vrcp.f32 %v8970_v0  ;;  %v19411_v0 = vrot.slane %v10603_v62, %v21397_v14  ;;  %21412 = vst [vmem:[#allocation62_spill] sm:$0xff] %v19419_v48  ;;  %v19426_v62 = vrot.slane %v10669_v6, %v21397_v14 }
 0x7c1   : > { %v9543_v23 = vpack.c.bf16 %v9504_v11, %v9503_v46  ;;  %v19400_v31 = vpop.eup %14478  ;;  %v9577_v40 = vpack.i.b16 %v9544_v36, %v19287_v8  ;;  %v9580_v12 = vshrl.u32 %v9544_v36, 16 }
 0x7c2   : > { %v19408_v63 = vpop.eup %14480  ;;  %21410 = vst [vmem:[#allocation60_spill] sm:$0xff] %v19411_v0  ;;  %21414 = vst [vmem:[#allocation43_spill] sm:$0xff] %v19426_v62 }
 0x7c3   : > { %v9561_v11 = vpack.i.b16 %v9543_v23, %v19297_v54  ;;  %v9564_v41 = vshrl.u32 %v9543_v23, 16  ;;  %v19415_v53 = vpop.eup %14482  ;;  %v9581_v46 = vpack.i.b16 %v9580_v12, %v9579_v60  ;;  %v9826_v8 = vcombine.high %v9577_v40, %v21396_v50 }
 0x7c4   : > { %21411 = vst [vmem:[#allocation40_spill] sm:$0xff] %v19415_v53  ;;  %v9833_v36 = vrot.slane %v9577_v40, %v21397_v14  ;;  %v19423_v25 = vpop.eup %14484 }
 0x7c5   : > { %21413 = vst [vmem:[#allocation65_spill] sm:$0xff] %v19423_v25  ;;  %v9565_v27 = vpack.i.b16 %v9564_v41, %v9563_v49  ;;  %v9694_v54 = vcombine.high %v9561_v11, %v21396_v50  ;;  %v9701_v23 = vrot.slane %v9561_v11, %v21397_v14  ;;  %v19430_v0 = vpop.eup %14486  ;;  %v9840_v38 = vrot.slane %v9826_v8, %v21397_v14 }
 0x7c6   : > { %v13853_v59 = vpop.f32.mrb[84].mxu0  ;;  %21415 = vst [vmem:[#allocation67_spill] sm:$0xff] %v19430_v0  ;;  %v9841_v60 = vcombine.low %v19226_v1, %v9833_v36  ;;  %v9842_v12 = vcombine.high %v19226_v1, %v9833_v36  ;;  %v9892_v40 = vcombine.high %v9581_v46, %v21396_v50  ;;  %v19436_v34 = vpop.eup %14488  ;;  %v9899_v6 = vrot.slane %v9581_v46, %v21397_v14 }
 0x7c7   : > { %v9247_v48 = vpop.f32.mrb[85].mxu0  ;;  %21416 = vst [vmem:[#allocation64_spill] sm:$0xff] %v19436_v34  ;;  %v9708_v49 = vrot.slane %v9694_v54, %v21397_v14  ;;  %v9709_v11 = vcombine.low %v19240_v10, %v9701_v23  ;;  %v9710_v41 = vcombine.high %v19240_v10, %v9701_v23  ;;  %v19444_v8 = vpop.eup %14490  ;;  %v9857_v36 = vcombine.low %v19232_v61, %v9840_v38 }
 0x7c8   : > { %v19442_v62 = vpop.f32.mrb[86].mxu0  ;;  %21417 = vst [vmem:[#allocation75_spill] sm:$0xff] %v19444_v8  ;;  %v9849_v25 = vrot.slane %v9841_v60, %v21418_v15  ;;  %v9856_v1 = vrot.slane %v9842_v12, %v21418_v15  ;;  %v9858_v34 = vcombine.high %v19232_v61, %v9840_v38  ;;  %v19452_v46 = vpop.eup %14492  ;;  %v9906_v54 = vrot.slane %v9892_v40, %v21397_v14 }
 0x7c9   : > { %v19450_v0 = vpop.f32.mrb[87].mxu0  ;;  %21419 = vst [vmem:[#allocation79_spill] sm:$0xff] %v19452_v46  ;;  %v9907_v10 = vcombine.low %v19236_v45, %v9899_v6  ;;  %v9908_v23 = vcombine.high %v19236_v45, %v9899_v6  ;;  %v9717_v8 = vrot.slane %v9709_v11, %v21418_v15  ;;  %v19458_v53 = vpop.eup %14494  ;;  %v19461_v60 = vrot.slane %v9857_v36, %v21418_v15 }
 0x7ca   : > { %21420 = vst [vmem:[#allocation78_spill] sm:$0xff] %v19458_v53  ;;  %v19464_v12 = vrot.slane %v9858_v34, %v21418_v15  ;;  %v10835_v61 = vcombine.low %v9849_v25, %v9856_v1  ;;  %v13300_v38 = vcombine.high %v9849_v25, %v9856_v1  ;;  %v19466_v13 = vpop.eup %14496  ;;  %v9923_v45 = vcombine.low %v19246_v55, %v9906_v54 }
 0x7cb   : > { %21421 = vst [vmem:[#allocation44_spill] sm:$0xff] %v19466_v13  ;;  %v19469_v40 = vrot.slane %v9907_v10, %v21418_v15  ;;  %v19472_v46 = vrot.slane %v9908_v23, %v21418_v15  ;;  %v9924_v6 = vcombine.high %v19246_v55, %v9906_v54  ;;  %v9725_v25 = vcombine.low %v19249_v33, %v9708_v49  ;;  %v14162_v55 = vld [vmem:[%s15548_s8] sm:$0xff]  }
 0x7cc   : > { %v19477_v11 = vrot.slane %v10835_v61, %v21397_v14  ;;  %v19480_v34 = vrot.slane %v13300_v38, %v21397_v14  ;;  %v19487_v10 = vrot.slane %v9923_v45, %v21418_v15  ;;  %v9724_v38 = vrot.slane %v9710_v41, %v21418_v15  ;;  %13895 = vmatprep.subr.bf16.mxu0 %v14162_v55 }
 0x7cd   : > { %v13885_v36 = vpop.f32.mrb[68].mxu1  ;;  %v19490_v23 = vrot.slane %v9924_v6, %v21418_v15  ;;  %v9726_v1 = vcombine.high %v19249_v33, %v9708_v49  ;;  %v9760_v45 = vcombine.high %v9565_v27, %v21396_v50  ;;  %v9767_v54 = vrot.slane %v9565_v27, %v21397_v14  ;;  %13896 = vmatpush3.bf16.msra.mxu0 %v14162_v55 }
 0x7ce   : > { %v9344_v61 = vpop.f32.mrb[69].mxu1  ;;  %v9493_v53 = vmul.f32 %v19268_v22, %v13853_v59  ;;  %v9733_v2 = vrot.slane %v9725_v25, %v21418_v15  ;;  %v10735_v21 = vcombine.low %v9717_v8, %v9724_v38  ;;  %v13296_v6 = vcombine.high %v9717_v8, %v9724_v38  ;;  %13897 = vmatprep.subr.bf16.mxu0 %v14163_v42  ;;  %v14164_v38 = vld [vmem:[%s15548_s8 + $0x10] sm:$0xff]  }
 0x7cf   : > { %v13886_v13 = vpop.f32.mrb[70].mxu1  ;;  %v9740_v33 = vrot.slane %v9726_v1, %v21418_v15  ;;  %v9774_v49 = vrot.slane %v9760_v45, %v21397_v14  ;;  %v9775_v37 = vcombine.low %v19253_v32, %v9767_v54  ;;  %v9776_v43 = vcombine.high %v19253_v32, %v9767_v54 }
 0x7d0   : > { %v9347_v41 = vpop.f32.mrb[71].mxu1  ;;  %v9491_v16 = vmul.f32 %v19280_v44, %v9247_v48  ;;  %v19517_v59 = vrot.slane %v10735_v21, %v21397_v14  ;;  %v19522_v32 = vrot.slane %v13296_v6, %v21397_v14  ;;  %v9494_v21 = vmul.f32 %v19273_v39, %v19442_v62 }
 0x7d1   : > { %v9791_v27 = vcombine.low %v19259_v17, %v9774_v49  ;;  %v9792_v22 = vcombine.high %v19259_v17, %v9774_v49  ;;  %v10751_v25 = vcombine.low %v9733_v2, %v9740_v33  ;;  %v9783_v1 = vrot.slane %v9775_v37, %v21418_v15  ;;  %13898 = vmatpush3.bf16.msra.mxu0 %v14163_v42 }
 0x7d2   : > { %v9790_v45 = vrot.slane %v9776_v43, %v21418_v15  ;;  %v13297_v8 = vcombine.high %v9733_v2, %v9740_v33  ;;  %v9492_v2 = vmul.f32 %v19289_v5, %v19450_v0  ;;  %v9538_v49 = vpack.c.bf16 %v9494_v21, %v9493_v53  ;;  %13899 = vmatprep.subr.bf16.mxu0 %v14164_v38 }
 0x7d3   : > { %v19525_v44 = vrot.slane %v9791_v27, %v21418_v15  ;;  %v19528_v48 = vrot.slane %v9792_v22, %v21418_v15  ;;  %v19531_v17 = vrot.slane %v10751_v25, %v21397_v14  ;;  %v9509_v39 = vmul.f32 %v19299_v19, %v13885_v36 }
 0x7d4   : > { %v19536_v43 = vrot.slane %v13297_v8, %v21397_v14  ;;  %v10785_v37 = vcombine.low %v9783_v1, %v9790_v45  ;;  %v13298_v54 = vcombine.high %v9783_v1, %v9790_v45  ;;  %v9537_v5 = vpack.c.bf16 %v9492_v2, %v9491_v16 }
 0x7d5   : > { %v10801_v6 = vcombine.low %v19525_v44, %v19528_v48  ;;  %v13299_v33 = vcombine.high %v19525_v44, %v19528_v48  ;;  %v9507_v0 = vmul.f32 %v19322_v24, %v9344_v61  ;;  %v9611_v25 = vshrl.u32 %v9538_v49, 16  ;;  %v14165_v61 = vld [vmem:[%s15548_s8 + $0x18] sm:$0xff]   ;;  %13900 = vmatpush3.bf16.msra.mxu0 %v14164_v38 }
 0x7d6   : > { %v19547_v55 = vrot.slane %v10785_v37, %v21397_v14  ;;  %v19550_v27 = vrot.slane %v13298_v54, %v21397_v14  ;;  %v9510_v1 = vmul.f32 %v19311_v56, %v13886_v13  ;;  %v9508_v45 = vmul.f32 %v19335_v35, %v9347_v41  ;;  %13901 = vmatprep.subr.bf16.mxu0 %v14165_v61 }
 0x7d7   : > { %v9595_v36 = vshrl.u32 %v9537_v5, 16  ;;  %v21422_v24 = vcombine.low %v19461_v60, %v19464_v12  ;;  %v21423_v42 = vcombine.high %v19461_v60, %v19464_v12  ;;  %v21424_v41 = vcombine.low %v19469_v40, %v19472_v46 }
 0x7d8   : > { %v13857_v62 = vpop.f32.mrb[88].mxu0  ;;  %v9546_v56 = vpack.c.bf16 %v9510_v1, %v9509_v39  ;;  %v9545_v13 = vpack.c.bf16 %v9508_v45, %v9507_v0  ;;  %v14166_v45 = vld [vmem:[%s15548_s8 + $0x20] sm:$0xff]  }
 0x7d9   : > { %v9263_v22 = vpop.f32.mrb[89].mxu0  ;;  %v9497_v53 = vmul.f32 %v19349_v58, %v13857_v62  ;;  %v10858_v16 = vrot.slane %v21422_v24, %v21397_v14  ;;  %v10866_v58 = vrot.slane %v21423_v42, %v21397_v14  ;;  %v19576_v54 = vrot.slane %v21424_v41, %v21397_v14  ;;  %13902 = vmatpush3.bf16.msra.mxu0 %v14165_v61 }
 0x7da   : > { %v13858_v19 = vpop.f32.mrb[90].mxu0  ;;  %v9495_v8 = vmul.f32 %v19370_v28, %v9263_v22  ;;  %v9609_v60 = vpack.i.b16 %v9546_v56, %v9538_v49  ;;  %v9612_v12 = vshrl.u32 %v9546_v56, 16  ;;  %v9593_v39 = vpack.i.b16 %v9545_v13, %v9537_v5  ;;  %13903 = vmatprep.subr.bf16.mxu0 %v14166_v45 }
 0x7db   : > { %v9498_v21 = vmul.f32 %v19360_v7, %v13858_v19  ;;  %v9266_v37 = vpop.f32.mrb[91].mxu0  ;;  %v10867_v7 = vcombine.low %v19477_v11, %v19480_v34  ;;  %v9596_v62 = vshrl.u32 %v9545_v13, 16  ;;  %v10875_v22 = vcombine.low %v10858_v16, %v10866_v58 }
 0x7dc   : > { %v9496_v35 = vmul.f32 %v19378_v3, %v9266_v37  ;;  %v21425_v3 = vcombine.high %v19469_v40, %v19472_v46  ;;  %v9613_v46 = vpack.i.b16 %v9612_v12, %v9611_v25  ;;  %v10090_v40 = vcombine.high %v9609_v60, %v21396_v50 }
 0x7dd   : > { %v19568_v28 = vpack.c.bf16 %v9498_v21, %v9497_v53  ;;  %v19588_v34 = vrot.slane %v10867_v7, %v21418_v15  ;;  %v10097_v49 = vrot.slane %v9609_v60, %v21397_v14  ;;  %v9597_v5 = vpack.i.b16 %v9596_v62, %v9595_v36  ;;  %13904 = vmatpush3.bf16.msra.mxu0 %v14166_v45 }
 0x7de   : > { %v19582_v2 = vrot.slane %v21425_v3, %v21397_v14  ;;  %v19585_v11 = vpack.c.bf16 %v9496_v35, %v9495_v8  ;;  %v9958_v38 = vcombine.high %v9593_v39, %v21396_v50  ;;  %v9965_v19 = vrot.slane %v9593_v39, %v21397_v14 }
 0x7df   : > { %v9643_v0 = vshrl.u32 %v19568_v28, 16  ;;  %v19590_v1 = vpop.f32.mrb[72].mxu1  ;;  %v19601_v21 = vrot.slane %v10875_v22, %v21418_v15  ;;  %v10104_v25 = vrot.slane %v10090_v40, %v21397_v14  ;;  %v10105_v24 = vcombine.low %v19266_v20, %v10097_v49 }
 0x7e0   : > { %v19595_v53 = vpop.f32.mrb[73].mxu1  ;;  %v10106_v16 = vcombine.high %v19266_v20, %v10097_v49  ;;  %v10156_v36 = vcombine.high %v9613_v46, %v21396_v50  ;;  %v10163_v13 = vrot.slane %v9613_v46, %v21397_v14  ;;  %v9972_v35 = vrot.slane %v9958_v38, %v21397_v14 }
 0x7e1   : > { %v19603_v37 = vpop.f32.mrb[74].mxu1  ;;  %v9973_v42 = vcombine.low %v19278_v18, %v9965_v19  ;;  %v9974_v58 = vcombine.high %v19278_v18, %v9965_v19  ;;  %v10113_v7 = vrot.slane %v10105_v24, %v21418_v15  ;;  %v10121_v20 = vcombine.low %v19292_v9, %v10104_v25 }
 0x7e2   : > { %v19609_v56 = vpop.f32.mrb[75].mxu1  ;;  %v10120_v41 = vrot.slane %v10106_v16, %v21418_v15  ;;  %v10122_v3 = vcombine.high %v19292_v9, %v10104_v25  ;;  %v10170_v60 = vrot.slane %v10156_v36, %v21397_v14  ;;  %v10171_v61 = vcombine.low %v19303_v47, %v10163_v13 }
 0x7e3   : > { %v10172_v12 = vcombine.high %v19303_v47, %v10163_v13  ;;  %v9981_v39 = vrot.slane %v9973_v42, %v21418_v15  ;;  %v19624_v62 = vrot.slane %v10121_v20, %v21418_v15  ;;  %v9990_v20 = vcombine.high %v19306_v29, %v9972_v35 }
 0x7e4   : > { %v19627_v18 = vrot.slane %v10122_v3, %v21418_v15  ;;  %v11035_v22 = vcombine.low %v10113_v7, %v10120_v41  ;;  %v13308_v46 = vcombine.high %v10113_v7, %v10120_v41  ;;  %v19630_v40 = vrot.slane %v10171_v61, %v21418_v15  ;;  %v14167_v61 = vld [vmem:[%s15548_s8 + $0x28] sm:$0xff]  }
 0x7e5   : > { %v19633_v9 = vrot.slane %v10172_v12, %v21418_v15  ;;  %v10187_v49 = vcombine.low %v19325_v26, %v10170_v60  ;;  %v10188_v47 = vcombine.high %v19325_v26, %v10170_v60  ;;  %v9988_v7 = vrot.slane %v9974_v58, %v21418_v15  ;;  %13905 = vmatprep.subr.bf16.mxu0 %v14167_v61 }
 0x7e6   : > { %v19638_v38 = vrot.slane %v11035_v22, %v21397_v14  ;;  %v19641_v19 = vrot.slane %v13308_v46, %v21397_v14  ;;  %v9989_v41 = vcombine.low %v19306_v29, %v9972_v35  ;;  %v10024_v3 = vcombine.high %v9597_v5, %v21396_v50  ;;  %13906 = vmatpush3.bf16.msra.mxu0 %v14167_v61 }
 0x7e7   : > { %v19650_v16 = vrot.slane %v10187_v49, %v21418_v15  ;;  %v19653_v36 = vrot.slane %v10188_v47, %v21418_v15  ;;  %v10031_v22 = vrot.slane %v9597_v5, %v21397_v14  ;;  %v19674_v46 = vcombine.high %v19588_v34, %v19601_v21 }
 0x7e8   : > { %v19679_v29 = vrot.slane %v9989_v41, %v21418_v15  ;;  %v19682_v35 = vrot.slane %v9990_v20, %v21418_v15  ;;  %v10038_v49 = vrot.slane %v10024_v3, %v21397_v14  ;;  %v10935_v47 = vcombine.low %v9981_v39, %v9988_v7 }
 0x7e9   : > { %v10039_v12 = vcombine.low %v19315_v51, %v10031_v22  ;;  %v10040_v5 = vcombine.high %v19315_v51, %v10031_v22  ;;  %v13304_v13 = vcombine.high %v9981_v39, %v9988_v7  ;;  %v21426_v26 = vcombine.low %v19487_v10, %v19490_v23 }
 0x7ea   : > { %v19647_v24 = vpop.f32.mrb[92].mxu0  ;;  %v10055_v41 = vcombine.low %v19328_v52, %v10038_v49  ;;  %v10056_v25 = vcombine.high %v19328_v52, %v10038_v49  ;;  %v19695_v20 = vrot.slane %v10935_v47, %v21397_v14  ;;  %v10951_v3 = vcombine.low %v19679_v29, %v19682_v35 }
 0x7eb   : > { %v19659_v42 = vpop.f32.mrb[93].mxu0  ;;  %v10908_v45 = vrot.slane %v21426_v26, %v21397_v14  ;;  %v19700_v8 = vrot.slane %v10039_v12, %v21418_v15  ;;  %v19703_v51 = vrot.slane %v10040_v5, %v21418_v15  ;;  %v19706_v39 = vrot.slane %v13304_v13, %v21397_v14 }
 0x7ec   : > { %v19665_v60 = vpop.f32.mrb[94].mxu0  ;;  %v19713_v7 = vrot.slane %v10055_v41, %v21418_v15  ;;  %v19716_v22 = vrot.slane %v10056_v25, %v21418_v15  ;;  %v21427_v12 = vcombine.high %v19487_v10, %v19490_v23  ;;  %v10917_v13 = vcombine.low %v19576_v54, %v19582_v2  ;;  %v14168_v10 = vld [vmem:[%s15548_s8 + $0x30] sm:$0xff]  }
 0x7ed   : > { %v19676_v58 = vpop.f32.mrb[95].mxu0  ;;  %v9513_v25 = vmul.f32 %v19384_v57, %v19590_v1  ;;  %v9511_v41 = vmul.f32 %v19400_v31, %v19595_v53  ;;  %v9514_v57 = vmul.f32 %v19393_v30, %v19603_v37  ;;  %v10767_v31 = vcombine.low %v19517_v59, %v19522_v32  ;;  %13907 = vmatprep.subr.bf16.mxu0 %v14168_v10 }
 0x7ee   : > { %v10916_v49 = vrot.slane %v21427_v12, %v21397_v14  ;;  %v19741_v54 = vrot.slane %v10917_v13, %v21418_v15  ;;  %v10775_v1 = vcombine.low %v19531_v17, %v19536_v43  ;;  %v10808_v53 = vrot.slane %v10801_v6, %v21397_v14  ;;  %13908 = vmatpush3.bf16.msra.mxu0 %v14168_v10 }
 0x7ef   : > { %v10817_v30 = vcombine.low %v19547_v55, %v19550_v27  ;;  %v9512_v59 = vmul.f32 %v19408_v63, %v19609_v56  ;;  %v9548_v32 = vpack.c.bf16 %v9514_v57, %v9513_v25  ;;  %v10774_v17 = vrot.slane %v10767_v31, %v21418_v15 }
 0x7f0   : > { %v10925_v2 = vcombine.low %v10908_v45, %v10916_v49  ;;  %v10816_v45 = vrot.slane %v13299_v33, %v21397_v14  ;;  %v10782_v43 = vrot.slane %v10775_v1, %v21418_v15  ;;  %v19770_v6 = vcombine.low %v19588_v34, %v19601_v21 }
 0x7f1   : > { %v19710_v52 = vpop.f32.mrb[76].mxu1  ;;  %v19777_v44 = vrot.slane %v10817_v30, %v21418_v15  ;;  %v9547_v33 = vpack.c.bf16 %v9512_v59, %v9511_v41  ;;  %v9641_v63 = vpack.i.b16 %v9548_v32, %v19568_v28  ;;  %v9644_v55 = vshrl.u32 %v9548_v32, 16 }
 0x7f2   : > { %v19724_v47 = vpop.f32.mrb[77].mxu1  ;;  %v19756_v13 = vrot.slane %v10925_v2, %v21418_v15  ;;  %v10825_v48 = vcombine.low %v10808_v53, %v10816_v45  ;;  %v19780_v27 = vcombine.low %v10774_v17, %v10782_v43  ;;  %v19782_v56 = vcombine.high %v10774_v17, %v10782_v43 }
 0x7f3   : > { %v19734_v26 = vpop.f32.mrb[78].mxu1  ;;  %v9625_v49 = vpack.i.b16 %v9547_v33, %v19585_v11  ;;  %v9628_v25 = vshrl.u32 %v9547_v33, 16  ;;  %v9645_v2 = vpack.i.b16 %v9644_v55, %v9643_v0  ;;  %v10354_v41 = vcombine.high %v9641_v63, %v21396_v50  ;;  %v21429_v33 = vld [vmem:[#allocation61_spill] sm:$0xff] }
 0x7f4   : > { %v19743_v12 = vpop.f32.mrb[79].mxu1  ;;  %v19774_v37 = vcombine.high %v19741_v54, %v19756_v13  ;;  %v10832_v21 = vrot.slane %v10825_v48, %v21418_v15  ;;  %v10361_v57 = vrot.slane %v9641_v63, %v21397_v14  ;;  %v11538_v31 = vshrl.u32 %v19780_v27, 16 }
 0x7f5   : > { %v21428_v53 = vshrl.u32 %v19585_v11, 16  ;;  %v10222_v30 = vcombine.high %v9625_v49, %v21396_v50  ;;  %v10229_v59 = vrot.slane %v9625_v49, %v21397_v14  ;;  %v10368_v28 = vrot.slane %v10354_v41, %v21397_v14  ;;  %v21430_v49 = vld [vmem:[#allocation41_spill] sm:$0xff] }
 0x7f6   : > { %v11555_v34 = vpack.i.b16 %v19774_v37, %v19674_v46  ;;  %v19795_v1 = vcombine.low %v19777_v44, %v10832_v21  ;;  %v10369_v0 = vcombine.low %v19332_v4, %v10361_v57  ;;  %v10370_v32 = vcombine.high %v19332_v4, %v10361_v57  ;;  %v21431_v57 = vld [vmem:[#allocation58_spill] sm:$0xff] }
 0x7f7   : > { %v9629_v45 = vpack.i.b16 %v9628_v25, %v21428_v53  ;;  %v10420_v17 = vcombine.high %v9645_v2, %v21396_v50  ;;  %v10427_v43 = vrot.slane %v9645_v2, %v21397_v14  ;;  %v10236_v11 = vrot.slane %v10222_v30, %v21397_v14 }
 0x7f8   : > { %11649 = vrot.lane.b32.xlu1 %v11555_v34, %s15005_s28  ;;  %v11539_v48 = vshrl.u32 %v19795_v1, 16  ;;  %v10237_v63 = vcombine.low %v21429_v33, %v10229_v59  ;;  %v10377_v55 = vrot.slane %v10369_v0, %v21418_v15  ;;  %v10384_v34 = vrot.slane %v10370_v32, %v21418_v15 }
 0x7f9   : > { %v10385_v25 = vcombine.low %v21430_v49, %v10368_v28  ;;  %v10386_v41 = vcombine.high %v21430_v49, %v10368_v28  ;;  %v10434_v4 = vrot.slane %v10420_v17, %v21397_v14  ;;  %v10435_v53 = vcombine.low %v21431_v57, %v10427_v43  ;;  %v21432_v17 = vld [vmem:[#allocation69_spill] sm:$0xff] }
 0x7fa   : > { %v10436_v2 = vcombine.high %v21431_v57, %v10427_v43  ;;  %v11540_v23 = vpack.i.b16 %v11539_v48, %v11538_v31  ;;  %v11235_v0 = vcombine.low %v10377_v55, %v10384_v34  ;;  %v13316_v32 = vcombine.high %v10377_v55, %v10384_v34 }
 0x7fb   : > { %v19818_v30 = vrot.slane %v10385_v25, %v21418_v15  ;;  %v19821_v61 = vrot.slane %v10386_v41, %v21418_v15  ;;  %v19824_v5 = vrot.slane %v10435_v53, %v21418_v15  ;;  %v10451_v49 = vcombine.low %v21432_v17, %v10434_v4 }
 0x7fc   : > { %v19827_v28 = vrot.slane %v10436_v2, %v21418_v15  ;;  %v10452_v43 = vcombine.high %v21432_v17, %v10434_v4  ;;  %11631 = vrot.lane.b32.xlu0 %v11540_v23, %s15007_s14  ;;  %v19833_v31 = vrot.slane %v11235_v0, %v21397_v14  ;;  %v19836_v48 = vrot.slane %v13316_v32, %v21397_v14  ;;  %v21433_v2 = vld [vmem:[#allocation42_spill] sm:$0xff]  ;;  %v14169_v4 = vld [vmem:[%s15548_s8 + $0x38] sm:$0xff]  }
 0x7fd   : > { %v19843_v25 = vrot.slane %v10451_v49, %v21418_v15  ;;  %v10238_v57 = vcombine.high %v21429_v33, %v10229_v59  ;;  %v10245_v53 = vrot.slane %v10237_v63, %v21418_v15  ;;  %v10253_v0 = vcombine.low %v21433_v2, %v10236_v11  ;;  %13909 = vmatprep.subr.bf16.mxu0 %v14169_v4 }
 0x7fe   : > { %v19846_v41 = vrot.slane %v10452_v43, %v21418_v15  ;;  %v10254_v32 = vcombine.high %v21433_v2, %v10236_v11  ;;  %v10288_v43 = vcombine.high %v9629_v45, %v21396_v50  ;;  %v10295_v23 = vrot.slane %v9629_v45, %v21397_v14  ;;  %v21434_v2 = vld [vmem:[#allocation66_spill] sm:$0xff]  ;;  %13910 = vmatpush3.bf16.msra.mxu0 %v14169_v4 }
 0x7ff   : > { %v10252_v10 = vrot.slane %v10238_v57, %v21418_v15  ;;  %v19865_v59 = vrot.slane %v10253_v0, %v21418_v15  ;;  %v10834_v11 = vcombine.high %v19777_v44, %v10832_v21  ;;  %v11544_v34 = vshrl.u32 %v19782_v56, 16 }
 0x800   : > { %v19868_v33 = vrot.slane %v10254_v32, %v21418_v15  ;;  %v10302_v63 = vrot.slane %v10288_v43, %v21397_v14  ;;  %v10303_v17 = vcombine.low %v21434_v2, %v10295_v23  ;;  %v10304_v49 = vcombine.high %v21434_v2, %v10295_v23  ;;  %v21435_v32 = vld [vmem:[#allocation68_spill] sm:$0xff] }
 0x801   : > { %v11135_v45 = vcombine.low %v10245_v53, %v10252_v10  ;;  %v13312_v55 = vcombine.high %v10245_v53, %v10252_v10  ;;  %v11543_v10 = vpack.i.b16 %v10834_v11, %v19782_v56  ;;  %v11545_v0 = vshrl.u32 %v10834_v11, 16  ;;  %v21436_v11 = vld [vmem:[#allocation40_spill] sm:$0xff] }
 0x802   : > { %v11151_v57 = vcombine.low %v19865_v59, %v19868_v33  ;;  %v19880_v44 = vrot.slane %v10303_v17, %v21418_v15  ;;  %v19883_v21 = vrot.slane %v10304_v49, %v21418_v15  ;;  %v10319_v23 = vcombine.low %v21435_v32, %v10302_v63 }
 0x803   : > { %v10320_v43 = vcombine.high %v21435_v32, %v10302_v63  ;;  %v19888_v2 = vrot.slane %v11135_v45, %v21397_v14  ;;  %v19891_v53 = vrot.slane %v13312_v55, %v21397_v14  ;;  %11647 = vrot.lane.b32.xlu1 %v11543_v10, %s15005_s28  ;;  %v11546_v45 = vpack.i.b16 %v11545_v0, %v11544_v34  ;;  %v21437_v63 = vld [vmem:[#allocation67_spill] sm:$0xff]  ;;  %v21438_v34 = vld [vmem:[#allocation65_spill] sm:$0xff]  ;;  %v21439_v10 = vld [vmem:[#allocation64_spill] sm:$0xff] }
 0x804   : > { %v19895_v4 = vrot.slane %v10319_v23, %v21418_v15  ;;  %v19907_v55 = vcombine.low %v19741_v54, %v19756_v13  ;;  %v11550_v56 = vshrl.u32 %v19770_v6, 16  ;;  %v9501_v32 = vmul.f32 %v21436_v11, %v19647_v24 }
 0x805   : > { %v19898_v17 = vrot.slane %v10320_v43, %v21418_v15  ;;  %v9499_v49 = vmul.f32 %v21437_v63, %v19659_v42  ;;  %v9502_v0 = vmul.f32 %v21438_v34, %v19665_v60  ;;  %11663 = vrot.lane.b32.xlu0 %v11546_v45, %s15006_s19  ;;  %v11556_v13 = vshrl.u32 %v19674_v46, 16 }
 0x806   : > { %v11551_v54 = vshrl.u32 %v19907_v55, 16  ;;  %v11557_v24 = vshrl.u32 %v19774_v37, 16  ;;  %v9500_v11 = vmul.f32 %v21439_v10, %v19676_v58  ;;  %v21440_v43 = vcombine.low %v19624_v62, %v19627_v18 }
 0x807   : > { %v9542_v23 = vpack.c.bf16 %v9502_v0, %v9501_v32  ;;  %v21441_v60 = vcombine.high %v19624_v62, %v19627_v18  ;;  %v11067_v45 = vcombine.low %v19638_v38, %v19641_v19  ;;  %v21442_v58 = vcombine.low %v19630_v40, %v19633_v9 }
 0x808   : > { %v11058_v42 = vrot.slane %v21440_v43, %v21397_v14  ;;  %v11552_v46 = vpack.i.b16 %v11551_v54, %v11550_v56  ;;  %v11558_v34 = vpack.i.b16 %v11557_v24, %v11556_v13  ;;  %v9541_v37 = vpack.c.bf16 %v9500_v11, %v9499_v49  ;;  %v21446_v13 = vld [vmem:[#allocation78_spill] sm:$0xff] }
 0x809   : > { %v11066_v63 = vrot.slane %v21441_v60, %v21397_v14  ;;  %v11092_v32 = vrot.slane %v21442_v58, %v21397_v14  ;;  %v9675_v0 = vshrl.u32 %v9542_v23, 16  ;;  %v11074_v10 = vrot.slane %v11067_v45, %v21418_v15 }
 0x80a   : > { %v21443_v62 = vcombine.high %v19630_v40, %v19633_v9  ;;  %11633 = vrot.lane.b32.xlu1 %v11552_v46, %s15007_s14  ;;  %v9659_v38 = vshrl.u32 %v9541_v37, 16  ;;  %v21444_v19 = vcombine.low %v19650_v16, %v19653_v36  ;;  %v21445_v56 = vcombine.high %v19650_v16, %v19653_v36 }
 0x80b   : > { %v11075_v43 = vcombine.low %v11058_v42, %v11066_v63  ;;  %v9517_v24 = vmul.f32 %v21446_v13, %v19710_v52  ;;  %v10958_v9 = vrot.slane %v10951_v3, %v21397_v14  ;;  %v21447_v42 = vcombine.high %v19679_v29, %v19682_v35 }
 0x80c   : > { %v11100_v18 = vrot.slane %v21443_v62, %v21397_v14  ;;  %v11108_v49 = vrot.slane %v21444_v19, %v21397_v14  ;;  %v11116_v54 = vrot.slane %v21445_v56, %v21397_v14  ;;  %v10967_v16 = vcombine.low %v19695_v20, %v19706_v39 }
 0x80d   : > { %v11082_v11 = vrot.slane %v11075_v43, %v21418_v15  ;;  %v10966_v60 = vrot.slane %v21447_v42, %v21397_v14  ;;  %v21448_v36 = vcombine.low %v19700_v8, %v19703_v51  ;;  %v21449_v45 = vcombine.high %v19700_v8, %v19703_v51 }
 0x80e   : > { %v11117_v40 = vcombine.low %v11092_v32, %v11100_v18  ;;  %v11125_v63 = vcombine.low %v11108_v49, %v11116_v54  ;;  %v21450_v35 = vcombine.low %v19713_v7, %v19716_v22  ;;  %11665 = vrot.lane.b32.xlu1 %v11558_v34, %s15006_s19  ;;  %v10974_v32 = vrot.slane %v10967_v16, %v21418_v15  ;;  %v21452_v18 = vld [vmem:[#allocation75_spill] sm:$0xff]  ;;  %v21453_v49 = vld [vmem:[#allocation44_spill] sm:$0xff] }
 0x80f   : > { %v10992_v52 = vrot.slane %v21448_v36, %v21397_v14  ;;  %v11000_v46 = vrot.slane %v21449_v45, %v21397_v14  ;;  %v19975_v3 = vcombine.high %v11074_v10, %v11082_v11  ;;  %v10975_v29 = vcombine.low %v10958_v9, %v10966_v60  ;;  %v21454_v34 = vld [vmem:[#allocation79_spill] sm:$0xff] }
 0x810   : > { %v11124_v58 = vrot.slane %v11117_v40, %v21418_v15  ;;  %v11008_v20 = vrot.slane %v21450_v35, %v21397_v14  ;;  %v11132_v39 = vrot.slane %v11125_v63, %v21418_v15  ;;  %v21451_v8 = vcombine.high %v19713_v7, %v19716_v22 }
 0x811   : > { %v11017_v43 = vcombine.low %v10992_v52, %v11000_v46  ;;  %v10982_v62 = vrot.slane %v10975_v29, %v21418_v15  ;;  %v9515_v19 = vmul.f32 %v21452_v18, %v19724_v47  ;;  %v9518_v56 = vmul.f32 %v21453_v49, %v19734_v26  ;;  %v21456_v49 = vld [vmem:[#allocation70_spill] sm:$0xff] }
 0x812   : > { %v11016_v51 = vrot.slane %v21451_v8, %v21397_v14  ;;  %v9516_v54 = vmul.f32 %v21454_v34, %v19743_v12  ;;  %v19996_v13 = vcombine.high %v11124_v58, %v11132_v39  ;;  %v19999_v42 = vcombine.low %v11074_v10, %v11082_v11 }
 0x813   : > { %v11024_v40 = vrot.slane %v11017_v43, %v21418_v15  ;;  %v20001_v7 = vcombine.high %v10974_v32, %v10982_v62  ;;  %v9550_v22 = vpack.c.bf16 %v9518_v56, %v9517_v24  ;;  %v20003_v63 = vcombine.low %v11124_v58, %v11132_v39  ;;  %v21455_v43 = vld [vmem:[#allocation63_spill] sm:$0xff] }
 0x814   : > { %v11025_v9 = vcombine.low %v11008_v20, %v11016_v51  ;;  %v9549_v60 = vpack.c.bf16 %v9516_v54, %v9515_v19  ;;  %v11579_v47 = vpack.i.b16 %v19996_v13, %v19975_v3  ;;  %v11574_v12 = vshrl.u32 %v19999_v42, 16 }
 0x815   : > { %v20009_v16 = vcombine.low %v10974_v32, %v10982_v62  ;;  %v9673_v36 = vpack.i.b16 %v9550_v22, %v9542_v23  ;;  %v9676_v52 = vshrl.u32 %v9550_v22, 16  ;;  %v11575_v24 = vshrl.u32 %v20003_v63, 16 }
 0x816   : > { %v11032_v26 = vrot.slane %v11025_v9, %v21418_v15  ;;  %v9657_v45 = vpack.i.b16 %v9549_v60, %v9541_v37  ;;  %v9660_v10 = vshrl.u32 %v9549_v60, 16  ;;  %11653 = vrot.lane.b32.xlu1 %v11579_v47, %s15005_s28  ;;  %v21457_v9 = vld [vmem:[#allocation60_spill] sm:$0xff] }
 0x817   : > { %v11562_v58 = vshrl.u32 %v20009_v16, 16  ;;  %v9677_v29 = vpack.i.b16 %v9676_v52, %v9675_v0  ;;  %v10618_v35 = vcombine.high %v9673_v36, %v21396_v50  ;;  %v10625_v20 = vrot.slane %v9673_v36, %v21397_v14 }
 0x818   : > { %v20012_v11 = vcombine.high %v11024_v40, %v11032_v26  ;;  %v20015_v46 = vcombine.low %v11024_v40, %v11032_v26  ;;  %v9661_v39 = vpack.i.b16 %v9660_v10, %v9659_v38  ;;  %v10486_v37 = vcombine.high %v9657_v45, %v21396_v50  ;;  %v21458_v26 = vld [vmem:[#allocation62_spill] sm:$0xff] }
 0x819   : > { %v10493_v32 = vrot.slane %v9657_v45, %v21397_v14  ;;  %v11576_v8 = vpack.i.b16 %v11575_v24, %v11574_v12  ;;  %v10632_v51 = vrot.slane %v10618_v35, %v21397_v14  ;;  %v10633_v62 = vcombine.low %v21455_v43, %v10625_v20 }
 0x81a   : > { %v11567_v23 = vpack.i.b16 %v20012_v11, %v20001_v7  ;;  %v10634_v18 = vcombine.high %v21455_v43, %v10625_v20  ;;  %v10684_v0 = vcombine.high %v9677_v29, %v21396_v50  ;;  %v10691_v38 = vrot.slane %v9677_v29, %v21397_v14 }
 0x81b   : > { %v10500_v19 = vrot.slane %v10486_v37, %v21397_v14  ;;  %v10501_v56 = vcombine.low %v21456_v49, %v10493_v32  ;;  %v10502_v34 = vcombine.high %v21456_v49, %v10493_v32  ;;  %v10641_v54 = vrot.slane %v10633_v62, %v21418_v15  ;;  %11637 = vrot.lane.b32.xlu1 %v11576_v8, %s15007_s14 }
 0x81c   : > { %11651 = vrot.lane.b32.xlu0 %v11567_v23, %s15005_s28  ;;  %v10648_v40 = vrot.slane %v10634_v18, %v21418_v15  ;;  %v10649_v22 = vcombine.low %v21457_v9, %v10632_v51  ;;  %v10650_v60 = vcombine.high %v21457_v9, %v10632_v51  ;;  %v10698_v47 = vrot.slane %v10684_v0, %v21397_v14  ;;  %v21459_v23 = vld [vmem:[#allocation43_spill] sm:$0xff] }
 0x81d   : > { %v10699_v12 = vcombine.low %v21458_v26, %v10691_v38  ;;  %v10700_v36 = vcombine.high %v21458_v26, %v10691_v38  ;;  %v10509_v52 = vrot.slane %v10501_v56, %v21418_v15  ;;  %v10516_v56 = vrot.slane %v10502_v34, %v21418_v15 }
 0x81e   : > { %v20043_v45 = vrot.slane %v10649_v22, %v21418_v15  ;;  %v20046_v10 = vrot.slane %v10650_v60, %v21418_v15  ;;  %v11435_v24 = vcombine.low %v10641_v54, %v10648_v40  ;;  %v13324_v29 = vcombine.high %v10641_v54, %v10648_v40  ;;  %v21460_v54 = vld [vmem:[#allocation71_spill] sm:$0xff] }
 0x81f   : > { %v20049_v35 = vrot.slane %v10699_v12, %v21418_v15  ;;  %v20052_v20 = vrot.slane %v10700_v36, %v21418_v15  ;;  %v10715_v37 = vcombine.low %v21459_v23, %v10698_v47  ;;  %v10716_v32 = vcombine.high %v21459_v23, %v10698_v47 }
 0x820   : > { %v20057_v8 = vrot.slane %v11435_v24, %v21397_v14  ;;  %v20060_v51 = vrot.slane %v13324_v29, %v21397_v14  ;;  %v11451_v43 = vcombine.low %v20043_v45, %v20046_v10  ;;  %v13325_v62 = vcombine.high %v20043_v45, %v20046_v10 }
 0x821   : > { %v20067_v18 = vrot.slane %v10715_v37, %v21418_v15  ;;  %v20070_v0 = vrot.slane %v10716_v32, %v21418_v15  ;;  %v11485_v38 = vcombine.low %v20049_v35, %v20052_v20  ;;  %v13326_v49 = vcombine.high %v20049_v35, %v20052_v20 }
 0x822   : > { %v10517_v40 = vcombine.low %v21460_v54, %v10500_v19  ;;  %v10518_v9 = vcombine.high %v21460_v54, %v10500_v19  ;;  %v10552_v22 = vcombine.high %v9661_v39, %v21396_v50  ;;  %v10559_v26 = vrot.slane %v9661_v39, %v21397_v14  ;;  %v21461_v50 = vld [vmem:[#allocation76_spill] sm:$0xff] }
 0x823   : > { %v11563_v12 = vshrl.u32 %v20015_v46, 16  ;;  %v11335_v24 = vcombine.low %v10509_v52, %v10516_v56  ;;  %v13320_v37 = vcombine.high %v10509_v52, %v10516_v56  ;;  %v21462_v54 = vld [vmem:[#allocation48_spill] sm:$0xff]  ;;  %v11500_v45 = vrot.slane %v13326_v49, %v21397_v14 }
 0x824   : > { %v20087_v36 = vrot.slane %v10517_v40, %v21418_v15  ;;  %v20090_v34 = vrot.slane %v10518_v9, %v21418_v15  ;;  %v10566_v19 = vrot.slane %v10552_v22, %v21397_v14  ;;  %v10567_v29 = vcombine.low %v21461_v50, %v10559_v26 }
 0x825   : > { %v10568_v23 = vcombine.high %v21461_v50, %v10559_v26  ;;  %v11564_v32 = vpack.i.b16 %v11563_v12, %v11562_v58  ;;  %v20098_v60 = vrot.slane %v11335_v24, %v21397_v14  ;;  %v20109_v26 = vrot.slane %v13320_v37, %v21397_v14 }
 0x826   : > { %v10583_v47 = vcombine.low %v21462_v54, %v10566_v19  ;;  %v10584_v39 = vcombine.high %v21462_v54, %v10566_v19  ;;  %v11351_v40 = vcombine.low %v20087_v36, %v20090_v34  ;;  %v20103_v9 = vrot.slane %v10567_v29, %v21418_v15 }
 0x827   : > { %v20106_v22 = vrot.slane %v10568_v23, %v21418_v15  ;;  %v13321_v58 = vcombine.high %v20087_v36, %v20090_v34  ;;  %11635 = vrot.lane.b32.xlu0 %v11564_v32, %s15007_s14  ;;  %v11580_v12 = vshrl.u32 %v19975_v3, 16  ;;  %v11581_v19 = vshrl.u32 %v19996_v13, 16 }
 0x828   : > { %v20115_v52 = vrot.slane %v10583_v47, %v21418_v15  ;;  %v20118_v56 = vrot.slane %v10584_v39, %v21418_v15  ;;  %v11568_v29 = vshrl.u32 %v20001_v7, 16  ;;  %v11569_v23 = vshrl.u32 %v20012_v11, 16 }
 0x829   : > { %v11385_v24 = vcombine.low %v20103_v9, %v20106_v22  ;;  %v13322_v50 = vcombine.high %v20103_v9, %v20106_v22  ;;  %v11582_v32 = vpack.i.b16 %v11581_v19, %v11580_v12  ;;  %v21463_v3 = vcombine.low %v19818_v30, %v19821_v61 }
 0x82a   : > { %v11570_v54 = vpack.i.b16 %v11569_v23, %v11568_v29  ;;  %v21464_v39 = vcombine.high %v19818_v30, %v19821_v61  ;;  %v11267_v11 = vcombine.low %v19833_v31, %v19836_v48  ;;  %v21465_v47 = vcombine.low %v19824_v5, %v19827_v28 }
 0x82b   : > { %v11258_v13 = vrot.slane %v21463_v3, %v21397_v14  ;;  %11669 = vrot.lane.b32.xlu1 %v11582_v32, %s15006_s19  ;;  %v21466_v12 = vcombine.high %v19824_v5, %v19827_v28  ;;  %v21467_v61 = vcombine.low %v19843_v25, %v19846_v41  ;;  %v21468_v31 = vcombine.high %v19843_v25, %v19846_v41 }
 0x82c   : > { %v11266_v7 = vrot.slane %v21464_v39, %v21397_v14  ;;  %v11292_v37 = vrot.slane %v21465_v47, %v21397_v14  ;;  %v11158_v29 = vrot.slane %v11151_v57, %v21397_v14  ;;  %11667 = vrot.lane.b32.xlu0 %v11570_v54, %s15006_s19  ;;  %v11274_v5 = vrot.slane %v11267_v11, %v21418_v15 }
 0x82d   : > { %v11300_v19 = vrot.slane %v21466_v12, %v21397_v14  ;;  %v11308_v30 = vrot.slane %v21467_v61, %v21397_v14  ;;  %v11316_v48 = vrot.slane %v21468_v31, %v21397_v14  ;;  %v21469_v23 = vcombine.high %v19865_v59, %v19868_v33 }
 0x82e   : > { %v11275_v28 = vcombine.low %v11258_v13, %v11266_v7  ;;  %v11167_v32 = vcombine.low %v19888_v2, %v19891_v53  ;;  %v21470_v3 = vcombine.low %v19880_v44, %v19883_v21  ;;  %v21471_v54 = vcombine.high %v19880_v44, %v19883_v21 }
 0x82f   : > { %v11166_v47 = vrot.slane %v21469_v23, %v21397_v14  ;;  %v11317_v25 = vcombine.low %v11292_v37, %v11300_v19  ;;  %v11325_v41 = vcombine.low %v11308_v30, %v11316_v48  ;;  %v21472_v2 = vcombine.low %v19895_v4, %v19898_v17 }
 0x830   : > { %v11192_v57 = vrot.slane %v21470_v3, %v21397_v14  ;;  %v11200_v13 = vrot.slane %v21471_v54, %v21397_v14  ;;  %v11282_v39 = vrot.slane %v11275_v28, %v21418_v15  ;;  %v11174_v59 = vrot.slane %v11167_v32, %v21418_v15 }
 0x831   : > { %v11175_v33 = vcombine.low %v11158_v29, %v11166_v47  ;;  %v11208_v53 = vrot.slane %v21472_v2, %v21397_v14  ;;  %v11324_v37 = vrot.slane %v11317_v25, %v21418_v15  ;;  %v11332_v7 = vrot.slane %v11325_v41, %v21418_v15 }
 0x832   : > { %v21473_v11 = vcombine.high %v19895_v4, %v19898_v17  ;;  %v11217_v21 = vcombine.low %v11192_v57, %v11200_v13  ;;  %v11284_v12 = vcombine.high %v11274_v5, %v11282_v39  ;;  %v20192_v61 = vcombine.low %v11274_v5, %v11282_v39 }
 0x833   : > { %v11182_v19 = vrot.slane %v11175_v33, %v21418_v15  ;;  %v11458_v30 = vrot.slane %v11451_v43, %v21397_v14  ;;  %v11334_v31 = vcombine.high %v11324_v37, %v11332_v7  ;;  %v20199_v28 = vcombine.low %v11324_v37, %v11332_v7 }
 0x834   : > { %v11216_v44 = vrot.slane %v21473_v11, %v21397_v14  ;;  %v11224_v48 = vrot.slane %v11217_v21, %v21418_v15  ;;  %v11598_v4 = vshrl.u32 %v20192_v61, 16  ;;  %v11604_v47 = vshrl.u32 %v11284_v12, 16 }
 0x835   : > { %v11184_v23 = vcombine.high %v11174_v59, %v11182_v19  ;;  %v20202_v17 = vcombine.low %v11174_v59, %v11182_v19  ;;  %v11603_v32 = vpack.i.b16 %v11334_v31, %v11284_v12  ;;  %v11599_v25 = vshrl.u32 %v20199_v28, 16 }
 0x836   : > { %v11225_v29 = vcombine.low %v11208_v53, %v11216_v44  ;;  %v11605_v41 = vshrl.u32 %v11334_v31, 16  ;;  %v11466_v57 = vrot.slane %v13325_v62, %v21397_v14  ;;  %v11467_v54 = vcombine.low %v20057_v8, %v20060_v51 }
 0x837   : > { %v11586_v43 = vshrl.u32 %v20202_v17, 16  ;;  %v11592_v3 = vshrl.u32 %v11184_v23, 16  ;;  %11657 = vrot.lane.b32.xlu1 %v11603_v32, %s15005_s28  ;;  %v11600_v39 = vpack.i.b16 %v11599_v25, %v11598_v4  ;;  %v11492_v37 = vrot.slane %v11485_v38, %v21397_v14 }
 0x838   : > { %v11232_v5 = vrot.slane %v11225_v29, %v21418_v15  ;;  %v11606_v33 = vpack.i.b16 %v11605_v41, %v11604_v47  ;;  %v11474_v2 = vrot.slane %v11467_v54, %v21418_v15  ;;  %v11475_v53 = vcombine.low %v11458_v30, %v11466_v57 }
 0x839   : > { %v21474_v62 = vcombine.low %v20067_v18, %v20070_v0  ;;  %v21475_v38 = vcombine.high %v20067_v18, %v20070_v0  ;;  %v11517_v21 = vcombine.low %v11492_v37, %v11500_v45  ;;  %v11358_v35 = vrot.slane %v11351_v40, %v21397_v14 }
 0x83a   : > { %v11234_v13 = vcombine.high %v11224_v48, %v11232_v5  ;;  %v20214_v59 = vcombine.low %v11224_v48, %v11232_v5  ;;  %v11482_v11 = vrot.slane %v11475_v53, %v21418_v15  ;;  %v11366_v12 = vrot.slane %v13321_v58, %v21397_v14 }
 0x83b   : > { %v11508_v7 = vrot.slane %v21474_v62, %v21397_v14  ;;  %v11516_v44 = vrot.slane %v21475_v38, %v21397_v14  ;;  %11641 = vrot.lane.b32.xlu1 %v11600_v39, %s15007_s14  ;;  %v11367_v0 = vcombine.low %v20098_v60, %v20109_v26  ;;  %v11392_v40 = vrot.slane %v11385_v24, %v21397_v14 }
 0x83c   : > { %v11591_v10 = vpack.i.b16 %v11234_v13, %v11184_v23  ;;  %v11587_v8 = vshrl.u32 %v20214_v59, 16  ;;  %v11593_v51 = vshrl.u32 %v11234_v13, 16  ;;  %v11484_v19 = vcombine.high %v11474_v2, %v11482_v11 }
 0x83d   : > { %v11525_v18 = vcombine.low %v11508_v7, %v11516_v44  ;;  %v11375_v30 = vcombine.low %v11358_v35, %v11366_v12  ;;  %v11400_v31 = vrot.slane %v13322_v50, %v21397_v14  ;;  %v21476_v36 = vcombine.low %v20115_v52, %v20118_v56 }
 0x83e   : > { %11655 = vrot.lane.b32.xlu0 %v11591_v10, %s15005_s28  ;;  %v11588_v20 = vpack.i.b16 %v11587_v8, %v11586_v43  ;;  %v11594_v49 = vpack.i.b16 %v11593_v51, %v11592_v3  ;;  %v11524_v58 = vrot.slane %v11517_v21, %v21418_v15  ;;  %v21477_v26 = vcombine.high %v20115_v52, %v20118_v56 }
 0x83f   : > { %v11408_v34 = vrot.slane %v21476_v36, %v21397_v14  ;;  %v11532_v60 = vrot.slane %v11525_v18, %v21418_v15  ;;  %v20265_v24 = vcombine.low %v11474_v2, %v11482_v11  ;;  %11673 = vrot.lane.b32.xlu1 %v11606_v33, %s15006_s19  ;;  %v11374_v9 = vrot.slane %v11367_v0, %v21418_v15 }
 0x840   : > { %v11416_v48 = vrot.slane %v21477_v26, %v21397_v14  ;;  %v11382_v22 = vrot.slane %v11375_v30, %v21418_v15  ;;  %v11417_v50 = vcombine.low %v11392_v40, %v11400_v31  ;;  %v11628_v29 = vshrl.u32 %v11484_v19, 16 }
 0x841   : > { %v11534_v23 = vcombine.high %v11524_v58, %v11532_v60  ;;  %v20271_v47 = vcombine.low %v11524_v58, %v11532_v60  ;;  %v11622_v32 = vshrl.u32 %v20265_v24, 16  ;;  %v11549_v5 = vpack.i.b16 %v19907_v55, %v19770_v6 }
 0x842   : > { %11639 = vrot.lane.b32.xlu0 %v11588_v20, %s15007_s14  ;;  %v11425_v4 = vcombine.low %v11408_v34, %v11416_v48  ;;  %v11384_v52 = vcombine.high %v11374_v9, %v11382_v22  ;;  %v11424_v14 = vrot.slane %v11417_v50, %v21418_v15  ;;  %v20275_v56 = vcombine.low %v11374_v9, %v11382_v22 }
 0x843   : > { %v11627_v25 = vpack.i.b16 %v11534_v23, %v11484_v19  ;;  %v11623_v43 = vshrl.u32 %v20271_v47, 16  ;;  %v11629_v3 = vshrl.u32 %v11534_v23, 16  ;;  %v11573_v13 = vpack.i.b16 %v20003_v63, %v19999_v42 }
 0x844   : > { %v11432_v41 = vrot.slane %v11425_v4, %v21418_v15  ;;  %v11610_v57 = vshrl.u32 %v20275_v56, 16  ;;  %v11616_v54 = vshrl.u32 %v11384_v52, 16  ;;  %v11561_v15 = vpack.i.b16 %v20015_v46, %v20009_v16 }
 0x845   : > { %11661 = vrot.lane.b32.xlu1 %v11627_v25, %s15005_s28  ;;  %v11624_v33 = vpack.i.b16 %v11623_v43, %v11622_v32  ;;  %v11630_v6 = vpack.i.b16 %v11629_v3, %v11628_v29  ;;  %v11597_v55 = vpack.i.b16 %v20199_v28, %v20192_v61  ;;  %v11585_v53 = vpack.i.b16 %v20214_v59, %v20202_v17 }
 0x846   : > { %11671 = vrot.lane.b32.xlu0 %v11594_v49, %s15006_s19  ;;  %v11434_v39 = vcombine.high %v11424_v14, %v11432_v41  ;;  %v20286_v2 = vcombine.low %v11424_v14, %v11432_v41  ;;  %v11621_v37 = vpack.i.b16 %v20271_v47, %v20265_v24  ;;  %v11537_v17 = vpack.i.b16 %v19795_v1, %v19780_v27 }
 0x848   : > { %v11615_v42 = vpack.i.b16 %v11434_v39, %v11384_v52  ;;  %v11611_v63 = vshrl.u32 %v20286_v2, 16  ;;  %v11617_v45 = vshrl.u32 %v11434_v39, 16  ;;  %v11609_v10 = vpack.i.b16 %v20286_v2, %v20275_v56 }
 0x849   : > { %11645 = vrot.lane.b32.xlu1 %v11624_v33, %s15007_s14  ;;  %v20335_v33 = vld [vmem:[%s21478_s2] ss:$0 sm:$0xff] }
 0x84a   : > { %11659 = vrot.lane.b32.xlu0 %v11615_v42, %s15005_s28  ;;  %v11612_v16 = vpack.i.b16 %v11611_v63, %v11610_v57  ;;  %v11618_v46 = vpack.i.b16 %v11617_v45, %v11616_v54  ;;  %v14595_v63 = vld [vmem:[%s15601_s21 + $0x8] sm:$0xff] }
 0x84d   : > { %11677 = vrot.lane.b32.xlu1 %v11630_v6, %s15006_s19 }
 0x84e   : > { %11643 = vrot.lane.b32.xlu0 %v11612_v16, %s15007_s14 }
 0x852   : > { %11675 = vrot.lane.b32.xlu0 %v11618_v46, %s15006_s19 }
 0x86a   : > { %v11650_v61 = vpop.permute.xlu1 %11649 }
 0x86e   : > { %v11632_v28 = vpop.permute.xlu0 %11631 }
 0x86f   : > { %v11681_v59 = vsel %vm7942_vm0, %v11537_v17, %v11632_v28 }
 0x875   : > { %v11648_v8 = vpop.permute.xlu1 %11647 }
 0x876   : > { %v11705_v51 = vsel %vm11703_vm1, %v11681_v59, %v11648_v8 }
 0x877   : > { %v11664_v62 = vpop.permute.xlu0 %11663 }
 0x878   : > { %v11722_v7 = vsel %vm11720_vm2, %v11705_v51, %v11664_v62 }
 0x879   : > { %13911 = vmatprep.mubr.bf16.mxu0 %v11722_v7 }
 0x87c   : > { %v11634_v11 = vpop.permute.xlu1 %11633 }
 0x87d   : > { %v11684_v38 = vsel %vm7942_vm0, %v11549_v5, %v11634_v11  ;;  %v14598_v11 = vld [vmem:[%s15601_s21 + $0x20] sm:$0xff] }
 0x87e   : > { %v11707_v44 = vsel %vm11703_vm1, %v11684_v38, %v11650_v61  ;;  %v14597_v61 = vld [vmem:[%s15601_s21 + $0x18] sm:$0xff] }
 0x880   : > { %v11666_v21 = vpop.permute.xlu1 %11665 }
 0x881   : > { %v11725_v35 = vsel %vm11720_vm2, %v11707_v44, %v11666_v21 }
 0x882   : > { %13912 = vmatmul.mubr.bf16.vlgmr.msra.gmra.mrb[96].mxu0 %v11725_v35  ;;  %v14599_v35 = vld [vmem:[%s15601_s21 + $0x28] sm:$0xff] }
 0x888   : > { %v11654_v27 = vpop.permute.xlu1 %11653 }
 0x88d   : > { %v11638_v20 = vpop.permute.xlu1 %11637 }
 0x88e   : > { %v11652_v1 = vpop.permute.xlu0 %11651  ;;  %v11690_v19 = vsel %vm7942_vm0, %v11573_v13, %v11638_v20 }
 0x88f   : > { %v11711_v31 = vsel %vm11703_vm1, %v11690_v19, %v11654_v27 }
 0x899   : > { %v11636_v49 = vpop.permute.xlu0 %11635 }
 0x89a   : > { %v11687_v12 = vsel %vm7942_vm0, %v11561_v15, %v11636_v49  ;;  %v14601_v49 = vld [vmem:[%s15601_s21 + $0x38] sm:$0xff] }
 0x89b   : > { %v11709_v30 = vsel %vm11703_vm1, %v11687_v12, %v11652_v1  ;;  %v14600_v1 = vld [vmem:[%s15601_s21 + $0x30] sm:$0xff] }
 0x89d   : > { %v11670_v18 = vpop.permute.xlu1 %11669 }
 0x89e   : > { %v11668_v0 = vpop.permute.xlu0 %11667  ;;  %v11731_v36 = vsel %vm11720_vm2, %v11711_v31, %v11670_v18 }
 0x89f   : > { %v11728_v40 = vsel %vm11720_vm2, %v11709_v30, %v11668_v0 }
 0x8a0   : > { %13915 = vmatprep.mubr.bf16.mxu0 %v11728_v40 }
 0x8a1   : > { %13916 = vmatmul.mubr.bf16.gmra.mrb[100].mxu0 %v11731_v36  ;;  %v14602_v36 = vld [vmem:[%s15601_s21 + $0x40] sm:$0xff] }
 0x8a9   : > { %v11658_v34 = vpop.permute.xlu1 %11657 }
 0x8ad   : > { %v11642_v60 = vpop.permute.xlu1 %11641 }
 0x8ae   : > { %v11696_v22 = vsel %vm7942_vm0, %v11597_v55, %v11642_v60 }
 0x8af   : > { %v11715_v4 = vsel %vm11703_vm1, %v11696_v22, %v11658_v34 }
 0x8b0   : > { %v11656_v58 = vpop.permute.xlu0 %11655 }
 0x8b1   : > { %v11674_v9 = vpop.permute.xlu1 %11673 }
 0x8b2   : > { %v11737_v52 = vsel %vm11720_vm2, %v11715_v4, %v11674_v9  ;;  %v14604_v9 = vld [vmem:[%s15601_s21 + $0x50] sm:$0xff] }
 0x8b4   : > { %v11640_v26 = vpop.permute.xlu0 %11639 }
 0x8b5   : > { %v11693_v48 = vsel %vm7942_vm0, %v11585_v53, %v11640_v26  ;;  %v14594_v53 = vld [vmem:[%s15601_s21] sm:$0xff]  ;;  %v14603_v26 = vld [vmem:[%s15601_s21 + $0x48] sm:$0xff] }
 0x8b6   : > { %v11713_v29 = vsel %vm11703_vm1, %v11693_v48, %v11656_v58 }
 0x8b7   : > { %v11662_v32 = vpop.permute.xlu1 %11661 }
 0x8b8   : > { %v11672_v50 = vpop.permute.xlu0 %11671 }
 0x8b9   : > { %v11734_v23 = vsel %vm11720_vm2, %v11713_v29, %v11672_v50  ;;  %v14605_v50 = vld [vmem:[%s15601_s21 + $0x58] sm:$0xff] }
 0x8ba   : > { %13919 = vmatprep.mubr.bf16.mxu0 %v11734_v23 }
 0x8bb   : > { %13920 = vmatmul.mubr.bf16.gmra.mrb[104].mxu0 %v11737_v52  ;;  %v11646_v56 = vpop.permute.xlu1 %11645 }
 0x8bc   : > { %v11660_v14 = vpop.permute.xlu0 %11659  ;;  %v11702_v41 = vsel %vm7942_vm0, %v11621_v37, %v11646_v56 }
 0x8bd   : > { %v11719_v13 = vsel %vm11703_vm1, %v11702_v41, %v11662_v32 }
 0x8bf   : > { %v11678_v43 = vpop.permute.xlu1 %11677 }
 0x8c0   : > { %v11644_v5 = vpop.permute.xlu0 %11643  ;;  %v11743_v39 = vsel %vm11720_vm2, %v11719_v13, %v11678_v43 }
 0x8c1   : > { %v11699_v25 = vsel %vm7942_vm0, %v11609_v10, %v11644_v5  ;;  %v14596_v10 = vld [vmem:[%s15601_s21 + $0x10] sm:$0xff]  ;;  %v14606_v5 = vld [vmem:[%s15601_s21 + $0x60] sm:$0xff] }
 0x8c2   : > { %v11717_v57 = vsel %vm11703_vm1, %v11699_v25, %v11660_v14 }
 0x8c4   : > { %v11676_v3 = vpop.permute.xlu0 %11675 }
 0x8c5   : > { %v11740_v54 = vsel %vm11720_vm2, %v11717_v57, %v11676_v3  ;;  %v14607_v3 = vld [vmem:[%s15601_s21 + $0x68] sm:$0xff] }
 0x8c6   : > { %13923 = vmatprep.mubr.bf16.mxu0 %v11740_v54  ;;  %v14608_v54 = vld [vmem:[%s15601_s21 + $0x70] sm:$0xff] }
 0x8c7   : > { %13924 = vmatmul.mubr.bf16.gmra.mrb[108].mxu0 %v11743_v39  ;;  %v14609_v39 = vld [vmem:[%s15601_s21 + $0x78] sm:$0xff] }
 0x955   : > { %v13913_v24 = vpop.f32.mrb[96].mxu0 }
 0x956   : > { %v11850_v47 = vpop.f32.mrb[97].mxu0  ;;  %v11859_v55 = vadd.f32 %v13913_v24, %v20335_v33 }
 0x957   : > { %v11851_v2 = vadd.f32 %v20335_v33, %v11850_v47  ;;  %v13914_v6 = vpop.f32.mrb[98].mxu0  ;;  %v14170_v47 = vld [vmem:[%s15557_s15] ss:$8 sps:$4 sm:$0xff]  }
 0x958   : > { %v11853_v15 = vpop.f32.mrb[99].mxu0  ;;  %v20348_v16 = vadd.f32 %v14596_v10, %v11859_v55  ;;  %v11862_v46 = vadd.f32 %v13914_v6, %v20335_v33  ;;  %v14173_v6 = vld [vmem:[%s15557_s15 + $0x10] ss:$8 sps:$4 sm:$0xff]  }
 0x959   : > { %v20340_v37 = vadd.f32 %v14594_v53, %v11851_v2  ;;  %v11854_v42 = vadd.f32 %v20335_v33, %v11853_v15  ;;  %v14175_v2 = vld [vmem:[%s15557_s15 + $0x14] ss:$8 sps:$4 sm:$0xff]  }
 0x95a   : > { %v20354_v28 = vadd.f32 %v14597_v61, %v11862_v46 }
 0x95b   : > { %v20344_v45 = vadd.f32 %v14595_v63, %v11854_v42  ;;  %11931 = vadd.xlane.f32.xlu0 %v20340_v37 }
 0x95d   : > { %11933 = vadd.xlane.f32.xlu1 %v20344_v45 }
 0x95f   : > { %11935 = vadd.xlane.f32.xlu0 %v20348_v16 }
 0x963   : > { %11937 = vadd.xlane.f32.xlu0 %v20354_v28 }
 0x974   : > { %v13917_v17 = vpop.f32.mrb[100].mxu0 }
 0x975   : > { %v11866_v59 = vpop.f32.mrb[101].mxu0  ;;  %v11875_v7 = vadd.f32 %v13917_v17, %v20335_v33 }
 0x976   : > { %v11867_v8 = vadd.f32 %v20335_v33, %v11866_v59  ;;  %v13918_v51 = vpop.f32.mrb[102].mxu0 }
 0x977   : > { %v11869_v62 = vpop.f32.mrb[103].mxu0  ;;  %v11878_v21 = vadd.f32 %v13918_v51, %v20335_v33  ;;  %v20369_v20 = vadd.f32 %v14600_v1, %v11875_v7 }
 0x978   : > { %v20360_v38 = vadd.f32 %v14598_v11, %v11867_v8  ;;  %v11870_v44 = vadd.f32 %v20335_v33, %v11869_v62 }
 0x979   : > { %v20373_v12 = vadd.f32 %v14601_v49, %v11878_v21 }
 0x97a   : > { %v20365_v27 = vadd.f32 %v14599_v35, %v11870_v44  ;;  %11939 = vadd.xlane.f32.xlu0 %v20360_v38 }
 0x97c   : > { %11941 = vadd.xlane.f32.xlu1 %v20365_v27 }
 0x97e   : > { %11943 = vadd.xlane.f32.xlu0 %v20369_v20 }
 0x980   : > { %11945 = vadd.xlane.f32.xlu1 %v20373_v12 }
 0x98e   : > { %v13921_v19 = vpop.f32.mrb[104].mxu0 }
 0x98f   : > { %v11882_v18 = vpop.f32.mrb[105].mxu0  ;;  %v11891_v31 = vadd.f32 %v13921_v19, %v20335_v33 }
 0x990   : > { %v11883_v0 = vadd.f32 %v20335_v33, %v11882_v18  ;;  %v13922_v30 = vpop.f32.mrb[106].mxu0 }
 0x991   : > { %v11885_v40 = vpop.f32.mrb[107].mxu0  ;;  %v11894_v60 = vadd.f32 %v13922_v30, %v20335_v33  ;;  %v20389_v22 = vadd.f32 %v14604_v9, %v11891_v31 }
 0x992   : > { %v20380_v34 = vadd.f32 %v14602_v36, %v11883_v0  ;;  %v11886_v58 = vadd.f32 %v20335_v33, %v11885_v40 }
 0x993   : > { %v20393_v29 = vadd.f32 %v14605_v50, %v11894_v60  ;;  %v14176_v50 = vld [vmem:[%s15557_s15 + $0x20] ss:$8 sps:$4 sm:$0xff]  }
 0x994   : > { %v20385_v48 = vadd.f32 %v14603_v26, %v11886_v58  ;;  %11947 = vadd.xlane.f32.xlu0 %v20380_v34 }
 0x996   : > { %11949 = vadd.xlane.f32.xlu1 %v20385_v48 }
 0x998   : > { %11951 = vadd.xlane.f32.xlu0 %v20389_v22 }
 0x99a   : > { %11953 = vadd.xlane.f32.xlu1 %v20393_v29  ;;  %v13925_v23 = vpop.f32.mrb[108].mxu0 }
 0x99b   : > { %v11898_v4 = vpop.f32.mrb[109].mxu0  ;;  %v11907_v56 = vadd.f32 %v13925_v23, %v20335_v33  ;;  %v14178_v23 = vld [vmem:[%s15557_s15 + $0x24] ss:$8 sps:$4 sm:$0xff]  }
 0x99c   : > { %v11899_v32 = vadd.f32 %v20335_v33, %v11898_v4  ;;  %v13926_v52 = vpop.f32.mrb[110].mxu0 }
 0x99d   : > { %v11901_v14 = vpop.f32.mrb[111].mxu0  ;;  %v11910_v43 = vadd.f32 %v13926_v52, %v20335_v33  ;;  %v20409_v13 = vadd.f32 %v14608_v54, %v11907_v56  ;;  %v14179_v52 = vld [vmem:[%s15557_s15 + $0x30] ss:$8 sps:$4 sm:$0xff]   ;;  %v14182_v56 = vld [vmem:[%s15557_s15 + $0x40] ss:$8 sps:$4 sm:$0xff]  }
 0x99e   : > { %v20400_v25 = vadd.f32 %v14606_v5, %v11899_v32  ;;  %v11902_v41 = vadd.f32 %v20335_v33, %v11901_v14  ;;  %v14172_v33 = vld [vmem:[%s15557_s15 + $0x4] ss:$8 sps:$4 sm:$0xff]   ;;  %v14181_v32 = vld [vmem:[%s15557_s15 + $0x34] ss:$8 sps:$4 sm:$0xff]  }
 0x99f   : > { %v20413_v24 = vadd.f32 %v14609_v39, %v11910_v43  ;;  %12267 = vmatprep.subr.bf16.mxu1 %v14172_v33  ;;  %v14184_v14 = vld [vmem:[%s15557_s15 + $0x44] ss:$8 sps:$4 sm:$0xff]   ;;  %v14187_v5 = vld [vmem:[%s15557_s15 + $0x54] ss:$8 sps:$4 sm:$0xff]  }
 0x9a0   : > { %v20405_v57 = vadd.f32 %v14607_v3, %v11902_v41  ;;  %11955 = vadd.xlane.f32.xlu0 %v20400_v25  ;;  %12268 = vmatpush1.bf16.msra.mxu1 %v14170_v47  ;;  %v14185_v41 = vld [vmem:[%s15557_s15 + $0x50] ss:$8 sps:$4 sm:$0xff]  }
 0x9a1   : > { %12269 = vmatprep.subr.bf16.mxu1 %v14175_v2 }
 0x9a2   : > { %11957 = vadd.xlane.f32.xlu1 %v20405_v57 }
 0x9a4   : > { %11959 = vadd.xlane.f32.xlu0 %v20409_v13  ;;  %12270 = vmatpush1.bf16.msra.mxu1 %v14173_v6 }
 0x9a5   : > { %12271 = vmatprep.subr.bf16.mxu1 %v14178_v23 }
 0x9a6   : > { %11961 = vadd.xlane.f32.xlu1 %v20413_v24 }
 0x9a8   : > { %12272 = vmatpush1.bf16.msra.mxu1 %v14176_v50 }
 0x9a9   : > { %12273 = vmatprep.subr.bf16.mxu1 %v14181_v32 }
 0x9ac   : > { %12274 = vmatpush1.bf16.msra.mxu1 %v14179_v52 }
 0x9ad   : > { %12275 = vmatprep.subr.bf16.mxu1 %v14184_v14  ;;  %v14194_v14 = vld [vmem:[%s15565_s26 + $0x40] sm:$0xff]  }
 0x9ae   : > { %13543 = vmatprep.subr.bf16.mxu0 %v14194_v14 }
 0x9b0   : > { %12276 = vmatpush1.bf16.msra.mxu1 %v14182_v56  ;;  %v14195_v56 = vld [vmem:[%s15565_s26] sm:$0xff]  }
 0x9b1   : > { %12277 = vmatprep.subr.bf16.mxu1 %v14187_v5  ;;  %v14196_v5 = vld [vmem:[%s15565_s26 + $0x48] sm:$0xff]   ;;  %13544 = vmatpush3.bf16.msra.mxu0 %v14195_v56 }
 0x9b2   : > { %13545 = vmatprep.subr.bf16.mxu0 %v14196_v5 }
 0x9b4   : > { %12278 = vmatpush1.bf16.msra.mxu1 %v14185_v41  ;;  %v14197_v41 = vld [vmem:[%s15565_s26 + $0x8] sm:$0xff]  }
 0x9b5   : > { %13546 = vmatpush3.bf16.msra.mxu0 %v14197_v41 }
 0x9e8   : > { %v11932_v15 = vpop.xlane.xlu0 %11931 }
 0x9e9   : > { %v11963_v55 = vmul.f32 0.0078125, %v11932_v15 }
 0x9ea   : > { %v11934_v53 = vpop.xlane.xlu1 %11933 }
 0x9eb   : > { %v20422_v42 = vsub.f32 %v20340_v37, %v11963_v55  ;;  %v11964_v63 = vmul.f32 0.0078125, %v11934_v53  ;;  %v14188_v53 = vld [vmem:[%s15557_s15 + $0x60] ss:$8 sps:$4 sm:$0xff]  }
 0x9ec   : > { %v11936_v10 = vpop.xlane.xlu0 %11935 }
 0x9ed   : > { %v20425_v46 = vsub.f32 %v20344_v45, %v11964_v63  ;;  %v11965_v61 = vmul.f32 0.0078125, %v11936_v10  ;;  %v11995_v17 = vmul.f32 %v20422_v42, %v20422_v42  ;;  %v14190_v63 = vld [vmem:[%s15557_s15 + $0x64] ss:$8 sps:$4 sm:$0xff]  }
 0x9ee   : > { %12279 = vmatprep.subr.bf16.mxu1 %v14190_v63 }
 0x9ef   : > { %v20430_v59 = vsub.f32 %v20348_v16, %v11965_v61  ;;  %12011 = vadd.xlane.f32.xlu0 %v11995_v17  ;;  %v11996_v8 = vmul.f32 %v20425_v46, %v20425_v46  ;;  %12280 = vmatpush1.bf16.msra.mxu1 %v14188_v53 }
 0x9f0   : > { %v11938_v51 = vpop.xlane.xlu0 %11937 }
 0x9f1   : > { %v11966_v62 = vmul.f32 0.0078125, %v11938_v51  ;;  %12013 = vadd.xlane.f32.xlu1 %v11996_v8  ;;  %v11997_v7 = vmul.f32 %v20430_v59, %v20430_v59 }
 0x9f3   : > { %v20437_v11 = vsub.f32 %v20354_v28, %v11966_v62  ;;  %12015 = vadd.xlane.f32.xlu0 %v11997_v7  ;;  %v14191_v62 = vld [vmem:[%s15557_s15 + $0x70] ss:$8 sps:$4 sm:$0xff]   ;;  %v14193_v7 = vld [vmem:[%s15557_s15 + $0x74] ss:$8 sps:$4 sm:$0xff]  }
 0x9f4   : > { %12281 = vmatprep.subr.bf16.mxu1 %v14193_v7 }
 0x9f5   : > { %v11998_v44 = vmul.f32 %v20437_v11, %v20437_v11  ;;  %12282 = vmatpush1.bf16.msra.mxu1 %v14191_v62  ;;  %v20522_v62 = vld [vmem:[%s797_s11] ss:$0 sm:$0xff]  ;;  %s21485_s11 = scalar_lea.vmem [#allocation14], %s15538_s7 }
 0x9f6   : > { %13927 = vmatprep.subr.bf16.mxu1 %v14194_v14 }
 0x9f7   : > { %12017 = vadd.xlane.f32.xlu1 %v11998_v44 }
 0xa07   : > { %v11940_v21 = vpop.xlane.xlu0 %11939 }
 0xa08   : > { %v11967_v35 = vmul.f32 0.0078125, %v11940_v21 }
 0xa09   : > { %v11942_v1 = vpop.xlane.xlu1 %11941 }
 0xa0a   : > { %v20442_v49 = vsub.f32 %v20360_v38, %v11967_v35  ;;  %v11968_v19 = vmul.f32 0.0078125, %v11942_v1 }
 0xa0b   : > { %v11944_v18 = vpop.xlane.xlu0 %11943 }
 0xa0c   : > { %v20445_v0 = vsub.f32 %v20365_v27, %v11968_v19  ;;  %v11969_v30 = vmul.f32 0.0078125, %v11944_v18  ;;  %v11999_v40 = vmul.f32 %v20442_v49, %v20442_v49 }
 0xa0d   : > { %v11946_v31 = vpop.xlane.xlu1 %11945 }
 0xa0e   : > { %v20450_v36 = vsub.f32 %v20369_v20, %v11969_v30  ;;  %v11970_v58 = vmul.f32 0.0078125, %v11946_v31  ;;  %12019 = vadd.xlane.f32.xlu0 %v11999_v40  ;;  %v12000_v60 = vmul.f32 %v20445_v0, %v20445_v0 }
 0xa10   : > { %v20455_v26 = vsub.f32 %v20373_v12, %v11970_v58  ;;  %12021 = vadd.xlane.f32.xlu1 %v12000_v60  ;;  %v12001_v9 = vmul.f32 %v20450_v36, %v20450_v36 }
 0xa12   : > { %12023 = vadd.xlane.f32.xlu0 %v12001_v9  ;;  %v12002_v4 = vmul.f32 %v20455_v26, %v20455_v26 }
 0xa14   : > { %12025 = vadd.xlane.f32.xlu1 %v12002_v4 }
 0xa21   : > { %v11948_v43 = vpop.xlane.xlu0 %11947 }
 0xa22   : > { %v11971_v3 = vmul.f32 0.0078125, %v11948_v43 }
 0xa23   : > { %v11950_v54 = vpop.xlane.xlu1 %11949 }
 0xa24   : > { %v20470_v39 = vsub.f32 %v20380_v34, %v11971_v3  ;;  %v11972_v47 = vmul.f32 0.0078125, %v11950_v54 }
 0xa25   : > { %v11952_v33 = vpop.xlane.xlu0 %11951 }
 0xa26   : > { %v20473_v2 = vsub.f32 %v20385_v48, %v11972_v47  ;;  %v11973_v6 = vmul.f32 0.0078125, %v11952_v33  ;;  %v12003_v15 = vmul.f32 %v20470_v39, %v20470_v39 }
 0xa27   : > { %v11954_v55 = vpop.xlane.xlu1 %11953 }
 0xa28   : > { %v20480_v10 = vsub.f32 %v20389_v22, %v11973_v6  ;;  %v11974_v61 = vmul.f32 0.0078125, %v11954_v55  ;;  %12027 = vadd.xlane.f32.xlu0 %v12003_v15  ;;  %v12004_v17 = vmul.f32 %v20473_v2, %v20473_v2 }
 0xa2a   : > { %v20485_v8 = vsub.f32 %v20393_v29, %v11974_v61  ;;  %12029 = vadd.xlane.f32.xlu1 %v12004_v17  ;;  %v12005_v51 = vmul.f32 %v20480_v10, %v20480_v10 }
 0xa2c   : > { %12031 = vadd.xlane.f32.xlu0 %v12005_v51  ;;  %v12006_v44 = vmul.f32 %v20485_v8, %v20485_v8 }
 0xa2d   : > { %v11956_v21 = vpop.xlane.xlu0 %11955 }
 0xa2e   : > { %12033 = vadd.xlane.f32.xlu1 %v12006_v44  ;;  %v11975_v35 = vmul.f32 0.0078125, %v11956_v21 }
 0xa2f   : > { %v11958_v1 = vpop.xlane.xlu1 %11957 }
 0xa30   : > { %v20494_v19 = vsub.f32 %v20400_v25, %v11975_v35  ;;  %v11976_v18 = vmul.f32 0.0078125, %v11958_v1 }
 0xa31   : > { %v11960_v30 = vpop.xlane.xlu0 %11959 }
 0xa32   : > { %v20497_v40 = vsub.f32 %v20405_v57, %v11976_v18  ;;  %v11977_v31 = vmul.f32 0.0078125, %v11960_v30  ;;  %v12007_v58 = vmul.f32 %v20494_v19, %v20494_v19  ;;  %v20532_v18 = vld [vmem:[%s800_s27] ss:$0 sm:$0xff]  ;;  %s21486_s27 = sld [smem:[#allocation29_spill]] }
 0xa33   : > { %v11962_v60 = vpop.xlane.xlu1 %11961 }
 0xa34   : > { %v20502_v9 = vsub.f32 %v20409_v13, %v11977_v31  ;;  %v11978_v50 = vmul.f32 0.0078125, %v11962_v60  ;;  %12035 = vadd.xlane.f32.xlu0 %v12007_v58  ;;  %v12008_v23 = vmul.f32 %v20497_v40, %v20497_v40 }
 0xa36   : > { %v20507_v4 = vsub.f32 %v20413_v24, %v11978_v50  ;;  %12037 = vadd.xlane.f32.xlu1 %v12008_v23  ;;  %v12009_v32 = vmul.f32 %v20502_v9, %v20502_v9 }
 0xa38   : > { %12039 = vadd.xlane.f32.xlu0 %v12009_v32  ;;  %v12010_v52 = vmul.f32 %v20507_v4, %v20507_v4  ;;  %s13382_s7 = sshll.u32 %s21486_s27, 11 }
 0xa39   : > { %s20705_s23 = scalar_lea.hbm %s21487_s3, %s13382_s7 }
 0xa3a   : > { %12041 = vadd.xlane.f32.xlu1 %v12010_v52  ;;  %v21481_v52 = vmov 0  }
 0xa7c   : > { %v12012_v43 = vpop.xlane.xlu0 %12011 }
 0xa7d   : > { %v12043_v3 = vmul.f32 0.0078125, %v12012_v43 }
 0xa7e   : > { %v12014_v54 = vpop.xlane.xlu1 %12013 }
 0xa7f   : > { %v12059_v47 = vadd.f32 1e-05, %v12043_v3  ;;  %v12044_v33 = vmul.f32 0.0078125, %v12014_v54 }
 0xa80   : > { %v12016_v6 = vpop.xlane.xlu0 %12015 }
 0xa81   : > { %14498 = vrsqrt.f32 %v12059_v47  ;;  %v12060_v15 = vadd.f32 1e-05, %v12044_v33  ;;  %v12045_v55 = vmul.f32 0.0078125, %v12016_v6 }
 0xa83   : > { %14500 = vrsqrt.f32 %v12060_v15  ;;  %v12061_v53 = vadd.f32 1e-05, %v12045_v55 }
 0xa84   : > { %v12018_v63 = vpop.xlane.xlu1 %12017 }
 0xa85   : > { %14502 = vrsqrt.f32 %v12061_v53  ;;  %v12046_v61 = vmul.f32 0.0078125, %v12018_v63 }
 0xa87   : > { %v12062_v17 = vadd.f32 1e-05, %v12046_v61 }
 0xa89   : > { %14504 = vrsqrt.f32 %v12062_v17 }
 0xa8b   : > { %v14499_v51 = vpop.eup %14498 }
 0xa8c   : > { %v12091_v7 = vmul.f32 %v14499_v51, %v20422_v42 }
 0xa8d   : > { %v14501_v44 = vpop.eup %14500 }
 0xa8e   : > { %v12113_v21 = vmul.f32 %v20522_v62, %v12091_v7  ;;  %v12092_v35 = vmul.f32 %v14501_v44, %v20425_v46 }
 0xa8f   : > { %v14503_v1 = vpop.eup %14502 }
 0xa90   : > { %v12114_v30 = vmul.f32 %v20522_v62, %v12092_v35  ;;  %v12135_v31 = vadd.f32 %v20532_v18, %v12113_v21  ;;  %v12093_v42 = vmul.f32 %v14503_v1, %v20430_v59 }
 0xa92   : > { %v12136_v58 = vadd.f32 %v20532_v18, %v12114_v30  ;;  %v12115_v46 = vmul.f32 %v20522_v62, %v12093_v42 }
 0xa93   : > { %v14505_v60 = vpop.eup %14504 }
 0xa94   : > { %v12151_v50 = vpack.c.bf16 %v12136_v58, %v12135_v31  ;;  %v12094_v23 = vmul.f32 %v14505_v60, %v20437_v11  ;;  %v12137_v54 = vadd.f32 %v20532_v18, %v12115_v46 }
 0xa96   : > { %12300 = vmatmul.mubr.bf16.vlgmr.msra.gmra.mrb[80].mxu1 %v12151_v50  ;;  %v12116_v32 = vmul.f32 %v20522_v62, %v12094_v23 }
 0xa97   : > { %12309 = vmatprep.mubr.bf16.mxu1 %v21481_v52  ;;  %13935 = vmatpush3.bf16.msra.mxu1 %v14195_v56 }
 0xa98   : > { %v12138_v14 = vadd.f32 %v20532_v18, %v12116_v32  ;;  %13928 = vmatprep.subr.bf16.mxu1 %v14196_v5 }
 0xa9a   : > { %v12152_v11 = vpack.c.bf16 %v12138_v14, %v12137_v54 }
 0xa9b   : > { %v12020_v43 = vpop.xlane.xlu0 %12019  ;;  %13936 = vmatpush3.bf16.msra.mxu1 %v14197_v41 }
 0xa9c   : > { %v12047_v3 = vmul.f32 0.0078125, %v12020_v43 }
 0xa9d   : > { %v12022_v59 = vpop.xlane.xlu1 %12021 }
 0xa9e   : > { %v12063_v47 = vadd.f32 1e-05, %v12047_v3  ;;  %v12048_v33 = vmul.f32 0.0078125, %v12022_v59  ;;  %12310 = vmatmul.mubr.bf16.gmra.mrb[84].mxu1 %v12152_v11 }
 0xa9f   : > { %v12024_v6 = vpop.xlane.xlu0 %12023  ;;  %12319 = vmatprep.mubr.bf16.mxu1 %v21481_v52 }
 0xaa0   : > { %14506 = vrsqrt.f32 %v12063_v47  ;;  %v12064_v15 = vadd.f32 1e-05, %v12048_v33  ;;  %v12049_v55 = vmul.f32 0.0078125, %v12024_v6 }
 0xaa1   : > { %v12026_v53 = vpop.xlane.xlu1 %12025 }
 0xaa2   : > { %14508 = vrsqrt.f32 %v12064_v15  ;;  %v12065_v56 = vadd.f32 1e-05, %v12049_v55  ;;  %v12050_v5 = vmul.f32 0.0078125, %v12026_v53 }
 0xaa4   : > { %14510 = vrsqrt.f32 %v12065_v56  ;;  %v12066_v63 = vadd.f32 1e-05, %v12050_v5 }
 0xaa6   : > { %14512 = vrsqrt.f32 %v12066_v63 }
 0xaaa   : > { %v14507_v61 = vpop.eup %14506 }
 0xaab   : > { %v12095_v41 = vmul.f32 %v14507_v61, %v20442_v49 }
 0xaac   : > { %v14509_v17 = vpop.eup %14508 }
 0xaad   : > { %v12096_v51 = vmul.f32 %v14509_v17, %v20445_v0  ;;  %v12117_v7 = vmul.f32 %v20522_v62, %v12095_v41 }
 0xaae   : > { %v14511_v44 = vpop.eup %14510 }
 0xaaf   : > { %v12118_v21 = vmul.f32 %v20522_v62, %v12096_v51  ;;  %v12139_v30 = vadd.f32 %v20532_v18, %v12117_v7  ;;  %v12097_v42 = vmul.f32 %v14511_v44, %v20450_v36 }
 0xab0   : > { %v14513_v35 = vpop.eup %14512 }
 0xab1   : > { %v12140_v58 = vadd.f32 %v20532_v18, %v12118_v21  ;;  %v12098_v60 = vmul.f32 %v14513_v35, %v20455_v26  ;;  %v12119_v3 = vmul.f32 %v20522_v62, %v12097_v42 }
 0xab3   : > { %v12153_v0 = vpack.c.bf16 %v12140_v58, %v12139_v30  ;;  %v12120_v46 = vmul.f32 %v20522_v62, %v12098_v60  ;;  %v12141_v33 = vadd.f32 %v20532_v18, %v12119_v3 }
 0xab5   : > { %v12028_v1 = vpop.xlane.xlu0 %12027  ;;  %12320 = vmatmul.mubr.bf16.gmra.mrb[88].mxu1 %v12153_v0  ;;  %v12142_v26 = vadd.f32 %v20532_v18, %v12120_v46 }
 0xab6   : > { %v12051_v31 = vmul.f32 0.0078125, %v12028_v1  ;;  %12329 = vmatprep.mubr.bf16.mxu1 %v21481_v52 }
 0xab7   : > { %v12030_v49 = vpop.xlane.xlu1 %12029  ;;  %v12154_v11 = vpack.c.bf16 %v12142_v26, %v12141_v33 }
 0xab8   : > { %v12067_v50 = vadd.f32 1e-05, %v12051_v31  ;;  %v12052_v23 = vmul.f32 0.0078125, %v12030_v49 }
 0xab9   : > { %v12032_v32 = vpop.xlane.xlu0 %12031 }
 0xaba   : > { %14514 = vrsqrt.f32 %v12067_v50  ;;  %v12068_v14 = vadd.f32 1e-05, %v12052_v23  ;;  %v12053_v43 = vmul.f32 0.0078125, %v12032_v32 }
 0xabb   : > { %v12034_v54 = vpop.xlane.xlu1 %12033 }
 0xabc   : > { %14516 = vrsqrt.f32 %v12068_v14  ;;  %v12069_v36 = vadd.f32 1e-05, %v12053_v43  ;;  %v12054_v59 = vmul.f32 0.0078125, %v12034_v54 }
 0xabd   : > { %12330 = vmatmul.mubr.bf16.gmra.mrb[92].mxu1 %v12154_v11 }
 0xabe   : > { %14518 = vrsqrt.f32 %v12069_v36  ;;  %v12070_v47 = vadd.f32 1e-05, %v12054_v59  ;;  %12339 = vmatprep.mubr.bf16.mxu1 %v21481_v52 }
 0xac0   : > { %14520 = vrsqrt.f32 %v12070_v47 }
 0xac1   : > { %v12036_v6 = vpop.xlane.xlu0 %12035 }
 0xac2   : > { %v12055_v15 = vmul.f32 0.0078125, %v12036_v6 }
 0xac3   : > { %v12038_v53 = vpop.xlane.xlu1 %12037 }
 0xac4   : > { %v14515_v55 = vpop.eup %14514  ;;  %v12071_v56 = vadd.f32 1e-05, %v12055_v15  ;;  %v12056_v5 = vmul.f32 0.0078125, %v12038_v53 }
 0xac5   : > { %v12099_v63 = vmul.f32 %v14515_v55, %v20470_v39  ;;  %v12040_v41 = vpop.xlane.xlu0 %12039 }
 0xac6   : > { %v14517_v61 = vpop.eup %14516  ;;  %14522 = vrsqrt.f32 %v12071_v56  ;;  %v12072_v17 = vadd.f32 1e-05, %v12056_v5  ;;  %v12057_v51 = vmul.f32 0.0078125, %v12040_v41  ;;  %v14198_v56 = vld [vmem:[%s15565_s26 + $0x50] sm:$0xff]   ;;  %v14200_v5 = vld [vmem:[%s15565_s26 + $0x58] sm:$0xff]  }
 0xac7   : > { %v12100_v7 = vmul.f32 %v14517_v61, %v20473_v2  ;;  %v12042_v21 = vpop.xlane.xlu1 %12041  ;;  %v12121_v35 = vmul.f32 %v20522_v62, %v12099_v63  ;;  %13547 = vmatprep.subr.bf16.mxu0 %v14198_v56  ;;  %13929 = vmatprep.subr.bf16.mxu1 %v14198_v56  ;;  %v14201_v63 = vld [vmem:[%s15565_s26 + $0x18] sm:$0xff]   ;;  %v14205_v61 = vld [vmem:[%s15565_s26 + $0x28] sm:$0xff]   ;;  %v14206_v41 = vld [vmem:[%s15565_s26 + $0x70] sm:$0xff]  }
 0xac8   : > { %v14519_v44 = vpop.eup %14518  ;;  %14524 = vrsqrt.f32 %v12072_v17  ;;  %v12058_v1 = vmul.f32 0.0078125, %v12042_v21  ;;  %v12073_v58 = vadd.f32 1e-05, %v12057_v51  ;;  %v14207_v17 = vld [vmem:[%s15565_s26 + $0x30] sm:$0xff]   ;;  %v14208_v51 = vld [vmem:[%s15565_s26 + $0x78] sm:$0xff]   ;;  %v21482_v21 = vld [vmem:[#allocation39_spill] sm:$0xff] }
 0xac9   : > { %v12122_v30 = vmul.f32 %v20522_v62, %v12100_v7  ;;  %v12143_v42 = vadd.f32 %v20532_v18, %v12121_v35  ;;  %v12101_v49 = vmul.f32 %v14519_v44, %v20480_v10  ;;  %v14209_v7 = vld [vmem:[%s15565_s26 + $0x38] sm:$0xff]   ;;  %v21483_v35 = vsub.s32 0, %v21482_v21 }
 0xaca   : > { %v14521_v31 = vpop.eup %14520  ;;  %v12074_v39 = vadd.f32 1e-05, %v12058_v1  ;;  %v12175_v44 = vld [vmem:[%s15559_s17] sm:$0x3]  ;;  %s12834_s17 = sshll.u32 %s15601_s21, 4  ;;  %s20707_s17 = int_to_ptr.vmem [resolvable:$true] %s12834_s17 }
 0xacb   : > { %v12144_v60 = vadd.f32 %v20532_v18, %v12122_v30  ;;  %v12102_v50 = vmul.f32 %v14521_v31, %v20485_v8  ;;  %v12123_v0 = vmul.f32 %v20522_v62, %v12101_v49  ;;  %v20601_v1 = vrot.slane %v12175_v44, %v21483_v35  ;;  %s14850_s24 = scalar_lea.vmem %s20707_s17, 2048  ;;  %p14857_p12 = scmp.lt.s32.totalorder %s20707_s17, %s14855_s0 }
 0xacc   : > { %14526 = vrsqrt.f32 %v12074_v39  ;;  %v21484_v30 = vsub.s32 1, %v21482_v21  ;;  %p14851_p2 = scmp.ne.s32.totalorder %s20707_s17, %s14850_s24  ;;  %p14858_p4 = scmp.lt.s32.totalorder %s14856_s5, %s14850_s24 }
 0xacd   : > { %v12155_v2 = vpack.c.bf16 %v12144_v60, %v12143_v42  ;;  %v12124_v23 = vmul.f32 %v20522_v62, %v12102_v50  ;;  %14528 = vrsqrt.f32 %v12073_v58  ;;  %v12145_v43 = vadd.f32 %v20532_v18, %v12123_v0 }
 0xace   : > { %v20605_v31 = vrot.slane %v12175_v44, %v21484_v30  ;;  %p14852_p8 = pnand %p14851_p2, %p21488_p0  ;;  %p14859_p10 = por %p14858_p4, %p14857_p12 }
 0xacf   : > { %12340 = vmatmul.mubr.bf16.gmra.mrb[96].mxu1 %v12155_v2  ;;  %v12146_v32 = vadd.f32 %v20532_v18, %v12124_v23 }
 0xad0   : > { %12349 = vmatprep.mubr.bf16.mxu1 %v21481_v52  ;;  %v14523_v46 = vpop.eup %14522  ;;  %p14853_p9 = pneg %p14852_p8 }
 0xad1   : > { %v12103_v10 = vmul.f32 %v14523_v46, %v20494_v19  ;;  %v12156_v3 = vpack.c.bf16 %v12146_v32, %v12145_v43 }
 0xad2   : > { %v14525_v14 = vpop.eup %14524  ;;  %p14860_p6 = pnand %p14859_p10, %p14853_p9 }
 0xad3   : > { %v12104_v8 = vmul.f32 %v14525_v14, %v20497_v40  ;;  %v12125_v59 = vmul.f32 %v20522_v62, %v12103_v10 }
 0xad5   : > { %v12126_v54 = vmul.f32 %v20522_v62, %v12104_v8  ;;  %v12147_v19 = vadd.f32 %v20532_v18, %v12125_v59 }
 0xad6   : > { %v14527_v36 = vpop.eup %14526 }
 0xad7   : > { %12350 = vmatmul.mubr.bf16.gmra.mrb[100].mxu1 %v12156_v3  ;;  %v14529_v26 = vpop.eup %14528  ;;  %v12148_v47 = vadd.f32 %v20532_v18, %v12126_v54  ;;  %v12106_v33 = vmul.f32 %v14527_v36, %v20507_v4 }
 0xad8   : > { %12359 = vmatprep.mubr.bf16.mxu1 %v21481_v52  ;;  %v12105_v40 = vmul.f32 %v14529_v26, %v20502_v9  ;;  %v14199_v9 = vld [vmem:[%s15565_s26 + $0x10] sm:$0xff]  }
 0xad9   : > { %v12157_v11 = vpack.c.bf16 %v12148_v47, %v12147_v19  ;;  %v12128_v6 = vmul.f32 %v20522_v62, %v12106_v33  ;;  %13548 = vmatpush3.bf16.msra.mxu0 %v14199_v9  ;;  %13937 = vmatpush3.bf16.msra.mxu1 %v14199_v9 }
 0xada   : > { %v12127_v15 = vmul.f32 %v20522_v62, %v12105_v40  ;;  %13549 = vmatprep.subr.bf16.mxu0 %v14200_v5  ;;  %13930 = vmatprep.subr.bf16.mxu1 %v14200_v5  ;;  %v14202_v62 = vld [vmem:[%s15565_s26 + $0x60] sm:$0xff]  }
 0xadb   : > { %v12150_v55 = vadd.f32 %v20532_v18, %v12128_v6 }
 0xadc   : > { %v12149_v53 = vadd.f32 %v20532_v18, %v12127_v15  ;;  %v14203_v18 = vld [vmem:[%s15565_s26 + $0x20] sm:$0xff]  }
 0xadd   : > { %13550 = vmatpush3.bf16.msra.mxu0 %v14201_v63  ;;  %13938 = vmatpush3.bf16.msra.mxu1 %v14201_v63 }
 0xade   : > { %v12158_v4 = vpack.c.bf16 %v12150_v55, %v12149_v53  ;;  %13551 = vmatprep.subr.bf16.mxu0 %v14202_v62  ;;  %13931 = vmatprep.subr.bf16.mxu1 %v14202_v62 }
 0xadf   : > { %12360 = vmatmul.mubr.bf16.gmra.mrb[104].mxu1 %v12157_v11 }
 0xae0   : > { %12369 = vmatprep.mubr.bf16.mxu1 %v21481_v52  ;;  %v14204_v52 = vld [vmem:[%s15565_s26 + $0x68] sm:$0xff]  }
 0xae1   : > { %13552 = vmatpush3.bf16.msra.mxu0 %v14203_v18  ;;  %13939 = vmatpush3.bf16.msra.mxu1 %v14203_v18 }
 0xae2   : > { %13553 = vmatprep.subr.bf16.mxu0 %v14204_v52  ;;  %13932 = vmatprep.subr.bf16.mxu1 %v14204_v52 }
 0xae5   : > { %13554 = vmatpush3.bf16.msra.mxu0 %v14205_v61  ;;  %13940 = vmatpush3.bf16.msra.mxu1 %v14205_v61 }
 0xae6   : > { %13555 = vmatprep.subr.bf16.mxu0 %v14206_v41  ;;  %13933 = vmatprep.subr.bf16.mxu1 %v14206_v41 }
 0xae7   : > { %12370 = vmatmul.mubr.bf16.gmra.mrb[108].mxu1 %v12158_v4 }
 0xae9   : > { %13556 = vmatpush3.bf16.msra.mxu0 %v14207_v17  ;;  %13941 = vmatpush3.bf16.msra.mxu1 %v14207_v17 }
 0xaea   : > { %13557 = vmatprep.subr.bf16.mxu0 %v14208_v51  ;;  %13934 = vmatprep.subr.bf16.mxu1 %v14208_v51 }
 0xaed   : > { %13558 = vmatpush3.bf16.msra.mxu0 %v14209_v7  ;;  %13942 = vmatpush3.bf16.msra.mxu1 %v14209_v7 }
 0xb69   : > { %v12301_v58 = vpop.f32.mrb[80].mxu1 }
 0xb6a   : > { %v12302_v42 = vadd.f32 %v12301_v58, %v20601_v1  ;;  %v12303_v39 = vpop.f32.mrb[81].mxu1 }
 0xb6b   : > { %v12304_v60 = vadd.f32 %v12303_v39, %v20605_v31  ;;  %v12305_v49 = vpop.f32.mrb[82].mxu1 }
 0xb6c   : > { %v12412_v50 = vmul.f32 0.70710677, %v12302_v42  ;;  %v12306_v2 = vadd.f32 %v12305_v49, %v20601_v1  ;;  %v12307_v23 = vpop.f32.mrb[83].mxu1  ;;  %v12380_v56 = vmul.f32 0.5, %v12302_v42 }
 0xb6d   : > { %v12413_v0 = vmul.f32 0.70710677, %v12304_v60  ;;  %v12308_v46 = vadd.f32 %v12307_v23, %v20605_v31  ;;  %v12381_v63 = vmul.f32 0.5, %v12304_v60 }
 0xb6e   : > { %14530 = verf.f32 %v12412_v50  ;;  %v12414_v32 = vmul.f32 0.70710677, %v12306_v2  ;;  %v12382_v9 = vmul.f32 0.5, %v12306_v2 }
 0xb6f   : > { %14532 = verf.f32 %v12413_v0  ;;  %v12415_v14 = vmul.f32 0.70710677, %v12308_v46  ;;  %v12383_v62 = vmul.f32 0.5, %v12308_v46 }
 0xb70   : > { %14534 = verf.f32 %v12414_v32 }
 0xb71   : > { %14536 = verf.f32 %v12415_v14  ;;  %v12311_v43 = vpop.f32.mrb[84].mxu1 }
 0xb72   : > { %v12312_v10 = vadd.f32 %v12311_v43, %v20601_v1  ;;  %v12313_v8 = vpop.f32.mrb[85].mxu1 }
 0xb73   : > { %v12314_v3 = vadd.f32 %v12313_v8, %v20605_v31  ;;  %v12315_v54 = vpop.f32.mrb[86].mxu1 }
 0xb74   : > { %v12416_v36 = vmul.f32 0.70710677, %v12312_v10  ;;  %v12316_v59 = vadd.f32 %v12315_v54, %v20601_v1  ;;  %v12317_v26 = vpop.f32.mrb[87].mxu1  ;;  %v12384_v49 = vmul.f32 0.5, %v12312_v10 }
 0xb75   : > { %v12417_v47 = vmul.f32 0.70710677, %v12314_v3  ;;  %v12318_v33 = vadd.f32 %v12317_v26, %v20605_v31  ;;  %v12385_v60 = vmul.f32 0.5, %v12314_v3 }
 0xb76   : > { %14538 = verf.f32 %v12416_v36  ;;  %v12418_v19 = vmul.f32 0.70710677, %v12316_v59  ;;  %v12386_v42 = vmul.f32 0.5, %v12316_v59 }
 0xb77   : > { %14540 = verf.f32 %v12417_v47  ;;  %v12419_v40 = vmul.f32 0.70710677, %v12318_v33  ;;  %v12387_v2 = vmul.f32 0.5, %v12318_v33 }
 0xb78   : > { %v14531_v11 = vpop.eup %14530  ;;  %14542 = verf.f32 %v12418_v19 }
 0xb79   : > { %v14533_v6 = vpop.eup %14532  ;;  %v12476_v15 = vadd.f32 1.0, %v14531_v11  ;;  %14544 = verf.f32 %v12419_v40 }
 0xb7a   : > { %v14535_v55 = vpop.eup %14534  ;;  %v12477_v53 = vadd.f32 1.0, %v14533_v6 }
 0xb7b   : > { %v14537_v4 = vpop.eup %14536  ;;  %v12478_v5 = vadd.f32 1.0, %v14535_v55  ;;  %v12508_v52 = vmul.f32 %v12476_v15, %v12380_v56 }
 0xb7c   : > { %v12479_v18 = vadd.f32 1.0, %v14537_v4  ;;  %v12509_v41 = vmul.f32 %v12477_v53, %v12381_v63 }
 0xb7d   : > { %v12510_v61 = vmul.f32 %v12478_v5, %v12382_v9 }
 0xb7e   : > { %v12511_v17 = vmul.f32 %v12479_v18, %v12383_v62 }
 0xb7f   : > { %v12540_v51 = vpack.c.bf16 %v12510_v61, %v12508_v52 }
 0xb80   : > { %v14539_v7 = vpop.eup %14538  ;;  %v12541_v44 = vpack.c.bf16 %v12511_v17, %v12509_v41 }
 0xb81   : > { %v14541_v21 = vpop.eup %14540  ;;  %v12480_v35 = vadd.f32 1.0, %v14539_v7 }
 0xb82   : > { %v14543_v30 = vpop.eup %14542  ;;  %v12481_v58 = vadd.f32 1.0, %v14541_v21  ;;  %12723 = vmatprep.mubr.bf16.mxu0 %v12541_v44 }
 0xb83   : > { %v14545_v39 = vpop.eup %14544  ;;  %v12482_v50 = vadd.f32 1.0, %v14543_v30  ;;  %12724 = vmatmul.mubr.bf16.vlgmr.msra.gmra.mrb[112].mxu0 %v12540_v51  ;;  %v12512_v0 = vmul.f32 %v12480_v35, %v12384_v49 }
 0xb84   : > { %v12483_v23 = vadd.f32 1.0, %v14545_v39  ;;  %v12513_v32 = vmul.f32 %v12481_v58, %v12385_v60 }
 0xb85   : > { %v12514_v46 = vmul.f32 %v12482_v50, %v12386_v42 }
 0xb86   : > { %v12515_v14 = vmul.f32 %v12483_v23, %v12387_v2 }
 0xb87   : > { %v12542_v36 = vpack.c.bf16 %v12514_v46, %v12512_v0 }
 0xb88   : > { %v12321_v43 = vpop.f32.mrb[88].mxu1  ;;  %v12543_v19 = vpack.c.bf16 %v12515_v14, %v12513_v32 }
 0xb89   : > { %v12322_v8 = vadd.f32 %v12321_v43, %v20601_v1  ;;  %v12323_v54 = vpop.f32.mrb[89].mxu1 }
 0xb8a   : > { %v12324_v26 = vadd.f32 %v12323_v54, %v20605_v31  ;;  %v12325_v47 = vpop.f32.mrb[90].mxu1  ;;  %12731 = vmatprep.mubr.bf16.mxu0 %v12543_v19 }
 0xb8b   : > { %v12420_v10 = vmul.f32 0.70710677, %v12322_v8  ;;  %v12326_v59 = vadd.f32 %v12325_v47, %v20601_v1  ;;  %v12327_v40 = vpop.f32.mrb[91].mxu1  ;;  %12732 = vmatmul.mubr.bf16.gmra.mrb[116].mxu0 %v12542_v36  ;;  %v12388_v35 = vmul.f32 0.5, %v12322_v8 }
 0xb8c   : > { %v12421_v3 = vmul.f32 0.70710677, %v12324_v26  ;;  %v12328_v33 = vadd.f32 %v12327_v40, %v20605_v31  ;;  %v12389_v39 = vmul.f32 0.5, %v12324_v26 }
 0xb8d   : > { %14546 = verf.f32 %v12420_v10  ;;  %v12422_v11 = vmul.f32 0.70710677, %v12326_v59  ;;  %v12390_v30 = vmul.f32 0.5, %v12326_v59 }
 0xb8e   : > { %14548 = verf.f32 %v12421_v3  ;;  %v12423_v6 = vmul.f32 0.70710677, %v12328_v33  ;;  %v12391_v49 = vmul.f32 0.5, %v12328_v33 }
 0xb8f   : > { %14550 = verf.f32 %v12422_v11 }
 0xb90   : > { %14552 = verf.f32 %v12423_v6  ;;  %v12331_v15 = vpop.f32.mrb[92].mxu1 }
 0xb91   : > { %v12332_v55 = vadd.f32 %v12331_v15, %v20601_v1  ;;  %v12333_v53 = vpop.f32.mrb[93].mxu1 }
 0xb92   : > { %v12334_v4 = vadd.f32 %v12333_v53, %v20605_v31  ;;  %v12335_v56 = vpop.f32.mrb[94].mxu1 }
 0xb93   : > { %v12424_v9 = vmul.f32 0.70710677, %v12332_v55  ;;  %v12336_v5 = vadd.f32 %v12335_v56, %v20601_v1  ;;  %v12337_v63 = vpop.f32.mrb[95].mxu1  ;;  %v12392_v3 = vmul.f32 0.5, %v12332_v55 }
 0xb94   : > { %v12425_v62 = vmul.f32 0.70710677, %v12334_v4  ;;  %v12338_v18 = vadd.f32 %v12337_v63, %v20605_v31  ;;  %v12393_v53 = vmul.f32 0.5, %v12334_v4 }
 0xb95   : > { %14554 = verf.f32 %v12424_v9  ;;  %v12426_v52 = vmul.f32 0.70710677, %v12336_v5  ;;  %v12394_v56 = vmul.f32 0.5, %v12336_v5 }
 0xb96   : > { %14556 = verf.f32 %v12425_v62  ;;  %v12427_v61 = vmul.f32 0.70710677, %v12338_v18  ;;  %v12395_v63 = vmul.f32 0.5, %v12338_v18 }
 0xb97   : > { %v14547_v41 = vpop.eup %14546  ;;  %14558 = verf.f32 %v12426_v52 }
 0xb98   : > { %v14549_v17 = vpop.eup %14548  ;;  %v12484_v51 = vadd.f32 1.0, %v14547_v41  ;;  %14560 = verf.f32 %v12427_v61 }
 0xb99   : > { %v14551_v7 = vpop.eup %14550  ;;  %v12485_v44 = vadd.f32 1.0, %v14549_v17 }
 0xb9a   : > { %v14553_v21 = vpop.eup %14552  ;;  %v12486_v58 = vadd.f32 1.0, %v14551_v7  ;;  %v12516_v50 = vmul.f32 %v12484_v51, %v12388_v35 }
 0xb9b   : > { %v12487_v42 = vadd.f32 1.0, %v14553_v21  ;;  %v12517_v2 = vmul.f32 %v12485_v44, %v12389_v39 }
 0xb9c   : > { %v12518_v60 = vmul.f32 %v12486_v58, %v12390_v30 }
 0xb9d   : > { %v12519_v23 = vmul.f32 %v12487_v42, %v12391_v49 }
 0xb9e   : > { %v12544_v14 = vpack.c.bf16 %v12518_v60, %v12516_v50 }
 0xb9f   : > { %v14555_v43 = vpop.eup %14554  ;;  %v12545_v47 = vpack.c.bf16 %v12519_v23, %v12517_v2 }
 0xba0   : > { %v14557_v8 = vpop.eup %14556  ;;  %v12488_v19 = vadd.f32 1.0, %v14555_v43 }
 0xba1   : > { %v14559_v40 = vpop.eup %14558  ;;  %v12489_v33 = vadd.f32 1.0, %v14557_v8  ;;  %12739 = vmatprep.mubr.bf16.mxu0 %v12545_v47 }
 0xba2   : > { %v12341_v0 = vpop.f32.mrb[96].mxu1  ;;  %v14561_v15 = vpop.eup %14560  ;;  %v12490_v9 = vadd.f32 1.0, %v14559_v40  ;;  %12740 = vmatmul.mubr.bf16.gmra.mrb[120].mxu0 %v12544_v14  ;;  %v12520_v61 = vmul.f32 %v12488_v19, %v12392_v3 }
 0xba3   : > { %v12342_v46 = vadd.f32 %v12341_v0, %v20601_v1  ;;  %v12343_v32 = vpop.f32.mrb[97].mxu1  ;;  %v12491_v62 = vadd.f32 1.0, %v14561_v15  ;;  %v12521_v51 = vmul.f32 %v12489_v33, %v12393_v53 }
 0xba4   : > { %v12344_v54 = vadd.f32 %v12343_v32, %v20605_v31  ;;  %v12345_v36 = vpop.f32.mrb[98].mxu1  ;;  %v12522_v41 = vmul.f32 %v12490_v9, %v12394_v56 }
 0xba5   : > { %v12428_v10 = vmul.f32 0.70710677, %v12342_v46  ;;  %v12346_v26 = vadd.f32 %v12345_v36, %v20601_v1  ;;  %v12347_v59 = vpop.f32.mrb[99].mxu1  ;;  %v12523_v55 = vmul.f32 %v12491_v62, %v12395_v63  ;;  %v12396_v47 = vmul.f32 0.5, %v12342_v46 }
 0xba6   : > { %v12429_v11 = vmul.f32 0.70710677, %v12344_v54  ;;  %v12348_v6 = vadd.f32 %v12347_v59, %v20605_v31  ;;  %v12546_v4 = vpack.c.bf16 %v12522_v41, %v12520_v61  ;;  %v12397_v40 = vmul.f32 0.5, %v12344_v54 }
 0xba7   : > { %14562 = verf.f32 %v12428_v10  ;;  %v12430_v52 = vmul.f32 0.70710677, %v12346_v26  ;;  %v12547_v18 = vpack.c.bf16 %v12523_v55, %v12521_v51  ;;  %v12398_v3 = vmul.f32 0.5, %v12346_v26 }
 0xba8   : > { %14564 = verf.f32 %v12429_v11  ;;  %v12431_v17 = vmul.f32 0.70710677, %v12348_v6  ;;  %v12399_v53 = vmul.f32 0.5, %v12348_v6 }
 0xba9   : > { %14566 = verf.f32 %v12430_v52  ;;  %12747 = vmatprep.mubr.bf16.mxu0 %v12547_v18 }
 0xbaa   : > { %v12351_v7 = vpop.f32.mrb[100].mxu1  ;;  %14568 = verf.f32 %v12431_v17  ;;  %12748 = vmatmul.mubr.bf16.gmra.mrb[124].mxu0 %v12546_v4 }
 0xbab   : > { %v12352_v44 = vadd.f32 %v12351_v7, %v20601_v1  ;;  %v12353_v21 = vpop.f32.mrb[101].mxu1 }
 0xbac   : > { %v20629_v5 = vadd.f32 %v12353_v21, %v20605_v31  ;;  %v12355_v35 = vpop.f32.mrb[102].mxu1 }
 0xbad   : > { %v12432_v30 = vmul.f32 0.70710677, %v12352_v44  ;;  %v12356_v58 = vadd.f32 %v12355_v35, %v20601_v1  ;;  %v12357_v39 = vpop.f32.mrb[103].mxu1 }
 0xbae   : > { %v12433_v49 = vmul.f32 0.70710677, %v20629_v5  ;;  %v12358_v42 = vadd.f32 %v12357_v39, %v20605_v31 }
 0xbaf   : > { %14570 = verf.f32 %v12432_v30  ;;  %v12434_v50 = vmul.f32 0.70710677, %v12356_v58 }
 0xbb0   : > { %14572 = verf.f32 %v12433_v49  ;;  %v12435_v60 = vmul.f32 0.70710677, %v12358_v42  ;;  %v12400_v49 = vmul.f32 0.5, %v12352_v44 }
 0xbb1   : > { %v14563_v2 = vpop.eup %14562  ;;  %14574 = verf.f32 %v12434_v50  ;;  %v12402_v50 = vmul.f32 0.5, %v12356_v58 }
 0xbb2   : > { %v14565_v23 = vpop.eup %14564  ;;  %14576 = verf.f32 %v12435_v60  ;;  %v12361_v0 = vpop.f32.mrb[104].mxu1  ;;  %v12492_v32 = vadd.f32 1.0, %v14563_v2 }
 0xbb3   : > { %v20635_v14 = vadd.f32 %v12361_v0, %v20601_v1  ;;  %v12363_v43 = vpop.f32.mrb[105].mxu1  ;;  %v14567_v36 = vpop.eup %14566  ;;  %v12493_v8 = vadd.f32 1.0, %v14565_v23  ;;  %v12401_v0 = vmul.f32 0.5, %v20629_v5 }
 0xbb4   : > { %v20638_v19 = vadd.f32 %v12363_v43, %v20605_v31  ;;  %v12365_v10 = vpop.f32.mrb[106].mxu1  ;;  %v14569_v59 = vpop.eup %14568  ;;  %v12494_v33 = vadd.f32 1.0, %v14567_v36  ;;  %v12524_v62 = vmul.f32 %v12492_v32, %v12396_v47  ;;  %v12403_v32 = vmul.f32 0.5, %v12358_v42 }
 0xbb5   : > { %v12436_v11 = vmul.f32 0.70710677, %v20635_v14  ;;  %v12367_v15 = vpop.f32.mrb[107].mxu1  ;;  %v12495_v56 = vadd.f32 1.0, %v14569_v59  ;;  %v12366_v63 = vadd.f32 %v12365_v10, %v20601_v1  ;;  %v12525_v61 = vmul.f32 %v12493_v8, %v12397_v40 }
 0xbb6   : > { %v12437_v9 = vmul.f32 0.70710677, %v20638_v19  ;;  %v12526_v46 = vmul.f32 %v12494_v33, %v12398_v3  ;;  %v12368_v52 = vadd.f32 %v12367_v15, %v20605_v31 }
 0xbb7   : > { %14578 = verf.f32 %v12436_v11  ;;  %v12527_v41 = vmul.f32 %v12495_v56, %v12399_v53  ;;  %v12438_v54 = vmul.f32 0.70710677, %v12366_v63 }
 0xbb8   : > { %14580 = verf.f32 %v12437_v9  ;;  %v12439_v17 = vmul.f32 0.70710677, %v12368_v52  ;;  %v12548_v51 = vpack.c.bf16 %v12526_v46, %v12524_v62 }
 0xbb9   : > { %v14571_v26 = vpop.eup %14570  ;;  %14582 = verf.f32 %v12438_v54  ;;  %v12549_v21 = vpack.c.bf16 %v12527_v41, %v12525_v61  ;;  %v12406_v61 = vmul.f32 0.5, %v12366_v63  ;;  %v12407_v54 = vmul.f32 0.5, %v12368_v52 }
 0xbba   : > { %v14573_v55 = vpop.eup %14572  ;;  %v12496_v7 = vadd.f32 1.0, %v14571_v26  ;;  %v12371_v6 = vpop.f32.mrb[108].mxu1  ;;  %14584 = verf.f32 %v12439_v17 }
 0xbbb   : > { %v14575_v4 = vpop.eup %14574  ;;  %v12497_v35 = vadd.f32 1.0, %v14573_v55  ;;  %v12372_v18 = vadd.f32 %v12371_v6, %v20601_v1  ;;  %v12373_v30 = vpop.f32.mrb[109].mxu1  ;;  %12755 = vmatprep.mubr.bf16.mxu0 %v12549_v21 }
 0xbbc   : > { %v14577_v39 = vpop.eup %14576  ;;  %v12498_v60 = vadd.f32 1.0, %v14575_v4  ;;  %v12374_v2 = vadd.f32 %v12373_v30, %v20605_v31  ;;  %v12375_v23 = vpop.f32.mrb[110].mxu1  ;;  %12756 = vmatmul.mubr.bf16.gmra.mrb[128].mxu0 %v12548_v51  ;;  %v12528_v8 = vmul.f32 %v12496_v7, %v12400_v49 }
 0xbbd   : > { %v12499_v43 = vadd.f32 1.0, %v14577_v39  ;;  %v12440_v36 = vmul.f32 0.70710677, %v12372_v18  ;;  %v12377_v47 = vpop.f32.mrb[111].mxu1  ;;  %v12376_v40 = vadd.f32 %v12375_v23, %v20601_v1  ;;  %v12529_v3 = vmul.f32 %v12497_v35, %v12401_v0 }
 0xbbe   : > { %v12530_v10 = vmul.f32 %v12498_v60, %v12402_v50  ;;  %v12441_v59 = vmul.f32 0.70710677, %v12374_v2  ;;  %v12378_v58 = vadd.f32 %v12377_v47, %v20605_v31  ;;  %v12404_v1 = vmul.f32 0.5, %v20635_v14 }
 0xbbf   : > { %v12531_v44 = vmul.f32 %v12499_v43, %v12403_v32  ;;  %14586 = verf.f32 %v12440_v36  ;;  %v12442_v33 = vmul.f32 0.70710677, %v12376_v40  ;;  %v12405_v31 = vmul.f32 0.5, %v20638_v19 }
 0xbc0   : > { %14588 = verf.f32 %v12441_v59  ;;  %v12550_v11 = vpack.c.bf16 %v12530_v10, %v12528_v8  ;;  %v12443_v5 = vmul.f32 0.70710677, %v12378_v58  ;;  %v12408_v63 = vmul.f32 0.5, %v12372_v18  ;;  %v20653_v18 = vld [vmem:[%s21485_s11] ss:$0 sm:$0xff] }
 0xbc1   : > { %v14579_v15 = vpop.eup %14578  ;;  %v12551_v42 = vpack.c.bf16 %v12531_v44, %v12529_v3  ;;  %14590 = verf.f32 %v12442_v33  ;;  %v12410_v50 = vmul.f32 0.5, %v12376_v40  ;;  %v12409_v19 = vmul.f32 0.5, %v12374_v2 }
 0xbc2   : > { %v14581_v53 = vpop.eup %14580  ;;  %v12500_v56 = vadd.f32 1.0, %v14579_v15  ;;  %14592 = verf.f32 %v12443_v5  ;;  %v12411_v52 = vmul.f32 0.5, %v12378_v58 }
 0xbc3   : > { %12763 = vmatprep.mubr.bf16.mxu0 %v12551_v42  ;;  %v14583_v9 = vpop.eup %14582  ;;  %v12501_v62 = vadd.f32 1.0, %v14581_v53 }
 0xbc4   : > { %v14585_v46 = vpop.eup %14584  ;;  %v12502_v41 = vadd.f32 1.0, %v14583_v9  ;;  %12764 = vmatmul.mubr.bf16.gmra.mrb[132].mxu0 %v12550_v11  ;;  %v12532_v17 = vmul.f32 %v12500_v56, %v12404_v1 }
 0xbc5   : > { %v12503_v26 = vadd.f32 1.0, %v14585_v46  ;;  %v12533_v55 = vmul.f32 %v12501_v62, %v12405_v31 }
 0xbc6   : > { %v12534_v51 = vmul.f32 %v12502_v41, %v12406_v61 }
 0xbc7   : > { %v12535_v7 = vmul.f32 %v12503_v26, %v12407_v54 }
 0xbc8   : > { %v12552_v21 = vpack.c.bf16 %v12534_v51, %v12532_v17 }
 0xbc9   : > { %v14587_v6 = vpop.eup %14586  ;;  %v12553_v35 = vpack.c.bf16 %v12535_v7, %v12533_v55 }
 0xbca   : > { %v14589_v4 = vpop.eup %14588  ;;  %v12504_v30 = vadd.f32 1.0, %v14587_v6 }
 0xbcb   : > { %v14591_v39 = vpop.eup %14590  ;;  %v12505_v49 = vadd.f32 1.0, %v14589_v4  ;;  %12771 = vmatprep.mubr.bf16.mxu1 %v12553_v35 }
 0xbcc   : > { %v14593_v14 = vpop.eup %14592  ;;  %v12506_v60 = vadd.f32 1.0, %v14591_v39  ;;  %12772 = vmatmul.mubr.bf16.vlgmr.msra.gmra.mrb[112].mxu1 %v12552_v21  ;;  %v12536_v0 = vmul.f32 %v12504_v30, %v12408_v63 }
 0xbcd   : > { %v12507_v23 = vadd.f32 1.0, %v14593_v14  ;;  %v12537_v43 = vmul.f32 %v12505_v49, %v12409_v19 }
 0xbce   : > { %v12538_v32 = vmul.f32 %v12506_v60, %v12410_v50 }
 0xbcf   : > { %v12539_v36 = vmul.f32 %v12507_v23, %v12411_v52 }
 0xbd0   : > { %v12554_v47 = vpack.c.bf16 %v12538_v32, %v12536_v0 }
 0xbd1   : > { %v12555_v8 = vpack.c.bf16 %v12539_v36, %v12537_v43 }
 0xbd3   : > { %12779 = vmatprep.mubr.bf16.mxu1 %v12555_v8 }
 0xbd4   : > { %12780 = vmatmul.mubr.bf16.gmra.mrb[116].mxu1 %v12554_v47 }
 0xc56   : > { %v13559_v10 = vpop.f32.mrb[112].mxu0 }
 0xc57   : > { %v13560_v59 = vpop.f32.mrb[113].mxu0 }
 0xc58   : > { %v13561_v40 = vadd.f32 %v13560_v59, %v13559_v10  ;;  %v13562_v3 = vpop.f32.mrb[114].mxu0 }
 0xc59   : > { %v13563_v2 = vpop.f32.mrb[115].mxu0 }
 0xc5a   : > { %v12726_v44 = vadd.f32 %v13561_v40, %v20653_v18  ;;  %v13564_v58 = vadd.f32 %v13563_v2, %v13562_v3 }
 0xc5c   : > { %v12788_v33 = vadd.f32 %v12726_v44, %v20340_v37  ;;  %v12729_v11 = vadd.f32 %v13564_v58, %v20653_v18 }
 0xc5e   : > { %12804 = vst [vmem:[%s15601_s21] sm:$0xff] %v12788_v33  ;;  %v12789_v15 = vadd.f32 %v12729_v11, %v20344_v45  ;;  %v13565_v5 = vpop.f32.mrb[116].mxu0 }
 0xc5f   : > { %v13566_v42 = vpop.f32.mrb[117].mxu0 }
 0xc60   : > { %12805 = vst [vmem:[%s15601_s21 + $0x8] sm:$0xff] %v12789_v15  ;;  %v13567_v53 = vadd.f32 %v13566_v42, %v13565_v5  ;;  %v13568_v56 = vpop.f32.mrb[118].mxu0 }
 0xc61   : > { %v13569_v9 = vpop.f32.mrb[119].mxu0 }
 0xc62   : > { %v12734_v62 = vadd.f32 %v13567_v53, %v20653_v18  ;;  %v13570_v46 = vadd.f32 %v13569_v9, %v13568_v56 }
 0xc64   : > { %v12790_v1 = vadd.f32 %v12734_v62, %v20348_v16  ;;  %v12737_v37 = vadd.f32 %v13570_v46, %v20653_v18 }
 0xc66   : > { %12806 = vst [vmem:[%s15601_s21 + $0x10] sm:$0xff] %v12790_v1  ;;  %v12791_v61 = vadd.f32 %v12737_v37, %v20354_v28 }
 0xc68   : > { %12807 = vst [vmem:[%s15601_s21 + $0x18] sm:$0xff] %v12791_v61 }
 0xc75   : > { %v13571_v45 = vpop.f32.mrb[120].mxu0 }
 0xc76   : > { %v13572_v41 = vpop.f32.mrb[121].mxu0 }
 0xc77   : > { %v13573_v31 = vadd.f32 %v13572_v41, %v13571_v45  ;;  %v13574_v54 = vpop.f32.mrb[122].mxu0 }
 0xc78   : > { %v13575_v26 = vpop.f32.mrb[123].mxu0 }
 0xc79   : > { %v12742_v17 = vadd.f32 %v13573_v31, %v20653_v18  ;;  %v13576_v51 = vadd.f32 %v13575_v26, %v13574_v54 }
 0xc7b   : > { %v12792_v55 = vadd.f32 %v12742_v17, %v20360_v38  ;;  %v12745_v16 = vadd.f32 %v13576_v51, %v20653_v18 }
 0xc7d   : > { %12808 = vst [vmem:[%s15601_s21 + $0x20] sm:$0xff] %v12792_v55  ;;  %v12793_v7 = vadd.f32 %v12745_v16, %v20365_v27  ;;  %v13577_v6 = vpop.f32.mrb[124].mxu0 }
 0xc7e   : > { %v13578_v28 = vpop.f32.mrb[125].mxu0 }
 0xc7f   : > { %12809 = vst [vmem:[%s15601_s21 + $0x28] sm:$0xff] %v12793_v7  ;;  %v13579_v21 = vadd.f32 %v13578_v28, %v13577_v6  ;;  %v13580_v4 = vpop.f32.mrb[126].mxu0 }
 0xc80   : > { %v13581_v35 = vpop.f32.mrb[127].mxu0 }
 0xc81   : > { %v12750_v30 = vadd.f32 %v13579_v21, %v20653_v18  ;;  %v13582_v39 = vadd.f32 %v13581_v35, %v13580_v4 }
 0xc83   : > { %v12794_v49 = vadd.f32 %v12750_v30, %v20369_v20  ;;  %v12753_v38 = vadd.f32 %v13582_v39, %v20653_v18 }
 0xc85   : > { %12810 = vst [vmem:[%s15601_s21 + $0x30] sm:$0xff] %v12794_v49  ;;  %v12795_v14 = vadd.f32 %v12753_v38, %v20373_v12 }
 0xc87   : > { %12811 = vst [vmem:[%s15601_s21 + $0x38] sm:$0xff] %v12795_v14 }
 0xc8f   : > { %v13583_v27 = vpop.f32.mrb[128].mxu0 }
 0xc90   : > { %v13584_v63 = vpop.f32.mrb[129].mxu0 }
 0xc91   : > { %v13585_v50 = vadd.f32 %v13584_v63, %v13583_v27  ;;  %v13586_v60 = vpop.f32.mrb[130].mxu0 }
 0xc92   : > { %v13587_v19 = vpop.f32.mrb[131].mxu0 }
 0xc93   : > { %v12758_v52 = vadd.f32 %v13585_v50, %v20653_v18  ;;  %v13588_v23 = vadd.f32 %v13587_v19, %v13586_v60 }
 0xc95   : > { %v12796_v0 = vadd.f32 %v12758_v52, %v20380_v34  ;;  %v12761_v20 = vadd.f32 %v13588_v23, %v20653_v18 }
 0xc97   : > { %12812 = vst [vmem:[%s15601_s21 + $0x40] sm:$0xff] %v12796_v0  ;;  %v12797_v32 = vadd.f32 %v12761_v20, %v20385_v48  ;;  %v13589_v43 = vpop.f32.mrb[132].mxu0 }
 0xc98   : > { %v13590_v12 = vpop.f32.mrb[133].mxu0 }
 0xc99   : > { %12813 = vst [vmem:[%s15601_s21 + $0x48] sm:$0xff] %v12797_v32  ;;  %v13591_v36 = vadd.f32 %v13590_v12, %v13589_v43  ;;  %v13592_v47 = vpop.f32.mrb[134].mxu0 }
 0xc9a   : > { %v13593_v8 = vpop.f32.mrb[135].mxu0 }
 0xc9b   : > { %v12766_v10 = vadd.f32 %v13591_v36, %v20653_v18  ;;  %v13594_v59 = vadd.f32 %v13593_v8, %v13592_v47 }
 0xc9d   : > { %v12798_v40 = vadd.f32 %v12766_v10, %v20389_v22  ;;  %v12769_v34 = vadd.f32 %v13594_v59, %v20653_v18 }
 0xc9f   : > { %12814 = vst [vmem:[%s15601_s21 + $0x50] sm:$0xff] %v12798_v40  ;;  %v12799_v3 = vadd.f32 %v12769_v34, %v20393_v29  ;;  %v13595_v2 = vpop.f32.mrb[112].mxu1 }
 0xca0   : > { %v13596_v48 = vpop.f32.mrb[113].mxu1 }
 0xca1   : > { %12815 = vst [vmem:[%s15601_s21 + $0x58] sm:$0xff] %v12799_v3  ;;  %v13597_v44 = vadd.f32 %v13596_v48, %v13595_v2  ;;  %v13598_v58 = vpop.f32.mrb[114].mxu1 }
 0xca2   : > { %v13599_v33 = vpop.f32.mrb[115].mxu1 }
 0xca3   : > { %v12774_v11 = vadd.f32 %v13597_v44, %v20653_v18  ;;  %v13600_v15 = vadd.f32 %v13599_v33, %v13598_v58 }
 0xca5   : > { %v12800_v5 = vadd.f32 %v12774_v11, %v20400_v25  ;;  %v12777_v22 = vadd.f32 %v13600_v15, %v20653_v18 }
 0xca7   : > { %12816 = vst [vmem:[%s15601_s21 + $0x60] sm:$0xff] %v12800_v5  ;;  %v12801_v42 = vadd.f32 %v12777_v22, %v20405_v57  ;;  %v13601_v29 = vpop.f32.mrb[116].mxu1 }
 0xca8   : > { %v13602_v53 = vpop.f32.mrb[117].mxu1 }
 0xca9   : > { %12817 = vst [vmem:[%s15601_s21 + $0x68] sm:$0xff] %v12801_v42  ;;  %v13603_v56 = vadd.f32 %v13602_v53, %v13601_v29  ;;  %v13604_v9 = vpop.f32.mrb[118].mxu1 }
 0xcaa   : > { %v13605_v62 = vpop.f32.mrb[119].mxu1 }
 0xcab   : > { %v12782_v46 = vadd.f32 %v13603_v56, %v20653_v18  ;;  %v13606_v1 = vadd.f32 %v13605_v62, %v13604_v9 }
 0xcad   : > { %v12802_v25 = vadd.f32 %v12782_v46, %v20409_v13  ;;  %v12785_v37 = vadd.f32 %v13606_v1, %v20653_v18 }
 0xcaf   : > { %12818 = vst [vmem:[%s15601_s21 + $0x70] sm:$0xff] %v12802_v25  ;;  %v12803_v57 = vadd.f32 %v12785_v37, %v20413_v24 }
 0xcb1   : > { %12819 = vst [vmem:[%s15601_s21 + $0x78] sm:$0xff] %v12803_v57 }
 0xcb2   : > { %14863 = shalt.err (!%p14860_p6)
}
 0xcb3   : > { %s14864_s21 = scalar_lea.hbm %s20705_s23, 2048  ;;  %s14868_s16 = scalar_lea.hbm %s21487_s3, 4096 }
 0xcb4   : > { %p14865_p11 = scmp.ne.s32.totalorder %s20705_s23, %s14864_s21  ;;  %p14869_p13 = scmp.lt.u32.totalorder %s20705_s23, %s21487_s3 }
 0xcb5   : > { %p14870_p5 = scmp.lt.u32.totalorder %s14868_s16, %s14864_s21  ;;  %p14872_p2 = scmp.lt.u32.totalorder %s14864_s21, %s20705_s23 }
 0xcb6   : > { %p14866_p3 = pnand %p14865_p11, %p21488_p0 }
 0xcb7   : > { %p14871_p1 = por %p14870_p5, %p14869_p13 }
 0xcb8   : > { %p14867_p7 = pneg %p14866_p3 }
 0xcb9   : > { %p14873_p8 = por %p14872_p2, %p14871_p1 }
 0xcbb   : > { %p14874_p9 = pnand %p14873_p8, %p14867_p7 }
 0xcbd   : > { %14877 = shalt.err (!%p14874_p9)
}
 0xcbe   : > { %s15011_s28 = smov 128   ;;  %s15012_s19 = smov 8  }
 0xcbf   : > { %13995 = dma.vmem_to_hbm [thread:$0]  (%p21488_p0), %s20707_s17, 2048, %s20705_s23, %s12821_s13, %s15011_s28, %s15011_s28, %s15012_s19  }
 0xcc0 PF: > { %s21489_s14 = sld [smem:[#allocation32_spill]]  ;;  %s21490_s2 = sld [smem:[#allocation25_spill]] }
 0xcc1   : > { %s21491_s22 = sld [smem:[#allocation38_spill]] }
 0xcc6   : > { %p14027_p12 = scmp.ge.s32.totalorder %s21489_s14, 2  ;;  %s12849_s8 = sand.u32 1, %s21490_s2  }
 0xcc7   : > { %p21492_p4 = scmp.ne.s32.totalorder %s21491_s22, 0  ;;  %s12850_s6 = scalar_lea.sflag [#allocation4], %s12849_s8 }
 0xcc9   : > { %p14023_p10 = pnand %p14027_p12, %p21492_p4 }
 0xccb   : > { %14943 = dma.done.wait (!%p14023_p10), %s12850_s6, 2048  }
 0xccc   : > { %14945 = vsyncadd (!%p14023_p10), %s12850_s6, 4294965248  ;;  %s41_s18 = sadd.s32 1, %s21489_s14   ;;  %s21493_s25 = sld [smem:[#allocation23_spill]] }
 0xccd   : > { %p38_p6 = scmp.ge.s32.totalorder %s41_s18, 6   ;;  %s21494_s26 = sld [smem:[#allocation24_spill]] }
 0xcce   : > { %s21495_s27 = sld [smem:[#allocation36_spill]]  ;;  %s21496_s28 = sld [smem:[#allocation26_spill]] }
 0xccf   : > { %s21497_s29 = sld [smem:[#allocation27_spill]]  ;;  %s21498_s30 = sld [smem:[#allocation37_spill]] }
 0xcd0   : > { %s21499_s14 = sld [smem:[#allocation30_spill]]  ;;  %s21500_s15 = sld [smem:[#allocation31_spill]] }
 0xcd1   : > { %s21501_s16 = sld [smem:[#allocation33_spill]]  ;;  %s21502_s17 = sld [smem:[#allocation34_spill]] }
 0xcd2   :  { %40 = sbr.rel (!%p38_p6) target bundleno = 32 (0x20), region = 221 }
 0xcd9   :  { %12855 = vsyncpa [#allocation3], 1 }
 0xcda   :  { %12857 = vsyncpa [#allocation3 + $0x1], 1 }
 0xcdb   :  { %12858 = vsyncpa [#allocation6], 1 }
 0xcdc   :  { %12860 = vsyncpa [#allocation6 + $0x1], 1 }
 0xcdd   :  { %12861 = vsyncpa [#allocation9], 1 }
 0xcde   :  { %12863 = vsyncpa [#allocation9 + $0x1], 1 }
 0xcdf   :  { %12864 = vsyncpa [#allocation12], 1 }
 0xce0   :  { %12866 = vsyncpa [#allocation12 + $0x1], 1 }
 0xce1   :  { %12867 = vsyncpa [#allocation15], 1 }
 0xce2   :  { %12869 = vsyncpa [#allocation15 + $0x1], 1 }
 0xce3   :  { %12870 = vsyncpa [#allocation4], 1 }
 0xce4   :  { %12872 = vsyncpa [#allocation4 + $0x1], 1 }

</bundles_post_ra>
